<compile_context>
chip_gen: v5e
topology: v5e:2x2
jax: 0.10.0
libtpu: 0.0.40
codegen_flags: <defaults>
</compile_context>

<pallas_src>
import jax
import jax.numpy as jnp
from jax.experimental import pallas as pl
from jax.experimental.pallas import tpu as pltpu


def _round_up(v, m):
    return ((v + m - 1) // m) * m


# --------------------------- fused Pallas kernel -----------------------------

def _make_kernel(H, W, C, B):
    """Fused forward kernel: B images per grid step, HxW, C (=num_plane) channels."""
    HW, Hs, Ws = H * W, H // 2, W // 2
    HWs = Hs * Ws
    A = 128                                   # left halo (lanes); images 128-aligned
    SB = _round_up(HW + W + 1, 128)           # per-image lane stride, full-res scratch
    SS = _round_up(HWs + Ws + 1, 128)         # per-image lane stride, half-res scratch
    PWB, PWS = A + B * SB, A + B * SS
    K9 = 9 * C
    KP = _round_up(K9 + 1, 8)                 # fused contraction: 9 taps * C + bias row

    def kernel(x_ref, w3_ref, w1_ref, vec_ref, up_ref, sel1_ref,
               o_ref, pad_b, pad_s):
        # Gaps / borders of the halo scratches must be zero; image interiors are
        # fully rewritten before every read, so one cheap aligned zero per step
        # (also megacore-safe since it is unconditional).
        pad_b[...] = jnp.zeros((C, PWB), jnp.float32)
        pad_s[...] = jnp.zeros((C, PWS), jnp.float32)

        def col_masks(hw, w):
            xc = jax.lax.broadcasted_iota(jnp.int32, (1, hw), 1) % w
            return xc > 0, xc < (w - 1)

        def bias_rows(hw):                    # row 0 == 1 (bias tap), rest K-padding
            r = jax.lax.broadcasted_iota(jnp.int32, (KP - K9, hw), 0)
            return jnp.where(r == 0, 1.0, 0.0)

        geo_b = (pad_b, HW, W, SB) + col_masks(HW, W) + (bias_rows(HW),)
        geo_s = (pad_s, HWs, Ws, SS) + col_masks(HWs, Ws) + (bias_rows(HWs),)

        def w1(j):                            # (C, C) bf16 1x1-conv slab
            return w1_ref[:, j * C:(j + 1) * C]

        def vcol(j):                          # (C, 1) f32 per-channel column
            return vec_ref[:, j:j + 1]

        def fill_pad(pad, x, hw, st):         # scatter images into their halo regions
            for i in range(B):
                pad[:, A + i * st: A + i * st + hw] = x[:, i * hw:(i + 1) * hw]

        def tap_slab(pad, a0, k, hw, ml, mr, dx):
            slab = pad[:, a0 + k: a0 + k + hw]
            if dx == -1:
                return jnp.where(ml, slab, 0.0)
            if dx == 1:
                return jnp.where(mr, slab, 0.0)
            return slab

        def conv3x3(x, idx, relu, residual=None, small=False):
            """3x3 conv (pad=1) + folded BN; one fused MXU matmul per call."""
            pad, hw, w, st, ml, mr, ones_blk = geo_s if small else geo_b
            fill_pad(pad, x, hw, st)
            per_img = []
            for i in range(B):
                a0 = A + i * st
                rows = [tap_slab(pad, a0, dy * w + dx, hw, ml, mr, dx)
                        for dy in (-1, 0, 1) for dx in (-1, 0, 1)]
                rows.append(ones_blk)                              # bias + K padding
                per_img.append(jnp.concatenate(rows, axis=0))      # (KP, hw)
            stacked = jnp.concatenate(per_img, axis=1)             # (KP, B*hw)
            y = jnp.dot(w3_ref[idx], stacked.astype(jnp.bfloat16),
                        preferred_element_type=jnp.float32)
            if residual is not None:
                y = y + residual
            return jnp.maximum(y, 0.0) if relu else y

        def resblock(x, c3, down=None, small=False):
            """BasicResBlock: relu(bn1(conv1)) -> bn2(conv2) + identity -> relu."""
            h = conv3x3(x, c3, relu=True, small=small)
            if down is None:
                identity = x
            else:
                wj, bj = down                                       # folded 1x1 + BN
                identity = jnp.dot(w1(wj), x.astype(jnp.bfloat16),
                                   preferred_element_type=jnp.float32) + vcol(bj)
            return conv3x3(h, c3 + 1, relu=True, residual=identity, small=small)

        def maxpool_down(x, sel, small=False):
            """MaxPool2d(3, stride=2, pad=1); `sel` carries the stride-2 selection
            (and, for pool-2, the fused bilinear upsample).  Zero halo == -inf
            because pool inputs are post-ReLU (>= 0)."""
            pad, hw, w, st, ml, mr, _ = geo_s if small else geo_b
            fill_pad(pad, x, hw, st)
            outs = []
            for i in range(B):
                a0 = A + i * st
                m = x[:, i * hw:(i + 1) * hw]
                for dy in (-1, 0, 1):
                    for dx in (-1, 0, 1):
                        if dy == 0 and dx == 0:
                            continue
                        m = jnp.maximum(m, tap_slab(pad, a0, dy * w + dx,
                                                    hw, ml, mr, dx))
                outs.append(jnp.dot(m.astype(jnp.bfloat16), sel,
                                    preferred_element_type=jnp.float32))
            return jnp.concatenate(outs, axis=1)

        # B images side-by-side on the lane axis: (C, B*HW)
        x = jnp.concatenate([x_ref[i] for i in range(B)], axis=1).astype(jnp.float32)

        # trunk branch: two resblocks at full resolution
        trunk = resblock(x, 0, down=(0, 0))
        trunk = resblock(trunk, 2)

        # soft-mask branch
        d1 = resblock(x, 4, down=(1, 1))
        skip = resblock(d1, 6)
        p1 = maxpool_down(d1, sel1_ref[...])                   # (C, B*HW/4)
        d2 = resblock(p1, 8, small=True)
        up = maxpool_down(d2, up_ref[...], small=True)         # pool2 + 2x bilinear

        m = up + skip
        # out_mask: BN -> ReLU -> 1x1 -> BN -> ReLU -> 1x1 -> sigmoid
        h = jnp.maximum(m * vec_ref[:, 2:3] + vcol(3), 0.0)
        h = jnp.maximum(jnp.dot(w1(2), h.astype(jnp.bfloat16),
                                preferred_element_type=jnp.float32) + vcol(4), 0.0)
        h = jnp.dot(w1(3), h.astype(jnp.bfloat16),
                    preferred_element_type=jnp.float32)
        hc = jnp.clip(h, -30.0, 30.0)                          # keep exp finite
        mask = pl.reciprocal(1.0 + jnp.exp(-hc), approx=True)  # sigmoid on EUP
        out = (1.0 + mask) * trunk
        for i in range(B):
            o_ref[i] = out[:, i * HW:(i + 1) * HW].astype(o_ref.dtype)

    scratch = [pltpu.VMEM((C, PWB), jnp.float32),
               pltpu.VMEM((C, PWS), jnp.float32)]
    return kernel, scratch


# ------------------- trace-time constants & parameter packing ----------------

def _bilinear_matrix(out_size, in_size):
    # nn.UpsamplingBilinear2d == bilinear with align_corners=True
    i = jnp.arange(out_size, dtype=jnp.float32)
    if out_size > 1:
        src = i * (in_size - 1) / (out_size - 1)
    else:
        src = jnp.zeros((out_size,), jnp.float32)
    lo = jnp.clip(jnp.floor(src).astype(jnp.int32), 0, max(in_size - 2, 0))
    frac = src - lo.astype(jnp.float32)
    rows = jnp.arange(out_size)
    m = jnp.zeros((out_size, in_size), jnp.float32)
    m = m.at[rows, lo].add(1.0 - frac)
    m = m.at[rows, jnp.minimum(lo + 1, in_size - 1)].add(frac)
    return m


def _upsample_matrix(size):
    """Composed (size/4 -> size/2 -> size) align_corners=True bilinear on flat HW."""
    m1h = _bilinear_matrix(size // 2, size // 4)
    m2h = _bilinear_matrix(size, size // 2)
    return jnp.kron(m2h, m2h) @ jnp.kron(m1h, m1h)     # (size^2, (size/4)^2)


def _pool_select_matrix(h, w):
    """0/1 matrix selecting the (2ho, 2wo) entries of a flattened (h, w) map."""
    ho, wo = h // 2, w // 2
    rows = jnp.arange(ho * wo)
    cols = (2 * (rows // wo)) * w + 2 * (rows % wo)
    return jnp.zeros((ho * wo, h * w), jnp.float32).at[rows, cols].set(1.0)


def _pack_params(params, C):
    """Pack weights lane-dense (contraction last), fold BN scale+bias, cast bf16."""
    K9 = 9 * C
    KP = _round_up(K9 + 1, 8)

    def w3_pack(w, scale, bias):        # (3,3,cin,C) HWIO -> (C, KP), BN folded
        cin = w.shape[2]
        if cin < C:
            w = jnp.pad(w, ((0, 0), (0, 0), (0, C - cin), (0, 0)))
        w = w * scale[None, None, None, :]                    # fold BN scale (cout)
        wt = jnp.transpose(w, (3, 0, 1, 2)).reshape(C, K9)    # (cout, tap*cin)
        full = jnp.zeros((C, KP), jnp.float32)
        return full.at[:, :K9].set(wt).at[:, K9].set(bias)    # bias hits the ones row

    def w1_pack(w, scale=None):         # (cin, C) -> (C, C) = (cout, cin)
        cin = w.shape[0]
        if cin < C:
            w = jnp.pad(w, ((0, C - cin), (0, 0)))
        if scale is not None:
            w = w * scale[None, :]
        return w.T

    def down_pack(blk):                 # identity fallback when no 1x1 downsample
        if 'wd' in blk:
            return w1_pack(blk['wd'], blk['sd']), blk['bd']
        return jnp.eye(C, dtype=jnp.float32), jnp.zeros((C,), jnp.float32)

    order3 = [('trunk1', 'w1', 's1', 'b1'), ('trunk1', 'w2', 's2', 'b2'),
              ('trunk2', 'w1', 's1', 'b1'), ('trunk2', 'w2', 's2', 'b2'),
              ('down1', 'w1', 's1', 'b1'), ('down1', 'w2', 's2', 'b2'),
              ('skip1', 'w1', 's1', 'b1'), ('skip1', 'w2', 's2', 'b2'),
              ('down2', 'w1', 's1', 'b1'), ('down2', 'w2', 's2', 'b2')]
    w3_all = jnp.stack([w3_pack(params[b][w], params[b][s], params[b][t])
                        for b, w, s, t in order3]).astype(jnp.bfloat16)

    mp = params['mask']
    dw_t1, db_t1 = down_pack(params['trunk1'])
    dw_d1, db_d1 = down_pack(params['down1'])
    w1_all = jnp.concatenate(
        [dw_t1, dw_d1, w1_pack(mp['w1'], mp['s1']), w1_pack(mp['w2'])],
        axis=1).astype(jnp.bfloat16)                          # (C, 4C) lane-dense

    zero = jnp.zeros((C,), jnp.float32)
    vec_all = jnp.stack([db_t1, db_d1, mp['s0'], mp['b0'], mp['b1'],
                         zero, zero, zero], axis=1)           # (C, 8) f32
    return w3_all, w1_all, vec_all


# ------------------------------ forward wrapper -------------------------------

def attention_block_forward(params, x, size):
    """x: NCHW (N, in_plane, size, size) -> NCHW (N, num_plane, size, size)."""
    N, cin, H, W = x.shape
    assert H == size and W == size and size % 4 == 0
    C = params['trunk1']['w1'].shape[-1]            # num_plane
    assert cin <= C
    HW = H * W
    B = 2 if N % 2 == 0 else 1                      # images per grid step (lane batch)

    w3_all, w1_all, vec_all = _pack_params(params, C)
    sel1_t = _pool_select_matrix(H, W).T.astype(jnp.bfloat16)         # (HW, HW/4)
    # pool-2 stride-2 select fused with both bilinear upsamples: (HW/4, HW)
    sel2_up = (_pool_select_matrix(H // 2, W // 2).T
               @ _upsample_matrix(size).T).astype(jnp.bfloat16)

    # channel-pad to num_plane and flatten spatial: lane-dense (C, H*W) tiles.
    xp = jnp.pad(x, ((0, 0), (0, C - cin), (0, 0), (0, 0))).reshape(N, C, HW)

    kernel, scratch = _make_kernel(H, W, C, B)

    out = pl.pallas_call(
        kernel,
        out_shape=jax.ShapeDtypeStruct((N, C, HW), x.dtype),
        grid=(N // B,),
        in_specs=[
            pl.BlockSpec((B, C, HW), lambda n: (n, 0, 0)),
            pl.BlockSpec(w3_all.shape, lambda n: (0, 0, 0)),
            pl.BlockSpec(w1_all.shape, lambda n: (0, 0)),
            pl.BlockSpec(vec_all.shape, lambda n: (0, 0)),
            pl.BlockSpec(sel2_up.shape, lambda n: (0, 0)),
            pl.BlockSpec(sel1_t.shape, lambda n: (0, 0)),
        ],
        out_specs=pl.BlockSpec((B, C, HW), lambda n: (n, 0, 0)),
        scratch_shapes=scratch,
        compiler_params=pltpu.CompilerParams(
            dimension_semantics=("parallel",)),     # batch tiles -> megacore on v7x
    )(xp, w3_all, w1_all, vec_all, sel2_up, sel1_t)

    return out.reshape(N, C, H, W)


# --------------------------- parameter initialization -------------------------

_BN_EPS = 1e-5


def _fold_bn(key, c):
    kg, kb, km, kv = jax.random.split(key, 4)
    gamma = 1.0 + 0.1 * jax.random.normal(kg, (c,), jnp.float32)
    beta = 0.1 * jax.random.normal(kb, (c,), jnp.float32)
    mean = 0.1 * jax.random.normal(km, (c,), jnp.float32)
    var = 1.0 + 0.1 * jax.random.uniform(kv, (c,), jnp.float32)
    scale = gamma / jnp.sqrt(var + _BN_EPS)
    bias = beta - mean * scale
    return scale, bias


def _init_resblock(key, cin, cout):
    ks = jax.random.split(key, 6)
    p = {
        'w1': 0.2 * jax.random.normal(ks[0], (3, 3, cin, cout), jnp.float32),
        'w2': 0.2 * jax.random.normal(ks[2], (3, 3, cout, cout), jnp.float32),
    }
    p['s1'], p['b1'] = _fold_bn(ks[1], cout)
    p['s2'], p['b2'] = _fold_bn(ks[3], cout)
    if cin != cout:  # downSamplingChoice (stride is always 1 in this module)
        p['wd'] = 0.2 * jax.random.normal(ks[4], (cin, cout), jnp.float32)
        p['sd'], p['bd'] = _fold_bn(ks[5], cout)
    return p


def init_attention_block(key, in_plane, num_plane):
    keys = jax.random.split(key, 8)
    params = {
        'trunk1': _init_resblock(keys[0], in_plane, num_plane),
        'trunk2': _init_resblock(keys[1], num_plane, num_plane),
        'down1': _init_resblock(keys[2], in_plane, num_plane),
        'skip1': _init_resblock(keys[3], num_plane, num_plane),
        'down2': _init_resblock(keys[4], num_plane, num_plane),
    }
    s0, b0 = _fold_bn(keys[5], num_plane)
    s1, b1 = _fold_bn(keys[6], num_plane)
    kw1, kw2 = jax.random.split(keys[7], 2)
    params['mask'] = dict(
        s0=s0, b0=b0,
        w1=0.2 * jax.random.normal(kw1, (num_plane, num_plane), jnp.float32),
        s1=s1, b1=b1,
        w2=0.2 * jax.random.normal(kw2, (num_plane, num_plane), jnp.float32),
    )
    return params


# --------------------------------- main ---------------------------------------

if __name__ == "__main__":
    size, in_plane, num_plane, batch = 16, 4, 8, 2
    key = jax.random.PRNGKey(0)
    kparams, kx = jax.random.split(key)
    params = init_attention_block(kparams, in_plane, num_plane)
    # NCHW input, same layout as the PyTorch reference: (2, 4, 16, 16)
    x = jax.random.normal(kx, (batch, in_plane, size, size), jnp.float32)

    fwd = jax.jit(attention_block_forward, static_argnums=(2,))
    out = fwd(params, x, size)
    out = jax.block_until_ready(out)

    assert out.shape == (batch, num_plane, size, size), out.shape
    assert bool(jnp.all(jnp.isfinite(out)))
    print("KERNEL_OK")
</pallas_src>

<mosaic_0001>
module attributes {stable_mosaic.version = 11 : i64} {
  func.func @kernel(%arg0: i32, %arg1: memref<2x8x256xf32, #tpu.memory_space<vmem>>, %arg2: memref<10x8x80xbf16, #tpu.memory_space<vmem>>, %arg3: memref<8x32xbf16, #tpu.memory_space<vmem>>, %arg4: memref<8x8xf32, #tpu.memory_space<vmem>>, %arg5: memref<64x256xbf16, #tpu.memory_space<vmem>>, %arg6: memref<256x64xbf16, #tpu.memory_space<vmem>>, %arg7: memref<2x8x256xf32, #tpu.memory_space<vmem>>, %arg8: memref<8x896xf32, #tpu.memory_space<vmem>>, %arg9: memref<8x384xf32, #tpu.memory_space<vmem>>) attributes {dimension_semantics = [#tpu.dimension_semantics<parallel>], iteration_bounds = array<i64: 1>, scalar_prefetch = 0 : i64, scratch_operands = 2 : i64, tpu.core_type = #tpu.core_type<tc>, window_params = [{transform_indices = @transform_0, window_bounds = array<i64: 2, 8, 256>}, {pipeline_mode = #tpu.pipeline_mode<synchronous>, transform_indices = @transform_1, window_bounds = array<i64: 10, 8, 80>}, {pipeline_mode = #tpu.pipeline_mode<synchronous>, transform_indices = @transform_2, window_bounds = array<i64: 8, 32>}, {pipeline_mode = #tpu.pipeline_mode<synchronous>, transform_indices = @transform_3, window_bounds = array<i64: 8, 8>}, {pipeline_mode = #tpu.pipeline_mode<synchronous>, transform_indices = @transform_4, window_bounds = array<i64: 64, 256>}, {pipeline_mode = #tpu.pipeline_mode<synchronous>, transform_indices = @transform_5, window_bounds = array<i64: 256, 64>}, {transform_indices = @transform_6, window_bounds = array<i64: 2, 8, 256>}]} {
    %cst = arith.constant 0.000000e+00 : f32
    %0 = vector.broadcast %cst : f32 to vector<8x896xf32>
    %c0 = arith.constant 0 : index
    %c0_0 = arith.constant 0 : index
    %1 = vector.load %arg8[%c0, %c0_0] : memref<8x896xf32, #tpu.memory_space<vmem>>, vector<8x896xf32>
    tpu.vector_store %arg8[%c0, %c0_0], %0 {strides = array<i32>} : memref<8x896xf32, #tpu.memory_space<vmem>>, vector<8x896xf32>,
    %cst_1 = arith.constant 0.000000e+00 : f32
    %2 = vector.broadcast %cst_1 : f32 to vector<8x384xf32>
    %c0_2 = arith.constant 0 : index
    %c0_3 = arith.constant 0 : index
    %3 = vector.load %arg9[%c0_2, %c0_3] : memref<8x384xf32, #tpu.memory_space<vmem>>, vector<8x384xf32>
    tpu.vector_store %arg9[%c0_2, %c0_3], %2 {strides = array<i32>} : memref<8x384xf32, #tpu.memory_space<vmem>>, vector<8x384xf32>,
    %4 = tpu.iota {dimensions = array<i32: 1>} : vector<1x256xi32>
    %c16_i32 = arith.constant 16 : i32
    %c0_i32 = arith.constant 0 : i32
    %5 = arith.cmpi eq, %c16_i32, %c0_i32 : i32
    %c1_i32 = arith.constant 1 : i32
    %6 = arith.select %5, %c1_i32, %c16_i32 : i32
    %7 = vector.broadcast %6 : i32 to vector<1x256xi32>
    %8 = arith.remsi %4, %7 : vector<1x256xi32>
    %c0_i32_4 = arith.constant 0 : i32
    %9 = vector.broadcast %c0_i32_4 : i32 to vector<1x256xi32>
    %10 = arith.cmpi ne, %8, %9 : vector<1x256xi32>
    %c0_i32_5 = arith.constant 0 : i32
    %11 = vector.broadcast %c0_i32_5 : i32 to vector<1x256xi32>
    %12 = arith.cmpi slt, %8, %11 : vector<1x256xi32>
    %c0_i32_6 = arith.constant 0 : i32
    %13 = arith.cmpi slt, %6, %c0_i32_6 : i32
    %14 = vector.broadcast %13 : i1 to vector<1x256xi1>
    %15 = vector.broadcast %14 : vector<1x256xi1> to vector<1x256xi1>
    %16 = arith.xori %12, %15 : vector<1x256xi1>
    %17 = arith.andi %16, %10 : vector<1x256xi1>
    %18 = vector.broadcast %6 : i32 to vector<1x256xi32>
    %19 = arith.addi %8, %18 : vector<1x256xi32>
    %20 = arith.select %17, %19, %8 : vector<1x256xi1>, vector<1x256xi32>
    %c0_i32_7 = arith.constant 0 : i32
    %21 = vector.broadcast %c0_i32_7 : i32 to vector<1x256xi32>
    %22 = arith.cmpi sgt, %20, %21 : vector<1x256xi32>
    %c15_i32 = arith.constant 15 : i32
    %23 = vector.broadcast %c15_i32 : i32 to vector<1x256xi32>
    %24 = arith.cmpi slt, %20, %23 : vector<1x256xi32>
    %25 = tpu.iota {dimensions = array<i32: 0>} : vector<8x256xi32>
    %c0_i32_8 = arith.constant 0 : i32
    %26 = vector.broadcast %c0_i32_8 : i32 to vector<8x256xi32>
    %27 = arith.cmpi eq, %25, %26 : vector<8x256xi32>
    %cst_9 = arith.constant 1.000000e+00 : f32
    %cst_10 = arith.constant 0.000000e+00 : f32
    %28 = vector.broadcast %cst_9 : f32 to vector<8x256xf32>
    %29 = vector.broadcast %cst_10 : f32 to vector<8x256xf32>
    %30 = arith.select %27, %28, %29 : vector<8x256xi1>, vector<8x256xf32>
    %31 = tpu.iota {dimensions = array<i32: 1>} : vector<1x64xi32>
    %c8_i32 = arith.constant 8 : i32
    %c0_i32_11 = arith.constant 0 : i32
    %32 = arith.cmpi eq, %c8_i32, %c0_i32_11 : i32
    %c1_i32_12 = arith.constant 1 : i32
    %33 = arith.select %32, %c1_i32_12, %c8_i32 : i32
    %34 = vector.broadcast %33 : i32 to vector<1x64xi32>
    %35 = arith.remsi %31, %34 : vector<1x64xi32>
    %c0_i32_13 = arith.constant 0 : i32
    %36 = vector.broadcast %c0_i32_13 : i32 to vector<1x64xi32>
    %37 = arith.cmpi ne, %35, %36 : vector<1x64xi32>
    %c0_i32_14 = arith.constant 0 : i32
    %38 = vector.broadcast %c0_i32_14 : i32 to vector<1x64xi32>
    %39 = arith.cmpi slt, %35, %38 : vector<1x64xi32>
    %c0_i32_15 = arith.constant 0 : i32
    %40 = arith.cmpi slt, %33, %c0_i32_15 : i32
    %41 = vector.broadcast %40 : i1 to vector<1x64xi1>
    %42 = vector.broadcast %41 : vector<1x64xi1> to vector<1x64xi1>
    %43 = arith.xori %39, %42 : vector<1x64xi1>
    %44 = arith.andi %43, %37 : vector<1x64xi1>
    %45 = vector.broadcast %33 : i32 to vector<1x64xi32>
    %46 = arith.addi %35, %45 : vector<1x64xi32>
    %47 = arith.select %44, %46, %35 : vector<1x64xi1>, vector<1x64xi32>
    %c0_i32_16 = arith.constant 0 : i32
    %48 = vector.broadcast %c0_i32_16 : i32 to vector<1x64xi32>
    %49 = arith.cmpi sgt, %47, %48 : vector<1x64xi32>
    %c7_i32 = arith.constant 7 : i32
    %50 = vector.broadcast %c7_i32 : i32 to vector<1x64xi32>
    %51 = arith.cmpi slt, %47, %50 : vector<1x64xi32>
    %52 = tpu.iota {dimensions = array<i32: 0>} : vector<8x64xi32>
    %c0_i32_17 = arith.constant 0 : i32
    %53 = vector.broadcast %c0_i32_17 : i32 to vector<8x64xi32>
    %54 = arith.cmpi eq, %52, %53 : vector<8x64xi32>
    %cst_18 = arith.constant 1.000000e+00 : f32
    %cst_19 = arith.constant 0.000000e+00 : f32
    %55 = vector.broadcast %cst_18 : f32 to vector<8x64xf32>
    %56 = vector.broadcast %cst_19 : f32 to vector<8x64xf32>
    %57 = arith.select %54, %55, %56 : vector<8x64xi1>, vector<8x64xf32>
    %c0_20 = arith.constant 0 : index
    %c0_21 = arith.constant 0 : index
    %c0_22 = arith.constant 0 : index
    %58 = vector.load %arg1[%c0_20, %c0_21, %c0_22] : memref<2x8x256xf32, #tpu.memory_space<vmem>>, vector<1x8x256xf32>
    %59 = vector.shape_cast %58 : vector<1x8x256xf32> to vector<8x256xf32>
    %c1 = arith.constant 1 : index
    %c0_23 = arith.constant 0 : index
    %c0_24 = arith.constant 0 : index
    %60 = vector.load %arg1[%c1, %c0_23, %c0_24] : memref<2x8x256xf32, #tpu.memory_space<vmem>>, vector<1x8x256xf32>
    %61 = vector.shape_cast %60 : vector<1x8x256xf32> to vector<8x256xf32>
    %62 = tpu.concatenate %59, %61 in 1 : vector<8x256xf32>, vector<8x256xf32> -> vector<8x512xf32>
    %63 = vector.extract_strided_slice %62 {offsets = [0, 0], sizes = [8, 256], strides = [1, 1]} : vector<8x512xf32> to vector<8x256xf32>
    %c0_25 = arith.constant 0 : index
    %c128 = arith.constant 128 : index
    %64 = vector.load %arg8[%c0_25, %c128] : memref<8x896xf32, #tpu.memory_space<vmem>>, vector<8x256xf32>
    tpu.vector_store %arg8[%c0_25, %c128], %63 {strides = array<i32>} : memref<8x896xf32, #tpu.memory_space<vmem>>, vector<8x256xf32>,
    %65 = vector.extract_strided_slice %62 {offsets = [0, 256], sizes = [8, 256], strides = [1, 1]} : vector<8x512xf32> to vector<8x256xf32>
    %c0_26 = arith.constant 0 : index
    %c512 = arith.constant 512 : index
    %66 = vector.load %arg8[%c0_26, %c512] : memref<8x896xf32, #tpu.memory_space<vmem>>, vector<8x256xf32>
    tpu.vector_store %arg8[%c0_26, %c512], %65 {strides = array<i32>} : memref<8x896xf32, #tpu.memory_space<vmem>>, vector<8x256xf32>,
    %c0_27 = arith.constant 0 : index
    %c111 = arith.constant 111 : index
    %67 = vector.load %arg8[%c0_27, %c111] : memref<8x896xf32, #tpu.memory_space<vmem>>, vector<8x256xf32>
    %cst_28 = arith.constant 0.000000e+00 : f32
    %68 = vector.shape_cast %22 : vector<1x256xi1> to vector<1x256xi1>
    %69 = vector.broadcast %68 : vector<1x256xi1> to vector<8x256xi1>
    %70 = vector.broadcast %cst_28 : f32 to vector<8x256xf32>
    %71 = arith.select %69, %67, %70 : vector<8x256xi1>, vector<8x256xf32>
    %c0_29 = arith.constant 0 : index
    %c112 = arith.constant 112 : index
    %72 = vector.load %arg8[%c0_29, %c112] : memref<8x896xf32, #tpu.memory_space<vmem>>, vector<8x256xf32>
    %c0_30 = arith.constant 0 : index
    %c113 = arith.constant 113 : index
    %73 = vector.load %arg8[%c0_30, %c113] : memref<8x896xf32, #tpu.memory_space<vmem>>, vector<8x256xf32>
    %cst_31 = arith.constant 0.000000e+00 : f32
    %74 = vector.shape_cast %24 : vector<1x256xi1> to vector<1x256xi1>
    %75 = vector.broadcast %74 : vector<1x256xi1> to vector<8x256xi1>
    %76 = vector.broadcast %cst_31 : f32 to vector<8x256xf32>
    %77 = arith.select %75, %73, %76 : vector<8x256xi1>, vector<8x256xf32>
    %c0_32 = arith.constant 0 : index
    %c127 = arith.constant 127 : index
    %78 = vector.load %arg8[%c0_32, %c127] : memref<8x896xf32, #tpu.memory_space<vmem>>, vector<8x256xf32>
    %cst_33 = arith.constant 0.000000e+00 : f32
    %79 = vector.shape_cast %22 : vector<1x256xi1> to vector<1x256xi1>
    %80 = vector.broadcast %79 : vector<1x256xi1> to vector<8x256xi1>
    %81 = vector.broadcast %cst_33 : f32 to vector<8x256xf32>
    %82 = arith.select %80, %78, %81 : vector<8x256xi1>, vector<8x256xf32>
    %c0_34 = arith.constant 0 : index
    %c128_35 = arith.constant 128 : index
    %83 = vector.load %arg8[%c0_34, %c128_35] : memref<8x896xf32, #tpu.memory_space<vmem>>, vector<8x256xf32>
    %c0_36 = arith.constant 0 : index
    %c129 = arith.constant 129 : index
    %84 = vector.load %arg8[%c0_36, %c129] : memref<8x896xf32, #tpu.memory_space<vmem>>, vector<8x256xf32>
    %cst_37 = arith.constant 0.000000e+00 : f32
    %85 = vector.shape_cast %24 : vector<1x256xi1> to vector<1x256xi1>
    %86 = vector.broadcast %85 : vector<1x256xi1> to vector<8x256xi1>
    %87 = vector.broadcast %cst_37 : f32 to vector<8x256xf32>
    %88 = arith.select %86, %84, %87 : vector<8x256xi1>, vector<8x256xf32>
    %c0_38 = arith.constant 0 : index
    %c143 = arith.constant 143 : index
    %89 = vector.load %arg8[%c0_38, %c143] : memref<8x896xf32, #tpu.memory_space<vmem>>, vector<8x256xf32>
    %cst_39 = arith.constant 0.000000e+00 : f32
    %90 = vector.shape_cast %22 : vector<1x256xi1> to vector<1x256xi1>
    %91 = vector.broadcast %90 : vector<1x256xi1> to vector<8x256xi1>
    %92 = vector.broadcast %cst_39 : f32 to vector<8x256xf32>
    %93 = arith.select %91, %89, %92 : vector<8x256xi1>, vector<8x256xf32>
    %c0_40 = arith.constant 0 : index
    %c144 = arith.constant 144 : index
    %94 = vector.load %arg8[%c0_40, %c144] : memref<8x896xf32, #tpu.memory_space<vmem>>, vector<8x256xf32>
    %c0_41 = arith.constant 0 : index
    %c145 = arith.constant 145 : index
    %95 = vector.load %arg8[%c0_41, %c145] : memref<8x896xf32, #tpu.memory_space<vmem>>, vector<8x256xf32>
    %cst_42 = arith.constant 0.000000e+00 : f32
    %96 = vector.shape_cast %24 : vector<1x256xi1> to vector<1x256xi1>
    %97 = vector.broadcast %96 : vector<1x256xi1> to vector<8x256xi1>
    %98 = vector.broadcast %cst_42 : f32 to vector<8x256xf32>
    %99 = arith.select %97, %95, %98 : vector<8x256xi1>, vector<8x256xf32>
    %100 = tpu.concatenate %71, %72, %77, %82, %83, %88, %93, %94, %99, %30 in 0 : vector<8x256xf32>, vector<8x256xf32>, vector<8x256xf32>, vector<8x256xf32>, vector<8x256xf32>, vector<8x256xf32>, vector<8x256xf32>, vector<8x256xf32>, vector<8x256xf32>, vector<8x256xf32> -> vector<80x256xf32>
    %c0_43 = arith.constant 0 : index
    %c495 = arith.constant 495 : index
    %101 = vector.load %arg8[%c0_43, %c495] : memref<8x896xf32, #tpu.memory_space<vmem>>, vector<8x256xf32>
    %cst_44 = arith.constant 0.000000e+00 : f32
    %102 = vector.shape_cast %22 : vector<1x256xi1> to vector<1x256xi1>
    %103 = vector.broadcast %102 : vector<1x256xi1> to vector<8x256xi1>
    %104 = vector.broadcast %cst_44 : f32 to vector<8x256xf32>
    %105 = arith.select %103, %101, %104 : vector<8x256xi1>, vector<8x256xf32>
    %c0_45 = arith.constant 0 : index
    %c496 = arith.constant 496 : index
    %106 = vector.load %arg8[%c0_45, %c496] : memref<8x896xf32, #tpu.memory_space<vmem>>, vector<8x256xf32>
    %c0_46 = arith.constant 0 : index
    %c497 = arith.constant 497 : index
    %107 = vector.load %arg8[%c0_46, %c497] : memref<8x896xf32, #tpu.memory_space<vmem>>, vector<8x256xf32>
    %cst_47 = arith.constant 0.000000e+00 : f32
    %108 = vector.shape_cast %24 : vector<1x256xi1> to vector<1x256xi1>
    %109 = vector.broadcast %108 : vector<1x256xi1> to vector<8x256xi1>
    %110 = vector.broadcast %cst_47 : f32 to vector<8x256xf32>
    %111 = arith.select %109, %107, %110 : vector<8x256xi1>, vector<8x256xf32>
    %c0_48 = arith.constant 0 : index
    %c511 = arith.constant 511 : index
    %112 = vector.load %arg8[%c0_48, %c511] : memref<8x896xf32, #tpu.memory_space<vmem>>, vector<8x256xf32>
    %cst_49 = arith.constant 0.000000e+00 : f32
    %113 = vector.shape_cast %22 : vector<1x256xi1> to vector<1x256xi1>
    %114 = vector.broadcast %113 : vector<1x256xi1> to vector<8x256xi1>
    %115 = vector.broadcast %cst_49 : f32 to vector<8x256xf32>
    %116 = arith.select %114, %112, %115 : vector<8x256xi1>, vector<8x256xf32>
    %c0_50 = arith.constant 0 : index
    %c512_51 = arith.constant 512 : index
    %117 = vector.load %arg8[%c0_50, %c512_51] : memref<8x896xf32, #tpu.memory_space<vmem>>, vector<8x256xf32>
    %c0_52 = arith.constant 0 : index
    %c513 = arith.constant 513 : index
    %118 = vector.load %arg8[%c0_52, %c513] : memref<8x896xf32, #tpu.memory_space<vmem>>, vector<8x256xf32>
    %cst_53 = arith.constant 0.000000e+00 : f32
    %119 = vector.shape_cast %24 : vector<1x256xi1> to vector<1x256xi1>
    %120 = vector.broadcast %119 : vector<1x256xi1> to vector<8x256xi1>
    %121 = vector.broadcast %cst_53 : f32 to vector<8x256xf32>
    %122 = arith.select %120, %118, %121 : vector<8x256xi1>, vector<8x256xf32>
    %c0_54 = arith.constant 0 : index
    %c527 = arith.constant 527 : index
    %123 = vector.load %arg8[%c0_54, %c527] : memref<8x896xf32, #tpu.memory_space<vmem>>, vector<8x256xf32>
    %cst_55 = arith.constant 0.000000e+00 : f32
    %124 = vector.shape_cast %22 : vector<1x256xi1> to vector<1x256xi1>
    %125 = vector.broadcast %124 : vector<1x256xi1> to vector<8x256xi1>
    %126 = vector.broadcast %cst_55 : f32 to vector<8x256xf32>
    %127 = arith.select %125, %123, %126 : vector<8x256xi1>, vector<8x256xf32>
    %c0_56 = arith.constant 0 : index
    %c528 = arith.constant 528 : index
    %128 = vector.load %arg8[%c0_56, %c528] : memref<8x896xf32, #tpu.memory_space<vmem>>, vector<8x256xf32>
    %c0_57 = arith.constant 0 : index
    %c529 = arith.constant 529 : index
    %129 = vector.load %arg8[%c0_57, %c529] : memref<8x896xf32, #tpu.memory_space<vmem>>, vector<8x256xf32>
    %cst_58 = arith.constant 0.000000e+00 : f32
    %130 = vector.shape_cast %24 : vector<1x256xi1> to vector<1x256xi1>
    %131 = vector.broadcast %130 : vector<1x256xi1> to vector<8x256xi1>
    %132 = vector.broadcast %cst_58 : f32 to vector<8x256xf32>
    %133 = arith.select %131, %129, %132 : vector<8x256xi1>, vector<8x256xf32>
    %134 = tpu.concatenate %105, %106, %111, %116, %117, %122, %127, %128, %133, %30 in 0 : vector<8x256xf32>, vector<8x256xf32>, vector<8x256xf32>, vector<8x256xf32>, vector<8x256xf32>, vector<8x256xf32>, vector<8x256xf32>, vector<8x256xf32>, vector<8x256xf32>, vector<8x256xf32> -> vector<80x256xf32>
    %135 = tpu.concatenate %100, %134 in 1 : vector<80x256xf32>, vector<80x256xf32> -> vector<80x512xf32>
    %c0_59 = arith.constant 0 : index
    %c0_60 = arith.constant 0 : index
    %c0_61 = arith.constant 0 : index
    %136 = vector.load %arg2[%c0_59, %c0_60, %c0_61] : memref<10x8x80xbf16, #tpu.memory_space<vmem>>, vector<1x8x80xbf16>
    %137 = vector.shape_cast %136 : vector<1x8x80xbf16> to vector<8x80xbf16>
    %138 = arith.truncf %135 : vector<80x512xf32> to vector<80x512xbf16>
    %cst_62 = arith.constant dense<0.000000e+00> : vector<8x512xf32>
    %139 = tpu.matmul %137, %138, %cst_62 {dimension_numbers = #tpu.dot_dimension_numbers<[1], [0], [0], [1], [0, 0, 1, 1], [], []>} : vector<8x80xbf16>, vector<80x512xbf16>, vector<8x512xf32> -> vector<8x512xf32>
    %cst_63 = arith.constant 0.000000e+00 : f32
    %140 = vector.broadcast %cst_63 : f32 to vector<8x512xf32>
    %141 = arith.maximumf %139, %140 : vector<8x512xf32>
    %c0_64 = arith.constant 0 : index
    %c0_65 = arith.constant 0 : index
    %142 = vector.load %arg3[%c0_64, %c0_65] : memref<8x32xbf16, #tpu.memory_space<vmem>>, vector<8x8xbf16>
    %143 = arith.truncf %62 : vector<8x512xf32> to vector<8x512xbf16>
    %cst_66 = arith.constant dense<0.000000e+00> : vector<8x512xf32>
    %144 = tpu.matmul %142, %143, %cst_66 {dimension_numbers = #tpu.dot_dimension_numbers<[1], [0], [0], [1], [0, 0, 1, 1], [], []>} : vector<8x8xbf16>, vector<8x512xbf16>, vector<8x512xf32> -> vector<8x512xf32>
    %c0_67 = arith.constant 0 : index
    %c0_68 = arith.constant 0 : index
    %145 = vector.load %arg4[%c0_67, %c0_68] : memref<8x8xf32, #tpu.memory_space<vmem>>, vector<8x1xf32>
    %146 = vector.broadcast %145 : vector<8x1xf32> to vector<8x512xf32>
    %147 = arith.addf %144, %146 : vector<8x512xf32>
    %148 = vector.extract_strided_slice %141 {offsets = [0, 0], sizes = [8, 256], strides = [1, 1]} : vector<8x512xf32> to vector<8x256xf32>
    %c0_69 = arith.constant 0 : index
    %c128_70 = arith.constant 128 : index
    %149 = vector.load %arg8[%c0_69, %c128_70] : memref<8x896xf32, #tpu.memory_space<vmem>>, vector<8x256xf32>
    tpu.vector_store %arg8[%c0_69, %c128_70], %148 {strides = array<i32>} : memref<8x896xf32, #tpu.memory_space<vmem>>, vector<8x256xf32>,
    %150 = vector.extract_strided_slice %141 {offsets = [0, 256], sizes = [8, 256], strides = [1, 1]} : vector<8x512xf32> to vector<8x256xf32>
    %c0_71 = arith.constant 0 : index
    %c512_72 = arith.constant 512 : index
    %151 = vector.load %arg8[%c0_71, %c512_72] : memref<8x896xf32, #tpu.memory_space<vmem>>, vector<8x256xf32>
    tpu.vector_store %arg8[%c0_71, %c512_72], %150 {strides = array<i32>} : memref<8x896xf32, #tpu.memory_space<vmem>>, vector<8x256xf32>,
    %c0_73 = arith.constant 0 : index
    %c111_74 = arith.constant 111 : index
    %152 = vector.load %arg8[%c0_73, %c111_74] : memref<8x896xf32, #tpu.memory_space<vmem>>, vector<8x256xf32>
    %cst_75 = arith.constant 0.000000e+00 : f32
    %153 = vector.shape_cast %22 : vector<1x256xi1> to vector<1x256xi1>
    %154 = vector.broadcast %153 : vector<1x256xi1> to vector<8x256xi1>
    %155 = vector.broadcast %cst_75 : f32 to vector<8x256xf32>
    %156 = arith.select %154, %152, %155 : vector<8x256xi1>, vector<8x256xf32>
    %c0_76 = arith.constant 0 : index
    %c112_77 = arith.constant 112 : index
    %157 = vector.load %arg8[%c0_76, %c112_77] : memref<8x896xf32, #tpu.memory_space<vmem>>, vector<8x256xf32>
    %c0_78 = arith.constant 0 : index
    %c113_79 = arith.constant 113 : index
    %158 = vector.load %arg8[%c0_78, %c113_79] : memref<8x896xf32, #tpu.memory_space<vmem>>, vector<8x256xf32>
    %cst_80 = arith.constant 0.000000e+00 : f32
    %159 = vector.shape_cast %24 : vector<1x256xi1> to vector<1x256xi1>
    %160 = vector.broadcast %159 : vector<1x256xi1> to vector<8x256xi1>
    %161 = vector.broadcast %cst_80 : f32 to vector<8x256xf32>
    %162 = arith.select %160, %158, %161 : vector<8x256xi1>, vector<8x256xf32>
    %c0_81 = arith.constant 0 : index
    %c127_82 = arith.constant 127 : index
    %163 = vector.load %arg8[%c0_81, %c127_82] : memref<8x896xf32, #tpu.memory_space<vmem>>, vector<8x256xf32>
    %cst_83 = arith.constant 0.000000e+00 : f32
    %164 = vector.shape_cast %22 : vector<1x256xi1> to vector<1x256xi1>
    %165 = vector.broadcast %164 : vector<1x256xi1> to vector<8x256xi1>
    %166 = vector.broadcast %cst_83 : f32 to vector<8x256xf32>
    %167 = arith.select %165, %163, %166 : vector<8x256xi1>, vector<8x256xf32>
    %c0_84 = arith.constant 0 : index
    %c128_85 = arith.constant 128 : index
    %168 = vector.load %arg8[%c0_84, %c128_85] : memref<8x896xf32, #tpu.memory_space<vmem>>, vector<8x256xf32>
    %c0_86 = arith.constant 0 : index
    %c129_87 = arith.constant 129 : index
    %169 = vector.load %arg8[%c0_86, %c129_87] : memref<8x896xf32, #tpu.memory_space<vmem>>, vector<8x256xf32>
    %cst_88 = arith.constant 0.000000e+00 : f32
    %170 = vector.shape_cast %24 : vector<1x256xi1> to vector<1x256xi1>
    %171 = vector.broadcast %170 : vector<1x256xi1> to vector<8x256xi1>
    %172 = vector.broadcast %cst_88 : f32 to vector<8x256xf32>
    %173 = arith.select %171, %169, %172 : vector<8x256xi1>, vector<8x256xf32>
    %c0_89 = arith.constant 0 : index
    %c143_90 = arith.constant 143 : index
    %174 = vector.load %arg8[%c0_89, %c143_90] : memref<8x896xf32, #tpu.memory_space<vmem>>, vector<8x256xf32>
    %cst_91 = arith.constant 0.000000e+00 : f32
    %175 = vector.shape_cast %22 : vector<1x256xi1> to vector<1x256xi1>
    %176 = vector.broadcast %175 : vector<1x256xi1> to vector<8x256xi1>
    %177 = vector.broadcast %cst_91 : f32 to vector<8x256xf32>
    %178 = arith.select %176, %174, %177 : vector<8x256xi1>, vector<8x256xf32>
    %c0_92 = arith.constant 0 : index
    %c144_93 = arith.constant 144 : index
    %179 = vector.load %arg8[%c0_92, %c144_93] : memref<8x896xf32, #tpu.memory_space<vmem>>, vector<8x256xf32>
    %c0_94 = arith.constant 0 : index
    %c145_95 = arith.constant 145 : index
    %180 = vector.load %arg8[%c0_94, %c145_95] : memref<8x896xf32, #tpu.memory_space<vmem>>, vector<8x256xf32>
    %cst_96 = arith.constant 0.000000e+00 : f32
    %181 = vector.shape_cast %24 : vector<1x256xi1> to vector<1x256xi1>
    %182 = vector.broadcast %181 : vector<1x256xi1> to vector<8x256xi1>
    %183 = vector.broadcast %cst_96 : f32 to vector<8x256xf32>
    %184 = arith.select %182, %180, %183 : vector<8x256xi1>, vector<8x256xf32>
    %185 = tpu.concatenate %156, %157, %162, %167, %168, %173, %178, %179, %184, %30 in 0 : vector<8x256xf32>, vector<8x256xf32>, vector<8x256xf32>, vector<8x256xf32>, vector<8x256xf32>, vector<8x256xf32>, vector<8x256xf32>, vector<8x256xf32>, vector<8x256xf32>, vector<8x256xf32> -> vector<80x256xf32>
    %c0_97 = arith.constant 0 : index
    %c495_98 = arith.constant 495 : index
    %186 = vector.load %arg8[%c0_97, %c495_98] : memref<8x896xf32, #tpu.memory_space<vmem>>, vector<8x256xf32>
    %cst_99 = arith.constant 0.000000e+00 : f32
    %187 = vector.shape_cast %22 : vector<1x256xi1> to vector<1x256xi1>
    %188 = vector.broadcast %187 : vector<1x256xi1> to vector<8x256xi1>
    %189 = vector.broadcast %cst_99 : f32 to vector<8x256xf32>
    %190 = arith.select %188, %186, %189 : vector<8x256xi1>, vector<8x256xf32>
    %c0_100 = arith.constant 0 : index
    %c496_101 = arith.constant 496 : index
    %191 = vector.load %arg8[%c0_100, %c496_101] : memref<8x896xf32, #tpu.memory_space<vmem>>, vector<8x256xf32>
    %c0_102 = arith.constant 0 : index
    %c497_103 = arith.constant 497 : index
    %192 = vector.load %arg8[%c0_102, %c497_103] : memref<8x896xf32, #tpu.memory_space<vmem>>, vector<8x256xf32>
    %cst_104 = arith.constant 0.000000e+00 : f32
    %193 = vector.shape_cast %24 : vector<1x256xi1> to vector<1x256xi1>
    %194 = vector.broadcast %193 : vector<1x256xi1> to vector<8x256xi1>
    %195 = vector.broadcast %cst_104 : f32 to vector<8x256xf32>
    %196 = arith.select %194, %192, %195 : vector<8x256xi1>, vector<8x256xf32>
    %c0_105 = arith.constant 0 : index
    %c511_106 = arith.constant 511 : index
    %197 = vector.load %arg8[%c0_105, %c511_106] : memref<8x896xf32, #tpu.memory_space<vmem>>, vector<8x256xf32>
    %cst_107 = arith.constant 0.000000e+00 : f32
    %198 = vector.shape_cast %22 : vector<1x256xi1> to vector<1x256xi1>
    %199 = vector.broadcast %198 : vector<1x256xi1> to vector<8x256xi1>
    %200 = vector.broadcast %cst_107 : f32 to vector<8x256xf32>
    %201 = arith.select %199, %197, %200 : vector<8x256xi1>, vector<8x256xf32>
    %c0_108 = arith.constant 0 : index
    %c512_109 = arith.constant 512 : index
    %202 = vector.load %arg8[%c0_108, %c512_109] : memref<8x896xf32, #tpu.memory_space<vmem>>, vector<8x256xf32>
    %c0_110 = arith.constant 0 : index
    %c513_111 = arith.constant 513 : index
    %203 = vector.load %arg8[%c0_110, %c513_111] : memref<8x896xf32, #tpu.memory_space<vmem>>, vector<8x256xf32>
    %cst_112 = arith.constant 0.000000e+00 : f32
    %204 = vector.shape_cast %24 : vector<1x256xi1> to vector<1x256xi1>
    %205 = vector.broadcast %204 : vector<1x256xi1> to vector<8x256xi1>
    %206 = vector.broadcast %cst_112 : f32 to vector<8x256xf32>
    %207 = arith.select %205, %203, %206 : vector<8x256xi1>, vector<8x256xf32>
    %c0_113 = arith.constant 0 : index
    %c527_114 = arith.constant 527 : index
    %208 = vector.load %arg8[%c0_113, %c527_114] : memref<8x896xf32, #tpu.memory_space<vmem>>, vector<8x256xf32>
    %cst_115 = arith.constant 0.000000e+00 : f32
    %209 = vector.shape_cast %22 : vector<1x256xi1> to vector<1x256xi1>
    %210 = vector.broadcast %209 : vector<1x256xi1> to vector<8x256xi1>
    %211 = vector.broadcast %cst_115 : f32 to vector<8x256xf32>
    %212 = arith.select %210, %208, %211 : vector<8x256xi1>, vector<8x256xf32>
    %c0_116 = arith.constant 0 : index
    %c528_117 = arith.constant 528 : index
    %213 = vector.load %arg8[%c0_116, %c528_117] : memref<8x896xf32, #tpu.memory_space<vmem>>, vector<8x256xf32>
    %c0_118 = arith.constant 0 : index
    %c529_119 = arith.constant 529 : index
    %214 = vector.load %arg8[%c0_118, %c529_119] : memref<8x896xf32, #tpu.memory_space<vmem>>, vector<8x256xf32>
    %cst_120 = arith.constant 0.000000e+00 : f32
    %215 = vector.shape_cast %24 : vector<1x256xi1> to vector<1x256xi1>
    %216 = vector.broadcast %215 : vector<1x256xi1> to vector<8x256xi1>
    %217 = vector.broadcast %cst_120 : f32 to vector<8x256xf32>
    %218 = arith.select %216, %214, %217 : vector<8x256xi1>, vector<8x256xf32>
    %219 = tpu.concatenate %190, %191, %196, %201, %202, %207, %212, %213, %218, %30 in 0 : vector<8x256xf32>, vector<8x256xf32>, vector<8x256xf32>, vector<8x256xf32>, vector<8x256xf32>, vector<8x256xf32>, vector<8x256xf32>, vector<8x256xf32>, vector<8x256xf32>, vector<8x256xf32> -> vector<80x256xf32>
    %220 = tpu.concatenate %185, %219 in 1 : vector<80x256xf32>, vector<80x256xf32> -> vector<80x512xf32>
    %c1_121 = arith.constant 1 : index
    %c0_122 = arith.constant 0 : index
    %c0_123 = arith.constant 0 : index
    %221 = vector.load %arg2[%c1_121, %c0_122, %c0_123] : memref<10x8x80xbf16, #tpu.memory_space<vmem>>, vector<1x8x80xbf16>
    %222 = vector.shape_cast %221 : vector<1x8x80xbf16> to vector<8x80xbf16>
    %223 = arith.truncf %220 : vector<80x512xf32> to vector<80x512xbf16>
    %cst_124 = arith.constant dense<0.000000e+00> : vector<8x512xf32>
    %224 = tpu.matmul %222, %223, %cst_124 {dimension_numbers = #tpu.dot_dimension_numbers<[1], [0], [0], [1], [0, 0, 1, 1], [], []>} : vector<8x80xbf16>, vector<80x512xbf16>, vector<8x512xf32> -> vector<8x512xf32>
    %225 = arith.addf %224, %147 : vector<8x512xf32>
    %cst_125 = arith.constant 0.000000e+00 : f32
    %226 = vector.broadcast %cst_125 : f32 to vector<8x512xf32>
    %227 = arith.maximumf %225, %226 : vector<8x512xf32>
    %228 = vector.extract_strided_slice %227 {offsets = [0, 0], sizes = [8, 256], strides = [1, 1]} : vector<8x512xf32> to vector<8x256xf32>
    %c0_126 = arith.constant 0 : index
    %c128_127 = arith.constant 128 : index
    %229 = vector.load %arg8[%c0_126, %c128_127] : memref<8x896xf32, #tpu.memory_space<vmem>>, vector<8x256xf32>
    tpu.vector_store %arg8[%c0_126, %c128_127], %228 {strides = array<i32>} : memref<8x896xf32, #tpu.memory_space<vmem>>, vector<8x256xf32>,
    %230 = vector.extract_strided_slice %227 {offsets = [0, 256], sizes = [8, 256], strides = [1, 1]} : vector<8x512xf32> to vector<8x256xf32>
    %c0_128 = arith.constant 0 : index
    %c512_129 = arith.constant 512 : index
    %231 = vector.load %arg8[%c0_128, %c512_129] : memref<8x896xf32, #tpu.memory_space<vmem>>, vector<8x256xf32>
    tpu.vector_store %arg8[%c0_128, %c512_129], %230 {strides = array<i32>} : memref<8x896xf32, #tpu.memory_space<vmem>>, vector<8x256xf32>,
    %c0_130 = arith.constant 0 : index
    %c111_131 = arith.constant 111 : index
    %232 = vector.load %arg8[%c0_130, %c111_131] : memref<8x896xf32, #tpu.memory_space<vmem>>, vector<8x256xf32>
    %cst_132 = arith.constant 0.000000e+00 : f32
    %233 = vector.shape_cast %22 : vector<1x256xi1> to vector<1x256xi1>
    %234 = vector.broadcast %233 : vector<1x256xi1> to vector<8x256xi1>
    %235 = vector.broadcast %cst_132 : f32 to vector<8x256xf32>
    %236 = arith.select %234, %232, %235 : vector<8x256xi1>, vector<8x256xf32>
    %c0_133 = arith.constant 0 : index
    %c112_134 = arith.constant 112 : index
    %237 = vector.load %arg8[%c0_133, %c112_134] : memref<8x896xf32, #tpu.memory_space<vmem>>, vector<8x256xf32>
    %c0_135 = arith.constant 0 : index
    %c113_136 = arith.constant 113 : index
    %238 = vector.load %arg8[%c0_135, %c113_136] : memref<8x896xf32, #tpu.memory_space<vmem>>, vector<8x256xf32>
    %cst_137 = arith.constant 0.000000e+00 : f32
    %239 = vector.shape_cast %24 : vector<1x256xi1> to vector<1x256xi1>
    %240 = vector.broadcast %239 : vector<1x256xi1> to vector<8x256xi1>
    %241 = vector.broadcast %cst_137 : f32 to vector<8x256xf32>
    %242 = arith.select %240, %238, %241 : vector<8x256xi1>, vector<8x256xf32>
    %c0_138 = arith.constant 0 : index
    %c127_139 = arith.constant 127 : index
    %243 = vector.load %arg8[%c0_138, %c127_139] : memref<8x896xf32, #tpu.memory_space<vmem>>, vector<8x256xf32>
    %cst_140 = arith.constant 0.000000e+00 : f32
    %244 = vector.shape_cast %22 : vector<1x256xi1> to vector<1x256xi1>
    %245 = vector.broadcast %244 : vector<1x256xi1> to vector<8x256xi1>
    %246 = vector.broadcast %cst_140 : f32 to vector<8x256xf32>
    %247 = arith.select %245, %243, %246 : vector<8x256xi1>, vector<8x256xf32>
    %c0_141 = arith.constant 0 : index
    %c128_142 = arith.constant 128 : index
    %248 = vector.load %arg8[%c0_141, %c128_142] : memref<8x896xf32, #tpu.memory_space<vmem>>, vector<8x256xf32>
    %c0_143 = arith.constant 0 : index
    %c129_144 = arith.constant 129 : index
    %249 = vector.load %arg8[%c0_143, %c129_144] : memref<8x896xf32, #tpu.memory_space<vmem>>, vector<8x256xf32>
    %cst_145 = arith.constant 0.000000e+00 : f32
    %250 = vector.shape_cast %24 : vector<1x256xi1> to vector<1x256xi1>
    %251 = vector.broadcast %250 : vector<1x256xi1> to vector<8x256xi1>
    %252 = vector.broadcast %cst_145 : f32 to vector<8x256xf32>
    %253 = arith.select %251, %249, %252 : vector<8x256xi1>, vector<8x256xf32>
    %c0_146 = arith.constant 0 : index
    %c143_147 = arith.constant 143 : index
    %254 = vector.load %arg8[%c0_146, %c143_147] : memref<8x896xf32, #tpu.memory_space<vmem>>, vector<8x256xf32>
    %cst_148 = arith.constant 0.000000e+00 : f32
    %255 = vector.shape_cast %22 : vector<1x256xi1> to vector<1x256xi1>
    %256 = vector.broadcast %255 : vector<1x256xi1> to vector<8x256xi1>
    %257 = vector.broadcast %cst_148 : f32 to vector<8x256xf32>
    %258 = arith.select %256, %254, %257 : vector<8x256xi1>, vector<8x256xf32>
    %c0_149 = arith.constant 0 : index
    %c144_150 = arith.constant 144 : index
    %259 = vector.load %arg8[%c0_149, %c144_150] : memref<8x896xf32, #tpu.memory_space<vmem>>, vector<8x256xf32>
    %c0_151 = arith.constant 0 : index
    %c145_152 = arith.constant 145 : index
    %260 = vector.load %arg8[%c0_151, %c145_152] : memref<8x896xf32, #tpu.memory_space<vmem>>, vector<8x256xf32>
    %cst_153 = arith.constant 0.000000e+00 : f32
    %261 = vector.shape_cast %24 : vector<1x256xi1> to vector<1x256xi1>
    %262 = vector.broadcast %261 : vector<1x256xi1> to vector<8x256xi1>
    %263 = vector.broadcast %cst_153 : f32 to vector<8x256xf32>
    %264 = arith.select %262, %260, %263 : vector<8x256xi1>, vector<8x256xf32>
    %265 = tpu.concatenate %236, %237, %242, %247, %248, %253, %258, %259, %264, %30 in 0 : vector<8x256xf32>, vector<8x256xf32>, vector<8x256xf32>, vector<8x256xf32>, vector<8x256xf32>, vector<8x256xf32>, vector<8x256xf32>, vector<8x256xf32>, vector<8x256xf32>, vector<8x256xf32> -> vector<80x256xf32>
    %c0_154 = arith.constant 0 : index
    %c495_155 = arith.constant 495 : index
    %266 = vector.load %arg8[%c0_154, %c495_155] : memref<8x896xf32, #tpu.memory_space<vmem>>, vector<8x256xf32>
    %cst_156 = arith.constant 0.000000e+00 : f32
    %267 = vector.shape_cast %22 : vector<1x256xi1> to vector<1x256xi1>
    %268 = vector.broadcast %267 : vector<1x256xi1> to vector<8x256xi1>
    %269 = vector.broadcast %cst_156 : f32 to vector<8x256xf32>
    %270 = arith.select %268, %266, %269 : vector<8x256xi1>, vector<8x256xf32>
    %c0_157 = arith.constant 0 : index
    %c496_158 = arith.constant 496 : index
    %271 = vector.load %arg8[%c0_157, %c496_158] : memref<8x896xf32, #tpu.memory_space<vmem>>, vector<8x256xf32>
    %c0_159 = arith.constant 0 : index
    %c497_160 = arith.constant 497 : index
    %272 = vector.load %arg8[%c0_159, %c497_160] : memref<8x896xf32, #tpu.memory_space<vmem>>, vector<8x256xf32>
    %cst_161 = arith.constant 0.000000e+00 : f32
    %273 = vector.shape_cast %24 : vector<1x256xi1> to vector<1x256xi1>
    %274 = vector.broadcast %273 : vector<1x256xi1> to vector<8x256xi1>
    %275 = vector.broadcast %cst_161 : f32 to vector<8x256xf32>
    %276 = arith.select %274, %272, %275 : vector<8x256xi1>, vector<8x256xf32>
    %c0_162 = arith.constant 0 : index
    %c511_163 = arith.constant 511 : index
    %277 = vector.load %arg8[%c0_162, %c511_163] : memref<8x896xf32, #tpu.memory_space<vmem>>, vector<8x256xf32>
    %cst_164 = arith.constant 0.000000e+00 : f32
    %278 = vector.shape_cast %22 : vector<1x256xi1> to vector<1x256xi1>
    %279 = vector.broadcast %278 : vector<1x256xi1> to vector<8x256xi1>
    %280 = vector.broadcast %cst_164 : f32 to vector<8x256xf32>
    %281 = arith.select %279, %277, %280 : vector<8x256xi1>, vector<8x256xf32>
    %c0_165 = arith.constant 0 : index
    %c512_166 = arith.constant 512 : index
    %282 = vector.load %arg8[%c0_165, %c512_166] : memref<8x896xf32, #tpu.memory_space<vmem>>, vector<8x256xf32>
    %c0_167 = arith.constant 0 : index
    %c513_168 = arith.constant 513 : index
    %283 = vector.load %arg8[%c0_167, %c513_168] : memref<8x896xf32, #tpu.memory_space<vmem>>, vector<8x256xf32>
    %cst_169 = arith.constant 0.000000e+00 : f32
    %284 = vector.shape_cast %24 : vector<1x256xi1> to vector<1x256xi1>
    %285 = vector.broadcast %284 : vector<1x256xi1> to vector<8x256xi1>
    %286 = vector.broadcast %cst_169 : f32 to vector<8x256xf32>
    %287 = arith.select %285, %283, %286 : vector<8x256xi1>, vector<8x256xf32>
    %c0_170 = arith.constant 0 : index
    %c527_171 = arith.constant 527 : index
    %288 = vector.load %arg8[%c0_170, %c527_171] : memref<8x896xf32, #tpu.memory_space<vmem>>, vector<8x256xf32>
    %cst_172 = arith.constant 0.000000e+00 : f32
    %289 = vector.shape_cast %22 : vector<1x256xi1> to vector<1x256xi1>
    %290 = vector.broadcast %289 : vector<1x256xi1> to vector<8x256xi1>
    %291 = vector.broadcast %cst_172 : f32 to vector<8x256xf32>
    %292 = arith.select %290, %288, %291 : vector<8x256xi1>, vector<8x256xf32>
    %c0_173 = arith.constant 0 : index
    %c528_174 = arith.constant 528 : index
    %293 = vector.load %arg8[%c0_173, %c528_174] : memref<8x896xf32, #tpu.memory_space<vmem>>, vector<8x256xf32>
    %c0_175 = arith.constant 0 : index
    %c529_176 = arith.constant 529 : index
    %294 = vector.load %arg8[%c0_175, %c529_176] : memref<8x896xf32, #tpu.memory_space<vmem>>, vector<8x256xf32>
    %cst_177 = arith.constant 0.000000e+00 : f32
    %295 = vector.shape_cast %24 : vector<1x256xi1> to vector<1x256xi1>
    %296 = vector.broadcast %295 : vector<1x256xi1> to vector<8x256xi1>
    %297 = vector.broadcast %cst_177 : f32 to vector<8x256xf32>
    %298 = arith.select %296, %294, %297 : vector<8x256xi1>, vector<8x256xf32>
    %299 = tpu.concatenate %270, %271, %276, %281, %282, %287, %292, %293, %298, %30 in 0 : vector<8x256xf32>, vector<8x256xf32>, vector<8x256xf32>, vector<8x256xf32>, vector<8x256xf32>, vector<8x256xf32>, vector<8x256xf32>, vector<8x256xf32>, vector<8x256xf32>, vector<8x256xf32> -> vector<80x256xf32>
    %300 = tpu.concatenate %265, %299 in 1 : vector<80x256xf32>, vector<80x256xf32> -> vector<80x512xf32>
    %c2 = arith.constant 2 : index
    %c0_178 = arith.constant 0 : index
    %c0_179 = arith.constant 0 : index
    %301 = vector.load %arg2[%c2, %c0_178, %c0_179] : memref<10x8x80xbf16, #tpu.memory_space<vmem>>, vector<1x8x80xbf16>
    %302 = vector.shape_cast %301 : vector<1x8x80xbf16> to vector<8x80xbf16>
    %303 = arith.truncf %300 : vector<80x512xf32> to vector<80x512xbf16>
    %cst_180 = arith.constant dense<0.000000e+00> : vector<8x512xf32>
    %304 = tpu.matmul %302, %303, %cst_180 {dimension_numbers = #tpu.dot_dimension_numbers<[1], [0], [0], [1], [0, 0, 1, 1], [], []>} : vector<8x80xbf16>, vector<80x512xbf16>, vector<8x512xf32> -> vector<8x512xf32>
    %cst_181 = arith.constant 0.000000e+00 : f32
    %305 = vector.broadcast %cst_181 : f32 to vector<8x512xf32>
    %306 = arith.maximumf %304, %305 : vector<8x512xf32>
    %307 = vector.extract_strided_slice %306 {offsets = [0, 0], sizes = [8, 256], strides = [1, 1]} : vector<8x512xf32> to vector<8x256xf32>
    %c0_182 = arith.constant 0 : index
    %c128_183 = arith.constant 128 : index
    %308 = vector.load %arg8[%c0_182, %c128_183] : memref<8x896xf32, #tpu.memory_space<vmem>>, vector<8x256xf32>
    tpu.vector_store %arg8[%c0_182, %c128_183], %307 {strides = array<i32>} : memref<8x896xf32, #tpu.memory_space<vmem>>, vector<8x256xf32>,
    %309 = vector.extract_strided_slice %306 {offsets = [0, 256], sizes = [8, 256], strides = [1, 1]} : vector<8x512xf32> to vector<8x256xf32>
    %c0_184 = arith.constant 0 : index
    %c512_185 = arith.constant 512 : index
    %310 = vector.load %arg8[%c0_184, %c512_185] : memref<8x896xf32, #tpu.memory_space<vmem>>, vector<8x256xf32>
    tpu.vector_store %arg8[%c0_184, %c512_185], %309 {strides = array<i32>} : memref<8x896xf32, #tpu.memory_space<vmem>>, vector<8x256xf32>,
    %c0_186 = arith.constant 0 : index
    %c111_187 = arith.constant 111 : index
    %311 = vector.load %arg8[%c0_186, %c111_187] : memref<8x896xf32, #tpu.memory_space<vmem>>, vector<8x256xf32>
    %cst_188 = arith.constant 0.000000e+00 : f32
    %312 = vector.shape_cast %22 : vector<1x256xi1> to vector<1x256xi1>
    %313 = vector.broadcast %312 : vector<1x256xi1> to vector<8x256xi1>
    %314 = vector.broadcast %cst_188 : f32 to vector<8x256xf32>
    %315 = arith.select %313, %311, %314 : vector<8x256xi1>, vector<8x256xf32>
    %c0_189 = arith.constant 0 : index
    %c112_190 = arith.constant 112 : index
    %316 = vector.load %arg8[%c0_189, %c112_190] : memref<8x896xf32, #tpu.memory_space<vmem>>, vector<8x256xf32>
    %c0_191 = arith.constant 0 : index
    %c113_192 = arith.constant 113 : index
    %317 = vector.load %arg8[%c0_191, %c113_192] : memref<8x896xf32, #tpu.memory_space<vmem>>, vector<8x256xf32>
    %cst_193 = arith.constant 0.000000e+00 : f32
    %318 = vector.shape_cast %24 : vector<1x256xi1> to vector<1x256xi1>
    %319 = vector.broadcast %318 : vector<1x256xi1> to vector<8x256xi1>
    %320 = vector.broadcast %cst_193 : f32 to vector<8x256xf32>
    %321 = arith.select %319, %317, %320 : vector<8x256xi1>, vector<8x256xf32>
    %c0_194 = arith.constant 0 : index
    %c127_195 = arith.constant 127 : index
    %322 = vector.load %arg8[%c0_194, %c127_195] : memref<8x896xf32, #tpu.memory_space<vmem>>, vector<8x256xf32>
    %cst_196 = arith.constant 0.000000e+00 : f32
    %323 = vector.shape_cast %22 : vector<1x256xi1> to vector<1x256xi1>
    %324 = vector.broadcast %323 : vector<1x256xi1> to vector<8x256xi1>
    %325 = vector.broadcast %cst_196 : f32 to vector<8x256xf32>
    %326 = arith.select %324, %322, %325 : vector<8x256xi1>, vector<8x256xf32>
    %c0_197 = arith.constant 0 : index
    %c128_198 = arith.constant 128 : index
    %327 = vector.load %arg8[%c0_197, %c128_198] : memref<8x896xf32, #tpu.memory_space<vmem>>, vector<8x256xf32>
    %c0_199 = arith.constant 0 : index
    %c129_200 = arith.constant 129 : index
    %328 = vector.load %arg8[%c0_199, %c129_200] : memref<8x896xf32, #tpu.memory_space<vmem>>, vector<8x256xf32>
    %cst_201 = arith.constant 0.000000e+00 : f32
    %329 = vector.shape_cast %24 : vector<1x256xi1> to vector<1x256xi1>
    %330 = vector.broadcast %329 : vector<1x256xi1> to vector<8x256xi1>
    %331 = vector.broadcast %cst_201 : f32 to vector<8x256xf32>
    %332 = arith.select %330, %328, %331 : vector<8x256xi1>, vector<8x256xf32>
    %c0_202 = arith.constant 0 : index
    %c143_203 = arith.constant 143 : index
    %333 = vector.load %arg8[%c0_202, %c143_203] : memref<8x896xf32, #tpu.memory_space<vmem>>, vector<8x256xf32>
    %cst_204 = arith.constant 0.000000e+00 : f32
    %334 = vector.shape_cast %22 : vector<1x256xi1> to vector<1x256xi1>
    %335 = vector.broadcast %334 : vector<1x256xi1> to vector<8x256xi1>
    %336 = vector.broadcast %cst_204 : f32 to vector<8x256xf32>
    %337 = arith.select %335, %333, %336 : vector<8x256xi1>, vector<8x256xf32>
    %c0_205 = arith.constant 0 : index
    %c144_206 = arith.constant 144 : index
    %338 = vector.load %arg8[%c0_205, %c144_206] : memref<8x896xf32, #tpu.memory_space<vmem>>, vector<8x256xf32>
    %c0_207 = arith.constant 0 : index
    %c145_208 = arith.constant 145 : index
    %339 = vector.load %arg8[%c0_207, %c145_208] : memref<8x896xf32, #tpu.memory_space<vmem>>, vector<8x256xf32>
    %cst_209 = arith.constant 0.000000e+00 : f32
    %340 = vector.shape_cast %24 : vector<1x256xi1> to vector<1x256xi1>
    %341 = vector.broadcast %340 : vector<1x256xi1> to vector<8x256xi1>
    %342 = vector.broadcast %cst_209 : f32 to vector<8x256xf32>
    %343 = arith.select %341, %339, %342 : vector<8x256xi1>, vector<8x256xf32>
    %344 = tpu.concatenate %315, %316, %321, %326, %327, %332, %337, %338, %343, %30 in 0 : vector<8x256xf32>, vector<8x256xf32>, vector<8x256xf32>, vector<8x256xf32>, vector<8x256xf32>, vector<8x256xf32>, vector<8x256xf32>, vector<8x256xf32>, vector<8x256xf32>, vector<8x256xf32> -> vector<80x256xf32>
    %c0_210 = arith.constant 0 : index
    %c495_211 = arith.constant 495 : index
    %345 = vector.load %arg8[%c0_210, %c495_211] : memref<8x896xf32, #tpu.memory_space<vmem>>, vector<8x256xf32>
    %cst_212 = arith.constant 0.000000e+00 : f32
    %346 = vector.shape_cast %22 : vector<1x256xi1> to vector<1x256xi1>
    %347 = vector.broadcast %346 : vector<1x256xi1> to vector<8x256xi1>
    %348 = vector.broadcast %cst_212 : f32 to vector<8x256xf32>
    %349 = arith.select %347, %345, %348 : vector<8x256xi1>, vector<8x256xf32>
    %c0_213 = arith.constant 0 : index
    %c496_214 = arith.constant 496 : index
    %350 = vector.load %arg8[%c0_213, %c496_214] : memref<8x896xf32, #tpu.memory_space<vmem>>, vector<8x256xf32>
    %c0_215 = arith.constant 0 : index
    %c497_216 = arith.constant 497 : index
    %351 = vector.load %arg8[%c0_215, %c497_216] : memref<8x896xf32, #tpu.memory_space<vmem>>, vector<8x256xf32>
    %cst_217 = arith.constant 0.000000e+00 : f32
    %352 = vector.shape_cast %24 : vector<1x256xi1> to vector<1x256xi1>
    %353 = vector.broadcast %352 : vector<1x256xi1> to vector<8x256xi1>
    %354 = vector.broadcast %cst_217 : f32 to vector<8x256xf32>
    %355 = arith.select %353, %351, %354 : vector<8x256xi1>, vector<8x256xf32>
    %c0_218 = arith.constant 0 : index
    %c511_219 = arith.constant 511 : index
    %356 = vector.load %arg8[%c0_218, %c511_219] : memref<8x896xf32, #tpu.memory_space<vmem>>, vector<8x256xf32>
    %cst_220 = arith.constant 0.000000e+00 : f32
    %357 = vector.shape_cast %22 : vector<1x256xi1> to vector<1x256xi1>
    %358 = vector.broadcast %357 : vector<1x256xi1> to vector<8x256xi1>
    %359 = vector.broadcast %cst_220 : f32 to vector<8x256xf32>
    %360 = arith.select %358, %356, %359 : vector<8x256xi1>, vector<8x256xf32>
    %c0_221 = arith.constant 0 : index
    %c512_222 = arith.constant 512 : index
    %361 = vector.load %arg8[%c0_221, %c512_222] : memref<8x896xf32, #tpu.memory_space<vmem>>, vector<8x256xf32>
    %c0_223 = arith.constant 0 : index
    %c513_224 = arith.constant 513 : index
    %362 = vector.load %arg8[%c0_223, %c513_224] : memref<8x896xf32, #tpu.memory_space<vmem>>, vector<8x256xf32>
    %cst_225 = arith.constant 0.000000e+00 : f32
    %363 = vector.shape_cast %24 : vector<1x256xi1> to vector<1x256xi1>
    %364 = vector.broadcast %363 : vector<1x256xi1> to vector<8x256xi1>
    %365 = vector.broadcast %cst_225 : f32 to vector<8x256xf32>
    %366 = arith.select %364, %362, %365 : vector<8x256xi1>, vector<8x256xf32>
    %c0_226 = arith.constant 0 : index
    %c527_227 = arith.constant 527 : index
    %367 = vector.load %arg8[%c0_226, %c527_227] : memref<8x896xf32, #tpu.memory_space<vmem>>, vector<8x256xf32>
    %cst_228 = arith.constant 0.000000e+00 : f32
    %368 = vector.shape_cast %22 : vector<1x256xi1> to vector<1x256xi1>
    %369 = vector.broadcast %368 : vector<1x256xi1> to vector<8x256xi1>
    %370 = vector.broadcast %cst_228 : f32 to vector<8x256xf32>
    %371 = arith.select %369, %367, %370 : vector<8x256xi1>, vector<8x256xf32>
    %c0_229 = arith.constant 0 : index
    %c528_230 = arith.constant 528 : index
    %372 = vector.load %arg8[%c0_229, %c528_230] : memref<8x896xf32, #tpu.memory_space<vmem>>, vector<8x256xf32>
    %c0_231 = arith.constant 0 : index
    %c529_232 = arith.constant 529 : index
    %373 = vector.load %arg8[%c0_231, %c529_232] : memref<8x896xf32, #tpu.memory_space<vmem>>, vector<8x256xf32>
    %cst_233 = arith.constant 0.000000e+00 : f32
    %374 = vector.shape_cast %24 : vector<1x256xi1> to vector<1x256xi1>
    %375 = vector.broadcast %374 : vector<1x256xi1> to vector<8x256xi1>
    %376 = vector.broadcast %cst_233 : f32 to vector<8x256xf32>
    %377 = arith.select %375, %373, %376 : vector<8x256xi1>, vector<8x256xf32>
    %378 = tpu.concatenate %349, %350, %355, %360, %361, %366, %371, %372, %377, %30 in 0 : vector<8x256xf32>, vector<8x256xf32>, vector<8x256xf32>, vector<8x256xf32>, vector<8x256xf32>, vector<8x256xf32>, vector<8x256xf32>, vector<8x256xf32>, vector<8x256xf32>, vector<8x256xf32> -> vector<80x256xf32>
    %379 = tpu.concatenate %344, %378 in 1 : vector<80x256xf32>, vector<80x256xf32> -> vector<80x512xf32>
    %c3 = arith.constant 3 : index
    %c0_234 = arith.constant 0 : index
    %c0_235 = arith.constant 0 : index
    %380 = vector.load %arg2[%c3, %c0_234, %c0_235] : memref<10x8x80xbf16, #tpu.memory_space<vmem>>, vector<1x8x80xbf16>
    %381 = vector.shape_cast %380 : vector<1x8x80xbf16> to vector<8x80xbf16>
    %382 = arith.truncf %379 : vector<80x512xf32> to vector<80x512xbf16>
    %cst_236 = arith.constant dense<0.000000e+00> : vector<8x512xf32>
    %383 = tpu.matmul %381, %382, %cst_236 {dimension_numbers = #tpu.dot_dimension_numbers<[1], [0], [0], [1], [0, 0, 1, 1], [], []>} : vector<8x80xbf16>, vector<80x512xbf16>, vector<8x512xf32> -> vector<8x512xf32>
    %384 = arith.addf %383, %227 : vector<8x512xf32>
    %cst_237 = arith.constant 0.000000e+00 : f32
    %385 = vector.broadcast %cst_237 : f32 to vector<8x512xf32>
    %386 = arith.maximumf %384, %385 : vector<8x512xf32>
    %387 = vector.extract_strided_slice %62 {offsets = [0, 0], sizes = [8, 256], strides = [1, 1]} : vector<8x512xf32> to vector<8x256xf32>
    %c0_238 = arith.constant 0 : index
    %c128_239 = arith.constant 128 : index
    %388 = vector.load %arg8[%c0_238, %c128_239] : memref<8x896xf32, #tpu.memory_space<vmem>>, vector<8x256xf32>
    tpu.vector_store %arg8[%c0_238, %c128_239], %387 {strides = array<i32>} : memref<8x896xf32, #tpu.memory_space<vmem>>, vector<8x256xf32>,
    %389 = vector.extract_strided_slice %62 {offsets = [0, 256], sizes = [8, 256], strides = [1, 1]} : vector<8x512xf32> to vector<8x256xf32>
    %c0_240 = arith.constant 0 : index
    %c512_241 = arith.constant 512 : index
    %390 = vector.load %arg8[%c0_240, %c512_241] : memref<8x896xf32, #tpu.memory_space<vmem>>, vector<8x256xf32>
    tpu.vector_store %arg8[%c0_240, %c512_241], %389 {strides = array<i32>} : memref<8x896xf32, #tpu.memory_space<vmem>>, vector<8x256xf32>,
    %c0_242 = arith.constant 0 : index
    %c111_243 = arith.constant 111 : index
    %391 = vector.load %arg8[%c0_242, %c111_243] : memref<8x896xf32, #tpu.memory_space<vmem>>, vector<8x256xf32>
    %cst_244 = arith.constant 0.000000e+00 : f32
    %392 = vector.shape_cast %22 : vector<1x256xi1> to vector<1x256xi1>
    %393 = vector.broadcast %392 : vector<1x256xi1> to vector<8x256xi1>
    %394 = vector.broadcast %cst_244 : f32 to vector<8x256xf32>
    %395 = arith.select %393, %391, %394 : vector<8x256xi1>, vector<8x256xf32>
    %c0_245 = arith.constant 0 : index
    %c112_246 = arith.constant 112 : index
    %396 = vector.load %arg8[%c0_245, %c112_246] : memref<8x896xf32, #tpu.memory_space<vmem>>, vector<8x256xf32>
    %c0_247 = arith.constant 0 : index
    %c113_248 = arith.constant 113 : index
    %397 = vector.load %arg8[%c0_247, %c113_248] : memref<8x896xf32, #tpu.memory_space<vmem>>, vector<8x256xf32>
    %cst_249 = arith.constant 0.000000e+00 : f32
    %398 = vector.shape_cast %24 : vector<1x256xi1> to vector<1x256xi1>
    %399 = vector.broadcast %398 : vector<1x256xi1> to vector<8x256xi1>
    %400 = vector.broadcast %cst_249 : f32 to vector<8x256xf32>
    %401 = arith.select %399, %397, %400 : vector<8x256xi1>, vector<8x256xf32>
    %c0_250 = arith.constant 0 : index
    %c127_251 = arith.constant 127 : index
    %402 = vector.load %arg8[%c0_250, %c127_251] : memref<8x896xf32, #tpu.memory_space<vmem>>, vector<8x256xf32>
    %cst_252 = arith.constant 0.000000e+00 : f32
    %403 = vector.shape_cast %22 : vector<1x256xi1> to vector<1x256xi1>
    %404 = vector.broadcast %403 : vector<1x256xi1> to vector<8x256xi1>
    %405 = vector.broadcast %cst_252 : f32 to vector<8x256xf32>
    %406 = arith.select %404, %402, %405 : vector<8x256xi1>, vector<8x256xf32>
    %c0_253 = arith.constant 0 : index
    %c128_254 = arith.constant 128 : index
    %407 = vector.load %arg8[%c0_253, %c128_254] : memref<8x896xf32, #tpu.memory_space<vmem>>, vector<8x256xf32>
    %c0_255 = arith.constant 0 : index
    %c129_256 = arith.constant 129 : index
    %408 = vector.load %arg8[%c0_255, %c129_256] : memref<8x896xf32, #tpu.memory_space<vmem>>, vector<8x256xf32>
    %cst_257 = arith.constant 0.000000e+00 : f32
    %409 = vector.shape_cast %24 : vector<1x256xi1> to vector<1x256xi1>
    %410 = vector.broadcast %409 : vector<1x256xi1> to vector<8x256xi1>
    %411 = vector.broadcast %cst_257 : f32 to vector<8x256xf32>
    %412 = arith.select %410, %408, %411 : vector<8x256xi1>, vector<8x256xf32>
    %c0_258 = arith.constant 0 : index
    %c143_259 = arith.constant 143 : index
    %413 = vector.load %arg8[%c0_258, %c143_259] : memref<8x896xf32, #tpu.memory_space<vmem>>, vector<8x256xf32>
    %cst_260 = arith.constant 0.000000e+00 : f32
    %414 = vector.shape_cast %22 : vector<1x256xi1> to vector<1x256xi1>
    %415 = vector.broadcast %414 : vector<1x256xi1> to vector<8x256xi1>
    %416 = vector.broadcast %cst_260 : f32 to vector<8x256xf32>
    %417 = arith.select %415, %413, %416 : vector<8x256xi1>, vector<8x256xf32>
    %c0_261 = arith.constant 0 : index
    %c144_262 = arith.constant 144 : index
    %418 = vector.load %arg8[%c0_261, %c144_262] : memref<8x896xf32, #tpu.memory_space<vmem>>, vector<8x256xf32>
    %c0_263 = arith.constant 0 : index
    %c145_264 = arith.constant 145 : index
    %419 = vector.load %arg8[%c0_263, %c145_264] : memref<8x896xf32, #tpu.memory_space<vmem>>, vector<8x256xf32>
    %cst_265 = arith.constant 0.000000e+00 : f32
    %420 = vector.shape_cast %24 : vector<1x256xi1> to vector<1x256xi1>
    %421 = vector.broadcast %420 : vector<1x256xi1> to vector<8x256xi1>
    %422 = vector.broadcast %cst_265 : f32 to vector<8x256xf32>
    %423 = arith.select %421, %419, %422 : vector<8x256xi1>, vector<8x256xf32>
    %424 = tpu.concatenate %395, %396, %401, %406, %407, %412, %417, %418, %423, %30 in 0 : vector<8x256xf32>, vector<8x256xf32>, vector<8x256xf32>, vector<8x256xf32>, vector<8x256xf32>, vector<8x256xf32>, vector<8x256xf32>, vector<8x256xf32>, vector<8x256xf32>, vector<8x256xf32> -> vector<80x256xf32>
    %c0_266 = arith.constant 0 : index
    %c495_267 = arith.constant 495 : index
    %425 = vector.load %arg8[%c0_266, %c495_267] : memref<8x896xf32, #tpu.memory_space<vmem>>, vector<8x256xf32>
    %cst_268 = arith.constant 0.000000e+00 : f32
    %426 = vector.shape_cast %22 : vector<1x256xi1> to vector<1x256xi1>
    %427 = vector.broadcast %426 : vector<1x256xi1> to vector<8x256xi1>
    %428 = vector.broadcast %cst_268 : f32 to vector<8x256xf32>
    %429 = arith.select %427, %425, %428 : vector<8x256xi1>, vector<8x256xf32>
    %c0_269 = arith.constant 0 : index
    %c496_270 = arith.constant 496 : index
    %430 = vector.load %arg8[%c0_269, %c496_270] : memref<8x896xf32, #tpu.memory_space<vmem>>, vector<8x256xf32>
    %c0_271 = arith.constant 0 : index
    %c497_272 = arith.constant 497 : index
    %431 = vector.load %arg8[%c0_271, %c497_272] : memref<8x896xf32, #tpu.memory_space<vmem>>, vector<8x256xf32>
    %cst_273 = arith.constant 0.000000e+00 : f32
    %432 = vector.shape_cast %24 : vector<1x256xi1> to vector<1x256xi1>
    %433 = vector.broadcast %432 : vector<1x256xi1> to vector<8x256xi1>
    %434 = vector.broadcast %cst_273 : f32 to vector<8x256xf32>
    %435 = arith.select %433, %431, %434 : vector<8x256xi1>, vector<8x256xf32>
    %c0_274 = arith.constant 0 : index
    %c511_275 = arith.constant 511 : index
    %436 = vector.load %arg8[%c0_274, %c511_275] : memref<8x896xf32, #tpu.memory_space<vmem>>, vector<8x256xf32>
    %cst_276 = arith.constant 0.000000e+00 : f32
    %437 = vector.shape_cast %22 : vector<1x256xi1> to vector<1x256xi1>
    %438 = vector.broadcast %437 : vector<1x256xi1> to vector<8x256xi1>
    %439 = vector.broadcast %cst_276 : f32 to vector<8x256xf32>
    %440 = arith.select %438, %436, %439 : vector<8x256xi1>, vector<8x256xf32>
    %c0_277 = arith.constant 0 : index
    %c512_278 = arith.constant 512 : index
    %441 = vector.load %arg8[%c0_277, %c512_278] : memref<8x896xf32, #tpu.memory_space<vmem>>, vector<8x256xf32>
    %c0_279 = arith.constant 0 : index
    %c513_280 = arith.constant 513 : index
    %442 = vector.load %arg8[%c0_279, %c513_280] : memref<8x896xf32, #tpu.memory_space<vmem>>, vector<8x256xf32>
    %cst_281 = arith.constant 0.000000e+00 : f32
    %443 = vector.shape_cast %24 : vector<1x256xi1> to vector<1x256xi1>
    %444 = vector.broadcast %443 : vector<1x256xi1> to vector<8x256xi1>
    %445 = vector.broadcast %cst_281 : f32 to vector<8x256xf32>
    %446 = arith.select %444, %442, %445 : vector<8x256xi1>, vector<8x256xf32>
    %c0_282 = arith.constant 0 : index
    %c527_283 = arith.constant 527 : index
    %447 = vector.load %arg8[%c0_282, %c527_283] : memref<8x896xf32, #tpu.memory_space<vmem>>, vector<8x256xf32>
    %cst_284 = arith.constant 0.000000e+00 : f32
    %448 = vector.shape_cast %22 : vector<1x256xi1> to vector<1x256xi1>
    %449 = vector.broadcast %448 : vector<1x256xi1> to vector<8x256xi1>
    %450 = vector.broadcast %cst_284 : f32 to vector<8x256xf32>
    %451 = arith.select %449, %447, %450 : vector<8x256xi1>, vector<8x256xf32>
    %c0_285 = arith.constant 0 : index
    %c528_286 = arith.constant 528 : index
    %452 = vector.load %arg8[%c0_285, %c528_286] : memref<8x896xf32, #tpu.memory_space<vmem>>, vector<8x256xf32>
    %c0_287 = arith.constant 0 : index
    %c529_288 = arith.constant 529 : index
    %453 = vector.load %arg8[%c0_287, %c529_288] : memref<8x896xf32, #tpu.memory_space<vmem>>, vector<8x256xf32>
    %cst_289 = arith.constant 0.000000e+00 : f32
    %454 = vector.shape_cast %24 : vector<1x256xi1> to vector<1x256xi1>
    %455 = vector.broadcast %454 : vector<1x256xi1> to vector<8x256xi1>
    %456 = vector.broadcast %cst_289 : f32 to vector<8x256xf32>
    %457 = arith.select %455, %453, %456 : vector<8x256xi1>, vector<8x256xf32>
    %458 = tpu.concatenate %429, %430, %435, %440, %441, %446, %451, %452, %457, %30 in 0 : vector<8x256xf32>, vector<8x256xf32>, vector<8x256xf32>, vector<8x256xf32>, vector<8x256xf32>, vector<8x256xf32>, vector<8x256xf32>, vector<8x256xf32>, vector<8x256xf32>, vector<8x256xf32> -> vector<80x256xf32>
    %459 = tpu.concatenate %424, %458 in 1 : vector<80x256xf32>, vector<80x256xf32> -> vector<80x512xf32>
    %c4 = arith.constant 4 : index
    %c0_290 = arith.constant 0 : index
    %c0_291 = arith.constant 0 : index
    %460 = vector.load %arg2[%c4, %c0_290, %c0_291] : memref<10x8x80xbf16, #tpu.memory_space<vmem>>, vector<1x8x80xbf16>
    %461 = vector.shape_cast %460 : vector<1x8x80xbf16> to vector<8x80xbf16>
    %462 = arith.truncf %459 : vector<80x512xf32> to vector<80x512xbf16>
    %cst_292 = arith.constant dense<0.000000e+00> : vector<8x512xf32>
    %463 = tpu.matmul %461, %462, %cst_292 {dimension_numbers = #tpu.dot_dimension_numbers<[1], [0], [0], [1], [0, 0, 1, 1], [], []>} : vector<8x80xbf16>, vector<80x512xbf16>, vector<8x512xf32> -> vector<8x512xf32>
    %cst_293 = arith.constant 0.000000e+00 : f32
    %464 = vector.broadcast %cst_293 : f32 to vector<8x512xf32>
    %465 = arith.maximumf %463, %464 : vector<8x512xf32>
    %c0_294 = arith.constant 0 : index
    %c8 = arith.constant 8 : index
    %466 = vector.load %arg3[%c0_294, %c8] : memref<8x32xbf16, #tpu.memory_space<vmem>>, vector<8x8xbf16>
    %467 = arith.truncf %62 : vector<8x512xf32> to vector<8x512xbf16>
    %cst_295 = arith.constant dense<0.000000e+00> : vector<8x512xf32>
    %468 = tpu.matmul %466, %467, %cst_295 {dimension_numbers = #tpu.dot_dimension_numbers<[1], [0], [0], [1], [0, 0, 1, 1], [], []>} : vector<8x8xbf16>, vector<8x512xbf16>, vector<8x512xf32> -> vector<8x512xf32>
    %c0_296 = arith.constant 0 : index
    %c1_297 = arith.constant 1 : index
    %469 = vector.load %arg4[%c0_296, %c1_297] : memref<8x8xf32, #tpu.memory_space<vmem>>, vector<8x1xf32>
    %470 = vector.broadcast %469 : vector<8x1xf32> to vector<8x512xf32>
    %471 = arith.addf %468, %470 : vector<8x512xf32>
    %472 = vector.extract_strided_slice %465 {offsets = [0, 0], sizes = [8, 256], strides = [1, 1]} : vector<8x512xf32> to vector<8x256xf32>
    %c0_298 = arith.constant 0 : index
    %c128_299 = arith.constant 128 : index
    %473 = vector.load %arg8[%c0_298, %c128_299] : memref<8x896xf32, #tpu.memory_space<vmem>>, vector<8x256xf32>
    tpu.vector_store %arg8[%c0_298, %c128_299], %472 {strides = array<i32>} : memref<8x896xf32, #tpu.memory_space<vmem>>, vector<8x256xf32>,
    %474 = vector.extract_strided_slice %465 {offsets = [0, 256], sizes = [8, 256], strides = [1, 1]} : vector<8x512xf32> to vector<8x256xf32>
    %c0_300 = arith.constant 0 : index
    %c512_301 = arith.constant 512 : index
    %475 = vector.load %arg8[%c0_300, %c512_301] : memref<8x896xf32, #tpu.memory_space<vmem>>, vector<8x256xf32>
    tpu.vector_store %arg8[%c0_300, %c512_301], %474 {strides = array<i32>} : memref<8x896xf32, #tpu.memory_space<vmem>>, vector<8x256xf32>,
    %c0_302 = arith.constant 0 : index
    %c111_303 = arith.constant 111 : index
    %476 = vector.load %arg8[%c0_302, %c111_303] : memref<8x896xf32, #tpu.memory_space<vmem>>, vector<8x256xf32>
    %cst_304 = arith.constant 0.000000e+00 : f32
    %477 = vector.shape_cast %22 : vector<1x256xi1> to vector<1x256xi1>
    %478 = vector.broadcast %477 : vector<1x256xi1> to vector<8x256xi1>
    %479 = vector.broadcast %cst_304 : f32 to vector<8x256xf32>
    %480 = arith.select %478, %476, %479 : vector<8x256xi1>, vector<8x256xf32>
    %c0_305 = arith.constant 0 : index
    %c112_306 = arith.constant 112 : index
    %481 = vector.load %arg8[%c0_305, %c112_306] : memref<8x896xf32, #tpu.memory_space<vmem>>, vector<8x256xf32>
    %c0_307 = arith.constant 0 : index
    %c113_308 = arith.constant 113 : index
    %482 = vector.load %arg8[%c0_307, %c113_308] : memref<8x896xf32, #tpu.memory_space<vmem>>, vector<8x256xf32>
    %cst_309 = arith.constant 0.000000e+00 : f32
    %483 = vector.shape_cast %24 : vector<1x256xi1> to vector<1x256xi1>
    %484 = vector.broadcast %483 : vector<1x256xi1> to vector<8x256xi1>
    %485 = vector.broadcast %cst_309 : f32 to vector<8x256xf32>
    %486 = arith.select %484, %482, %485 : vector<8x256xi1>, vector<8x256xf32>
    %c0_310 = arith.constant 0 : index
    %c127_311 = arith.constant 127 : index
    %487 = vector.load %arg8[%c0_310, %c127_311] : memref<8x896xf32, #tpu.memory_space<vmem>>, vector<8x256xf32>
    %cst_312 = arith.constant 0.000000e+00 : f32
    %488 = vector.shape_cast %22 : vector<1x256xi1> to vector<1x256xi1>
    %489 = vector.broadcast %488 : vector<1x256xi1> to vector<8x256xi1>
    %490 = vector.broadcast %cst_312 : f32 to vector<8x256xf32>
    %491 = arith.select %489, %487, %490 : vector<8x256xi1>, vector<8x256xf32>
    %c0_313 = arith.constant 0 : index
    %c128_314 = arith.constant 128 : index
    %492 = vector.load %arg8[%c0_313, %c128_314] : memref<8x896xf32, #tpu.memory_space<vmem>>, vector<8x256xf32>
    %c0_315 = arith.constant 0 : index
    %c129_316 = arith.constant 129 : index
    %493 = vector.load %arg8[%c0_315, %c129_316] : memref<8x896xf32, #tpu.memory_space<vmem>>, vector<8x256xf32>
    %cst_317 = arith.constant 0.000000e+00 : f32
    %494 = vector.shape_cast %24 : vector<1x256xi1> to vector<1x256xi1>
    %495 = vector.broadcast %494 : vector<1x256xi1> to vector<8x256xi1>
    %496 = vector.broadcast %cst_317 : f32 to vector<8x256xf32>
    %497 = arith.select %495, %493, %496 : vector<8x256xi1>, vector<8x256xf32>
    %c0_318 = arith.constant 0 : index
    %c143_319 = arith.constant 143 : index
    %498 = vector.load %arg8[%c0_318, %c143_319] : memref<8x896xf32, #tpu.memory_space<vmem>>, vector<8x256xf32>
    %cst_320 = arith.constant 0.000000e+00 : f32
    %499 = vector.shape_cast %22 : vector<1x256xi1> to vector<1x256xi1>
    %500 = vector.broadcast %499 : vector<1x256xi1> to vector<8x256xi1>
    %501 = vector.broadcast %cst_320 : f32 to vector<8x256xf32>
    %502 = arith.select %500, %498, %501 : vector<8x256xi1>, vector<8x256xf32>
    %c0_321 = arith.constant 0 : index
    %c144_322 = arith.constant 144 : index
    %503 = vector.load %arg8[%c0_321, %c144_322] : memref<8x896xf32, #tpu.memory_space<vmem>>, vector<8x256xf32>
    %c0_323 = arith.constant 0 : index
    %c145_324 = arith.constant 145 : index
    %504 = vector.load %arg8[%c0_323, %c145_324] : memref<8x896xf32, #tpu.memory_space<vmem>>, vector<8x256xf32>
    %cst_325 = arith.constant 0.000000e+00 : f32
    %505 = vector.shape_cast %24 : vector<1x256xi1> to vector<1x256xi1>
    %506 = vector.broadcast %505 : vector<1x256xi1> to vector<8x256xi1>
    %507 = vector.broadcast %cst_325 : f32 to vector<8x256xf32>
    %508 = arith.select %506, %504, %507 : vector<8x256xi1>, vector<8x256xf32>
    %509 = tpu.concatenate %480, %481, %486, %491, %492, %497, %502, %503, %508, %30 in 0 : vector<8x256xf32>, vector<8x256xf32>, vector<8x256xf32>, vector<8x256xf32>, vector<8x256xf32>, vector<8x256xf32>, vector<8x256xf32>, vector<8x256xf32>, vector<8x256xf32>, vector<8x256xf32> -> vector<80x256xf32>
    %c0_326 = arith.constant 0 : index
    %c495_327 = arith.constant 495 : index
    %510 = vector.load %arg8[%c0_326, %c495_327] : memref<8x896xf32, #tpu.memory_space<vmem>>, vector<8x256xf32>
    %cst_328 = arith.constant 0.000000e+00 : f32
    %511 = vector.shape_cast %22 : vector<1x256xi1> to vector<1x256xi1>
    %512 = vector.broadcast %511 : vector<1x256xi1> to vector<8x256xi1>
    %513 = vector.broadcast %cst_328 : f32 to vector<8x256xf32>
    %514 = arith.select %512, %510, %513 : vector<8x256xi1>, vector<8x256xf32>
    %c0_329 = arith.constant 0 : index
    %c496_330 = arith.constant 496 : index
    %515 = vector.load %arg8[%c0_329, %c496_330] : memref<8x896xf32, #tpu.memory_space<vmem>>, vector<8x256xf32>
    %c0_331 = arith.constant 0 : index
    %c497_332 = arith.constant 497 : index
    %516 = vector.load %arg8[%c0_331, %c497_332] : memref<8x896xf32, #tpu.memory_space<vmem>>, vector<8x256xf32>
    %cst_333 = arith.constant 0.000000e+00 : f32
    %517 = vector.shape_cast %24 : vector<1x256xi1> to vector<1x256xi1>
    %518 = vector.broadcast %517 : vector<1x256xi1> to vector<8x256xi1>
    %519 = vector.broadcast %cst_333 : f32 to vector<8x256xf32>
    %520 = arith.select %518, %516, %519 : vector<8x256xi1>, vector<8x256xf32>
    %c0_334 = arith.constant 0 : index
    %c511_335 = arith.constant 511 : index
    %521 = vector.load %arg8[%c0_334, %c511_335] : memref<8x896xf32, #tpu.memory_space<vmem>>, vector<8x256xf32>
    %cst_336 = arith.constant 0.000000e+00 : f32
    %522 = vector.shape_cast %22 : vector<1x256xi1> to vector<1x256xi1>
    %523 = vector.broadcast %522 : vector<1x256xi1> to vector<8x256xi1>
    %524 = vector.broadcast %cst_336 : f32 to vector<8x256xf32>
    %525 = arith.select %523, %521, %524 : vector<8x256xi1>, vector<8x256xf32>
    %c0_337 = arith.constant 0 : index
    %c512_338 = arith.constant 512 : index
    %526 = vector.load %arg8[%c0_337, %c512_338] : memref<8x896xf32, #tpu.memory_space<vmem>>, vector<8x256xf32>
    %c0_339 = arith.constant 0 : index
    %c513_340 = arith.constant 513 : index
    %527 = vector.load %arg8[%c0_339, %c513_340] : memref<8x896xf32, #tpu.memory_space<vmem>>, vector<8x256xf32>
    %cst_341 = arith.constant 0.000000e+00 : f32
    %528 = vector.shape_cast %24 : vector<1x256xi1> to vector<1x256xi1>
    %529 = vector.broadcast %528 : vector<1x256xi1> to vector<8x256xi1>
    %530 = vector.broadcast %cst_341 : f32 to vector<8x256xf32>
    %531 = arith.select %529, %527, %530 : vector<8x256xi1>, vector<8x256xf32>
    %c0_342 = arith.constant 0 : index
    %c527_343 = arith.constant 527 : index
    %532 = vector.load %arg8[%c0_342, %c527_343] : memref<8x896xf32, #tpu.memory_space<vmem>>, vector<8x256xf32>
    %cst_344 = arith.constant 0.000000e+00 : f32
    %533 = vector.shape_cast %22 : vector<1x256xi1> to vector<1x256xi1>
    %534 = vector.broadcast %533 : vector<1x256xi1> to vector<8x256xi1>
    %535 = vector.broadcast %cst_344 : f32 to vector<8x256xf32>
    %536 = arith.select %534, %532, %535 : vector<8x256xi1>, vector<8x256xf32>
    %c0_345 = arith.constant 0 : index
    %c528_346 = arith.constant 528 : index
    %537 = vector.load %arg8[%c0_345, %c528_346] : memref<8x896xf32, #tpu.memory_space<vmem>>, vector<8x256xf32>
    %c0_347 = arith.constant 0 : index
    %c529_348 = arith.constant 529 : index
    %538 = vector.load %arg8[%c0_347, %c529_348] : memref<8x896xf32, #tpu.memory_space<vmem>>, vector<8x256xf32>
    %cst_349 = arith.constant 0.000000e+00 : f32
    %539 = vector.shape_cast %24 : vector<1x256xi1> to vector<1x256xi1>
    %540 = vector.broadcast %539 : vector<1x256xi1> to vector<8x256xi1>
    %541 = vector.broadcast %cst_349 : f32 to vector<8x256xf32>
    %542 = arith.select %540, %538, %541 : vector<8x256xi1>, vector<8x256xf32>
    %543 = tpu.concatenate %514, %515, %520, %525, %526, %531, %536, %537, %542, %30 in 0 : vector<8x256xf32>, vector<8x256xf32>, vector<8x256xf32>, vector<8x256xf32>, vector<8x256xf32>, vector<8x256xf32>, vector<8x256xf32>, vector<8x256xf32>, vector<8x256xf32>, vector<8x256xf32> -> vector<80x256xf32>
    %544 = tpu.concatenate %509, %543 in 1 : vector<80x256xf32>, vector<80x256xf32> -> vector<80x512xf32>
    %c5 = arith.constant 5 : index
    %c0_350 = arith.constant 0 : index
    %c0_351 = arith.constant 0 : index
    %545 = vector.load %arg2[%c5, %c0_350, %c0_351] : memref<10x8x80xbf16, #tpu.memory_space<vmem>>, vector<1x8x80xbf16>
    %546 = vector.shape_cast %545 : vector<1x8x80xbf16> to vector<8x80xbf16>
    %547 = arith.truncf %544 : vector<80x512xf32> to vector<80x512xbf16>
    %cst_352 = arith.constant dense<0.000000e+00> : vector<8x512xf32>
    %548 = tpu.matmul %546, %547, %cst_352 {dimension_numbers = #tpu.dot_dimension_numbers<[1], [0], [0], [1], [0, 0, 1, 1], [], []>} : vector<8x80xbf16>, vector<80x512xbf16>, vector<8x512xf32> -> vector<8x512xf32>
    %549 = arith.addf %548, %471 : vector<8x512xf32>
    %cst_353 = arith.constant 0.000000e+00 : f32
    %550 = vector.broadcast %cst_353 : f32 to vector<8x512xf32>
    %551 = arith.maximumf %549, %550 : vector<8x512xf32>
    %552 = vector.extract_strided_slice %551 {offsets = [0, 0], sizes = [8, 256], strides = [1, 1]} : vector<8x512xf32> to vector<8x256xf32>
    %c0_354 = arith.constant 0 : index
    %c128_355 = arith.constant 128 : index
    %553 = vector.load %arg8[%c0_354, %c128_355] : memref<8x896xf32, #tpu.memory_space<vmem>>, vector<8x256xf32>
    tpu.vector_store %arg8[%c0_354, %c128_355], %552 {strides = array<i32>} : memref<8x896xf32, #tpu.memory_space<vmem>>, vector<8x256xf32>,
    %554 = vector.extract_strided_slice %551 {offsets = [0, 256], sizes = [8, 256], strides = [1, 1]} : vector<8x512xf32> to vector<8x256xf32>
    %c0_356 = arith.constant 0 : index
    %c512_357 = arith.constant 512 : index
    %555 = vector.load %arg8[%c0_356, %c512_357] : memref<8x896xf32, #tpu.memory_space<vmem>>, vector<8x256xf32>
    tpu.vector_store %arg8[%c0_356, %c512_357], %554 {strides = array<i32>} : memref<8x896xf32, #tpu.memory_space<vmem>>, vector<8x256xf32>,
    %c0_358 = arith.constant 0 : index
    %c111_359 = arith.constant 111 : index
    %556 = vector.load %arg8[%c0_358, %c111_359] : memref<8x896xf32, #tpu.memory_space<vmem>>, vector<8x256xf32>
    %cst_360 = arith.constant 0.000000e+00 : f32
    %557 = vector.shape_cast %22 : vector<1x256xi1> to vector<1x256xi1>
    %558 = vector.broadcast %557 : vector<1x256xi1> to vector<8x256xi1>
    %559 = vector.broadcast %cst_360 : f32 to vector<8x256xf32>
    %560 = arith.select %558, %556, %559 : vector<8x256xi1>, vector<8x256xf32>
    %c0_361 = arith.constant 0 : index
    %c112_362 = arith.constant 112 : index
    %561 = vector.load %arg8[%c0_361, %c112_362] : memref<8x896xf32, #tpu.memory_space<vmem>>, vector<8x256xf32>
    %c0_363 = arith.constant 0 : index
    %c113_364 = arith.constant 113 : index
    %562 = vector.load %arg8[%c0_363, %c113_364] : memref<8x896xf32, #tpu.memory_space<vmem>>, vector<8x256xf32>
    %cst_365 = arith.constant 0.000000e+00 : f32
    %563 = vector.shape_cast %24 : vector<1x256xi1> to vector<1x256xi1>
    %564 = vector.broadcast %563 : vector<1x256xi1> to vector<8x256xi1>
    %565 = vector.broadcast %cst_365 : f32 to vector<8x256xf32>
    %566 = arith.select %564, %562, %565 : vector<8x256xi1>, vector<8x256xf32>
    %c0_366 = arith.constant 0 : index
    %c127_367 = arith.constant 127 : index
    %567 = vector.load %arg8[%c0_366, %c127_367] : memref<8x896xf32, #tpu.memory_space<vmem>>, vector<8x256xf32>
    %cst_368 = arith.constant 0.000000e+00 : f32
    %568 = vector.shape_cast %22 : vector<1x256xi1> to vector<1x256xi1>
    %569 = vector.broadcast %568 : vector<1x256xi1> to vector<8x256xi1>
    %570 = vector.broadcast %cst_368 : f32 to vector<8x256xf32>
    %571 = arith.select %569, %567, %570 : vector<8x256xi1>, vector<8x256xf32>
    %c0_369 = arith.constant 0 : index
    %c128_370 = arith.constant 128 : index
    %572 = vector.load %arg8[%c0_369, %c128_370] : memref<8x896xf32, #tpu.memory_space<vmem>>, vector<8x256xf32>
    %c0_371 = arith.constant 0 : index
    %c129_372 = arith.constant 129 : index
    %573 = vector.load %arg8[%c0_371, %c129_372] : memref<8x896xf32, #tpu.memory_space<vmem>>, vector<8x256xf32>
    %cst_373 = arith.constant 0.000000e+00 : f32
    %574 = vector.shape_cast %24 : vector<1x256xi1> to vector<1x256xi1>
    %575 = vector.broadcast %574 : vector<1x256xi1> to vector<8x256xi1>
    %576 = vector.broadcast %cst_373 : f32 to vector<8x256xf32>
    %577 = arith.select %575, %573, %576 : vector<8x256xi1>, vector<8x256xf32>
    %c0_374 = arith.constant 0 : index
    %c143_375 = arith.constant 143 : index
    %578 = vector.load %arg8[%c0_374, %c143_375] : memref<8x896xf32, #tpu.memory_space<vmem>>, vector<8x256xf32>
    %cst_376 = arith.constant 0.000000e+00 : f32
    %579 = vector.shape_cast %22 : vector<1x256xi1> to vector<1x256xi1>
    %580 = vector.broadcast %579 : vector<1x256xi1> to vector<8x256xi1>
    %581 = vector.broadcast %cst_376 : f32 to vector<8x256xf32>
    %582 = arith.select %580, %578, %581 : vector<8x256xi1>, vector<8x256xf32>
    %c0_377 = arith.constant 0 : index
    %c144_378 = arith.constant 144 : index
    %583 = vector.load %arg8[%c0_377, %c144_378] : memref<8x896xf32, #tpu.memory_space<vmem>>, vector<8x256xf32>
    %c0_379 = arith.constant 0 : index
    %c145_380 = arith.constant 145 : index
    %584 = vector.load %arg8[%c0_379, %c145_380] : memref<8x896xf32, #tpu.memory_space<vmem>>, vector<8x256xf32>
    %cst_381 = arith.constant 0.000000e+00 : f32
    %585 = vector.shape_cast %24 : vector<1x256xi1> to vector<1x256xi1>
    %586 = vector.broadcast %585 : vector<1x256xi1> to vector<8x256xi1>
    %587 = vector.broadcast %cst_381 : f32 to vector<8x256xf32>
    %588 = arith.select %586, %584, %587 : vector<8x256xi1>, vector<8x256xf32>
    %589 = tpu.concatenate %560, %561, %566, %571, %572, %577, %582, %583, %588, %30 in 0 : vector<8x256xf32>, vector<8x256xf32>, vector<8x256xf32>, vector<8x256xf32>, vector<8x256xf32>, vector<8x256xf32>, vector<8x256xf32>, vector<8x256xf32>, vector<8x256xf32>, vector<8x256xf32> -> vector<80x256xf32>
    %c0_382 = arith.constant 0 : index
    %c495_383 = arith.constant 495 : index
    %590 = vector.load %arg8[%c0_382, %c495_383] : memref<8x896xf32, #tpu.memory_space<vmem>>, vector<8x256xf32>
    %cst_384 = arith.constant 0.000000e+00 : f32
    %591 = vector.shape_cast %22 : vector<1x256xi1> to vector<1x256xi1>
    %592 = vector.broadcast %591 : vector<1x256xi1> to vector<8x256xi1>
    %593 = vector.broadcast %cst_384 : f32 to vector<8x256xf32>
    %594 = arith.select %592, %590, %593 : vector<8x256xi1>, vector<8x256xf32>
    %c0_385 = arith.constant 0 : index
    %c496_386 = arith.constant 496 : index
    %595 = vector.load %arg8[%c0_385, %c496_386] : memref<8x896xf32, #tpu.memory_space<vmem>>, vector<8x256xf32>
    %c0_387 = arith.constant 0 : index
    %c497_388 = arith.constant 497 : index
    %596 = vector.load %arg8[%c0_387, %c497_388] : memref<8x896xf32, #tpu.memory_space<vmem>>, vector<8x256xf32>
    %cst_389 = arith.constant 0.000000e+00 : f32
    %597 = vector.shape_cast %24 : vector<1x256xi1> to vector<1x256xi1>
    %598 = vector.broadcast %597 : vector<1x256xi1> to vector<8x256xi1>
    %599 = vector.broadcast %cst_389 : f32 to vector<8x256xf32>
    %600 = arith.select %598, %596, %599 : vector<8x256xi1>, vector<8x256xf32>
    %c0_390 = arith.constant 0 : index
    %c511_391 = arith.constant 511 : index
    %601 = vector.load %arg8[%c0_390, %c511_391] : memref<8x896xf32, #tpu.memory_space<vmem>>, vector<8x256xf32>
    %cst_392 = arith.constant 0.000000e+00 : f32
    %602 = vector.shape_cast %22 : vector<1x256xi1> to vector<1x256xi1>
    %603 = vector.broadcast %602 : vector<1x256xi1> to vector<8x256xi1>
    %604 = vector.broadcast %cst_392 : f32 to vector<8x256xf32>
    %605 = arith.select %603, %601, %604 : vector<8x256xi1>, vector<8x256xf32>
    %c0_393 = arith.constant 0 : index
    %c512_394 = arith.constant 512 : index
    %606 = vector.load %arg8[%c0_393, %c512_394] : memref<8x896xf32, #tpu.memory_space<vmem>>, vector<8x256xf32>
    %c0_395 = arith.constant 0 : index
    %c513_396 = arith.constant 513 : index
    %607 = vector.load %arg8[%c0_395, %c513_396] : memref<8x896xf32, #tpu.memory_space<vmem>>, vector<8x256xf32>
    %cst_397 = arith.constant 0.000000e+00 : f32
    %608 = vector.shape_cast %24 : vector<1x256xi1> to vector<1x256xi1>
    %609 = vector.broadcast %608 : vector<1x256xi1> to vector<8x256xi1>
    %610 = vector.broadcast %cst_397 : f32 to vector<8x256xf32>
    %611 = arith.select %609, %607, %610 : vector<8x256xi1>, vector<8x256xf32>
    %c0_398 = arith.constant 0 : index
    %c527_399 = arith.constant 527 : index
    %612 = vector.load %arg8[%c0_398, %c527_399] : memref<8x896xf32, #tpu.memory_space<vmem>>, vector<8x256xf32>
    %cst_400 = arith.constant 0.000000e+00 : f32
    %613 = vector.shape_cast %22 : vector<1x256xi1> to vector<1x256xi1>
    %614 = vector.broadcast %613 : vector<1x256xi1> to vector<8x256xi1>
    %615 = vector.broadcast %cst_400 : f32 to vector<8x256xf32>
    %616 = arith.select %614, %612, %615 : vector<8x256xi1>, vector<8x256xf32>
    %c0_401 = arith.constant 0 : index
    %c528_402 = arith.constant 528 : index
    %617 = vector.load %arg8[%c0_401, %c528_402] : memref<8x896xf32, #tpu.memory_space<vmem>>, vector<8x256xf32>
    %c0_403 = arith.constant 0 : index
    %c529_404 = arith.constant 529 : index
    %618 = vector.load %arg8[%c0_403, %c529_404] : memref<8x896xf32, #tpu.memory_space<vmem>>, vector<8x256xf32>
    %cst_405 = arith.constant 0.000000e+00 : f32
    %619 = vector.shape_cast %24 : vector<1x256xi1> to vector<1x256xi1>
    %620 = vector.broadcast %619 : vector<1x256xi1> to vector<8x256xi1>
    %621 = vector.broadcast %cst_405 : f32 to vector<8x256xf32>
    %622 = arith.select %620, %618, %621 : vector<8x256xi1>, vector<8x256xf32>
    %623 = tpu.concatenate %594, %595, %600, %605, %606, %611, %616, %617, %622, %30 in 0 : vector<8x256xf32>, vector<8x256xf32>, vector<8x256xf32>, vector<8x256xf32>, vector<8x256xf32>, vector<8x256xf32>, vector<8x256xf32>, vector<8x256xf32>, vector<8x256xf32>, vector<8x256xf32> -> vector<80x256xf32>
    %624 = tpu.concatenate %589, %623 in 1 : vector<80x256xf32>, vector<80x256xf32> -> vector<80x512xf32>
    %c6 = arith.constant 6 : index
    %c0_406 = arith.constant 0 : index
    %c0_407 = arith.constant 0 : index
    %625 = vector.load %arg2[%c6, %c0_406, %c0_407] : memref<10x8x80xbf16, #tpu.memory_space<vmem>>, vector<1x8x80xbf16>
    %626 = vector.shape_cast %625 : vector<1x8x80xbf16> to vector<8x80xbf16>
    %627 = arith.truncf %624 : vector<80x512xf32> to vector<80x512xbf16>
    %cst_408 = arith.constant dense<0.000000e+00> : vector<8x512xf32>
    %628 = tpu.matmul %626, %627, %cst_408 {dimension_numbers = #tpu.dot_dimension_numbers<[1], [0], [0], [1], [0, 0, 1, 1], [], []>} : vector<8x80xbf16>, vector<80x512xbf16>, vector<8x512xf32> -> vector<8x512xf32>
    %cst_409 = arith.constant 0.000000e+00 : f32
    %629 = vector.broadcast %cst_409 : f32 to vector<8x512xf32>
    %630 = arith.maximumf %628, %629 : vector<8x512xf32>
    %631 = vector.extract_strided_slice %630 {offsets = [0, 0], sizes = [8, 256], strides = [1, 1]} : vector<8x512xf32> to vector<8x256xf32>
    %c0_410 = arith.constant 0 : index
    %c128_411 = arith.constant 128 : index
    %632 = vector.load %arg8[%c0_410, %c128_411] : memref<8x896xf32, #tpu.memory_space<vmem>>, vector<8x256xf32>
    tpu.vector_store %arg8[%c0_410, %c128_411], %631 {strides = array<i32>} : memref<8x896xf32, #tpu.memory_space<vmem>>, vector<8x256xf32>,
    %633 = vector.extract_strided_slice %630 {offsets = [0, 256], sizes = [8, 256], strides = [1, 1]} : vector<8x512xf32> to vector<8x256xf32>
    %c0_412 = arith.constant 0 : index
    %c512_413 = arith.constant 512 : index
    %634 = vector.load %arg8[%c0_412, %c512_413] : memref<8x896xf32, #tpu.memory_space<vmem>>, vector<8x256xf32>
    tpu.vector_store %arg8[%c0_412, %c512_413], %633 {strides = array<i32>} : memref<8x896xf32, #tpu.memory_space<vmem>>, vector<8x256xf32>,
    %c0_414 = arith.constant 0 : index
    %c111_415 = arith.constant 111 : index
    %635 = vector.load %arg8[%c0_414, %c111_415] : memref<8x896xf32, #tpu.memory_space<vmem>>, vector<8x256xf32>
    %cst_416 = arith.constant 0.000000e+00 : f32
    %636 = vector.shape_cast %22 : vector<1x256xi1> to vector<1x256xi1>
    %637 = vector.broadcast %636 : vector<1x256xi1> to vector<8x256xi1>
    %638 = vector.broadcast %cst_416 : f32 to vector<8x256xf32>
    %639 = arith.select %637, %635, %638 : vector<8x256xi1>, vector<8x256xf32>
    %c0_417 = arith.constant 0 : index
    %c112_418 = arith.constant 112 : index
    %640 = vector.load %arg8[%c0_417, %c112_418] : memref<8x896xf32, #tpu.memory_space<vmem>>, vector<8x256xf32>
    %c0_419 = arith.constant 0 : index
    %c113_420 = arith.constant 113 : index
    %641 = vector.load %arg8[%c0_419, %c113_420] : memref<8x896xf32, #tpu.memory_space<vmem>>, vector<8x256xf32>
    %cst_421 = arith.constant 0.000000e+00 : f32
    %642 = vector.shape_cast %24 : vector<1x256xi1> to vector<1x256xi1>
    %643 = vector.broadcast %642 : vector<1x256xi1> to vector<8x256xi1>
    %644 = vector.broadcast %cst_421 : f32 to vector<8x256xf32>
    %645 = arith.select %643, %641, %644 : vector<8x256xi1>, vector<8x256xf32>
    %c0_422 = arith.constant 0 : index
    %c127_423 = arith.constant 127 : index
    %646 = vector.load %arg8[%c0_422, %c127_423] : memref<8x896xf32, #tpu.memory_space<vmem>>, vector<8x256xf32>
    %cst_424 = arith.constant 0.000000e+00 : f32
    %647 = vector.shape_cast %22 : vector<1x256xi1> to vector<1x256xi1>
    %648 = vector.broadcast %647 : vector<1x256xi1> to vector<8x256xi1>
    %649 = vector.broadcast %cst_424 : f32 to vector<8x256xf32>
    %650 = arith.select %648, %646, %649 : vector<8x256xi1>, vector<8x256xf32>
    %c0_425 = arith.constant 0 : index
    %c128_426 = arith.constant 128 : index
    %651 = vector.load %arg8[%c0_425, %c128_426] : memref<8x896xf32, #tpu.memory_space<vmem>>, vector<8x256xf32>
    %c0_427 = arith.constant 0 : index
    %c129_428 = arith.constant 129 : index
    %652 = vector.load %arg8[%c0_427, %c129_428] : memref<8x896xf32, #tpu.memory_space<vmem>>, vector<8x256xf32>
    %cst_429 = arith.constant 0.000000e+00 : f32
    %653 = vector.shape_cast %24 : vector<1x256xi1> to vector<1x256xi1>
    %654 = vector.broadcast %653 : vector<1x256xi1> to vector<8x256xi1>
    %655 = vector.broadcast %cst_429 : f32 to vector<8x256xf32>
    %656 = arith.select %654, %652, %655 : vector<8x256xi1>, vector<8x256xf32>
    %c0_430 = arith.constant 0 : index
    %c143_431 = arith.constant 143 : index
    %657 = vector.load %arg8[%c0_430, %c143_431] : memref<8x896xf32, #tpu.memory_space<vmem>>, vector<8x256xf32>
    %cst_432 = arith.constant 0.000000e+00 : f32
    %658 = vector.shape_cast %22 : vector<1x256xi1> to vector<1x256xi1>
    %659 = vector.broadcast %658 : vector<1x256xi1> to vector<8x256xi1>
    %660 = vector.broadcast %cst_432 : f32 to vector<8x256xf32>
    %661 = arith.select %659, %657, %660 : vector<8x256xi1>, vector<8x256xf32>
    %c0_433 = arith.constant 0 : index
    %c144_434 = arith.constant 144 : index
    %662 = vector.load %arg8[%c0_433, %c144_434] : memref<8x896xf32, #tpu.memory_space<vmem>>, vector<8x256xf32>
    %c0_435 = arith.constant 0 : index
    %c145_436 = arith.constant 145 : index
    %663 = vector.load %arg8[%c0_435, %c145_436] : memref<8x896xf32, #tpu.memory_space<vmem>>, vector<8x256xf32>
    %cst_437 = arith.constant 0.000000e+00 : f32
    %664 = vector.shape_cast %24 : vector<1x256xi1> to vector<1x256xi1>
    %665 = vector.broadcast %664 : vector<1x256xi1> to vector<8x256xi1>
    %666 = vector.broadcast %cst_437 : f32 to vector<8x256xf32>
    %667 = arith.select %665, %663, %666 : vector<8x256xi1>, vector<8x256xf32>
    %668 = tpu.concatenate %639, %640, %645, %650, %651, %656, %661, %662, %667, %30 in 0 : vector<8x256xf32>, vector<8x256xf32>, vector<8x256xf32>, vector<8x256xf32>, vector<8x256xf32>, vector<8x256xf32>, vector<8x256xf32>, vector<8x256xf32>, vector<8x256xf32>, vector<8x256xf32> -> vector<80x256xf32>
    %c0_438 = arith.constant 0 : index
    %c495_439 = arith.constant 495 : index
    %669 = vector.load %arg8[%c0_438, %c495_439] : memref<8x896xf32, #tpu.memory_space<vmem>>, vector<8x256xf32>
    %cst_440 = arith.constant 0.000000e+00 : f32
    %670 = vector.shape_cast %22 : vector<1x256xi1> to vector<1x256xi1>
    %671 = vector.broadcast %670 : vector<1x256xi1> to vector<8x256xi1>
    %672 = vector.broadcast %cst_440 : f32 to vector<8x256xf32>
    %673 = arith.select %671, %669, %672 : vector<8x256xi1>, vector<8x256xf32>
    %c0_441 = arith.constant 0 : index
    %c496_442 = arith.constant 496 : index
    %674 = vector.load %arg8[%c0_441, %c496_442] : memref<8x896xf32, #tpu.memory_space<vmem>>, vector<8x256xf32>
    %c0_443 = arith.constant 0 : index
    %c497_444 = arith.constant 497 : index
    %675 = vector.load %arg8[%c0_443, %c497_444] : memref<8x896xf32, #tpu.memory_space<vmem>>, vector<8x256xf32>
    %cst_445 = arith.constant 0.000000e+00 : f32
    %676 = vector.shape_cast %24 : vector<1x256xi1> to vector<1x256xi1>
    %677 = vector.broadcast %676 : vector<1x256xi1> to vector<8x256xi1>
    %678 = vector.broadcast %cst_445 : f32 to vector<8x256xf32>
    %679 = arith.select %677, %675, %678 : vector<8x256xi1>, vector<8x256xf32>
    %c0_446 = arith.constant 0 : index
    %c511_447 = arith.constant 511 : index
    %680 = vector.load %arg8[%c0_446, %c511_447] : memref<8x896xf32, #tpu.memory_space<vmem>>, vector<8x256xf32>
    %cst_448 = arith.constant 0.000000e+00 : f32
    %681 = vector.shape_cast %22 : vector<1x256xi1> to vector<1x256xi1>
    %682 = vector.broadcast %681 : vector<1x256xi1> to vector<8x256xi1>
    %683 = vector.broadcast %cst_448 : f32 to vector<8x256xf32>
    %684 = arith.select %682, %680, %683 : vector<8x256xi1>, vector<8x256xf32>
    %c0_449 = arith.constant 0 : index
    %c512_450 = arith.constant 512 : index
    %685 = vector.load %arg8[%c0_449, %c512_450] : memref<8x896xf32, #tpu.memory_space<vmem>>, vector<8x256xf32>
    %c0_451 = arith.constant 0 : index
    %c513_452 = arith.constant 513 : index
    %686 = vector.load %arg8[%c0_451, %c513_452] : memref<8x896xf32, #tpu.memory_space<vmem>>, vector<8x256xf32>
    %cst_453 = arith.constant 0.000000e+00 : f32
    %687 = vector.shape_cast %24 : vector<1x256xi1> to vector<1x256xi1>
    %688 = vector.broadcast %687 : vector<1x256xi1> to vector<8x256xi1>
    %689 = vector.broadcast %cst_453 : f32 to vector<8x256xf32>
    %690 = arith.select %688, %686, %689 : vector<8x256xi1>, vector<8x256xf32>
    %c0_454 = arith.constant 0 : index
    %c527_455 = arith.constant 527 : index
    %691 = vector.load %arg8[%c0_454, %c527_455] : memref<8x896xf32, #tpu.memory_space<vmem>>, vector<8x256xf32>
    %cst_456 = arith.constant 0.000000e+00 : f32
    %692 = vector.shape_cast %22 : vector<1x256xi1> to vector<1x256xi1>
    %693 = vector.broadcast %692 : vector<1x256xi1> to vector<8x256xi1>
    %694 = vector.broadcast %cst_456 : f32 to vector<8x256xf32>
    %695 = arith.select %693, %691, %694 : vector<8x256xi1>, vector<8x256xf32>
    %c0_457 = arith.constant 0 : index
    %c528_458 = arith.constant 528 : index
    %696 = vector.load %arg8[%c0_457, %c528_458] : memref<8x896xf32, #tpu.memory_space<vmem>>, vector<8x256xf32>
    %c0_459 = arith.constant 0 : index
    %c529_460 = arith.constant 529 : index
    %697 = vector.load %arg8[%c0_459, %c529_460] : memref<8x896xf32, #tpu.memory_space<vmem>>, vector<8x256xf32>
    %cst_461 = arith.constant 0.000000e+00 : f32
    %698 = vector.shape_cast %24 : vector<1x256xi1> to vector<1x256xi1>
    %699 = vector.broadcast %698 : vector<1x256xi1> to vector<8x256xi1>
    %700 = vector.broadcast %cst_461 : f32 to vector<8x256xf32>
    %701 = arith.select %699, %697, %700 : vector<8x256xi1>, vector<8x256xf32>
    %702 = tpu.concatenate %673, %674, %679, %684, %685, %690, %695, %696, %701, %30 in 0 : vector<8x256xf32>, vector<8x256xf32>, vector<8x256xf32>, vector<8x256xf32>, vector<8x256xf32>, vector<8x256xf32>, vector<8x256xf32>, vector<8x256xf32>, vector<8x256xf32>, vector<8x256xf32> -> vector<80x256xf32>
    %703 = tpu.concatenate %668, %702 in 1 : vector<80x256xf32>, vector<80x256xf32> -> vector<80x512xf32>
    %c7 = arith.constant 7 : index
    %c0_462 = arith.constant 0 : index
    %c0_463 = arith.constant 0 : index
    %704 = vector.load %arg2[%c7, %c0_462, %c0_463] : memref<10x8x80xbf16, #tpu.memory_space<vmem>>, vector<1x8x80xbf16>
    %705 = vector.shape_cast %704 : vector<1x8x80xbf16> to vector<8x80xbf16>
    %706 = arith.truncf %703 : vector<80x512xf32> to vector<80x512xbf16>
    %cst_464 = arith.constant dense<0.000000e+00> : vector<8x512xf32>
    %707 = tpu.matmul %705, %706, %cst_464 {dimension_numbers = #tpu.dot_dimension_numbers<[1], [0], [0], [1], [0, 0, 1, 1], [], []>} : vector<8x80xbf16>, vector<80x512xbf16>, vector<8x512xf32> -> vector<8x512xf32>
    %708 = arith.addf %707, %551 : vector<8x512xf32>
    %cst_465 = arith.constant 0.000000e+00 : f32
    %709 = vector.broadcast %cst_465 : f32 to vector<8x512xf32>
    %710 = arith.maximumf %708, %709 : vector<8x512xf32>
    %c0_466 = arith.constant 0 : index
    %c0_467 = arith.constant 0 : index
    %711 = vector.load %arg6[%c0_466, %c0_467] : memref<256x64xbf16, #tpu.memory_space<vmem>>, vector<256x64xbf16>
    %712 = vector.extract_strided_slice %551 {offsets = [0, 0], sizes = [8, 256], strides = [1, 1]} : vector<8x512xf32> to vector<8x256xf32>
    %c0_468 = arith.constant 0 : index
    %c128_469 = arith.constant 128 : index
    %713 = vector.load %arg8[%c0_468, %c128_469] : memref<8x896xf32, #tpu.memory_space<vmem>>, vector<8x256xf32>
    tpu.vector_store %arg8[%c0_468, %c128_469], %712 {strides = array<i32>} : memref<8x896xf32, #tpu.memory_space<vmem>>, vector<8x256xf32>,
    %714 = vector.extract_strided_slice %551 {offsets = [0, 256], sizes = [8, 256], strides = [1, 1]} : vector<8x512xf32> to vector<8x256xf32>
    %c0_470 = arith.constant 0 : index
    %c512_471 = arith.constant 512 : index
    %715 = vector.load %arg8[%c0_470, %c512_471] : memref<8x896xf32, #tpu.memory_space<vmem>>, vector<8x256xf32>
    tpu.vector_store %arg8[%c0_470, %c512_471], %714 {strides = array<i32>} : memref<8x896xf32, #tpu.memory_space<vmem>>, vector<8x256xf32>,
    %716 = vector.extract_strided_slice %551 {offsets = [0, 0], sizes = [8, 256], strides = [1, 1]} : vector<8x512xf32> to vector<8x256xf32>
    %c0_472 = arith.constant 0 : index
    %c111_473 = arith.constant 111 : index
    %717 = vector.load %arg8[%c0_472, %c111_473] : memref<8x896xf32, #tpu.memory_space<vmem>>, vector<8x256xf32>
    %cst_474 = arith.constant 0.000000e+00 : f32
    %718 = vector.shape_cast %22 : vector<1x256xi1> to vector<1x256xi1>
    %719 = vector.broadcast %718 : vector<1x256xi1> to vector<8x256xi1>
    %720 = vector.broadcast %cst_474 : f32 to vector<8x256xf32>
    %721 = arith.select %719, %717, %720 : vector<8x256xi1>, vector<8x256xf32>
    %722 = arith.maximumf %716, %721 : vector<8x256xf32>
    %c0_475 = arith.constant 0 : index
    %c112_476 = arith.constant 112 : index
    %723 = vector.load %arg8[%c0_475, %c112_476] : memref<8x896xf32, #tpu.memory_space<vmem>>, vector<8x256xf32>
    %724 = arith.maximumf %722, %723 : vector<8x256xf32>
    %c0_477 = arith.constant 0 : index
    %c113_478 = arith.constant 113 : index
    %725 = vector.load %arg8[%c0_477, %c113_478] : memref<8x896xf32, #tpu.memory_space<vmem>>, vector<8x256xf32>
    %cst_479 = arith.constant 0.000000e+00 : f32
    %726 = vector.shape_cast %24 : vector<1x256xi1> to vector<1x256xi1>
    %727 = vector.broadcast %726 : vector<1x256xi1> to vector<8x256xi1>
    %728 = vector.broadcast %cst_479 : f32 to vector<8x256xf32>
    %729 = arith.select %727, %725, %728 : vector<8x256xi1>, vector<8x256xf32>
    %730 = arith.maximumf %724, %729 : vector<8x256xf32>
    %c0_480 = arith.constant 0 : index
    %c127_481 = arith.constant 127 : index
    %731 = vector.load %arg8[%c0_480, %c127_481] : memref<8x896xf32, #tpu.memory_space<vmem>>, vector<8x256xf32>
    %cst_482 = arith.constant 0.000000e+00 : f32
    %732 = vector.shape_cast %22 : vector<1x256xi1> to vector<1x256xi1>
    %733 = vector.broadcast %732 : vector<1x256xi1> to vector<8x256xi1>
    %734 = vector.broadcast %cst_482 : f32 to vector<8x256xf32>
    %735 = arith.select %733, %731, %734 : vector<8x256xi1>, vector<8x256xf32>
    %736 = arith.maximumf %730, %735 : vector<8x256xf32>
    %c0_483 = arith.constant 0 : index
    %c129_484 = arith.constant 129 : index
    %737 = vector.load %arg8[%c0_483, %c129_484] : memref<8x896xf32, #tpu.memory_space<vmem>>, vector<8x256xf32>
    %cst_485 = arith.constant 0.000000e+00 : f32
    %738 = vector.shape_cast %24 : vector<1x256xi1> to vector<1x256xi1>
    %739 = vector.broadcast %738 : vector<1x256xi1> to vector<8x256xi1>
    %740 = vector.broadcast %cst_485 : f32 to vector<8x256xf32>
    %741 = arith.select %739, %737, %740 : vector<8x256xi1>, vector<8x256xf32>
    %742 = arith.maximumf %736, %741 : vector<8x256xf32>
    %c0_486 = arith.constant 0 : index
    %c143_487 = arith.constant 143 : index
    %743 = vector.load %arg8[%c0_486, %c143_487] : memref<8x896xf32, #tpu.memory_space<vmem>>, vector<8x256xf32>
    %cst_488 = arith.constant 0.000000e+00 : f32
    %744 = vector.shape_cast %22 : vector<1x256xi1> to vector<1x256xi1>
    %745 = vector.broadcast %744 : vector<1x256xi1> to vector<8x256xi1>
    %746 = vector.broadcast %cst_488 : f32 to vector<8x256xf32>
    %747 = arith.select %745, %743, %746 : vector<8x256xi1>, vector<8x256xf32>
    %748 = arith.maximumf %742, %747 : vector<8x256xf32>
    %c0_489 = arith.constant 0 : index
    %c144_490 = arith.constant 144 : index
    %749 = vector.load %arg8[%c0_489, %c144_490] : memref<8x896xf32, #tpu.memory_space<vmem>>, vector<8x256xf32>
    %750 = arith.maximumf %748, %749 : vector<8x256xf32>
    %c0_491 = arith.constant 0 : index
    %c145_492 = arith.constant 145 : index
    %751 = vector.load %arg8[%c0_491, %c145_492] : memref<8x896xf32, #tpu.memory_space<vmem>>, vector<8x256xf32>
    %cst_493 = arith.constant 0.000000e+00 : f32
    %752 = vector.shape_cast %24 : vector<1x256xi1> to vector<1x256xi1>
    %753 = vector.broadcast %752 : vector<1x256xi1> to vector<8x256xi1>
    %754 = vector.broadcast %cst_493 : f32 to vector<8x256xf32>
    %755 = arith.select %753, %751, %754 : vector<8x256xi1>, vector<8x256xf32>
    %756 = arith.maximumf %750, %755 : vector<8x256xf32>
    %757 = arith.truncf %756 : vector<8x256xf32> to vector<8x256xbf16>
    %cst_494 = arith.constant dense<0.000000e+00> : vector<8x64xf32>
    %758 = tpu.matmul %757, %711, %cst_494 {dimension_numbers = #tpu.dot_dimension_numbers<[1], [0], [0], [1], [0, 0, 1, 1], [], []>} : vector<8x256xbf16>, vector<256x64xbf16>, vector<8x64xf32> -> vector<8x64xf32>
    %759 = vector.extract_strided_slice %551 {offsets = [0, 256], sizes = [8, 256], strides = [1, 1]} : vector<8x512xf32> to vector<8x256xf32>
    %c0_495 = arith.constant 0 : index
    %c495_496 = arith.constant 495 : index
    %760 = vector.load %arg8[%c0_495, %c495_496] : memref<8x896xf32, #tpu.memory_space<vmem>>, vector<8x256xf32>
    %cst_497 = arith.constant 0.000000e+00 : f32
    %761 = vector.shape_cast %22 : vector<1x256xi1> to vector<1x256xi1>
    %762 = vector.broadcast %761 : vector<1x256xi1> to vector<8x256xi1>
    %763 = vector.broadcast %cst_497 : f32 to vector<8x256xf32>
    %764 = arith.select %762, %760, %763 : vector<8x256xi1>, vector<8x256xf32>
    %765 = arith.maximumf %759, %764 : vector<8x256xf32>
    %c0_498 = arith.constant 0 : index
    %c496_499 = arith.constant 496 : index
    %766 = vector.load %arg8[%c0_498, %c496_499] : memref<8x896xf32, #tpu.memory_space<vmem>>, vector<8x256xf32>
    %767 = arith.maximumf %765, %766 : vector<8x256xf32>
    %c0_500 = arith.constant 0 : index
    %c497_501 = arith.constant 497 : index
    %768 = vector.load %arg8[%c0_500, %c497_501] : memref<8x896xf32, #tpu.memory_space<vmem>>, vector<8x256xf32>
    %cst_502 = arith.constant 0.000000e+00 : f32
    %769 = vector.shape_cast %24 : vector<1x256xi1> to vector<1x256xi1>
    %770 = vector.broadcast %769 : vector<1x256xi1> to vector<8x256xi1>
    %771 = vector.broadcast %cst_502 : f32 to vector<8x256xf32>
    %772 = arith.select %770, %768, %771 : vector<8x256xi1>, vector<8x256xf32>
    %773 = arith.maximumf %767, %772 : vector<8x256xf32>
    %c0_503 = arith.constant 0 : index
    %c511_504 = arith.constant 511 : index
    %774 = vector.load %arg8[%c0_503, %c511_504] : memref<8x896xf32, #tpu.memory_space<vmem>>, vector<8x256xf32>
    %cst_505 = arith.constant 0.000000e+00 : f32
    %775 = vector.shape_cast %22 : vector<1x256xi1> to vector<1x256xi1>
    %776 = vector.broadcast %775 : vector<1x256xi1> to vector<8x256xi1>
    %777 = vector.broadcast %cst_505 : f32 to vector<8x256xf32>
    %778 = arith.select %776, %774, %777 : vector<8x256xi1>, vector<8x256xf32>
    %779 = arith.maximumf %773, %778 : vector<8x256xf32>
    %c0_506 = arith.constant 0 : index
    %c513_507 = arith.constant 513 : index
    %780 = vector.load %arg8[%c0_506, %c513_507] : memref<8x896xf32, #tpu.memory_space<vmem>>, vector<8x256xf32>
    %cst_508 = arith.constant 0.000000e+00 : f32
    %781 = vector.shape_cast %24 : vector<1x256xi1> to vector<1x256xi1>
    %782 = vector.broadcast %781 : vector<1x256xi1> to vector<8x256xi1>
    %783 = vector.broadcast %cst_508 : f32 to vector<8x256xf32>
    %784 = arith.select %782, %780, %783 : vector<8x256xi1>, vector<8x256xf32>
    %785 = arith.maximumf %779, %784 : vector<8x256xf32>
    %c0_509 = arith.constant 0 : index
    %c527_510 = arith.constant 527 : index
    %786 = vector.load %arg8[%c0_509, %c527_510] : memref<8x896xf32, #tpu.memory_space<vmem>>, vector<8x256xf32>
    %cst_511 = arith.constant 0.000000e+00 : f32
    %787 = vector.shape_cast %22 : vector<1x256xi1> to vector<1x256xi1>
    %788 = vector.broadcast %787 : vector<1x256xi1> to vector<8x256xi1>
    %789 = vector.broadcast %cst_511 : f32 to vector<8x256xf32>
    %790 = arith.select %788, %786, %789 : vector<8x256xi1>, vector<8x256xf32>
    %791 = arith.maximumf %785, %790 : vector<8x256xf32>
    %c0_512 = arith.constant 0 : index
    %c528_513 = arith.constant 528 : index
    %792 = vector.load %arg8[%c0_512, %c528_513] : memref<8x896xf32, #tpu.memory_space<vmem>>, vector<8x256xf32>
    %793 = arith.maximumf %791, %792 : vector<8x256xf32>
    %c0_514 = arith.constant 0 : index
    %c529_515 = arith.constant 529 : index
    %794 = vector.load %arg8[%c0_514, %c529_515] : memref<8x896xf32, #tpu.memory_space<vmem>>, vector<8x256xf32>
    %cst_516 = arith.constant 0.000000e+00 : f32
    %795 = vector.shape_cast %24 : vector<1x256xi1> to vector<1x256xi1>
    %796 = vector.broadcast %795 : vector<1x256xi1> to vector<8x256xi1>
    %797 = vector.broadcast %cst_516 : f32 to vector<8x256xf32>
    %798 = arith.select %796, %794, %797 : vector<8x256xi1>, vector<8x256xf32>
    %799 = arith.maximumf %793, %798 : vector<8x256xf32>
    %800 = arith.truncf %799 : vector<8x256xf32> to vector<8x256xbf16>
    %cst_517 = arith.constant dense<0.000000e+00> : vector<8x64xf32>
    %801 = tpu.matmul %800, %711, %cst_517 {dimension_numbers = #tpu.dot_dimension_numbers<[1], [0], [0], [1], [0, 0, 1, 1], [], []>} : vector<8x256xbf16>, vector<256x64xbf16>, vector<8x64xf32> -> vector<8x64xf32>
    %802 = tpu.concatenate %758, %801 in 1 : vector<8x64xf32>, vector<8x64xf32> -> vector<8x128xf32>
    %803 = vector.extract_strided_slice %802 {offsets = [0, 0], sizes = [8, 64], strides = [1, 1]} : vector<8x128xf32> to vector<8x64xf32>
    %c0_518 = arith.constant 0 : index
    %c128_519 = arith.constant 128 : index
    %804 = vector.load %arg9[%c0_518, %c128_519] : memref<8x384xf32, #tpu.memory_space<vmem>>, vector<8x64xf32>
    tpu.vector_store %arg9[%c0_518, %c128_519], %803 {strides = array<i32>} : memref<8x384xf32, #tpu.memory_space<vmem>>, vector<8x64xf32>,
    %805 = vector.extract_strided_slice %802 {offsets = [0, 64], sizes = [8, 64], strides = [1, 1]} : vector<8x128xf32> to vector<8x64xf32>
    %c0_520 = arith.constant 0 : index
    %c256 = arith.constant 256 : index
    %806 = vector.load %arg9[%c0_520, %c256] : memref<8x384xf32, #tpu.memory_space<vmem>>, vector<8x64xf32>
    tpu.vector_store %arg9[%c0_520, %c256], %805 {strides = array<i32>} : memref<8x384xf32, #tpu.memory_space<vmem>>, vector<8x64xf32>,
    %c0_521 = arith.constant 0 : index
    %c119 = arith.constant 119 : index
    %807 = vector.load %arg9[%c0_521, %c119] : memref<8x384xf32, #tpu.memory_space<vmem>>, vector<8x64xf32>
    %cst_522 = arith.constant 0.000000e+00 : f32
    %808 = vector.shape_cast %49 : vector<1x64xi1> to vector<1x64xi1>
    %809 = vector.broadcast %808 : vector<1x64xi1> to vector<8x64xi1>
    %810 = vector.broadcast %cst_522 : f32 to vector<8x64xf32>
    %811 = arith.select %809, %807, %810 : vector<8x64xi1>, vector<8x64xf32>
    %c0_523 = arith.constant 0 : index
    %c120 = arith.constant 120 : index
    %812 = vector.load %arg9[%c0_523, %c120] : memref<8x384xf32, #tpu.memory_space<vmem>>, vector<8x64xf32>
    %c0_524 = arith.constant 0 : index
    %c121 = arith.constant 121 : index
    %813 = vector.load %arg9[%c0_524, %c121] : memref<8x384xf32, #tpu.memory_space<vmem>>, vector<8x64xf32>
    %cst_525 = arith.constant 0.000000e+00 : f32
    %814 = vector.shape_cast %51 : vector<1x64xi1> to vector<1x64xi1>
    %815 = vector.broadcast %814 : vector<1x64xi1> to vector<8x64xi1>
    %816 = vector.broadcast %cst_525 : f32 to vector<8x64xf32>
    %817 = arith.select %815, %813, %816 : vector<8x64xi1>, vector<8x64xf32>
    %c0_526 = arith.constant 0 : index
    %c127_527 = arith.constant 127 : index
    %818 = vector.load %arg9[%c0_526, %c127_527] : memref<8x384xf32, #tpu.memory_space<vmem>>, vector<8x64xf32>
    %cst_528 = arith.constant 0.000000e+00 : f32
    %819 = vector.shape_cast %49 : vector<1x64xi1> to vector<1x64xi1>
    %820 = vector.broadcast %819 : vector<1x64xi1> to vector<8x64xi1>
    %821 = vector.broadcast %cst_528 : f32 to vector<8x64xf32>
    %822 = arith.select %820, %818, %821 : vector<8x64xi1>, vector<8x64xf32>
    %c0_529 = arith.constant 0 : index
    %c128_530 = arith.constant 128 : index
    %823 = vector.load %arg9[%c0_529, %c128_530] : memref<8x384xf32, #tpu.memory_space<vmem>>, vector<8x64xf32>
    %c0_531 = arith.constant 0 : index
    %c129_532 = arith.constant 129 : index
    %824 = vector.load %arg9[%c0_531, %c129_532] : memref<8x384xf32, #tpu.memory_space<vmem>>, vector<8x64xf32>
    %cst_533 = arith.constant 0.000000e+00 : f32
    %825 = vector.shape_cast %51 : vector<1x64xi1> to vector<1x64xi1>
    %826 = vector.broadcast %825 : vector<1x64xi1> to vector<8x64xi1>
    %827 = vector.broadcast %cst_533 : f32 to vector<8x64xf32>
    %828 = arith.select %826, %824, %827 : vector<8x64xi1>, vector<8x64xf32>
    %c0_534 = arith.constant 0 : index
    %c135 = arith.constant 135 : index
    %829 = vector.load %arg9[%c0_534, %c135] : memref<8x384xf32, #tpu.memory_space<vmem>>, vector<8x64xf32>
    %cst_535 = arith.constant 0.000000e+00 : f32
    %830 = vector.shape_cast %49 : vector<1x64xi1> to vector<1x64xi1>
    %831 = vector.broadcast %830 : vector<1x64xi1> to vector<8x64xi1>
    %832 = vector.broadcast %cst_535 : f32 to vector<8x64xf32>
    %833 = arith.select %831, %829, %832 : vector<8x64xi1>, vector<8x64xf32>
    %c0_536 = arith.constant 0 : index
    %c136 = arith.constant 136 : index
    %834 = vector.load %arg9[%c0_536, %c136] : memref<8x384xf32, #tpu.memory_space<vmem>>, vector<8x64xf32>
    %c0_537 = arith.constant 0 : index
    %c137 = arith.constant 137 : index
    %835 = vector.load %arg9[%c0_537, %c137] : memref<8x384xf32, #tpu.memory_space<vmem>>, vector<8x64xf32>
    %cst_538 = arith.constant 0.000000e+00 : f32
    %836 = vector.shape_cast %51 : vector<1x64xi1> to vector<1x64xi1>
    %837 = vector.broadcast %836 : vector<1x64xi1> to vector<8x64xi1>
    %838 = vector.broadcast %cst_538 : f32 to vector<8x64xf32>
    %839 = arith.select %837, %835, %838 : vector<8x64xi1>, vector<8x64xf32>
    %840 = tpu.concatenate %811, %812, %817, %822, %823, %828, %833, %834, %839, %57 in 0 : vector<8x64xf32>, vector<8x64xf32>, vector<8x64xf32>, vector<8x64xf32>, vector<8x64xf32>, vector<8x64xf32>, vector<8x64xf32>, vector<8x64xf32>, vector<8x64xf32>, vector<8x64xf32> -> vector<80x64xf32>
    %c0_539 = arith.constant 0 : index
    %c247 = arith.constant 247 : index
    %841 = vector.load %arg9[%c0_539, %c247] : memref<8x384xf32, #tpu.memory_space<vmem>>, vector<8x64xf32>
    %cst_540 = arith.constant 0.000000e+00 : f32
    %842 = vector.shape_cast %49 : vector<1x64xi1> to vector<1x64xi1>
    %843 = vector.broadcast %842 : vector<1x64xi1> to vector<8x64xi1>
    %844 = vector.broadcast %cst_540 : f32 to vector<8x64xf32>
    %845 = arith.select %843, %841, %844 : vector<8x64xi1>, vector<8x64xf32>
    %c0_541 = arith.constant 0 : index
    %c248 = arith.constant 248 : index
    %846 = vector.load %arg9[%c0_541, %c248] : memref<8x384xf32, #tpu.memory_space<vmem>>, vector<8x64xf32>
    %c0_542 = arith.constant 0 : index
    %c249 = arith.constant 249 : index
    %847 = vector.load %arg9[%c0_542, %c249] : memref<8x384xf32, #tpu.memory_space<vmem>>, vector<8x64xf32>
    %cst_543 = arith.constant 0.000000e+00 : f32
    %848 = vector.shape_cast %51 : vector<1x64xi1> to vector<1x64xi1>
    %849 = vector.broadcast %848 : vector<1x64xi1> to vector<8x64xi1>
    %850 = vector.broadcast %cst_543 : f32 to vector<8x64xf32>
    %851 = arith.select %849, %847, %850 : vector<8x64xi1>, vector<8x64xf32>
    %c0_544 = arith.constant 0 : index
    %c255 = arith.constant 255 : index
    %852 = vector.load %arg9[%c0_544, %c255] : memref<8x384xf32, #tpu.memory_space<vmem>>, vector<8x64xf32>
    %cst_545 = arith.constant 0.000000e+00 : f32
    %853 = vector.shape_cast %49 : vector<1x64xi1> to vector<1x64xi1>
    %854 = vector.broadcast %853 : vector<1x64xi1> to vector<8x64xi1>
    %855 = vector.broadcast %cst_545 : f32 to vector<8x64xf32>
    %856 = arith.select %854, %852, %855 : vector<8x64xi1>, vector<8x64xf32>
    %c0_546 = arith.constant 0 : index
    %c256_547 = arith.constant 256 : index
    %857 = vector.load %arg9[%c0_546, %c256_547] : memref<8x384xf32, #tpu.memory_space<vmem>>, vector<8x64xf32>
    %c0_548 = arith.constant 0 : index
    %c257 = arith.constant 257 : index
    %858 = vector.load %arg9[%c0_548, %c257] : memref<8x384xf32, #tpu.memory_space<vmem>>, vector<8x64xf32>
    %cst_549 = arith.constant 0.000000e+00 : f32
    %859 = vector.shape_cast %51 : vector<1x64xi1> to vector<1x64xi1>
    %860 = vector.broadcast %859 : vector<1x64xi1> to vector<8x64xi1>
    %861 = vector.broadcast %cst_549 : f32 to vector<8x64xf32>
    %862 = arith.select %860, %858, %861 : vector<8x64xi1>, vector<8x64xf32>
    %c0_550 = arith.constant 0 : index
    %c263 = arith.constant 263 : index
    %863 = vector.load %arg9[%c0_550, %c263] : memref<8x384xf32, #tpu.memory_space<vmem>>, vector<8x64xf32>
    %cst_551 = arith.constant 0.000000e+00 : f32
    %864 = vector.shape_cast %49 : vector<1x64xi1> to vector<1x64xi1>
    %865 = vector.broadcast %864 : vector<1x64xi1> to vector<8x64xi1>
    %866 = vector.broadcast %cst_551 : f32 to vector<8x64xf32>
    %867 = arith.select %865, %863, %866 : vector<8x64xi1>, vector<8x64xf32>
    %c0_552 = arith.constant 0 : index
    %c264 = arith.constant 264 : index
    %868 = vector.load %arg9[%c0_552, %c264] : memref<8x384xf32, #tpu.memory_space<vmem>>, vector<8x64xf32>
    %c0_553 = arith.constant 0 : index
    %c265 = arith.constant 265 : index
    %869 = vector.load %arg9[%c0_553, %c265] : memref<8x384xf32, #tpu.memory_space<vmem>>, vector<8x64xf32>
    %cst_554 = arith.constant 0.000000e+00 : f32
    %870 = vector.shape_cast %51 : vector<1x64xi1> to vector<1x64xi1>
    %871 = vector.broadcast %870 : vector<1x64xi1> to vector<8x64xi1>
    %872 = vector.broadcast %cst_554 : f32 to vector<8x64xf32>
    %873 = arith.select %871, %869, %872 : vector<8x64xi1>, vector<8x64xf32>
    %874 = tpu.concatenate %845, %846, %851, %856, %857, %862, %867, %868, %873, %57 in 0 : vector<8x64xf32>, vector<8x64xf32>, vector<8x64xf32>, vector<8x64xf32>, vector<8x64xf32>, vector<8x64xf32>, vector<8x64xf32>, vector<8x64xf32>, vector<8x64xf32>, vector<8x64xf32> -> vector<80x64xf32>
    %875 = tpu.concatenate %840, %874 in 1 : vector<80x64xf32>, vector<80x64xf32> -> vector<80x128xf32>
    %c8_555 = arith.constant 8 : index
    %c0_556 = arith.constant 0 : index
    %c0_557 = arith.constant 0 : index
    %876 = vector.load %arg2[%c8_555, %c0_556, %c0_557] : memref<10x8x80xbf16, #tpu.memory_space<vmem>>, vector<1x8x80xbf16>
    %877 = vector.shape_cast %876 : vector<1x8x80xbf16> to vector<8x80xbf16>
    %878 = arith.truncf %875 : vector<80x128xf32> to vector<80x128xbf16>
    %cst_558 = arith.constant dense<0.000000e+00> : vector<8x128xf32>
    %879 = tpu.matmul %877, %878, %cst_558 {dimension_numbers = #tpu.dot_dimension_numbers<[1], [0], [0], [1], [0, 0, 1, 1], [], []>} : vector<8x80xbf16>, vector<80x128xbf16>, vector<8x128xf32> -> vector<8x128xf32>
    %cst_559 = arith.constant 0.000000e+00 : f32
    %880 = vector.broadcast %cst_559 : f32 to vector<8x128xf32>
    %881 = arith.maximumf %879, %880 : vector<8x128xf32>
    %882 = vector.extract_strided_slice %881 {offsets = [0, 0], sizes = [8, 64], strides = [1, 1]} : vector<8x128xf32> to vector<8x64xf32>
    %c0_560 = arith.constant 0 : index
    %c128_561 = arith.constant 128 : index
    %883 = vector.load %arg9[%c0_560, %c128_561] : memref<8x384xf32, #tpu.memory_space<vmem>>, vector<8x64xf32>
    tpu.vector_store %arg9[%c0_560, %c128_561], %882 {strides = array<i32>} : memref<8x384xf32, #tpu.memory_space<vmem>>, vector<8x64xf32>,
    %884 = vector.extract_strided_slice %881 {offsets = [0, 64], sizes = [8, 64], strides = [1, 1]} : vector<8x128xf32> to vector<8x64xf32>
    %c0_562 = arith.constant 0 : index
    %c256_563 = arith.constant 256 : index
    %885 = vector.load %arg9[%c0_562, %c256_563] : memref<8x384xf32, #tpu.memory_space<vmem>>, vector<8x64xf32>
    tpu.vector_store %arg9[%c0_562, %c256_563], %884 {strides = array<i32>} : memref<8x384xf32, #tpu.memory_space<vmem>>, vector<8x64xf32>,
    %c0_564 = arith.constant 0 : index
    %c119_565 = arith.constant 119 : index
    %886 = vector.load %arg9[%c0_564, %c119_565] : memref<8x384xf32, #tpu.memory_space<vmem>>, vector<8x64xf32>
    %cst_566 = arith.constant 0.000000e+00 : f32
    %887 = vector.shape_cast %49 : vector<1x64xi1> to vector<1x64xi1>
    %888 = vector.broadcast %887 : vector<1x64xi1> to vector<8x64xi1>
    %889 = vector.broadcast %cst_566 : f32 to vector<8x64xf32>
    %890 = arith.select %888, %886, %889 : vector<8x64xi1>, vector<8x64xf32>
    %c0_567 = arith.constant 0 : index
    %c120_568 = arith.constant 120 : index
    %891 = vector.load %arg9[%c0_567, %c120_568] : memref<8x384xf32, #tpu.memory_space<vmem>>, vector<8x64xf32>
    %c0_569 = arith.constant 0 : index
    %c121_570 = arith.constant 121 : index
    %892 = vector.load %arg9[%c0_569, %c121_570] : memref<8x384xf32, #tpu.memory_space<vmem>>, vector<8x64xf32>
    %cst_571 = arith.constant 0.000000e+00 : f32
    %893 = vector.shape_cast %51 : vector<1x64xi1> to vector<1x64xi1>
    %894 = vector.broadcast %893 : vector<1x64xi1> to vector<8x64xi1>
    %895 = vector.broadcast %cst_571 : f32 to vector<8x64xf32>
    %896 = arith.select %894, %892, %895 : vector<8x64xi1>, vector<8x64xf32>
    %c0_572 = arith.constant 0 : index
    %c127_573 = arith.constant 127 : index
    %897 = vector.load %arg9[%c0_572, %c127_573] : memref<8x384xf32, #tpu.memory_space<vmem>>, vector<8x64xf32>
    %cst_574 = arith.constant 0.000000e+00 : f32
    %898 = vector.shape_cast %49 : vector<1x64xi1> to vector<1x64xi1>
    %899 = vector.broadcast %898 : vector<1x64xi1> to vector<8x64xi1>
    %900 = vector.broadcast %cst_574 : f32 to vector<8x64xf32>
    %901 = arith.select %899, %897, %900 : vector<8x64xi1>, vector<8x64xf32>
    %c0_575 = arith.constant 0 : index
    %c128_576 = arith.constant 128 : index
    %902 = vector.load %arg9[%c0_575, %c128_576] : memref<8x384xf32, #tpu.memory_space<vmem>>, vector<8x64xf32>
    %c0_577 = arith.constant 0 : index
    %c129_578 = arith.constant 129 : index
    %903 = vector.load %arg9[%c0_577, %c129_578] : memref<8x384xf32, #tpu.memory_space<vmem>>, vector<8x64xf32>
    %cst_579 = arith.constant 0.000000e+00 : f32
    %904 = vector.shape_cast %51 : vector<1x64xi1> to vector<1x64xi1>
    %905 = vector.broadcast %904 : vector<1x64xi1> to vector<8x64xi1>
    %906 = vector.broadcast %cst_579 : f32 to vector<8x64xf32>
    %907 = arith.select %905, %903, %906 : vector<8x64xi1>, vector<8x64xf32>
    %c0_580 = arith.constant 0 : index
    %c135_581 = arith.constant 135 : index
    %908 = vector.load %arg9[%c0_580, %c135_581] : memref<8x384xf32, #tpu.memory_space<vmem>>, vector<8x64xf32>
    %cst_582 = arith.constant 0.000000e+00 : f32
    %909 = vector.shape_cast %49 : vector<1x64xi1> to vector<1x64xi1>
    %910 = vector.broadcast %909 : vector<1x64xi1> to vector<8x64xi1>
    %911 = vector.broadcast %cst_582 : f32 to vector<8x64xf32>
    %912 = arith.select %910, %908, %911 : vector<8x64xi1>, vector<8x64xf32>
    %c0_583 = arith.constant 0 : index
    %c136_584 = arith.constant 136 : index
    %913 = vector.load %arg9[%c0_583, %c136_584] : memref<8x384xf32, #tpu.memory_space<vmem>>, vector<8x64xf32>
    %c0_585 = arith.constant 0 : index
    %c137_586 = arith.constant 137 : index
    %914 = vector.load %arg9[%c0_585, %c137_586] : memref<8x384xf32, #tpu.memory_space<vmem>>, vector<8x64xf32>
    %cst_587 = arith.constant 0.000000e+00 : f32
    %915 = vector.shape_cast %51 : vector<1x64xi1> to vector<1x64xi1>
    %916 = vector.broadcast %915 : vector<1x64xi1> to vector<8x64xi1>
    %917 = vector.broadcast %cst_587 : f32 to vector<8x64xf32>
    %918 = arith.select %916, %914, %917 : vector<8x64xi1>, vector<8x64xf32>
    %919 = tpu.concatenate %890, %891, %896, %901, %902, %907, %912, %913, %918, %57 in 0 : vector<8x64xf32>, vector<8x64xf32>, vector<8x64xf32>, vector<8x64xf32>, vector<8x64xf32>, vector<8x64xf32>, vector<8x64xf32>, vector<8x64xf32>, vector<8x64xf32>, vector<8x64xf32> -> vector<80x64xf32>
    %c0_588 = arith.constant 0 : index
    %c247_589 = arith.constant 247 : index
    %920 = vector.load %arg9[%c0_588, %c247_589] : memref<8x384xf32, #tpu.memory_space<vmem>>, vector<8x64xf32>
    %cst_590 = arith.constant 0.000000e+00 : f32
    %921 = vector.shape_cast %49 : vector<1x64xi1> to vector<1x64xi1>
    %922 = vector.broadcast %921 : vector<1x64xi1> to vector<8x64xi1>
    %923 = vector.broadcast %cst_590 : f32 to vector<8x64xf32>
    %924 = arith.select %922, %920, %923 : vector<8x64xi1>, vector<8x64xf32>
    %c0_591 = arith.constant 0 : index
    %c248_592 = arith.constant 248 : index
    %925 = vector.load %arg9[%c0_591, %c248_592] : memref<8x384xf32, #tpu.memory_space<vmem>>, vector<8x64xf32>
    %c0_593 = arith.constant 0 : index
    %c249_594 = arith.constant 249 : index
    %926 = vector.load %arg9[%c0_593, %c249_594] : memref<8x384xf32, #tpu.memory_space<vmem>>, vector<8x64xf32>
    %cst_595 = arith.constant 0.000000e+00 : f32
    %927 = vector.shape_cast %51 : vector<1x64xi1> to vector<1x64xi1>
    %928 = vector.broadcast %927 : vector<1x64xi1> to vector<8x64xi1>
    %929 = vector.broadcast %cst_595 : f32 to vector<8x64xf32>
    %930 = arith.select %928, %926, %929 : vector<8x64xi1>, vector<8x64xf32>
    %c0_596 = arith.constant 0 : index
    %c255_597 = arith.constant 255 : index
    %931 = vector.load %arg9[%c0_596, %c255_597] : memref<8x384xf32, #tpu.memory_space<vmem>>, vector<8x64xf32>
    %cst_598 = arith.constant 0.000000e+00 : f32
    %932 = vector.shape_cast %49 : vector<1x64xi1> to vector<1x64xi1>
    %933 = vector.broadcast %932 : vector<1x64xi1> to vector<8x64xi1>
    %934 = vector.broadcast %cst_598 : f32 to vector<8x64xf32>
    %935 = arith.select %933, %931, %934 : vector<8x64xi1>, vector<8x64xf32>
    %c0_599 = arith.constant 0 : index
    %c256_600 = arith.constant 256 : index
    %936 = vector.load %arg9[%c0_599, %c256_600] : memref<8x384xf32, #tpu.memory_space<vmem>>, vector<8x64xf32>
    %c0_601 = arith.constant 0 : index
    %c257_602 = arith.constant 257 : index
    %937 = vector.load %arg9[%c0_601, %c257_602] : memref<8x384xf32, #tpu.memory_space<vmem>>, vector<8x64xf32>
    %cst_603 = arith.constant 0.000000e+00 : f32
    %938 = vector.shape_cast %51 : vector<1x64xi1> to vector<1x64xi1>
    %939 = vector.broadcast %938 : vector<1x64xi1> to vector<8x64xi1>
    %940 = vector.broadcast %cst_603 : f32 to vector<8x64xf32>
    %941 = arith.select %939, %937, %940 : vector<8x64xi1>, vector<8x64xf32>
    %c0_604 = arith.constant 0 : index
    %c263_605 = arith.constant 263 : index
    %942 = vector.load %arg9[%c0_604, %c263_605] : memref<8x384xf32, #tpu.memory_space<vmem>>, vector<8x64xf32>
    %cst_606 = arith.constant 0.000000e+00 : f32
    %943 = vector.shape_cast %49 : vector<1x64xi1> to vector<1x64xi1>
    %944 = vector.broadcast %943 : vector<1x64xi1> to vector<8x64xi1>
    %945 = vector.broadcast %cst_606 : f32 to vector<8x64xf32>
    %946 = arith.select %944, %942, %945 : vector<8x64xi1>, vector<8x64xf32>
    %c0_607 = arith.constant 0 : index
    %c264_608 = arith.constant 264 : index
    %947 = vector.load %arg9[%c0_607, %c264_608] : memref<8x384xf32, #tpu.memory_space<vmem>>, vector<8x64xf32>
    %c0_609 = arith.constant 0 : index
    %c265_610 = arith.constant 265 : index
    %948 = vector.load %arg9[%c0_609, %c265_610] : memref<8x384xf32, #tpu.memory_space<vmem>>, vector<8x64xf32>
    %cst_611 = arith.constant 0.000000e+00 : f32
    %949 = vector.shape_cast %51 : vector<1x64xi1> to vector<1x64xi1>
    %950 = vector.broadcast %949 : vector<1x64xi1> to vector<8x64xi1>
    %951 = vector.broadcast %cst_611 : f32 to vector<8x64xf32>
    %952 = arith.select %950, %948, %951 : vector<8x64xi1>, vector<8x64xf32>
    %953 = tpu.concatenate %924, %925, %930, %935, %936, %941, %946, %947, %952, %57 in 0 : vector<8x64xf32>, vector<8x64xf32>, vector<8x64xf32>, vector<8x64xf32>, vector<8x64xf32>, vector<8x64xf32>, vector<8x64xf32>, vector<8x64xf32>, vector<8x64xf32>, vector<8x64xf32> -> vector<80x64xf32>
    %954 = tpu.concatenate %919, %953 in 1 : vector<80x64xf32>, vector<80x64xf32> -> vector<80x128xf32>
    %c9 = arith.constant 9 : index
    %c0_612 = arith.constant 0 : index
    %c0_613 = arith.constant 0 : index
    %955 = vector.load %arg2[%c9, %c0_612, %c0_613] : memref<10x8x80xbf16, #tpu.memory_space<vmem>>, vector<1x8x80xbf16>
    %956 = vector.shape_cast %955 : vector<1x8x80xbf16> to vector<8x80xbf16>
    %957 = arith.truncf %954 : vector<80x128xf32> to vector<80x128xbf16>
    %cst_614 = arith.constant dense<0.000000e+00> : vector<8x128xf32>
    %958 = tpu.matmul %956, %957, %cst_614 {dimension_numbers = #tpu.dot_dimension_numbers<[1], [0], [0], [1], [0, 0, 1, 1], [], []>} : vector<8x80xbf16>, vector<80x128xbf16>, vector<8x128xf32> -> vector<8x128xf32>
    %959 = arith.addf %958, %802 : vector<8x128xf32>
    %cst_615 = arith.constant 0.000000e+00 : f32
    %960 = vector.broadcast %cst_615 : f32 to vector<8x128xf32>
    %961 = arith.maximumf %959, %960 : vector<8x128xf32>
    %c0_616 = arith.constant 0 : index
    %c0_617 = arith.constant 0 : index
    %962 = vector.load %arg5[%c0_616, %c0_617] : memref<64x256xbf16, #tpu.memory_space<vmem>>, vector<64x256xbf16>
    %963 = vector.extract_strided_slice %961 {offsets = [0, 0], sizes = [8, 64], strides = [1, 1]} : vector<8x128xf32> to vector<8x64xf32>
    %c0_618 = arith.constant 0 : index
    %c128_619 = arith.constant 128 : index
    %964 = vector.load %arg9[%c0_618, %c128_619] : memref<8x384xf32, #tpu.memory_space<vmem>>, vector<8x64xf32>
    tpu.vector_store %arg9[%c0_618, %c128_619], %963 {strides = array<i32>} : memref<8x384xf32, #tpu.memory_space<vmem>>, vector<8x64xf32>,
    %965 = vector.extract_strided_slice %961 {offsets = [0, 64], sizes = [8, 64], strides = [1, 1]} : vector<8x128xf32> to vector<8x64xf32>
    %c0_620 = arith.constant 0 : index
    %c256_621 = arith.constant 256 : index
    %966 = vector.load %arg9[%c0_620, %c256_621] : memref<8x384xf32, #tpu.memory_space<vmem>>, vector<8x64xf32>
    tpu.vector_store %arg9[%c0_620, %c256_621], %965 {strides = array<i32>} : memref<8x384xf32, #tpu.memory_space<vmem>>, vector<8x64xf32>,
    %967 = vector.extract_strided_slice %961 {offsets = [0, 0], sizes = [8, 64], strides = [1, 1]} : vector<8x128xf32> to vector<8x64xf32>
    %c0_622 = arith.constant 0 : index
    %c119_623 = arith.constant 119 : index
    %968 = vector.load %arg9[%c0_622, %c119_623] : memref<8x384xf32, #tpu.memory_space<vmem>>, vector<8x64xf32>
    %cst_624 = arith.constant 0.000000e+00 : f32
    %969 = vector.shape_cast %49 : vector<1x64xi1> to vector<1x64xi1>
    %970 = vector.broadcast %969 : vector<1x64xi1> to vector<8x64xi1>
    %971 = vector.broadcast %cst_624 : f32 to vector<8x64xf32>
    %972 = arith.select %970, %968, %971 : vector<8x64xi1>, vector<8x64xf32>
    %973 = arith.maximumf %967, %972 : vector<8x64xf32>
    %c0_625 = arith.constant 0 : index
    %c120_626 = arith.constant 120 : index
    %974 = vector.load %arg9[%c0_625, %c120_626] : memref<8x384xf32, #tpu.memory_space<vmem>>, vector<8x64xf32>
    %975 = arith.maximumf %973, %974 : vector<8x64xf32>
    %c0_627 = arith.constant 0 : index
    %c121_628 = arith.constant 121 : index
    %976 = vector.load %arg9[%c0_627, %c121_628] : memref<8x384xf32, #tpu.memory_space<vmem>>, vector<8x64xf32>
    %cst_629 = arith.constant 0.000000e+00 : f32
    %977 = vector.shape_cast %51 : vector<1x64xi1> to vector<1x64xi1>
    %978 = vector.broadcast %977 : vector<1x64xi1> to vector<8x64xi1>
    %979 = vector.broadcast %cst_629 : f32 to vector<8x64xf32>
    %980 = arith.select %978, %976, %979 : vector<8x64xi1>, vector<8x64xf32>
    %981 = arith.maximumf %975, %980 : vector<8x64xf32>
    %c0_630 = arith.constant 0 : index
    %c127_631 = arith.constant 127 : index
    %982 = vector.load %arg9[%c0_630, %c127_631] : memref<8x384xf32, #tpu.memory_space<vmem>>, vector<8x64xf32>
    %cst_632 = arith.constant 0.000000e+00 : f32
    %983 = vector.shape_cast %49 : vector<1x64xi1> to vector<1x64xi1>
    %984 = vector.broadcast %983 : vector<1x64xi1> to vector<8x64xi1>
    %985 = vector.broadcast %cst_632 : f32 to vector<8x64xf32>
    %986 = arith.select %984, %982, %985 : vector<8x64xi1>, vector<8x64xf32>
    %987 = arith.maximumf %981, %986 : vector<8x64xf32>
    %c0_633 = arith.constant 0 : index
    %c129_634 = arith.constant 129 : index
    %988 = vector.load %arg9[%c0_633, %c129_634] : memref<8x384xf32, #tpu.memory_space<vmem>>, vector<8x64xf32>
    %cst_635 = arith.constant 0.000000e+00 : f32
    %989 = vector.shape_cast %51 : vector<1x64xi1> to vector<1x64xi1>
    %990 = vector.broadcast %989 : vector<1x64xi1> to vector<8x64xi1>
    %991 = vector.broadcast %cst_635 : f32 to vector<8x64xf32>
    %992 = arith.select %990, %988, %991 : vector<8x64xi1>, vector<8x64xf32>
    %993 = arith.maximumf %987, %992 : vector<8x64xf32>
    %c0_636 = arith.constant 0 : index
    %c135_637 = arith.constant 135 : index
    %994 = vector.load %arg9[%c0_636, %c135_637] : memref<8x384xf32, #tpu.memory_space<vmem>>, vector<8x64xf32>
    %cst_638 = arith.constant 0.000000e+00 : f32
    %995 = vector.shape_cast %49 : vector<1x64xi1> to vector<1x64xi1>
    %996 = vector.broadcast %995 : vector<1x64xi1> to vector<8x64xi1>
    %997 = vector.broadcast %cst_638 : f32 to vector<8x64xf32>
    %998 = arith.select %996, %994, %997 : vector<8x64xi1>, vector<8x64xf32>
    %999 = arith.maximumf %993, %998 : vector<8x64xf32>
    %c0_639 = arith.constant 0 : index
    %c136_640 = arith.constant 136 : index
    %1000 = vector.load %arg9[%c0_639, %c136_640] : memref<8x384xf32, #tpu.memory_space<vmem>>, vector<8x64xf32>
    %1001 = arith.maximumf %999, %1000 : vector<8x64xf32>
    %c0_641 = arith.constant 0 : index
    %c137_642 = arith.constant 137 : index
    %1002 = vector.load %arg9[%c0_641, %c137_642] : memref<8x384xf32, #tpu.memory_space<vmem>>, vector<8x64xf32>
    %cst_643 = arith.constant 0.000000e+00 : f32
    %1003 = vector.shape_cast %51 : vector<1x64xi1> to vector<1x64xi1>
    %1004 = vector.broadcast %1003 : vector<1x64xi1> to vector<8x64xi1>
    %1005 = vector.broadcast %cst_643 : f32 to vector<8x64xf32>
    %1006 = arith.select %1004, %1002, %1005 : vector<8x64xi1>, vector<8x64xf32>
    %1007 = arith.maximumf %1001, %1006 : vector<8x64xf32>
    %1008 = arith.truncf %1007 : vector<8x64xf32> to vector<8x64xbf16>
    %cst_644 = arith.constant dense<0.000000e+00> : vector<8x256xf32>
    %1009 = tpu.matmul %1008, %962, %cst_644 {dimension_numbers = #tpu.dot_dimension_numbers<[1], [0], [0], [1], [0, 0, 1, 1], [], []>} : vector<8x64xbf16>, vector<64x256xbf16>, vector<8x256xf32> -> vector<8x256xf32>
    %1010 = vector.extract_strided_slice %961 {offsets = [0, 64], sizes = [8, 64], strides = [1, 1]} : vector<8x128xf32> to vector<8x64xf32>
    %c0_645 = arith.constant 0 : index
    %c247_646 = arith.constant 247 : index
    %1011 = vector.load %arg9[%c0_645, %c247_646] : memref<8x384xf32, #tpu.memory_space<vmem>>, vector<8x64xf32>
    %cst_647 = arith.constant 0.000000e+00 : f32
    %1012 = vector.shape_cast %49 : vector<1x64xi1> to vector<1x64xi1>
    %1013 = vector.broadcast %1012 : vector<1x64xi1> to vector<8x64xi1>
    %1014 = vector.broadcast %cst_647 : f32 to vector<8x64xf32>
    %1015 = arith.select %1013, %1011, %1014 : vector<8x64xi1>, vector<8x64xf32>
    %1016 = arith.maximumf %1010, %1015 : vector<8x64xf32>
    %c0_648 = arith.constant 0 : index
    %c248_649 = arith.constant 248 : index
    %1017 = vector.load %arg9[%c0_648, %c248_649] : memref<8x384xf32, #tpu.memory_space<vmem>>, vector<8x64xf32>
    %1018 = arith.maximumf %1016, %1017 : vector<8x64xf32>
    %c0_650 = arith.constant 0 : index
    %c249_651 = arith.constant 249 : index
    %1019 = vector.load %arg9[%c0_650, %c249_651] : memref<8x384xf32, #tpu.memory_space<vmem>>, vector<8x64xf32>
    %cst_652 = arith.constant 0.000000e+00 : f32
    %1020 = vector.shape_cast %51 : vector<1x64xi1> to vector<1x64xi1>
    %1021 = vector.broadcast %1020 : vector<1x64xi1> to vector<8x64xi1>
    %1022 = vector.broadcast %cst_652 : f32 to vector<8x64xf32>
    %1023 = arith.select %1021, %1019, %1022 : vector<8x64xi1>, vector<8x64xf32>
    %1024 = arith.maximumf %1018, %1023 : vector<8x64xf32>
    %c0_653 = arith.constant 0 : index
    %c255_654 = arith.constant 255 : index
    %1025 = vector.load %arg9[%c0_653, %c255_654] : memref<8x384xf32, #tpu.memory_space<vmem>>, vector<8x64xf32>
    %cst_655 = arith.constant 0.000000e+00 : f32
    %1026 = vector.shape_cast %49 : vector<1x64xi1> to vector<1x64xi1>
    %1027 = vector.broadcast %1026 : vector<1x64xi1> to vector<8x64xi1>
    %1028 = vector.broadcast %cst_655 : f32 to vector<8x64xf32>
    %1029 = arith.select %1027, %1025, %1028 : vector<8x64xi1>, vector<8x64xf32>
    %1030 = arith.maximumf %1024, %1029 : vector<8x64xf32>
    %c0_656 = arith.constant 0 : index
    %c257_657 = arith.constant 257 : index
    %1031 = vector.load %arg9[%c0_656, %c257_657] : memref<8x384xf32, #tpu.memory_space<vmem>>, vector<8x64xf32>
    %cst_658 = arith.constant 0.000000e+00 : f32
    %1032 = vector.shape_cast %51 : vector<1x64xi1> to vector<1x64xi1>
    %1033 = vector.broadcast %1032 : vector<1x64xi1> to vector<8x64xi1>
    %1034 = vector.broadcast %cst_658 : f32 to vector<8x64xf32>
    %1035 = arith.select %1033, %1031, %1034 : vector<8x64xi1>, vector<8x64xf32>
    %1036 = arith.maximumf %1030, %1035 : vector<8x64xf32>
    %c0_659 = arith.constant 0 : index
    %c263_660 = arith.constant 263 : index
    %1037 = vector.load %arg9[%c0_659, %c263_660] : memref<8x384xf32, #tpu.memory_space<vmem>>, vector<8x64xf32>
    %cst_661 = arith.constant 0.000000e+00 : f32
    %1038 = vector.shape_cast %49 : vector<1x64xi1> to vector<1x64xi1>
    %1039 = vector.broadcast %1038 : vector<1x64xi1> to vector<8x64xi1>
    %1040 = vector.broadcast %cst_661 : f32 to vector<8x64xf32>
    %1041 = arith.select %1039, %1037, %1040 : vector<8x64xi1>, vector<8x64xf32>
    %1042 = arith.maximumf %1036, %1041 : vector<8x64xf32>
    %c0_662 = arith.constant 0 : index
    %c264_663 = arith.constant 264 : index
    %1043 = vector.load %arg9[%c0_662, %c264_663] : memref<8x384xf32, #tpu.memory_space<vmem>>, vector<8x64xf32>
    %1044 = arith.maximumf %1042, %1043 : vector<8x64xf32>
    %c0_664 = arith.constant 0 : index
    %c265_665 = arith.constant 265 : index
    %1045 = vector.load %arg9[%c0_664, %c265_665] : memref<8x384xf32, #tpu.memory_space<vmem>>, vector<8x64xf32>
    %cst_666 = arith.constant 0.000000e+00 : f32
    %1046 = vector.shape_cast %51 : vector<1x64xi1> to vector<1x64xi1>
    %1047 = vector.broadcast %1046 : vector<1x64xi1> to vector<8x64xi1>
    %1048 = vector.broadcast %cst_666 : f32 to vector<8x64xf32>
    %1049 = arith.select %1047, %1045, %1048 : vector<8x64xi1>, vector<8x64xf32>
    %1050 = arith.maximumf %1044, %1049 : vector<8x64xf32>
    %1051 = arith.truncf %1050 : vector<8x64xf32> to vector<8x64xbf16>
    %cst_667 = arith.constant dense<0.000000e+00> : vector<8x256xf32>
    %1052 = tpu.matmul %1051, %962, %cst_667 {dimension_numbers = #tpu.dot_dimension_numbers<[1], [0], [0], [1], [0, 0, 1, 1], [], []>} : vector<8x64xbf16>, vector<64x256xbf16>, vector<8x256xf32> -> vector<8x256xf32>
    %1053 = tpu.concatenate %1009, %1052 in 1 : vector<8x256xf32>, vector<8x256xf32> -> vector<8x512xf32>
    %1054 = arith.addf %1053, %710 : vector<8x512xf32>
    %c0_668 = arith.constant 0 : index
    %c2_669 = arith.constant 2 : index
    %1055 = vector.load %arg4[%c0_668, %c2_669] : memref<8x8xf32, #tpu.memory_space<vmem>>, vector<8x1xf32>
    %1056 = vector.broadcast %1055 : vector<8x1xf32> to vector<8x512xf32>
    %1057 = arith.mulf %1054, %1056 : vector<8x512xf32>
    %c0_670 = arith.constant 0 : index
    %c3_671 = arith.constant 3 : index
    %1058 = vector.load %arg4[%c0_670, %c3_671] : memref<8x8xf32, #tpu.memory_space<vmem>>, vector<8x1xf32>
    %1059 = vector.broadcast %1058 : vector<8x1xf32> to vector<8x512xf32>
    %1060 = arith.addf %1057, %1059 : vector<8x512xf32>
    %cst_672 = arith.constant 0.000000e+00 : f32
    %1061 = vector.broadcast %cst_672 : f32 to vector<8x512xf32>
    %1062 = arith.maximumf %1060, %1061 : vector<8x512xf32>
    %c0_673 = arith.constant 0 : index
    %c16 = arith.constant 16 : index
    %1063 = vector.load %arg3[%c0_673, %c16] : memref<8x32xbf16, #tpu.memory_space<vmem>>, vector<8x8xbf16>
    %1064 = arith.truncf %1062 : vector<8x512xf32> to vector<8x512xbf16>
    %cst_674 = arith.constant dense<0.000000e+00> : vector<8x512xf32>
    %1065 = tpu.matmul %1063, %1064, %cst_674 {dimension_numbers = #tpu.dot_dimension_numbers<[1], [0], [0], [1], [0, 0, 1, 1], [], []>} : vector<8x8xbf16>, vector<8x512xbf16>, vector<8x512xf32> -> vector<8x512xf32>
    %c0_675 = arith.constant 0 : index
    %c4_676 = arith.constant 4 : index
    %1066 = vector.load %arg4[%c0_675, %c4_676] : memref<8x8xf32, #tpu.memory_space<vmem>>, vector<8x1xf32>
    %1067 = vector.broadcast %1066 : vector<8x1xf32> to vector<8x512xf32>
    %1068 = arith.addf %1065, %1067 : vector<8x512xf32>
    %cst_677 = arith.constant 0.000000e+00 : f32
    %1069 = vector.broadcast %cst_677 : f32 to vector<8x512xf32>
    %1070 = arith.maximumf %1068, %1069 : vector<8x512xf32>
    %c0_678 = arith.constant 0 : index
    %c24 = arith.constant 24 : index
    %1071 = vector.load %arg3[%c0_678, %c24] : memref<8x32xbf16, #tpu.memory_space<vmem>>, vector<8x8xbf16>
    %1072 = arith.truncf %1070 : vector<8x512xf32> to vector<8x512xbf16>
    %cst_679 = arith.constant dense<0.000000e+00> : vector<8x512xf32>
    %1073 = tpu.matmul %1071, %1072, %cst_679 {dimension_numbers = #tpu.dot_dimension_numbers<[1], [0], [0], [1], [0, 0, 1, 1], [], []>} : vector<8x8xbf16>, vector<8x512xbf16>, vector<8x512xf32> -> vector<8x512xf32>
    %cst_680 = arith.constant -3.000000e+01 : f32
    %cst_681 = arith.constant 3.000000e+01 : f32
    %1074 = vector.broadcast %cst_680 : f32 to vector<8x512xf32>
    %1075 = arith.maximumf %1074, %1073 : vector<8x512xf32>
    %1076 = vector.broadcast %cst_681 : f32 to vector<8x512xf32>
    %1077 = arith.minimumf %1076, %1075 : vector<8x512xf32>
    %cst_682 = arith.constant 0.000000e+00 : f32
    %1078 = vector.broadcast %cst_682 : f32 to vector<8x512xf32>
    %1079 = arith.subf %1078, %1077 : vector<8x512xf32>
    %1080 = math.exp %1079 : vector<8x512xf32>
    %cst_683 = arith.constant 1.000000e+00 : f32
    %1081 = vector.broadcast %cst_683 : f32 to vector<8x512xf32>
    %1082 = arith.addf %1081, %1080 : vector<8x512xf32>
    %1083 = tpu.reciprocal %1082 {approx = true} : vector<8x512xf32> -> vector<8x512xf32>
    %cst_684 = arith.constant 1.000000e+00 : f32
    %1084 = vector.broadcast %cst_684 : f32 to vector<8x512xf32>
    %1085 = arith.addf %1084, %1083 : vector<8x512xf32>
    %1086 = arith.mulf %1085, %386 : vector<8x512xf32>
    %1087 = vector.extract_strided_slice %1086 {offsets = [0, 0], sizes = [8, 256], strides = [1, 1]} : vector<8x512xf32> to vector<8x256xf32>
    %c0_685 = arith.constant 0 : index
    %c0_686 = arith.constant 0 : index
    %c0_687 = arith.constant 0 : index
    %1088 = vector.load %arg7[%c0_685, %c0_686, %c0_687] : memref<2x8x256xf32, #tpu.memory_space<vmem>>, vector<1x8x256xf32>
    %1089 = vector.shape_cast %1088 : vector<1x8x256xf32> to vector<8x256xf32>
    %1090 = vector.shape_cast %1087 : vector<8x256xf32> to vector<1x8x256xf32>
    tpu.vector_store %arg7[%c0_685, %c0_686, %c0_687], %1090 {strides = array<i32>} : memref<2x8x256xf32, #tpu.memory_space<vmem>>, vector<1x8x256xf32>,
    %1091 = vector.extract_strided_slice %1086 {offsets = [0, 256], sizes = [8, 256], strides = [1, 1]} : vector<8x512xf32> to vector<8x256xf32>
    %c1_688 = arith.constant 1 : index
    %c0_689 = arith.constant 0 : index
    %c0_690 = arith.constant 0 : index
    %1092 = vector.load %arg7[%c1_688, %c0_689, %c0_690] : memref<2x8x256xf32, #tpu.memory_space<vmem>>, vector<1x8x256xf32>
    %1093 = vector.shape_cast %1092 : vector<1x8x256xf32> to vector<8x256xf32>
    %1094 = vector.shape_cast %1091 : vector<8x256xf32> to vector<1x8x256xf32>
    tpu.vector_store %arg7[%c1_688, %c0_689, %c0_690], %1094 {strides = array<i32>} : memref<2x8x256xf32, #tpu.memory_space<vmem>>, vector<1x8x256xf32>,
    return
  }
  func.func @transform_0(%arg0: i32) -> (i32, i32, i32) {
    %c0_i32 = arith.constant 0 : i32
    %c0_i32_0 = arith.constant 0 : i32
    %c0_i32_1 = arith.constant 0 : i32
    return %arg0, %c0_i32, %c0_i32_0 : i32, i32, i32
  }
  func.func @transform_1(%arg0: i32) -> (i32, i32, i32) {
    %c0_i32 = arith.constant 0 : i32
    %c0_i32_0 = arith.constant 0 : i32
    %c0_i32_1 = arith.constant 0 : i32
    %c0_i32_2 = arith.constant 0 : i32
    return %c0_i32, %c0_i32_0, %c0_i32_1 : i32, i32, i32
  }
  func.func @transform_2(%arg0: i32) -> (i32, i32) {
    %c0_i32 = arith.constant 0 : i32
    %c0_i32_0 = arith.constant 0 : i32
    %c0_i32_1 = arith.constant 0 : i32
    return %c0_i32, %c0_i32_0 : i32, i32
  }
  func.func @transform_3(%arg0: i32) -> (i32, i32) {
    %c0_i32 = arith.constant 0 : i32
    %c0_i32_0 = arith.constant 0 : i32
    %c0_i32_1 = arith.constant 0 : i32
    return %c0_i32, %c0_i32_0 : i32, i32
  }
  func.func @transform_4(%arg0: i32) -> (i32, i32) {
    %c0_i32 = arith.constant 0 : i32
    %c0_i32_0 = arith.constant 0 : i32
    %c0_i32_1 = arith.constant 0 : i32
    return %c0_i32, %c0_i32_0 : i32, i32
  }
  func.func @transform_5(%arg0: i32) -> (i32, i32) {
    %c0_i32 = arith.constant 0 : i32
    %c0_i32_0 = arith.constant 0 : i32
    %c0_i32_1 = arith.constant 0 : i32
    return %c0_i32, %c0_i32_0 : i32, i32
  }
  func.func @transform_6(%arg0: i32) -> (i32, i32, i32) {
    %c0_i32 = arith.constant 0 : i32
    %c0_i32_0 = arith.constant 0 : i32
    %c0_i32_1 = arith.constant 0 : i32
    return %arg0, %c0_i32, %c0_i32_0 : i32, i32, i32
  }
}

</mosaic_0001>

<bundles_post_ra>
// kernel: attention_block_forward.1
= control target key start
LH: loop header
LB: loop body
LE: loop exit
PB: predicated region body
PF: predicated region fallthrough
CT: control target
= control target key end

     0   :  { %v5721_v2 = vmov 0.0   ;;  %s5722_s25 = smov 113   ;;  %s5723_s26 = smov 111   ;;  %v34_v11 = vlaneseq  ;;  %vm8004_vm0 = vcmask 908288   ;;  %v8024_v21 = vmov 0  ;;  %s7992_s0 = inlined_call_operand.vmem [shape: f32[2,8,256], index: 0, kind: input, shape index: {}]   ;;  %s7993_s1 = inlined_call_operand.vmem [shape: bf16[10,8,80], index: 1, kind: input, shape index: {}]   ;;  %s7994_s2 = inlined_call_operand.vmem [shape: bf16[8,32], index: 2, kind: input, shape index: {}]   ;;  %s7995_s3 = inlined_call_operand.vmem [shape: f32[8,8], index: 3, kind: input, shape index: {}]   ;;  %s7996_s5 = inlined_call_operand.vmem [shape: bf16[256,64], index: 5, kind: input, shape index: {}]   ;;  %s7997_s4 = inlined_call_operand.vmem [shape: bf16[64,256], index: 4, kind: input, shape index: {}]   ;;  %s7998_s6 = inlined_call_operand.vmem [shape: f32[2,8,256], index: 6, kind: output, shape index: {}]  }
   0x1   :  { %v5784_v0 = vld [vmem:[%s7992_s0 + $0x10] sm:$0xff]  ;;  %v5789_v1 = vld [vmem:[%s7992_s0 + $0x18] sm:$0xff]  ;;  %31 = vst [vmem:[#allocation3] sm:$0xff] %v5721_v2  ;;  %s5724_s27 = smov 112   ;;  %s5725_s28 = smov 127   ;;  %v5822_v5 = vld [vmem:[%s7992_s0] sm:$0xff] }
   0x2   :  { %v4492_v3 = vpack.i.bf16 %v5789_v1, %v5784_v0  ;;  %32 = vst [vmem:[#allocation3 + $0x8] sm:$0xff] %v5721_v2  ;;  %v4512_v4 = vpack.i.bf16 %v5784_v0, %v5721_v2  ;;  %s5726_s29 = smov 15   ;;  %s5727_s30 = smov 1   ;;  %v5827_v6 = vld [vmem:[%s7992_s0 + $0x8] sm:$0xff]  ;;  %v4547_v8 = vpack.i.bf16 %v5822_v5, %v5721_v2  ;;  %v5860_v12 = vand.u32 127, %v34_v11 }
   0x3   :  { %33 = vst [vmem:[#allocation3 + $0x10] sm:$0xff] %v5721_v2  ;;  %s5728_s7 = smov 17   ;;  %s5729_s12 = smov 16   ;;  %v4527_v7 = vpack.i.bf16 %v5827_v6, %v5822_v5  ;;  %v5863_v14 = vshrl.u32 %v34_v11, 7  ;;  %vm8009_vm3 = vcmask 916480   ;;  %vm8001_vm4 = vcmask 924672  }
   0x4   :  { %4493 = vrot.lane.b32.xlu1 %v4492_v3, %s5722_s25  ;;  %4488 = vrot.lane.b32.xlu0 %v4492_v3, %s5723_s26  ;;  %v41_v13 = vand.u32 15, %v5860_v12  ;;  %v36_v16 = vadd.s32 128, %v5860_v12  ;;  %v8028_v31 = vmov 0  ;;  %v8030_v33 = vmov 0  ;;  %s5732_s20 = smov 120   ;;  %s5735_s18 = smov 121  }
   0x5   :  { %4498 = vrot.lane.b32.xlu2 %v4492_v3, %s5724_s27  ;;  %vm7999_vm2 = vcmp.eq.s32.totalorder %v5863_v14, 0  ;;  %vm5730_vm8 = vmmov 1   ;;  %vm8000_vm13 = vcmask 1039360   ;;  %s5736_s19 = smov 119   ;;  %s5737_s21 = smov 7  }
   0x6   :  { %vm5868_vm1 = vcmp.lt.s32.totalorder %v41_v13, 15  ;;  %v48_v26 = vand.u32 15, %v36_v16  ;;  %vm5884_vm6 = vcmp.gt.s32.totalorder %v41_v13, 0  ;;  %s5738_s22 = smov 8   ;;  %s5739_s23 = smov 9  }
   0x7   :  { %v8025_v21 = vsel %vm5868_vm1, 4294967295, %v8024_v21  ;;  %vm5878_vm5 = vmpackc.low %vm7999_vm2, %vm5868_vm1  ;;  %v8029_v31 = vsel %vm5884_vm6, 4294967295, %v8028_v31 }
   0x8   :  { %vm5888_vm7 = vcmp.lt.s32.totalorder %v48_v26, 15  ;;  %vm5897_vm9 = vmpackc.low %vm5730_vm8, %vm5884_vm6  ;;  %vm5910_vm11 = vcmp.gt.s32.totalorder %v48_v26, 0 }
   0x9   :  { %v8031_v33 = vsel %vm5888_vm7, 4294967295, %v8030_v33  ;;  %vm5906_vm10 = vmpackc.low %vm7999_vm2, %vm5888_vm7  ;;  %vm8002_vm2 = vcmask 121856  }
   0xa   :  { %vm5923_vm12 = vmpackc.low %vm5730_vm8, %vm5910_vm11 }
   0xb   :  { %vm5932_vm14 = vmpackc.low %vm5868_vm1, %vm5730_vm8 }
   0xc   :  { %270 = vrot.lane.b32.xlu1 %v5721_v2, %s5722_s25  ;;  %282 = vrot.lane.b32.xlu0 %v5721_v2, %s5723_s26  ;;  %vm5941_vm15 = vmpackc.low %vm5888_vm7, %vm5730_vm8  ;;  %vm8003_vm8 = vcmask 7168  }
   0xd   :  { %304 = vrot.lane.b32.xlu2 %v5721_v2, %s5724_s27 }
  0x14   :  { %258 = vrot.lane.b32.xlu1 %v5721_v2, %s5725_s28  ;;  %4503 = vrot.lane.b32.xlu0 %v4492_v3, %s5725_s28 }
  0x15   :  { %4508 = vrot.lane.b32.xlu2 %v4512_v4, %s5726_s29 }
  0x1c   :  { %4513 = vrot.lane.b32.xlu1 %v4512_v4, %s5727_s30  ;;  %228 = vrot.lane.b32.xlu0 %v5789_v1, %s5726_s29 }
  0x1d   :  { %240 = vrot.lane.b32.xlu2 %v5789_v1, %s5727_s30 }
  0x24   :  { %4518 = vrot.lane.b32.xlu0 %v4512_v4, %s5728_s7  ;;  %216 = vrot.lane.b32.xlu1 %v5789_v1, %s5728_s7 }
  0x25   :  { %4523 = vrot.lane.b32.xlu2 %v4512_v4, %s5729_s12 }
  0x2c   :  { %294 = vrot.lane.b32.xlu0 %v5789_v1, %s5729_s12  ;;  %4528 = vrot.lane.b32.xlu1 %v4527_v7, %s5723_s26 }
  0x2d   :  { %177 = vrot.lane.b32.xlu2 %v5721_v2, %s5723_s26 }
  0x34   :  { %4533 = vrot.lane.b32.xlu0 %v4527_v7, %s5722_s25  ;;  %164 = vrot.lane.b32.xlu1 %v5721_v2, %s5722_s25 }
  0x35   :  { %4538 = vrot.lane.b32.xlu2 %v4527_v7, %s5724_s27 }
  0x3c   :  { %201 = vrot.lane.b32.xlu0 %v5721_v2, %s5724_s27  ;;  %4543 = vrot.lane.b32.xlu1 %v4527_v7, %s5725_s28 }
  0x3d   :  { %151 = vrot.lane.b32.xlu2 %v5721_v2, %s5725_s28 }
  0x44   :  { %4548 = vrot.lane.b32.xlu0 %v4547_v8, %s5726_s29  ;;  %123 = vrot.lane.b32.xlu1 %v5827_v6, %s5726_s29 }
  0x45   :  { %4553 = vrot.lane.b32.xlu2 %v4547_v8, %s5727_s30 }
  0x4c   :  { %136 = vrot.lane.b32.xlu0 %v5827_v6, %s5727_s30  ;;  %4558 = vrot.lane.b32.xlu1 %v4547_v8, %s5728_s7 }
  0x4d   :  { %106 = vrot.lane.b32.xlu2 %v5827_v6, %s5728_s7 }
  0x54   :  { %4563 = vrot.lane.b32.xlu0 %v4547_v8, %s5729_s12  ;;  %190 = vrot.lane.b32.xlu1 %v5827_v6, %s5729_s12 }
  0x5f   :  { %v4499_v9 = vpop.permute.xlu2 %4498 }
  0x60   :  { %v4501_v17 = vunpack.i.h.bf16 %v4499_v9  ;;  %v4500_v18 = vunpack.i.l.bf16 %v4499_v9 }
  0x62   :  { %v306_v30 = vsel %vm8009_vm3, %v4500_v18, %v4501_v17 }
  0x67   :  { %v305_v10 = vpop.permute.xlu2 %304 }
  0x68   :  { %v307_v43 = vsel %vm8009_vm3, %v4501_v17, %v305_v10 }
  0x6f   :  { %v5865_v15 = vpop.permute.xlu2 %4508 }
  0x70   :  { %v4510_v58 = vunpack.i.l.bf16 %v5865_v15  ;;  %v4511_v59 = vunpack.i.h.bf16 %v5865_v15 }
  0x72   :  { %v230_v3 = vsel %vm8002_vm2, %v4510_v58, %v4511_v59 }
  0x76   :  { %v4494_v19 = vpop.permute.xlu1 %4493  ;;  %v4489_v20 = vpop.permute.xlu0 %4488 }
  0x77   :  { %v4496_v22 = vunpack.i.h.bf16 %v4494_v19  ;;  %v4495_v23 = vunpack.i.l.bf16 %v4494_v19  ;;  %v4491_v24 = vunpack.i.h.bf16 %v4489_v20  ;;  %v4490_v25 = vunpack.i.l.bf16 %v4489_v20  ;;  %v241_v36 = vpop.permute.xlu2 %240 }
  0x79   :  { %v284_v27 = vsel %vm8004_vm0, %v4490_v25, %v4491_v24  ;;  %v272_v29 = vsel %vm8001_vm4, %v4495_v23, %v4496_v22 }
  0x7a   :  { %v3826_v32 = vpack.c.bf16 1.0, %v284_v27  ;;  %v3829_v34 = vpack.c.bf16 %v306_v30, %v272_v29 }
  0x7c   :  { %3827 = vmatpush.bf16.msk.msra.mxu2 %vm5878_vm5, %v3826_v32 }
  0x7e   :  { %v271_v37 = vpop.permute.xlu1 %270  ;;  %v283_v38 = vpop.permute.xlu0 %282 }
  0x7f   :  { %v285_v39 = vsel %vm8004_vm0, %v4491_v24, %v283_v38  ;;  %v273_v44 = vsel %vm8001_vm4, %v4496_v22, %v271_v37  ;;  %v4524_v51 = vpop.permute.xlu2 %4523  ;;  %vm5969_vm4 = vmpackc.low %vm5884_vm6, %vm5868_vm1  ;;  %vm8050_vm1 = vcmask 1039360  }
  0x80   :  { %v3842_v42 = vpack.c.bf16 1.0, %v285_v39  ;;  %3830 = vmatpush.bf16.msk.msra.mxu2 %vm5897_vm9, %v3829_v34  ;;  %v3845_v46 = vpack.c.bf16 %v307_v43, %v273_v44  ;;  %v4526_v16 = vunpack.i.h.bf16 %v4524_v51  ;;  %v4525_v17 = vunpack.i.l.bf16 %v4524_v51 }
  0x82   :  { %3843 = vmatpush.bf16.msk.msra.mxu3 %vm5906_vm10, %v3842_v42 }
  0x86   :  { %v259_v47 = vpop.permute.xlu1 %258  ;;  %v4504_v48 = vpop.permute.xlu0 %4503  ;;  %3846 = vmatpush.bf16.msk.msra.mxu3 %vm5923_vm12, %v3845_v46 }
  0x87   :  { %v4506_v49 = vunpack.i.h.bf16 %v4504_v48  ;;  %v4505_v50 = vunpack.i.l.bf16 %v4504_v48  ;;  %v178_v11 = vpop.permute.xlu2 %177 }
  0x89   :  { %v260_v53 = vsel %vm8000_vm13, %v4505_v50, %v4506_v49  ;;  %v261_v54 = vsel %vm8000_vm13, %v4506_v49, %v259_v47  ;;  %vm5958_vm13 = vmpackc.low %vm5910_vm11, %vm5888_vm7 }
  0x8a   :  { %v3832_v56 = vpack.c.bf16 %v260_v53, %v5784_v0  ;;  %v3848_v57 = vpack.c.bf16 %v261_v54, %v5789_v1  ;;  %v310_v54 = vld [vmem:[%s7993_s1] sm:$0xf] }
  0x8c   :  { %3833 = vmatpush.bf16.msk.msra.mxu2 %vm5932_vm14, %v3832_v56  ;;  %3849 = vmatpush.bf16.msk.msra.mxu3 %vm5941_vm15, %v3848_v57 }
  0x8e   :  { %v4514_v60 = vpop.permute.xlu1 %4513  ;;  %v229_v61 = vpop.permute.xlu0 %228 }
  0x8f   :  { %v4516_v62 = vunpack.i.h.bf16 %v4514_v60  ;;  %v4515_v63 = vunpack.i.l.bf16 %v4514_v60  ;;  %v231_v8 = vsel %vm8002_vm2, %v4511_v59, %v229_v61  ;;  %vm8005_vm2 = vcmask 130048   ;;  %v4539_v26 = vpop.permute.xlu2 %4538 }
  0x90   :  { %v296_v23 = vsel %vm8005_vm2, %v4525_v17, %v4526_v16  ;;  %v4541_v44 = vunpack.i.h.bf16 %v4539_v26  ;;  %v4540_v46 = vunpack.i.l.bf16 %v4539_v26 }
  0x91   :  { %v243_v7 = vsel %vm8003_vm8, %v4516_v62, %v241_v36  ;;  %v242_v9 = vsel %vm8003_vm8, %v4515_v63, %v4516_v62  ;;  %vm8006_vm8 = vcmask 138240  }
  0x92   :  { %v3851_v13 = vpack.c.bf16 %v243_v7, %v231_v8  ;;  %v3835_v15 = vpack.c.bf16 %v242_v9, %v230_v3  ;;  %v204_v53 = vsel %vm8009_vm3, %v4540_v46, %v4541_v44 }
  0x94   :  { %3852 = vmatpush.bf16.msk.msra.mxu3 %vm5958_vm13, %v3851_v13  ;;  %3836 = vmatpush.bf16.msk.msra.mxu2 %vm5969_vm4, %v3835_v15 }
  0x96   :  { %v4519_v18 = vpop.permute.xlu0 %4518  ;;  %v217_v19 = vpop.permute.xlu1 %216 }
  0x97   :  { %v4521_v20 = vunpack.i.h.bf16 %v4519_v18  ;;  %v4520_v22 = vunpack.i.l.bf16 %v4519_v18  ;;  %v152_v47 = vpop.permute.xlu2 %151 }
  0x99   :  { %v218_v24 = vsel %vm8006_vm8, %v4520_v22, %v4521_v20  ;;  %v219_v30 = vsel %vm8006_vm8, %v4521_v20, %v217_v19 }
  0x9a   :  { %v3838_v25 = vpack.c.bf16 %v296_v23, %v218_v24 }
  0x9c   :  { %3839 = vmatpush.bf16.msk.msra.mxu2 %vm5897_vm9, %v3838_v25 }
  0x9e   :  { %v295_v27 = vpop.permute.xlu0 %294  ;;  %v4529_v29 = vpop.permute.xlu1 %4528 }
  0x9f   :  { %v297_v32 = vsel %vm8005_vm2, %v4526_v16, %v295_v27  ;;  %v4531_v34 = vunpack.i.h.bf16 %v4529_v29  ;;  %v4530_v36 = vunpack.i.l.bf16 %v4529_v29  ;;  %vm8048_vm2 = vcmask 924672   ;;  %v4554_v7 = vpop.permute.xlu2 %4553 }
  0xa0   :  { %v3854_v37 = vpack.c.bf16 %v297_v32, %v219_v30  ;;  %vm8049_vm8 = vmmov %vm8048_vm2  ;;  %v4556_v15 = vunpack.i.h.bf16 %v4554_v7  ;;  %v4555_v16 = vunpack.i.l.bf16 %v4554_v7 }
  0xa1   :  { %v180_v38 = vsel %vm8004_vm0, %v4530_v36, %v4531_v34  ;;  %v181_v39 = vsel %vm8004_vm0, %v4531_v34, %v178_v11  ;;  %vm8010_vm0 = vcmask 654336  }
  0xa2   :  { %3855 = vmatpush.bf16.msk.msra.mxu3 %vm5923_vm12, %v3854_v37  ;;  %v3794_v42 = vpack.c.bf16 1.0, %v180_v38  ;;  %v3810_v43 = vpack.c.bf16 1.0, %v181_v39  ;;  %3840 = vmatmul.msk.bf16.vlgmr.msra.gmra.mxu2 %vm8010_vm0, %v310_v54 }
  0xa4   :  { %3795 = vmatpush.bf16.msk.msra.mxu0 %vm5878_vm5, %v3794_v42  ;;  %3811 = vmatpush.bf16.msk.msra.mxu1 %vm5906_vm10, %v3810_v43 }
  0xa5   :  { %3856 = vmatmul.msk.bf16.vlgmr.msra.gmra.mxu3 %vm8010_vm0, %v310_v54  ;;  %vm8058_vm0 = vcmask 130048  }
  0xa6   :  { %v4534_v48 = vpop.permute.xlu0 %4533  ;;  %v165_v49 = vpop.permute.xlu1 %164 }
  0xa7   :  { %v4536_v50 = vunpack.i.h.bf16 %v4534_v48  ;;  %v4535_v51 = vunpack.i.l.bf16 %v4534_v48  ;;  %v107_v36 = vpop.permute.xlu2 %106 }
  0xa9   :  { %v167_v56 = vsel %vm8048_vm2, %v4535_v51, %v4536_v50  ;;  %v168_v60 = vsel %vm8049_vm8, %v4536_v50, %v165_v49  ;;  %vm8051_vm2 = vmmov %vm8050_vm1  ;;  %vm8053_vm8 = vcmask 121856  }
  0xaa   :  { %v3797_v57 = vpack.c.bf16 %v204_v53, %v167_v56 }
  0xac   :  { %3798 = vmatpush.bf16.msk.msra.mxu0 %vm5897_vm9, %v3797_v57 }
  0xae   :  { %v202_v58 = vpop.permute.xlu0 %201  ;;  %v4544_v59 = vpop.permute.xlu1 %4543 }
  0xaf   :  { %v205_v61 = vsel %vm8009_vm3, %v4541_v44, %v202_v58  ;;  %v4546_v62 = vunpack.i.h.bf16 %v4544_v59  ;;  %v4545_v63 = vunpack.i.l.bf16 %v4544_v59 }
  0xb0   :  { %v3813_v3 = vpack.c.bf16 %v205_v61, %v168_v60 }
  0xb1   :  { %v154_v8 = vsel %vm8050_vm1, %v4545_v63, %v4546_v62  ;;  %v155_v9 = vsel %vm8051_vm2, %v4546_v62, %v152_v47  ;;  %vm8052_vm1 = vcmask 7168   ;;  %vm8054_vm2 = vmmov %vm8053_vm8 }
  0xb2   :  { %3814 = vmatpush.bf16.msk.msra.mxu1 %vm5923_vm12, %v3813_v3  ;;  %v3800_v11 = vpack.c.bf16 %v154_v8, %v5822_v5  ;;  %v3816_v13 = vpack.c.bf16 %v155_v9, %v5827_v6  ;;  %v139_v22 = vsel %vm8052_vm1, %v4555_v16, %v4556_v15  ;;  %vm8055_vm3 = vmmov %vm8052_vm1  ;;  %vm8056_vm1 = vcmask 138240  }
  0xb4   :  { %3801 = vmatpush.bf16.msk.msra.mxu0 %vm5932_vm14, %v3800_v11  ;;  %v394_v11 = vpack.c.bf16 %v5784_v0, %v5784_v0 }
  0xb6   :  { %v4549_v17 = vpop.permute.xlu0 %4548  ;;  %v124_v18 = vpop.permute.xlu1 %123  ;;  %3817 = vmatpush.bf16.msk.msra.mxu1 %vm5941_vm15, %v3816_v13 }
  0xb7   :  { %v4551_v19 = vunpack.i.h.bf16 %v4549_v17  ;;  %v4550_v20 = vunpack.i.l.bf16 %v4549_v17 }
  0xb9   :  { %v126_v23 = vsel %vm8053_vm8, %v4550_v20, %v4551_v19  ;;  %v127_v27 = vsel %vm8054_vm2, %v4551_v19, %v124_v18  ;;  %vm8057_vm8 = vmmov %vm8056_vm1 }
  0xba   :  { %v3803_v24 = vpack.c.bf16 %v139_v22, %v126_v23  ;;  %vm8059_vm2 = vmmov %vm8058_vm0 }
  0xbc   :  { %3804 = vmatpush.bf16.msk.msra.mxu0 %vm5969_vm4, %v3803_v24 }
  0xbe   :  { %v137_v25 = vpop.permute.xlu0 %136  ;;  %v4559_v26 = vpop.permute.xlu1 %4558 }
  0xbf   :  { %v140_v29 = vsel %vm8055_vm3, %v4556_v15, %v137_v25  ;;  %v4561_v32 = vunpack.i.h.bf16 %v4559_v26  ;;  %v4560_v34 = vunpack.i.l.bf16 %v4559_v26  ;;  %vm8060_vm3 = vcmask 654336  }
  0xc0   :  { %v3819_v30 = vpack.c.bf16 %v140_v29, %v127_v27  ;;  %vm8061_vm6 = vmmov %vm8060_vm3  ;;  %v395_v15 = vpack.c.bf16 %v5789_v1, %v5789_v1 }
  0xc1   :  { %v110_v43 = vsel %vm8056_vm1, %v4561_v32, %v107_v36  ;;  %v109_v44 = vsel %vm8057_vm8, %v4560_v34, %v4561_v32  ;;  %v392_v34 = vpack.c.bf16 %v5822_v5, %v5822_v5  ;;  %v393_v36 = vpack.c.bf16 %v5827_v6, %v5827_v6 }
  0xc2   :  { %3820 = vmatpush.bf16.msk.msra.mxu1 %vm5958_vm13, %v3819_v30  ;;  %vm8016_vm8 = vcmask 64512  }
  0xc6   :  { %v4564_v37 = vpop.permute.xlu0 %4563  ;;  %v191_v38 = vpop.permute.xlu1 %190 }
  0xc7   :  { %v4566_v39 = vunpack.i.h.bf16 %v4564_v37  ;;  %v4565_v42 = vunpack.i.l.bf16 %v4564_v37 }
  0xc9   :  { %v194_v46 = vsel %vm8058_vm0, %v4566_v39, %v191_v38  ;;  %v193_v47 = vsel %vm8059_vm2, %v4565_v42, %v4566_v39  ;;  %vm8013_vm0 = vcmask 1043456   ;;  %v391_v38 = vld [vmem:[%s7994_s2] sm:$0xf]  ;;  %vm8064_vm2 = vcmask 924672  }
  0xca   :  { %v3822_v48 = vpack.c.bf16 %v194_v46, %v110_v43  ;;  %v3806_v49 = vpack.c.bf16 %v193_v47, %v109_v44  ;;  %v6084_v13 = vsel %vm8013_vm0, %v394_v11, 0  ;;  %v6092_v16 = vsel %vm8013_vm0, %v395_v15, 0 }
  0xcb   :  { %452 = vmatpush.bf16.msrb.mxu2 %v6084_v13  ;;  %465 = vmatpush.bf16.msrb.mxu3 %v6092_v16  ;;  %v6115_v37 = vsel %vm8013_vm0, %v392_v34, 0  ;;  %v6122_v39 = vsel %vm8013_vm0, %v393_v36, 0  ;;  %vm8068_vm0 = vcmask 1039360  }
  0xcc   :  { %3807 = vmatpush.bf16.msk.msra.mxu0 %vm5897_vm9, %v3806_v49  ;;  %3823 = vmatpush.bf16.msk.msra.mxu1 %vm5923_vm12, %v3822_v48  ;;  %vm8069_vm7 = vmmov %vm8068_vm0 }
  0xce   :  { %3859 = vmatmul.msk.bf16.vlgmr.msrb.gmra.mxu2 %vm8016_vm8, %v391_v38  ;;  %3860 = vmatmul.msk.bf16.vlgmr.msrb.gmra.mxu3 %vm8016_vm8, %v391_v38 }
  0xcf   :  { %3808 = vmatmul.msk.bf16.vlgmr.msra.gmra.mxu0 %vm8060_vm3, %v310_v54  ;;  %3824 = vmatmul.msk.bf16.vlgmr.msra.gmra.mxu1 %vm8061_vm6, %v310_v54  ;;  %vm8062_vm6 = vcmask 908288   ;;  %vm8065_vm3 = vmmov %vm8064_vm2 }
  0xd0   :  { %vm8063_vm1 = vmmov %vm8062_vm6  ;;  %426 = vmatpush.bf16.msrb.mxu0 %v6115_v37  ;;  %439 = vmatpush.bf16.msrb.mxu1 %v6122_v39 }
  0xdf   :  { %3857 = vmatmul.msk.bf16.vlgmr.msrb.gmra.mxu0 %vm8016_vm8, %v391_v38  ;;  %3858 = vmatmul.msk.bf16.vlgmr.msrb.gmra.mxu1 %vm8016_vm8, %v391_v38 }
 0x125   :  { %v370_v50 = vpop.f32.mrf.mxu2 }
 0x126   :  { %v6036_v61 = vmax.f32 %v370_v50, 0.0 }
 0x128   :  { %v383_v51 = vpop.f32.mrf.mxu3  ;;  %v4607_v7 = vpack.i.bf16 %v6036_v61, %v5721_v2 }
 0x129   :  { %v6038_v62 = vmax.f32 %v383_v51, 0.0 }
 0x12b   :  { %v4592_v3 = vpack.i.bf16 %v6038_v62, %v6036_v61 }
 0x12d   :  { %v372_v53 = vpop.f32.mrf.mxu2 }
 0x130   :  { %v385_v56 = vpop.f32.mrf.mxu3 }
 0x14c   :  { %v6030_v57 = vpop.f32.mrf.mxu0  ;;  %v357_v58 = vpop.f32.mrf.mxu1 }
 0x14d   :  { %v387_v59 = vmax.f32 %v6030_v57, 0.0  ;;  %v6058_v8 = vmax.f32 %v357_v58, 0.0 }
 0x14f   :  { %v4577_v60 = vpack.i.bf16 %v387_v59, %v5721_v2  ;;  %v4632_v9 = vpack.i.bf16 0.0, %v6058_v8 }
 0x151   :  { %4578 = vrot.lane.b32.xlu1 %v4577_v60, %s5724_s27  ;;  %4573 = vrot.lane.b32.xlu2 %v4577_v60, %s5722_s25 }
 0x152   :  { %4568 = vrot.lane.b32.xlu0 %v4577_v60, %s5723_s26 }
 0x154   :  { %v346_v54 = vpop.f32.mrf.mxu0  ;;  %v359_v63 = vpop.f32.mrf.mxu1 }
 0x159   :  { %4593 = vrot.lane.b32.xlu1 %v4592_v3, %s5722_s25  ;;  %4588 = vrot.lane.b32.xlu2 %v4592_v3, %s5723_s26 }
 0x15a   :  { %4583 = vrot.lane.b32.xlu0 %v4577_v60, %s5725_s28 }
 0x161   :  { %4608 = vrot.lane.b32.xlu1 %v4607_v7, %s5726_s29  ;;  %4603 = vrot.lane.b32.xlu2 %v4592_v3, %s5725_s28 }
 0x162   :  { %4598 = vrot.lane.b32.xlu0 %v4592_v3, %s5724_s27 }
 0x169   :  { %607 = vrot.lane.b32.xlu1 %v6038_v62, %s5727_s30  ;;  %595 = vrot.lane.b32.xlu2 %v6038_v62, %s5726_s29 }
 0x16a   :  { %4613 = vrot.lane.b32.xlu0 %v4607_v7, %s5727_s30 }
 0x171   :  { %4623 = vrot.lane.b32.xlu1 %v4607_v7, %s5729_s12  ;;  %4618 = vrot.lane.b32.xlu2 %v4607_v7, %s5728_s7 }
 0x172   :  { %583 = vrot.lane.b32.xlu0 %v6038_v62, %s5728_s7 }
 0x179   :  { %4633 = vrot.lane.b32.xlu1 %v4632_v9, %s5722_s25  ;;  %661 = vrot.lane.b32.xlu2 %v6038_v62, %s5729_s12 }
 0x17a   :  { %4628 = vrot.lane.b32.xlu0 %v4632_v9, %s5723_s26 }
 0x181   :  { %4648 = vrot.lane.b32.xlu1 %v4577_v60, %s5726_s29  ;;  %4638 = vrot.lane.b32.xlu2 %v4632_v9, %s5724_s27 }
 0x182   :  { %4643 = vrot.lane.b32.xlu0 %v4632_v9, %s5725_s28 }
 0x189   :  { %509 = vrot.lane.b32.xlu1 %v6058_v8, %s5727_s30  ;;  %497 = vrot.lane.b32.xlu2 %v6058_v8, %s5726_s29 }
 0x18a   :  { %4653 = vrot.lane.b32.xlu0 %v4577_v60, %s5727_s30 }
 0x191   :  { %4663 = vrot.lane.b32.xlu1 %v4577_v60, %s5729_s12  ;;  %4658 = vrot.lane.b32.xlu2 %v4577_v60, %s5728_s7 }
 0x192   :  { %485 = vrot.lane.b32.xlu0 %v6058_v8, %s5728_s7 }
 0x199   :  { %559 = vrot.lane.b32.xlu2 %v6058_v8, %s5729_s12 }
 0x1ab   :  { %v6095_v17 = vpop.permute.xlu2 %4573 }
 0x1ac   :  { %v4575_v44 = vunpack.i.l.bf16 %v6095_v17 }
 0x1b3   :  { %v4589_v0 = vpop.permute.xlu2 %4588 }
 0x1b4   :  { %v4591_v18 = vunpack.i.h.bf16 %v4589_v0  ;;  %v4590_v19 = vunpack.i.l.bf16 %v4589_v0 }
 0x1b6   :  { %v651_v20 = vsel %vm8062_vm6, %v4590_v19, %v4591_v18  ;;  %vm8066_vm6 = vcmask 916480  }
 0x1b7   :  { %v3895_v22 = vpack.c.bf16 1.0, %v651_v20 }
 0x1b9   :  { %3896 = vmatpush.bf16.msk.msra.mxu2 %vm5878_vm5, %v3895_v22 }
 0x1bb   :  { %v4604_v23 = vpop.permute.xlu2 %4603 }
 0x1bc   :  { %v4606_v46 = vunpack.i.h.bf16 %v4604_v23  ;;  %v4605_v47 = vunpack.i.l.bf16 %v4604_v23 }
 0x1be   :  { %v627_v7 = vsel %vm8068_vm0, %v4605_v47, %v4606_v46 }
 0x1bf   :  { %v3901_v19 = vpack.c.bf16 %v627_v7, %v6036_v61 }
 0x1c3   :  { %v6100_v24 = vpop.permute.xlu1 %4578  ;;  %v596_v29 = vpop.permute.xlu2 %595 }
 0x1c4   :  { %v6102_v1 = vpop.permute.xlu0 %4568  ;;  %v4580_v49 = vunpack.i.l.bf16 %v6100_v24 }
 0x1c5   :  { %v4570_v25 = vunpack.i.l.bf16 %v6102_v1 }
 0x1c7   :  { %v652_v26 = vsel %vm8063_vm1, %v4591_v18, %v4570_v25  ;;  %vm8067_vm1 = vmmov %vm8066_vm6 }
 0x1c8   :  { %v3911_v27 = vpack.c.bf16 1.0, %v652_v26 }
 0x1ca   :  { %3912 = vmatpush.bf16.msk.msra.mxu3 %vm5906_vm10, %v3911_v27 }
 0x1cb   :  { %v4594_v30 = vpop.permute.xlu1 %4593  ;;  %v4619_v42 = vpop.permute.xlu2 %4618 }
 0x1cc   :  { %v6108_v32 = vpop.permute.xlu0 %4583  ;;  %v4596_v5 = vunpack.i.h.bf16 %v4594_v30  ;;  %v4595_v6 = vunpack.i.l.bf16 %v4594_v30  ;;  %v4620_v38 = vunpack.i.l.bf16 %v4619_v42 }
 0x1cd   :  { %v4585_v50 = vunpack.i.l.bf16 %v6108_v32 }
 0x1ce   :  { %v639_v56 = vsel %vm8064_vm2, %v4595_v6, %v4596_v5  ;;  %v640_v58 = vsel %vm8065_vm3, %v4596_v5, %v4575_v44  ;;  %vm8072_vm2 = vcmask 7168  }
 0x1cf   :  { %v628_v9 = vsel %vm8069_vm7, %v4606_v46, %v4585_v50  ;;  %vm8070_vm7 = vcmask 121856   ;;  %vm8073_vm3 = vmmov %vm8072_vm2 }
 0x1d0   :  { %v3917_v20 = vpack.c.bf16 %v628_v9, %v6038_v62  ;;  %vm8071_vm0 = vmmov %vm8070_vm7  ;;  %v4621_v62 = vunpack.i.h.bf16 %v4619_v42 }
 0x1d3   :  { %v4609_v43 = vpop.permute.xlu1 %4608  ;;  %v662_v22 = vpop.permute.xlu2 %661 }
 0x1d4   :  { %v4599_v48 = vpop.permute.xlu0 %4598  ;;  %v4611_v11 = vunpack.i.h.bf16 %v4609_v43  ;;  %v4610_v15 = vunpack.i.l.bf16 %v4609_v43 }
 0x1d5   :  { %v4601_v51 = vunpack.i.h.bf16 %v4599_v48  ;;  %v4600_v53 = vunpack.i.l.bf16 %v4599_v48 }
 0x1d6   :  { %v597_v26 = vsel %vm8070_vm7, %v4610_v15, %v4611_v11  ;;  %v598_v27 = vsel %vm8071_vm0, %v4611_v11, %v596_v29  ;;  %v4576_v11 = vunpack.i.h.bf16 %v6095_v17 }
 0x1d7   :  { %v674_v60 = vsel %vm8066_vm6, %v4601_v51, %v4580_v49  ;;  %v673_v54 = vsel %vm8067_vm1, %v4600_v53, %v4601_v51  ;;  %vm8074_vm6 = vcmask 138240   ;;  %vm8075_vm1 = vcmask 130048   ;;  %v396_v53 = vld [vmem:[%s7995_s3] sm:$0xff] }
 0x1d8   :  { %v3898_v63 = vpack.c.bf16 %v673_v54, %v639_v56  ;;  %v3914_v3 = vpack.c.bf16 %v674_v60, %v640_v58  ;;  %v585_v29 = vsel %vm8074_vm6, %v4620_v38, %v4621_v62  ;;  %vm8076_vm7 = vmmov %vm8075_vm1  ;;  %v5731_v51 = vmov 0   ;;  %v6170_v56 = vld [vmem:[%s7993_s1 + $0x4] sm:$0xf] }
 0x1d9   :  { %vm8077_vm0 = vmmov %vm8074_vm6  ;;  %4667 = vset.pattern.permute.xlu0 %v5731_v51  ;;  %v4571_v60 = vunpack.i.h.bf16 %v6102_v1  ;;  %vm8080_vm6 = vcmask 908288  }
 0x1da   :  { %3899 = vmatpush.bf16.msk.msra.mxu2 %vm5897_vm9, %v3898_v63  ;;  %3915 = vmatpush.bf16.msk.msra.mxu3 %vm5923_vm12, %v3914_v3 }
 0x1db   :  { %v608_v0 = vpop.permute.xlu1 %607  ;;  %v4639_v49 = vpop.permute.xlu2 %4638  ;;  %399 = vperm.xlu0 %4667, %v396_v53  }
 0x1dc   :  { %v4614_v18 = vpop.permute.xlu0 %4613  ;;  %v4641_v15 = vunpack.i.h.bf16 %v4639_v49 }
 0x1dd   :  { %v4616_v23 = vunpack.i.h.bf16 %v4614_v18  ;;  %v4615_v25 = vunpack.i.l.bf16 %v4614_v18 }
 0x1de   :  { %3902 = vmatpush.bf16.msk.msra.mxu2 %vm5932_vm14, %v3901_v19  ;;  %3918 = vmatpush.bf16.msk.msra.mxu3 %vm5941_vm15, %v3917_v20 }
 0x1df   :  { %v610_v30 = vsel %vm8072_vm2, %v4616_v23, %v608_v0  ;;  %v609_v34 = vsel %vm8073_vm3, %v4615_v25, %v4616_v23  ;;  %vm8078_vm2 = vcmask 654336   ;;  %v4640_v0 = vunpack.i.l.bf16 %v4639_v49 }
 0x1e0   :  { %v3904_v61 = vpack.c.bf16 %v609_v34, %v597_v26  ;;  %v3920_v36 = vpack.c.bf16 %v610_v30, %v598_v27  ;;  %vm8079_vm3 = vmmov %vm8078_vm2 }
 0x1e2   :  { %3905 = vmatpush.bf16.msk.msra.mxu2 %vm5969_vm4, %v3904_v61  ;;  %3921 = vmatpush.bf16.msk.msra.mxu3 %vm5958_vm13, %v3920_v36 }
 0x1e3   :  { %v4624_v5 = vpop.permute.xlu1 %4623  ;;  %v498_v23 = vpop.permute.xlu2 %497 }
 0x1e4   :  { %v4626_v6 = vunpack.i.h.bf16 %v4624_v5  ;;  %v4625_v43 = vunpack.i.l.bf16 %v4624_v5  ;;  %v584_v44 = vpop.permute.xlu0 %583 }
 0x1e5   :  { %v586_v48 = vsel %vm8077_vm0, %v4621_v62, %v584_v44 }
 0x1e6   :  { %v663_v46 = vsel %vm8075_vm1, %v4625_v43, %v4626_v6  ;;  %v664_v47 = vsel %vm8076_vm7, %v4626_v6, %v662_v22  ;;  %vm8081_vm1 = vmmov %vm8080_vm6  ;;  %v4581_v22 = vunpack.i.h.bf16 %v6100_v24  ;;  %vm8082_vm7 = vcmask 924672  }
 0x1e7   :  { %v3923_v42 = vpack.c.bf16 %v664_v47, %v586_v48  ;;  %v3907_v50 = vpack.c.bf16 %v663_v46, %v585_v29  ;;  %vm8083_vm0 = vmmov %vm8082_vm7  ;;  %v4586_v24 = vunpack.i.h.bf16 %v6108_v32 }
 0x1e9   :  { %3908 = vmatpush.bf16.msk.msra.mxu2 %vm5897_vm9, %v3907_v50  ;;  %3924 = vmatpush.bf16.msk.msra.mxu3 %vm5923_vm12, %v3923_v42 }
 0x1eb   :  { %v4634_v58 = vpop.permute.xlu1 %4633  ;;  %v4659_v32 = vpop.permute.xlu2 %4658 }
 0x1ec   :  { %v4629_v54 = vpop.permute.xlu0 %4628  ;;  %3909 = vmatmul.msk.bf16.vlgmr.msra.gmra.mxu2 %vm8078_vm2, %v6170_v56  ;;  %3925 = vmatmul.msk.bf16.vlgmr.msra.gmra.mxu3 %vm8079_vm3, %v6170_v56  ;;  %v4636_v63 = vunpack.i.h.bf16 %v4634_v58  ;;  %v4635_v3 = vunpack.i.l.bf16 %v4634_v58  ;;  %vm8084_vm2 = vcmask 916480   ;;  %v4661_v58 = vunpack.i.h.bf16 %v4659_v32 }
 0x1ed   :  { %v4631_v7 = vunpack.i.h.bf16 %v4629_v54  ;;  %v4630_v9 = vunpack.i.l.bf16 %v4629_v54  ;;  %v571_v17 = vsel %vm8084_vm2, %v4581_v22, %v4640_v0  ;;  %vm8085_vm3 = vmmov %vm8084_vm2  ;;  %vm8090_vm2 = vcmask 7168   ;;  %v441_v22 = vpop.f32.mrf.mxu1 }
 0x1ee   :  { %v537_v25 = vsel %vm8082_vm7, %v4576_v11, %v4635_v3  ;;  %v538_v26 = vsel %vm8083_vm0, %v4635_v3, %v4636_v63  ;;  %v572_v27 = vsel %vm8085_vm3, %v4640_v0, %v4641_v15  ;;  %vm8088_vm7 = vcmask 121856   ;;  %vm8091_vm3 = vmmov %vm8090_vm2 }
 0x1ef   :  { %v549_v18 = vsel %vm8080_vm6, %v4571_v60, %v4630_v9  ;;  %v550_v19 = vsel %vm8081_vm1, %v4630_v9, %v4631_v7  ;;  %v3866_v61 = vpack.c.bf16 %v571_v17, %v537_v25  ;;  %v3882_v36 = vpack.c.bf16 %v572_v27, %v538_v26  ;;  %vm8089_vm0 = vmmov %vm8088_vm7  ;;  %v467_v25 = vpop.f32.mrf.mxu3 }
 0x1f0   :  { %v3863_v1 = vpack.c.bf16 1.0, %v549_v18  ;;  %v3879_v20 = vpack.c.bf16 1.0, %v550_v19  ;;  %vm8086_vm6 = vcmask 1039360   ;;  %v4660_v60 = vunpack.i.l.bf16 %v4659_v32 }
 0x1f1   :  { %vm8087_vm1 = vmmov %vm8086_vm6 }
 0x1f2   :  { %3864 = vmatpush.bf16.msk.msra.mxu0 %vm5878_vm5, %v3863_v1  ;;  %3880 = vmatpush.bf16.msk.msra.mxu1 %vm5906_vm10, %v3879_v20  ;;  %v428_v20 = vpop.f32.mrf.mxu0 }
 0x1f3   :  { %v4649_v30 = vpop.permute.xlu1 %4648  ;;  %v560_v9 = vpop.permute.xlu2 %559 }
 0x1f4   :  { %v4644_v34 = vpop.permute.xlu0 %4643  ;;  %v4651_v29 = vunpack.i.h.bf16 %v4649_v30  ;;  %v4650_v46 = vunpack.i.l.bf16 %v4649_v30 }
 0x1f5   :  { %v4646_v62 = vunpack.i.h.bf16 %v4644_v34  ;;  %v4645_v38 = vunpack.i.l.bf16 %v4644_v34  ;;  %v443_v17 = vpop.f32.mrf.mxu1 }
 0x1f6   :  { %3867 = vmatpush.bf16.msk.msra.mxu0 %vm5897_vm9, %v3866_v61  ;;  %3883 = vmatpush.bf16.msk.msra.mxu1 %vm5923_vm12, %v3882_v36  ;;  %v499_v50 = vsel %vm8088_vm7, %v4650_v46, %v4651_v29  ;;  %v500_v57 = vsel %vm8089_vm0, %v4651_v29, %v498_v23  ;;  %v454_v23 = vpop.f32.mrf.mxu2 }
 0x1f7   :  { %v525_v5 = vsel %vm8086_vm6, %v4586_v24, %v4645_v38  ;;  %v526_v6 = vsel %vm8087_vm1, %v4645_v38, %v4646_v62  ;;  %vm8092_vm6 = vcmask 138240   ;;  %vm8093_vm1 = vcmask 130048   ;;  %v469_v30 = vpop.f32.mrf.mxu3 }
 0x1f8   :  { %v3869_v43 = vpack.c.bf16 %v525_v5, %v387_v59  ;;  %v3885_v44 = vpack.c.bf16 %v526_v6, %v6058_v8  ;;  %v487_v11 = vsel %vm8092_vm6, %v4660_v60, %v4661_v58  ;;  %vm8094_vm7 = vmmov %vm8093_vm1 }
 0x1f9   :  { %vm8095_vm0 = vmmov %vm8092_vm6  ;;  %vm8101_vm6 = vcmask 908288  }
 0x1fa   :  { %3870 = vmatpush.bf16.msk.msra.mxu0 %vm5932_vm14, %v3869_v43  ;;  %3886 = vmatpush.bf16.msk.msra.mxu1 %vm5941_vm15, %v3885_v44  ;;  %v430_v26 = vpop.f32.mrf.mxu0 }
 0x1fb   :  { %v510_v47 = vpop.permute.xlu1 %509 }
 0x1fc   :  { %v4654_v48 = vpop.permute.xlu0 %4653 }
 0x1fd   :  { %v4656_v49 = vunpack.i.h.bf16 %v4654_v48  ;;  %v4655_v42 = vunpack.i.l.bf16 %v4654_v48 }
 0x1fe   :  { %v456_v27 = vpop.f32.mrf.mxu2 }
 0x1ff   :  { %v512_v59 = vsel %vm8090_vm2, %v4656_v49, %v510_v47  ;;  %v511_v8 = vsel %vm8091_vm3, %v4655_v42, %v4656_v49  ;;  %vm8096_vm2 = vcmask 654336  }
 0x200   :  { %v3872_v51 = vpack.c.bf16 %v511_v8, %v499_v50  ;;  %v3888_v53 = vpack.c.bf16 %v512_v59, %v500_v57  ;;  %vm8097_vm3 = vmmov %vm8096_vm2 }
 0x202   :  { %3873 = vmatpush.bf16.msk.msra.mxu0 %vm5969_vm4, %v3872_v51  ;;  %3889 = vmatpush.bf16.msk.msra.mxu1 %vm5958_vm13, %v3888_v53 }
 0x203   :  { %v4664_v54 = vpop.permute.xlu1 %4663 }
 0x204   :  { %v4666_v63 = vunpack.i.h.bf16 %v4664_v54  ;;  %v4665_v3 = vunpack.i.l.bf16 %v4664_v54  ;;  %v486_v7 = vpop.permute.xlu0 %485 }
 0x205   :  { %v488_v18 = vsel %vm8095_vm0, %v4661_v58, %v486_v7 }
 0x206   :  { %v561_v15 = vsel %vm8093_vm1, %v4665_v3, %v4666_v63  ;;  %v562_v0 = vsel %vm8094_vm7, %v4666_v63, %v560_v9  ;;  %vm8102_vm1 = vmmov %vm8101_vm6  ;;  %vm8103_vm7 = vcmask 916480  }
 0x207   :  { %v3891_v19 = vpack.c.bf16 %v562_v0, %v488_v18  ;;  %v3875_v1 = vpack.c.bf16 %v561_v15, %v487_v11  ;;  %vm8104_vm0 = vmmov %vm8103_vm7 }
 0x209   :  { %3876 = vmatpush.bf16.msk.msra.mxu0 %vm5897_vm9, %v3875_v1  ;;  %3892 = vmatpush.bf16.msk.msra.mxu1 %vm5923_vm12, %v3891_v19 }
 0x20c   :  { %3877 = vmatmul.msk.bf16.vlgmr.msra.gmra.mxu0 %vm8096_vm2, %v6170_v56  ;;  %3893 = vmatmul.msk.bf16.vlgmr.msra.gmra.mxu1 %vm8097_vm3, %v6170_v56  ;;  %vm8105_vm2 = vcmask 924672  }
 0x20d   :  { %vm8106_vm3 = vmmov %vm8105_vm2 }
 0x24d   :  { %v400_v62 = vpop.permute.xlu0 %399 }
 0x24e   :  { %v429_v38 = vadd.f32 %v428_v20, %v400_v62  ;;  %v455_v43 = vadd.f32 %v454_v23, %v400_v62  ;;  %v468_v44 = vadd.f32 %v467_v25, %v400_v62  ;;  %v442_v8 = vadd.f32 %v441_v22, %v400_v62 }
 0x26f   :  { %v737_v34 = vpop.f32.mrf.mxu2  ;;  %v750_v61 = vpop.f32.mrf.mxu3 }
 0x270   :  { %v738_v29 = vadd.f32 %v737_v34, %v455_v43  ;;  %v751_v46 = vadd.f32 %v750_v61, %v468_v44 }
 0x272   :  { %v6230_v42 = vmax.f32 %v738_v29, 0.0  ;;  %v6232_v50 = vmax.f32 %v751_v46, 0.0 }
 0x274   :  { %8098 = vst [vmem:[#allocation4_spill] sm:$0xff] %v6230_v42  ;;  %v4698_v57 = vpack.i.bf16 %v6232_v50, %v6230_v42  ;;  %v4718_v59 = vpack.i.bf16 %v6230_v42, %v5721_v2  ;;  %v4733_v53 = vpack.i.bf16 0.0, %v6232_v50 }
 0x275   :  { %8099 = vst [vmem:[#allocation5_spill] sm:$0xff] %v6232_v50 }
 0x277   :  { %v739_v36 = vpop.f32.mrf.mxu2  ;;  %v752_v24 = vpop.f32.mrf.mxu3 }
 0x289   :  { %v711_v5 = vpop.f32.mrf.mxu0  ;;  %v724_v6 = vpop.f32.mrf.mxu1 }
 0x28a   :  { %v712_v32 = vadd.f32 %v711_v5, %v429_v38  ;;  %v725_v51 = vadd.f32 %v724_v6, %v442_v8 }
 0x28c   :  { %v6223_v56 = vmax.f32 %v712_v32, 0.0  ;;  %v6248_v58 = vmax.f32 %v725_v51, 0.0 }
 0x28e   :  { %v4683_v47 = vpack.i.bf16 %v6223_v56, %v5721_v2  ;;  %8100 = vst [vmem:[#allocation6_spill] sm:$0xff] %v6248_v58  ;;  %v4748_v2 = vpack.i.bf16 0.0, %v6248_v58  ;;  %v4778_v60 = vpack.i.bf16 %v6248_v58, %v6223_v56 }
 0x290   :  { %4684 = vrot.lane.b32.xlu0 %v4683_v47, %s5725_s28  ;;  %4679 = vrot.lane.b32.xlu1 %v4683_v47, %s5724_s27 }
 0x291   :  { %4669 = vrot.lane.b32.xlu2 %v4683_v47, %s5723_s26  ;;  %v713_v48 = vpop.f32.mrf.mxu0  ;;  %v726_v49 = vpop.f32.mrf.mxu1 }
 0x298   :  { %4699 = vrot.lane.b32.xlu0 %v4698_v57, %s5724_s27  ;;  %4689 = vrot.lane.b32.xlu1 %v4698_v57, %s5723_s26 }
 0x299   :  { %4674 = vrot.lane.b32.xlu2 %v4683_v47, %s5722_s25 }
 0x2a0   :  { %4719 = vrot.lane.b32.xlu0 %v4718_v59, %s5727_s30  ;;  %4694 = vrot.lane.b32.xlu1 %v4698_v57, %s5722_s25 }
 0x2a1   :  { %4704 = vrot.lane.b32.xlu2 %v4698_v57, %s5725_s28 }
 0x2a8   :  { %4734 = vrot.lane.b32.xlu0 %v4733_v53, %s5728_s7  ;;  %4709 = vrot.lane.b32.xlu1 %v4718_v59, %s5726_s29 }
 0x2a9   :  { %4714 = vrot.lane.b32.xlu2 %v4733_v53, %s5726_s29 }
 0x2b0   :  { %4749 = vrot.lane.b32.xlu0 %v4748_v2, %s5723_s26  ;;  %4724 = vrot.lane.b32.xlu1 %v4733_v53, %s5727_s30 }
 0x2b1   :  { %4729 = vrot.lane.b32.xlu2 %v4718_v59, %s5728_s7 }
 0x2b8   :  { %4764 = vrot.lane.b32.xlu0 %v4748_v2, %s5725_s28  ;;  %4739 = vrot.lane.b32.xlu1 %v4718_v59, %s5729_s12 }
 0x2b9   :  { %4744 = vrot.lane.b32.xlu2 %v4733_v53, %s5729_s12 }
 0x2c0   :  { %4779 = vrot.lane.b32.xlu0 %v4778_v60, %s5728_s7  ;;  %4754 = vrot.lane.b32.xlu1 %v4748_v2, %s5722_s25 }
 0x2c1   :  { %4759 = vrot.lane.b32.xlu2 %v4748_v2, %s5724_s27 }
 0x2c8   :  { %4769 = vrot.lane.b32.xlu1 %v4778_v60, %s5726_s29 }
 0x2c9   :  { %4774 = vrot.lane.b32.xlu2 %v4778_v60, %s5727_s30 }
 0x2d0   :  { %4784 = vrot.lane.b32.xlu1 %v4778_v60, %s5729_s12 }
 0x2eb   :  { %v6265_v54 = vpop.permute.xlu2 %4669 }
 0x2ec   :  { %v4671_v0 = vunpack.i.l.bf16 %v6265_v54 }
 0x2f3   :  { %v6267_v63 = vpop.permute.xlu2 %4674 }
 0x2f4   :  { %v4676_v27 = vunpack.i.l.bf16 %v6267_v63 }
 0x2fb   :  { %v4705_v9 = vpop.permute.xlu2 %4704 }
 0x2fc   :  { %v4707_v30 = vunpack.i.h.bf16 %v4705_v9  ;;  %v4706_v34 = vunpack.i.l.bf16 %v4705_v9 }
 0x302   :  { %v6269_v3 = vpop.permute.xlu0 %4684  ;;  %v6271_v7 = vpop.permute.xlu1 %4679 }
 0x303   :  { %v6274_v1 = vpop.permute.xlu2 %4714  ;;  %v4686_v24 = vunpack.i.l.bf16 %v6269_v3  ;;  %v4681_v62 = vunpack.i.l.bf16 %v6271_v7 }
 0x30a   :  { %v4700_v11 = vpop.permute.xlu0 %4699  ;;  %v4690_v15 = vpop.permute.xlu1 %4689 }
 0x30b   :  { %v4692_v18 = vunpack.i.h.bf16 %v4690_v15  ;;  %v4691_v19 = vunpack.i.l.bf16 %v4690_v15  ;;  %v4702_v26 = vunpack.i.h.bf16 %v4700_v11  ;;  %v4701_v17 = vunpack.i.l.bf16 %v4700_v11  ;;  %v4730_v49 = vpop.permute.xlu2 %4729 }
 0x30d   :  { %v938_v20 = vsel %vm8101_vm6, %v4691_v19, %v4692_v18  ;;  %v939_v22 = vsel %vm8102_vm1, %v4692_v18, %v4671_v0  ;;  %v960_v6 = vsel %vm8103_vm7, %v4701_v17, %v4702_v26  ;;  %v961_v43 = vsel %vm8104_vm0, %v4702_v26, %v4681_v62 }
 0x30e   :  { %v3960_v23 = vpack.c.bf16 1.0, %v938_v20  ;;  %v3976_v25 = vpack.c.bf16 1.0, %v939_v22  ;;  %vm8107_vm6 = vcmask 1039360   ;;  %vm8109_vm7 = vcmask 7168  }
 0x30f   :  { %v914_v47 = vsel %vm8107_vm6, %v4706_v34, %v4707_v30  ;;  %vm8108_vm1 = vmmov %vm8107_vm6  ;;  %vm8110_vm0 = vcmask 121856   ;;  %v4672_v22 = vunpack.i.h.bf16 %v6265_v54  ;;  %v4716_v17 = vunpack.i.l.bf16 %v6274_v1 }
 0x310   :  { %3961 = vmatpush.bf16.msk.msrb.mxu2 %vm5878_vm5, %v3960_v23  ;;  %3977 = vmatpush.bf16.msk.msrb.mxu3 %vm5906_vm10, %v3976_v25  ;;  %v915_v48 = vsel %vm8108_vm1, %v4707_v30, %v4686_v24  ;;  %v3966_v53 = vpack.c.bf16 %v914_v47, %v6230_v42  ;;  %vm8113_vm6 = vmmov %vm8109_vm7  ;;  %v4732_v54 = vunpack.i.h.bf16 %v4730_v49  ;;  %v6331_v47 = vld [vmem:[#allocation3] sm:$0xff] }
 0x311   :  { %v3982_v2 = vpack.c.bf16 %v915_v48, %v6232_v50  ;;  %vm8114_vm1 = vmmov %vm8110_vm0 }
 0x312   :  { %v4720_v61 = vpop.permute.xlu0 %4719  ;;  %v4695_v36 = vpop.permute.xlu1 %4694 }
 0x313   :  { %v4697_v38 = vunpack.i.h.bf16 %v4695_v36  ;;  %v4696_v5 = vunpack.i.l.bf16 %v4695_v36  ;;  %v4722_v57 = vunpack.i.h.bf16 %v4720_v61  ;;  %v4721_v59 = vunpack.i.l.bf16 %v4720_v61  ;;  %v6307_v18 = vpop.permute.xlu2 %4744 }
 0x315   :  { %v926_v44 = vsel %vm8105_vm2, %v4696_v5, %v4697_v38  ;;  %v927_v32 = vsel %vm8106_vm3, %v4697_v38, %v4676_v27  ;;  %v896_v11 = vsel %vm8109_vm7, %v4721_v59, %v4722_v57  ;;  %vm8111_vm2 = vcmask 908288  }
 0x316   :  { %v3963_v29 = vpack.c.bf16 %v960_v6, %v926_v44  ;;  %v3979_v46 = vpack.c.bf16 %v961_v43, %v927_v32  ;;  %vm8112_vm3 = vmmov %vm8111_vm2  ;;  %v4731_v38 = vunpack.i.l.bf16 %v4730_v49  ;;  %v4746_v43 = vunpack.i.l.bf16 %v6307_v18 }
 0x317   :  { %vm8115_vm7 = vcmask 138240  }
 0x318   :  { %3964 = vmatpush.bf16.msk.msrb.mxu2 %vm5897_vm9, %v3963_v29  ;;  %3980 = vmatpush.bf16.msk.msrb.mxu3 %vm5923_vm12, %v3979_v46  ;;  %v6329_v46 = vld [vmem:[%s7992_s0 + $0x10] sm:$0xff]  ;;  %v872_v49 = vsel %vm8115_vm7, %v4731_v38, %v4732_v54 }
 0x319   :  { %v4788_v48 = vpack.i.bf16 %v6329_v46, %v6331_v47 }
 0x31a   :  { %v6295_v8 = vpop.permute.xlu0 %4734  ;;  %v4710_v51 = vpop.permute.xlu1 %4709 }
 0x31b   :  { %v4712_v60 = vunpack.i.h.bf16 %v4710_v51  ;;  %v4711_v9 = vunpack.i.l.bf16 %v4710_v51  ;;  %v4736_v5 = vunpack.i.l.bf16 %v6295_v8  ;;  %v4760_v29 = vpop.permute.xlu2 %4759  ;;  %4789 = vrot.lane.b32.xlu0 %v4788_v48, %s5723_s26  ;;  %4799 = vrot.lane.b32.xlu1 %v4788_v48, %s5724_s27 }
 0x31c   :  { %3967 = vmatpush.bf16.msk.msrb.mxu2 %vm5932_vm14, %v3966_v53  ;;  %3983 = vmatpush.bf16.msk.msrb.mxu3 %vm5941_vm15, %v3982_v2 }
 0x31d   :  { %v884_v15 = vsel %vm8110_vm0, %v4711_v9, %v4712_v60  ;;  %v885_v61 = vsel %vm8114_vm1, %v4712_v60, %v4716_v17  ;;  %vm8116_vm0 = vmmov %vm8115_vm7  ;;  %4794 = vrot.lane.b32.xlu2 %v4788_v48, %s5722_s25  ;;  %v6349_v9 = vld [vmem:[%s7993_s1 + $0x8] sm:$0xf]  ;;  %vm8121_vm7 = vcmask 916480  }
 0x31e   :  { %v3969_v0 = vpack.c.bf16 %v896_v11, %v884_v15  ;;  %v4762_v11 = vunpack.i.h.bf16 %v4760_v29  ;;  %v4761_v15 = vunpack.i.l.bf16 %v4760_v29 }
 0x320   :  { %3970 = vmatpush.bf16.msk.msrb.mxu2 %vm5969_vm4, %v3969_v0  ;;  %v4677_v0 = vunpack.i.h.bf16 %v6267_v63 }
 0x322   :  { %v4750_v19 = vpop.permute.xlu0 %4749  ;;  %v6309_v20 = vpop.permute.xlu1 %4724 }
 0x323   :  { %v4752_v23 = vunpack.i.h.bf16 %v4750_v19  ;;  %v4751_v25 = vunpack.i.l.bf16 %v4750_v19  ;;  %v4726_v26 = vunpack.i.l.bf16 %v6309_v20  ;;  %v4682_v19 = vunpack.i.h.bf16 %v6271_v7  ;;  %4804 = vrot.lane.b32.xlu0 %v4788_v48, %s5725_s28 }
 0x324   :  { %v4687_v7 = vunpack.i.h.bf16 %v6269_v3  ;;  %v4727_v3 = vunpack.i.h.bf16 %v6309_v20  ;;  %v4717_v48 = vunpack.i.h.bf16 %v6274_v1 }
 0x325   :  { %v836_v27 = vsel %vm8111_vm2, %v4672_v22, %v4751_v25  ;;  %v837_v30 = vsel %vm8112_vm3, %v4751_v25, %v4752_v23  ;;  %v897_v34 = vsel %vm8113_vm6, %v4722_v57, %v4726_v26  ;;  %v873_v57 = vsel %vm8116_vm0, %v4732_v54, %v4736_v5  ;;  %vm8122_vm0 = vmmov %vm8121_vm7 }
 0x326   :  { %v3928_v36 = vpack.c.bf16 1.0, %v836_v27  ;;  %v3944_v24 = vpack.c.bf16 1.0, %v837_v30  ;;  %v3985_v62 = vpack.c.bf16 %v897_v34, %v885_v61  ;;  %vm8117_vm2 = vcmask 130048   ;;  %v6360_v27 = vld [vmem:[%s7992_s0 + $0x18] sm:$0xff] }
 0x327   :  { %vm8118_vm3 = vmmov %vm8117_vm2  ;;  %vm8119_vm6 = vcmask 654336   ;;  %v6364_v63 = vpack.i.bf16 %v6331_v47, %v6360_v27  ;;  %v858_v30 = vsel %vm8121_vm7, %v4682_v19, %v4761_v15  ;;  %v859_v34 = vsel %vm8122_vm0, %v4761_v15, %v4762_v11 }
 0x328   :  { %3929 = vmatpush.bf16.msk.msrb.mxu0 %vm5878_vm5, %v3928_v36  ;;  %3945 = vmatpush.bf16.msk.msrb.mxu1 %vm5906_vm10, %v3944_v24  ;;  %vm8120_vm1 = vmmov %vm8119_vm6  ;;  %v4775_v24 = vpop.permute.xlu2 %4774  ;;  %vm8127_vm7 = vcmask 7168   ;;  %v4747_v19 = vunpack.i.h.bf16 %v6307_v18 }
 0x329   :  { %3986 = vmatpush.bf16.msk.msrb.mxu3 %vm5958_vm13, %v3985_v62  ;;  %4814 = vrot.lane.b32.xlu1 %v6364_v63, %s5722_s25  ;;  %vm8128_vm0 = vmmov %vm8127_vm7 }
 0x32a   :  { %v4740_v6 = vpop.permute.xlu1 %4739  ;;  %v4765_v60 = vpop.permute.xlu0 %4764  ;;  %4819 = vrot.lane.b32.xlu2 %v6364_v63, %s5724_s27 }
 0x32b   :  { %v4742_v44 = vunpack.i.h.bf16 %v4740_v6  ;;  %v4741_v32 = vunpack.i.l.bf16 %v4740_v6  ;;  %v4767_v22 = vunpack.i.h.bf16 %v4765_v60  ;;  %v4766_v25 = vunpack.i.l.bf16 %v4765_v60  ;;  %4809 = vrot.lane.b32.xlu0 %v6364_v63, %s5723_s26 }
 0x32c   :  { %v4777_v6 = vunpack.i.h.bf16 %v4775_v24 }
 0x32d   :  { %v950_v59 = vsel %vm8117_vm2, %v4741_v32, %v4742_v44  ;;  %v951_v51 = vsel %vm8118_vm3, %v4742_v44, %v4746_v43  ;;  %vm8123_vm2 = vcmask 924672   ;;  %v4776_v43 = vunpack.i.l.bf16 %v4775_v24 }
 0x32e   :  { %v3972_v53 = vpack.c.bf16 %v950_v59, %v872_v49  ;;  %v3988_v2 = vpack.c.bf16 %v951_v51, %v873_v57  ;;  %vm8124_vm3 = vmmov %vm8123_vm2 }
 0x32f   :  { %v798_v59 = vsel %vm8127_vm7, %v4727_v3, %v4776_v43  ;;  %v799_v20 = vsel %vm8128_vm0, %v4776_v43, %v4777_v6  ;;  %vm8133_vm7 = vcmask 130048  }
 0x330   :  { %3973 = vmatpush.bf16.msk.msrb.mxu2 %vm5897_vm9, %v3972_v53  ;;  %3989 = vmatpush.bf16.msk.msrb.mxu3 %vm5923_vm12, %v3988_v2  ;;  %vm8134_vm0 = vmmov %vm8133_vm7 }
 0x332   :  { %v4755_v23 = vpop.permute.xlu1 %4754  ;;  %v4780_v2 = vpop.permute.xlu0 %4779 }
 0x333   :  { %v4757_v26 = vunpack.i.h.bf16 %v4755_v23  ;;  %v4756_v17 = vunpack.i.l.bf16 %v4755_v23  ;;  %3974 = vmatmul.msk.bf16.vlgmr.msrb.gmra.mxu2 %vm8119_vm6, %v6349_v9  ;;  %3990 = vmatmul.msk.bf16.vlgmr.msrb.gmra.mxu3 %vm8120_vm1, %v6349_v9  ;;  %vm8125_vm6 = vcmask 1039360   ;;  %v4782_v1 = vunpack.i.h.bf16 %v4780_v2 }
 0x334   :  { %v812_v38 = vsel %vm8125_vm6, %v4687_v7, %v4766_v25  ;;  %vm8126_vm1 = vmmov %vm8125_vm6  ;;  %v4781_v15 = vunpack.i.l.bf16 %v4780_v2  ;;  %vm8131_vm6 = vcmask 138240  }
 0x335   :  { %v824_v61 = vsel %vm8123_vm2, %v4677_v0, %v4756_v17  ;;  %v825_v36 = vsel %vm8124_vm3, %v4756_v17, %v4757_v26  ;;  %v813_v5 = vsel %vm8126_vm1, %v4766_v25, %v4767_v22  ;;  %v3934_v32 = vpack.c.bf16 %v812_v38, %v6223_v56  ;;  %vm8132_vm1 = vmmov %vm8131_vm6 }
 0x336   :  { %v3931_v62 = vpack.c.bf16 %v858_v30, %v824_v61  ;;  %v3947_v54 = vpack.c.bf16 %v859_v34, %v825_v36  ;;  %v3950_v29 = vpack.c.bf16 %v813_v5, %v6248_v58  ;;  %vm8129_vm2 = vcmask 121856  }
 0x337   :  { %vm8130_vm3 = vmmov %vm8129_vm2  ;;  %v4737_v22 = vunpack.i.h.bf16 %v6295_v8  ;;  %v775_v17 = vsel %vm8132_vm1, %v4781_v15, %v4782_v1 }
 0x338   :  { %3932 = vmatpush.bf16.msk.msrb.mxu0 %vm5897_vm9, %v3931_v62  ;;  %3948 = vmatpush.bf16.msk.msrb.mxu1 %vm5923_vm12, %v3947_v54 }
 0x339   :  { %v774_v26 = vsel %vm8131_vm6, %v4737_v22, %v4781_v15  ;;  %vm8137_vm6 = vcmask 908288  }
 0x33a   :  { %v4770_v44 = vpop.permute.xlu1 %4769  ;;  %vm8138_vm1 = vmmov %vm8137_vm6 }
 0x33b   :  { %v4772_v49 = vunpack.i.h.bf16 %v4770_v44  ;;  %v4771_v57 = vunpack.i.l.bf16 %v4770_v44 }
 0x33c   :  { %3935 = vmatpush.bf16.msk.msrb.mxu0 %vm5932_vm14, %v3934_v32  ;;  %3951 = vmatpush.bf16.msk.msrb.mxu1 %vm5941_vm15, %v3950_v29  ;;  %v4898_v32 = vpack.i.bf16 %v6360_v27, %v6329_v46  ;;  %v6445_v29 = vld [vmem:[%s7992_s0] sm:$0xff] }
 0x33d   :  { %v786_v51 = vsel %vm8129_vm2, %v4717_v48, %v4771_v57  ;;  %v787_v53 = vsel %vm8130_vm3, %v4771_v57, %v4772_v49  ;;  %vm8135_vm2 = vcmask 654336  }
 0x33e   :  { %v3937_v60 = vpack.c.bf16 %v798_v59, %v786_v51  ;;  %v3953_v11 = vpack.c.bf16 %v799_v20, %v787_v53  ;;  %vm8136_vm3 = vmmov %vm8135_vm2  ;;  %v6479_v53 = vld [vmem:[%s7992_s0 + $0x8] sm:$0xff] }
 0x33f   :  { %v4983_v2 = vpack.i.bf16 %v6331_v47, %v6479_v53  ;;  %v5013_v22 = vpack.i.bf16 %v6479_v53, %v6445_v29 }
 0x340   :  { %3938 = vmatpush.bf16.msk.msrb.mxu0 %vm5969_vm4, %v3937_v60  ;;  %3954 = vmatpush.bf16.msk.msrb.mxu1 %vm5958_vm13, %v3953_v11 }
 0x342   :  { %v4785_v0 = vpop.permute.xlu1 %4784 }
 0x343   :  { %v4787_v23 = vunpack.i.h.bf16 %v4785_v0  ;;  %v4786_v25 = vunpack.i.l.bf16 %v4785_v0 }
 0x345   :  { %v848_v7 = vsel %vm8133_vm7, %v4747_v19, %v4786_v25  ;;  %v849_v30 = vsel %vm8134_vm0, %v4786_v25, %v4787_v23  ;;  %vm8139_vm7 = vcmask 916480  }
 0x346   :  { %v3940_v34 = vpack.c.bf16 %v848_v7, %v774_v26  ;;  %v3956_v61 = vpack.c.bf16 %v849_v30, %v775_v17  ;;  %vm8140_vm0 = vmmov %vm8139_vm7 }
 0x348   :  { %3941 = vmatpush.bf16.msk.msrb.mxu0 %vm5897_vm9, %v3940_v34  ;;  %3957 = vmatpush.bf16.msk.msrb.mxu1 %vm5923_vm12, %v3956_v61 }
 0x34b   :  { %3942 = vmatmul.msk.bf16.vlgmr.msrb.gmra.mxu0 %vm8135_vm2, %v6349_v9  ;;  %3958 = vmatmul.msk.bf16.vlgmr.msrb.gmra.mxu1 %vm8136_vm3, %v6349_v9  ;;  %vm8141_vm2 = vcmask 924672  }
 0x34c   :  { %vm8142_vm3 = vmmov %vm8141_vm2 }
 0x377   :  { %v6471_v51 = vpop.permute.xlu2 %4794 }
 0x384   :  { %v6486_v60 = vpop.permute.xlu2 %4819 }
 0x38d   :  { %v6488_v11 = vpop.permute.xlu0 %4789  ;;  %v6499_v7 = vpop.permute.xlu1 %4799 }
 0x38e   :  { %v4791_v1 = vunpack.i.l.bf16 %v6488_v11 }
 0x395   :  { %v6501_v30 = vpop.permute.xlu0 %4804 }
 0x39b   :  { %v6512_v61 = vpop.permute.xlu1 %4814 }
 0x3b6   :  { %v1024_v8 = vpop.f32.mrf.mxu2  ;;  %v1037_v18 = vpop.f32.mrf.mxu3 }
 0x3b7   :  { %v6414_v36 = vmax.f32 %v1024_v8, 0.0  ;;  %v6416_v24 = vmax.f32 %v1037_v18, 0.0  ;;  %v6514_v8 = vpop.permute.xlu0 %4809 }
 0x3b9   :  { %v4833_v62 = vpack.i.bf16 %v6416_v24, %v6414_v36  ;;  %v4853_v9 = vpack.i.bf16 %v6414_v36, %v6331_v47  ;;  %v4868_v6 = vpack.i.bf16 %v6331_v47, %v6416_v24 }
 0x3bb   :  { %4834 = vrot.lane.b32.xlu0 %v4833_v62, %s5724_s27  ;;  %4829 = vrot.lane.b32.xlu1 %v4833_v62, %s5722_s25 }
 0x3bc   :  { %4824 = vrot.lane.b32.xlu2 %v4833_v62, %s5723_s26 }
 0x3be   :  { %v1026_v54 = vpop.f32.mrf.mxu2  ;;  %v1039_v38 = vpop.f32.mrf.mxu3 }
 0x3bf   :  { %v4801_v54 = vunpack.i.l.bf16 %v6499_v7  ;;  %v4806_v38 = vunpack.i.l.bf16 %v6501_v30 }
 0x3c3   :  { %4854 = vrot.lane.b32.xlu0 %v4853_v9, %s5727_s30  ;;  %4844 = vrot.lane.b32.xlu1 %v4853_v9, %s5726_s29 }
 0x3c4   :  { %4839 = vrot.lane.b32.xlu2 %v4833_v62, %s5725_s28  ;;  %v4796_v62 = vunpack.i.l.bf16 %v6471_v51 }
 0x3c8   :  { %v998_v5 = vpop.f32.mrf.mxu0  ;;  %v1011_v3 = vpop.f32.mrf.mxu1 }
 0x3c9   :  { %v6449_v48 = vmax.f32 %v998_v5, 0.0  ;;  %v6451_v49 = vmax.f32 %v1011_v3, 0.0 }
 0x3cb   :  { %4869 = vrot.lane.b32.xlu0 %v4868_v6, %s5728_s7  ;;  %4859 = vrot.lane.b32.xlu1 %v4868_v6, %s5727_s30  ;;  %v4928_v57 = vpack.i.bf16 %v6451_v49, %v6449_v48  ;;  %v4958_v59 = vpack.i.bf16 %v6449_v48, %v6331_v47  ;;  %v4973_v20 = vpack.i.bf16 %v6331_v47, %v6451_v49 }
 0x3cc   :  { %4849 = vrot.lane.b32.xlu2 %v4868_v6, %s5726_s29 }
 0x3d0   :  { %v1000_v43 = vpop.f32.mrf.mxu0  ;;  %v1013_v44 = vpop.f32.mrf.mxu1 }
 0x3d3   :  { %4874 = vrot.lane.b32.xlu0 %v6364_v63, %s5725_s28  ;;  %4879 = vrot.lane.b32.xlu1 %v4853_v9, %s5729_s12  ;;  %v4913_v63 = vpack.i.bf16 %v6445_v29, %v6331_v47 }
 0x3d4   :  { %4864 = vrot.lane.b32.xlu2 %v4853_v9, %s5728_s7 }
 0x3db   :  { %4899 = vrot.lane.b32.xlu0 %v4898_v32, %s5728_s7  ;;  %4884 = vrot.lane.b32.xlu1 %v4898_v32, %s5726_s29 }
 0x3dc   :  { %4889 = vrot.lane.b32.xlu2 %v4868_v6, %s5729_s12 }
 0x3e3   :  { %4914 = vrot.lane.b32.xlu0 %v4913_v63, %s5723_s26  ;;  %4904 = vrot.lane.b32.xlu1 %v4898_v32, %s5729_s12 }
 0x3e4   :  { %4894 = vrot.lane.b32.xlu2 %v4898_v32, %s5727_s30 }
 0x3eb   :  { %4929 = vrot.lane.b32.xlu0 %v4928_v57, %s5724_s27  ;;  %4919 = vrot.lane.b32.xlu1 %v4928_v57, %s5722_s25 }
 0x3ec   :  { %4909 = vrot.lane.b32.xlu2 %v4928_v57, %s5723_s26 }
 0x3f3   :  { %4944 = vrot.lane.b32.xlu0 %v4913_v63, %s5725_s28  ;;  %4934 = vrot.lane.b32.xlu1 %v4913_v63, %s5724_s27 }
 0x3f4   :  { %4924 = vrot.lane.b32.xlu2 %v4913_v63, %s5722_s25 }
 0x3fb   :  { %4959 = vrot.lane.b32.xlu0 %v4958_v59, %s5727_s30  ;;  %4949 = vrot.lane.b32.xlu1 %v4958_v59, %s5726_s29 }
 0x3fc   :  { %4939 = vrot.lane.b32.xlu2 %v4928_v57, %s5725_s28 }
 0x403   :  { %4974 = vrot.lane.b32.xlu0 %v4973_v20, %s5728_s7  ;;  %4964 = vrot.lane.b32.xlu1 %v4973_v20, %s5727_s30 }
 0x404   :  { %4954 = vrot.lane.b32.xlu2 %v4973_v20, %s5726_s29 }
 0x40b   :  { %4984 = vrot.lane.b32.xlu0 %v4983_v2, %s5723_s26  ;;  %4979 = vrot.lane.b32.xlu1 %v4958_v59, %s5729_s12 }
 0x40c   :  { %4969 = vrot.lane.b32.xlu2 %v4958_v59, %s5728_s7 }
 0x413   :  { %4999 = vrot.lane.b32.xlu0 %v4983_v2, %s5725_s28  ;;  %4989 = vrot.lane.b32.xlu1 %v4983_v2, %s5722_s25 }
 0x414   :  { %1133 = vrot.lane.b32.xlu2 %v6451_v49, %s5729_s12 }
 0x416   :  { %v4825_v15 = vpop.permute.xlu2 %4824 }
 0x417   :  { %v4827_v0 = vunpack.i.h.bf16 %v4825_v15  ;;  %v4826_v19 = vunpack.i.l.bf16 %v4825_v15 }
 0x419   :  { %v1226_v23 = vsel %vm8137_vm6, %v4827_v0, %v4791_v1  ;;  %v1225_v25 = vsel %vm8138_vm1, %v4826_v19, %v4827_v0  ;;  %vm8143_vm6 = vcmask 1039360  }
 0x41a   :  { %v4041_v26 = vpack.c.bf16 1.0, %v1226_v23  ;;  %v4025_v17 = vpack.c.bf16 1.0, %v1225_v25  ;;  %vm8144_vm1 = vmmov %vm8143_vm6 }
 0x41b   :  { %5014 = vrot.lane.b32.xlu0 %v5013_v22, %s5728_s7  ;;  %5004 = vrot.lane.b32.xlu1 %v5013_v22, %s5726_s29 }
 0x41c   :  { %4994 = vrot.lane.b32.xlu2 %v4983_v2, %s5724_s27  ;;  %4026 = vmatpush.bf16.msk.msra.mxu2 %vm5878_vm5, %v4025_v17 }
 0x41d   :  { %4042 = vmatpush.bf16.msk.msra.mxu3 %vm5906_vm10, %v4041_v26 }
 0x41e   :  { %v4840_v34 = vpop.permute.xlu2 %4839 }
 0x41f   :  { %v4842_v9 = vunpack.i.h.bf16 %v4840_v34  ;;  %v4841_v5 = vunpack.i.l.bf16 %v4840_v34 }
 0x421   :  { %v1202_v19 = vsel %vm8143_vm6, %v4842_v9, %v4806_v38  ;;  %vm8149_vm6 = vcmask 908288  }
 0x422   :  { %v4047_v17 = vpack.c.bf16 %v1202_v19, %v6416_v24 }
 0x423   :  { %5019 = vrot.lane.b32.xlu1 %v4913_v63, %s5729_s12 }
 0x424   :  { %5009 = vrot.lane.b32.xlu2 %v5013_v22, %s5727_s30  ;;  %v1201_v22 = vsel %vm8144_vm1, %v4841_v5, %v4842_v9  ;;  %vm8150_vm1 = vmmov %vm8149_vm6 }
 0x425   :  { %v4031_v26 = vpack.c.bf16 %v1201_v22, %v6414_v36  ;;  %vm8155_vm8 = vmmov %vm8150_vm1 }
 0x426   :  { %v6516_v18 = vpop.permute.xlu2 %4849 }
 0x42c   :  { %1420 = vrot.lane.b32.xlu2 %v6479_v53, %s5729_s12 }
 0x42d   :  { %v4835_v3 = vpop.permute.xlu0 %4834  ;;  %v4830_v6 = vpop.permute.xlu1 %4829 }
 0x42e   :  { %v4837_v43 = vunpack.i.h.bf16 %v4835_v3  ;;  %v4836_v44 = vunpack.i.l.bf16 %v4835_v3  ;;  %v4832_v32 = vunpack.i.h.bf16 %v4830_v6  ;;  %v4831_v63 = vunpack.i.l.bf16 %v4830_v6  ;;  %v4865_v57 = vpop.permute.xlu2 %4864 }
 0x42f   :  { %v4867_v19 = vunpack.i.h.bf16 %v4865_v57  ;;  %v4866_v22 = vunpack.i.l.bf16 %v4865_v57 }
 0x430   :  { %v1248_v59 = vsel %vm8139_vm7, %v4837_v43, %v4801_v54  ;;  %v1247_v20 = vsel %vm8140_vm0, %v4836_v44, %v4837_v43  ;;  %v1214_v2 = vsel %vm8141_vm2, %v4832_v32, %v4796_v62  ;;  %v1213_v1 = vsel %vm8142_vm3, %v4831_v63, %v4832_v32 }
 0x431   :  { %v4028_v15 = vpack.c.bf16 %v1247_v20, %v1213_v1  ;;  %v4044_v0 = vpack.c.bf16 %v1248_v59, %v1214_v2  ;;  %vm8145_vm7 = vcmask 7168   ;;  %vm8146_vm0 = vcmask 121856  }
 0x432   :  { %v4851_v43 = vunpack.i.l.bf16 %v6516_v18  ;;  %vm8147_vm2 = vmmov %vm8146_vm0  ;;  %v4792_v2 = vunpack.i.h.bf16 %v6488_v11  ;;  %v4812_v1 = vunpack.i.h.bf16 %v6514_v8  ;;  %v4817_v11 = vunpack.i.h.bf16 %v6512_v61 }
 0x433   :  { %4029 = vmatpush.bf16.msk.msra.mxu2 %vm5897_vm9, %v4028_v15  ;;  %4045 = vmatpush.bf16.msk.msra.mxu3 %vm5923_vm12, %v4044_v0  ;;  %vm8148_vm3 = vmmov %vm8145_vm7  ;;  %v4811_v15 = vunpack.i.l.bf16 %v6514_v8  ;;  %v4797_v0 = vunpack.i.h.bf16 %v6471_v51  ;;  %v4816_v8 = vunpack.i.l.bf16 %v6512_v61 }
 0x435   :  { %v4855_v23 = vpop.permute.xlu0 %4854  ;;  %v4845_v25 = vpop.permute.xlu1 %4844  ;;  %v1512_v57 = vsel %vm8149_vm6, %v4792_v2, %v4811_v15  ;;  %vm8156_vm6 = vcmask 916480  }
 0x436   :  { %v4857_v34 = vunpack.i.h.bf16 %v4855_v23  ;;  %v4856_v62 = vunpack.i.l.bf16 %v4855_v23  ;;  %v4847_v54 = vunpack.i.h.bf16 %v4845_v25  ;;  %v4846_v3 = vunpack.i.l.bf16 %v4845_v25  ;;  %v6535_v6 = vpop.permute.xlu2 %4889 }
 0x437   :  { %4032 = vmatpush.bf16.msk.msra.mxu2 %vm5932_vm14, %v4031_v26  ;;  %4048 = vmatpush.bf16.msk.msra.mxu3 %vm5941_vm15, %v4047_v17  ;;  %v4822_v25 = vunpack.i.h.bf16 %v6486_v60  ;;  %v4821_v26 = vunpack.i.l.bf16 %v6486_v60  ;;  %v4802_v17 = vunpack.i.h.bf16 %v6499_v7  ;;  %v4090_v2 = vpack.c.bf16 1.0, %v1512_v57 }
 0x438   :  { %v1183_v38 = vsel %vm8145_vm7, %v4856_v62, %v4857_v34  ;;  %v1171_v9 = vsel %vm8146_vm0, %v4846_v3, %v4847_v54  ;;  %v1172_v63 = vsel %vm8147_vm2, %v4847_v54, %v4851_v43  ;;  %v4891_v54 = vunpack.i.l.bf16 %v6535_v6 }
 0x439   :  { %v4034_v5 = vpack.c.bf16 %v1183_v38, %v1171_v9  ;;  %v1513_v9 = vsel %vm8150_vm1, %v4811_v15, %v4812_v1  ;;  %vm8151_vm7 = vcmask 138240   ;;  %vm8153_vm2 = vcmask 130048  }
 0x43a   :  { %vm8152_vm0 = vmmov %vm8151_vm7  ;;  %vm8157_vm1 = vcmask 924672  }
 0x43b   :  { %4035 = vmatpush.bf16.msk.msra.mxu2 %vm5969_vm4, %v4034_v5  ;;  %v1159_v5 = vsel %vm8151_vm7, %v4866_v22, %v4867_v19  ;;  %v1500_v50 = vsel %vm8157_vm1, %v4797_v0, %v4816_v8  ;;  %v4106_v22 = vpack.c.bf16 1.0, %v1513_v9  ;;  %vm8159_vm7 = vmmov %vm8157_vm1  ;;  %v4807_v0 = vunpack.i.h.bf16 %v6501_v30 }
 0x43c   :  { %vm8164_vm1 = vcmask 121856  }
 0x43d   :  { %v6545_v36 = vpop.permute.xlu0 %4869  ;;  %v6547_v24 = vpop.permute.xlu1 %4859 }
 0x43e   :  { %v4861_v44 = vunpack.i.l.bf16 %v6547_v24  ;;  %v6551_v32 = vpop.permute.xlu2 %4894  ;;  %v4871_v23 = vunpack.i.l.bf16 %v6545_v36 }
 0x43f   :  { %v4897_v57 = vunpack.i.h.bf16 %v6551_v32 }
 0x440   :  { %v1184_v59 = vsel %vm8148_vm3, %v4857_v34, %v4861_v44  ;;  %v1160_v43 = vsel %vm8152_vm0, %v4867_v19, %v4871_v23  ;;  %vm8154_vm3 = vmmov %vm8153_vm2  ;;  %v6590_v19 = vld [vmem:[%s7993_s1 + $0xc] sm:$0xf]  ;;  %vm8160_vm0 = vcmask 1039360  }
 0x441   :  { %v4050_v20 = vpack.c.bf16 %v1184_v59, %v1172_v63 }
 0x443   :  { %4051 = vmatpush.bf16.msk.msra.mxu3 %vm5958_vm13, %v4050_v20 }
 0x445   :  { %v4875_v34 = vpop.permute.xlu0 %4874  ;;  %v4880_v62 = vpop.permute.xlu1 %4879 }
 0x446   :  { %v4882_v3 = vunpack.i.h.bf16 %v4880_v62  ;;  %v4881_v51 = vunpack.i.l.bf16 %v4880_v62  ;;  %v6568_v38 = vpop.permute.xlu2 %4909  ;;  %v4877_v1 = vunpack.i.h.bf16 %v4875_v34  ;;  %v1534_v62 = vsel %vm8156_vm6, %v4802_v17, %v4821_v26 }
 0x447   :  { %v4912_v60 = vunpack.i.h.bf16 %v6568_v38  ;;  %v4911_v7 = vunpack.i.l.bf16 %v6568_v38  ;;  %v4876_v42 = vunpack.i.l.bf16 %v4875_v34 }
 0x448   :  { %v1237_v61 = vsel %vm8153_vm2, %v4881_v51, %v4882_v3  ;;  %v1238_v44 = vsel %vm8154_vm3, %v4882_v3, %v4891_v54  ;;  %v1501_v54 = vsel %vm8159_vm7, %v4816_v8, %v4817_v11  ;;  %vm8161_vm2 = vcmask 654336   ;;  %vm8166_vm7 = vmmov %vm8164_vm1 }
 0x449   :  { %v1123_v63 = vsel %vm8155_vm8, %v4911_v7, %v4912_v60  ;;  %v4037_v59 = vpack.c.bf16 %v1237_v61, %v1159_v5  ;;  %v4053_v20 = vpack.c.bf16 %v1238_v44, %v1160_v43  ;;  %vm8158_vm8 = vmmov %vm8156_vm6  ;;  %v1489_v3 = vsel %vm8160_vm0, %v4876_v42, %v4877_v1 }
 0x44a   :  { %v3993_v15 = vpack.c.bf16 1.0, %v1123_v63  ;;  %v1535_v23 = vsel %vm8158_vm8, %v4821_v26, %v4822_v25  ;;  %vm8162_vm3 = vmmov %vm8161_vm2  ;;  %v4093_v25 = vpack.c.bf16 %v1534_v62, %v1500_v50  ;;  %v4852_v8 = vunpack.i.h.bf16 %v6516_v18 }
 0x44b   :  { %4038 = vmatpush.bf16.msk.msra.mxu2 %vm5897_vm9, %v4037_v59  ;;  %4054 = vmatpush.bf16.msk.msra.mxu3 %vm5923_vm12, %v4053_v20  ;;  %vm8163_vm6 = vmmov %vm8160_vm0  ;;  %v4109_v30 = vpack.c.bf16 %v1535_v23, %v1501_v54  ;;  %v4862_v7 = vunpack.i.h.bf16 %v6547_v24  ;;  %v4896_v5 = vunpack.i.l.bf16 %v6551_v32  ;;  %vm8165_vm8 = vcmask 7168  }
 0x44c   :  { %3994 = vmatpush.bf16.msk.msra.mxu0 %vm5878_vm5, %v3993_v15  ;;  %v1488_v26 = vsel %vm8163_vm6, %v4807_v0, %v4876_v42  ;;  %v4112_v42 = vpack.c.bf16 %v1489_v3, %v6360_v27  ;;  %v4892_v24 = vunpack.i.h.bf16 %v6535_v6  ;;  %v4872_v32 = vunpack.i.h.bf16 %v6545_v36  ;;  %vm8167_vm0 = vmmov %vm8165_vm8 }
 0x44d   :  { %v4900_v17 = vpop.permute.xlu0 %4899  ;;  %v4885_v34 = vpop.permute.xlu1 %4884  ;;  %v4096_v50 = vpack.c.bf16 %v1488_v26, %v6329_v46  ;;  %v1471_v44 = vsel %vm8165_vm8, %v4896_v5, %v4897_v57  ;;  %v1470_v59 = vsel %vm8167_vm0, %v4862_v7, %v4896_v5  ;;  %vm8170_vm6 = vcmask 908288  }
 0x44e   :  { %v6602_v51 = vpop.permute.xlu2 %4924  ;;  %4039 = vmatmul.msk.bf16.vlgmr.msra.gmra.mxu2 %vm8161_vm2, %v6590_v19  ;;  %4055 = vmatmul.msk.bf16.vlgmr.msra.gmra.mxu3 %vm8162_vm3, %v6590_v19  ;;  %v4886_v11 = vunpack.i.l.bf16 %v4885_v34  ;;  %v4887_v9 = vunpack.i.h.bf16 %v4885_v34  ;;  %v4902_v43 = vunpack.i.h.bf16 %v4900_v17  ;;  %v4901_v61 = vunpack.i.l.bf16 %v4900_v17 }
 0x44f   :  { %4091 = vmatpush.bf16.msk.msrb.mxu2 %vm5878_vm5, %v4090_v2  ;;  %4107 = vmatpush.bf16.msk.msrb.mxu3 %vm5906_vm10, %v4106_v22  ;;  %vm8168_vm2 = vcmask 138240   ;;  %vm8174_vm0 = vcmask 924672  }
 0x450   :  { %v1458_v18 = vsel %vm8164_vm1, %v4852_v8, %v4886_v11  ;;  %v1459_v63 = vsel %vm8166_vm7, %v4886_v11, %v4887_v9  ;;  %v1447_v27 = vsel %vm8168_vm2, %v4901_v61, %v4902_v43  ;;  %vm8169_vm3 = vmmov %vm8168_vm2  ;;  %vm8171_vm1 = vcmask 130048  }
 0x451   :  { %v4099_v22 = vpack.c.bf16 %v1470_v59, %v1458_v18  ;;  %v4115_v23 = vpack.c.bf16 %v1471_v44, %v1459_v63  ;;  %v1446_v6 = vsel %vm8169_vm3, %v4872_v32, %v4901_v61  ;;  %vm8172_vm8 = vmmov %vm8171_vm1  ;;  %vm8173_vm7 = vcmask 916480  }
 0x452   :  { %vm8175_vm2 = vcmask 1039360   ;;  %vm8176_vm3 = vmmov %vm8174_vm0 }
 0x453   :  { %4094 = vmatpush.bf16.msk.msrb.mxu2 %vm5897_vm9, %v4093_v25  ;;  %4110 = vmatpush.bf16.msk.msrb.mxu3 %vm5923_vm12, %v4109_v30 }
 0x455   :  { %v6630_v46 = vpop.permute.xlu0 %4914  ;;  %v4905_v20 = vpop.permute.xlu1 %4904 }
 0x456   :  { %v4916_v2 = vunpack.i.l.bf16 %v6630_v46  ;;  %v4907_v1 = vunpack.i.h.bf16 %v4905_v20  ;;  %v4906_v15 = vunpack.i.l.bf16 %v4905_v20  ;;  %v4940_v62 = vpop.permute.xlu2 %4939 }
 0x457   :  { %4097 = vmatpush.bf16.msk.msrb.mxu2 %vm5932_vm14, %v4096_v50  ;;  %4113 = vmatpush.bf16.msk.msrb.mxu3 %vm5941_vm15, %v4112_v42  ;;  %v4942_v38 = vunpack.i.h.bf16 %v4940_v62 }
 0x458   :  { %v1124_v36 = vsel %vm8170_vm6, %v4912_v60, %v4916_v2  ;;  %v1524_v54 = vsel %vm8171_vm1, %v4892_v24, %v4906_v15  ;;  %v1525_v0 = vsel %vm8172_vm8, %v4906_v15, %v4907_v1  ;;  %v4941_v60 = vunpack.i.l.bf16 %v4940_v62  ;;  %vm8177_vm6 = vmmov %vm8173_vm7 }
 0x459   :  { %v4009_v17 = vpack.c.bf16 1.0, %v1124_v36  ;;  %v4102_v34 = vpack.c.bf16 %v1524_v54, %v1446_v6  ;;  %v4118_v3 = vpack.c.bf16 %v1525_v0, %v1447_v27  ;;  %vm8178_vm1 = vmmov %vm8175_vm2  ;;  %vm8179_vm8 = vcmask 7168  }
 0x45a   :  { %v1099_v42 = vsel %vm8175_vm2, %v4941_v60, %v4942_v38  ;;  %vm8182_vm2 = vmmov %vm8179_vm8 }
 0x45b   :  { %4100 = vmatpush.bf16.msk.msrb.mxu2 %vm5969_vm4, %v4099_v22  ;;  %4116 = vmatpush.bf16.msk.msrb.mxu3 %vm5958_vm13, %v4115_v23 }
 0x45c   :  { %4010 = vmatpush.bf16.msk.msra.mxu1 %vm5906_vm10, %v4009_v17 }
 0x45d   :  { %v4930_v25 = vpop.permute.xlu0 %4929  ;;  %v4920_v26 = vpop.permute.xlu1 %4919 }
 0x45e   :  { %v4932_v11 = vunpack.i.h.bf16 %v4930_v25  ;;  %v4931_v30 = vunpack.i.l.bf16 %v4930_v25  ;;  %v4922_v8 = vunpack.i.h.bf16 %v4920_v26  ;;  %v4921_v57 = vunpack.i.l.bf16 %v4920_v26  ;;  %v6653_v5 = vpop.permute.xlu2 %4954  ;;  %v6691_v25 = vld [vmem:[%s7993_s1 + $0x10] sm:$0xf] }
 0x45f   :  { %4103 = vmatpush.bf16.msk.msrb.mxu2 %vm5897_vm9, %v4102_v34  ;;  %4119 = vmatpush.bf16.msk.msrb.mxu3 %vm5923_vm12, %v4118_v3 }
 0x460   :  { %v1145_v9 = vsel %vm8173_vm7, %v4931_v30, %v4932_v11  ;;  %v1111_v7 = vsel %vm8174_vm0, %v4921_v57, %v4922_v8  ;;  %vm8180_vm7 = vcmask 121856   ;;  %v4917_v30 = vunpack.i.h.bf16 %v6630_v46 }
 0x461   :  { %v3996_v43 = vpack.c.bf16 %v1145_v9, %v1111_v7  ;;  %vm8181_vm0 = vmmov %vm8180_vm7 }
 0x463   :  { %1667 = vmatpush.bf16.msra.mxu2 %v6084_v13  ;;  %1680 = vmatpush.bf16.msra.mxu3 %v6092_v16  ;;  %v4926_v13 = vunpack.i.l.bf16 %v6602_v51  ;;  %v3999_v16 = vpack.c.bf16 %v1099_v42, %v6449_v48 }
 0x464   :  { %3997 = vmatpush.bf16.msk.msra.mxu0 %vm5897_vm9, %v3996_v43 }
 0x465   :  { %v6659_v50 = vpop.permute.xlu0 %4944  ;;  %v6661_v61 = vpop.permute.xlu1 %4934  ;;  %v1112_v63 = vsel %vm8176_vm3, %v4922_v8, %v4926_v13  ;;  %vm8183_vm3 = vcmask 654336  }
 0x466   :  { %v4946_v18 = vunpack.i.l.bf16 %v6659_v50  ;;  %v4936_v44 = vunpack.i.l.bf16 %v6661_v61  ;;  %v4970_v27 = vpop.permute.xlu2 %4969  ;;  %4104 = vmatmul.msk.bf16.vlgmr.msrb.gmra.mxu2 %vm8183_vm3, %v6691_v25 }
 0x467   :  { %v4972_v26 = vunpack.i.h.bf16 %v4970_v27 }
 0x468   :  { %4000 = vmatpush.bf16.msk.msra.mxu0 %vm5932_vm14, %v3999_v16  ;;  %v1146_v24 = vsel %vm8177_vm6, %v4932_v11, %v4936_v44  ;;  %v1100_v59 = vsel %vm8178_vm1, %v4942_v38, %v4946_v18  ;;  %vm8184_vm6 = vmmov %vm8183_vm3  ;;  %v4971_v11 = vunpack.i.l.bf16 %v4970_v27  ;;  %vm8185_vm1 = vcmask 138240  }
 0x469   :  { %v4012_v32 = vpack.c.bf16 %v1146_v24, %v1112_v63  ;;  %v4015_v2 = vpack.c.bf16 %v1100_v59, %v6451_v49  ;;  %v4956_v49 = vunpack.i.l.bf16 %v6653_v5  ;;  %4120 = vmatmul.msk.bf16.vlgmr.msrb.gmra.mxu3 %vm8184_vm6, %v6691_v25  ;;  %vm8190_vm3 = vmmov %vm8185_vm1  ;;  %vm8191_vm6 = vcmask 916480  }
 0x46a   :  { %v1061_v16 = vsel %vm8185_vm1, %v4971_v11, %v4972_v26  ;;  %vm8192_vm1 = vcmask 654336  }
 0x46b   :  { %4013 = vmatpush.bf16.msk.msra.mxu1 %vm5923_vm12, %v4012_v32 }
 0x46d   :  { %v4960_v20 = vpop.permute.xlu0 %4959  ;;  %v4950_v48 = vpop.permute.xlu1 %4949 }
 0x46e   :  { %v4962_v1 = vunpack.i.h.bf16 %v4960_v20  ;;  %v4961_v15 = vunpack.i.l.bf16 %v4960_v20  ;;  %v4952_v62 = vunpack.i.h.bf16 %v4950_v48  ;;  %v4951_v22 = vunpack.i.l.bf16 %v4950_v48  ;;  %v1134_v54 = vpop.permute.xlu2 %1133 }
 0x46f   :  { %4016 = vmatpush.bf16.msk.msra.mxu1 %vm5941_vm15, %v4015_v2 }
 0x470   :  { %v1085_v23 = vsel %vm8179_vm8, %v4961_v15, %v4962_v1  ;;  %v1073_v6 = vsel %vm8180_vm7, %v4951_v22, %v4952_v62  ;;  %v1074_v3 = vsel %vm8181_vm0, %v4952_v62, %v4956_v49  ;;  %vm8186_vm8 = vcmask 908288  }
 0x471   :  { %v4002_v36 = vpack.c.bf16 %v1085_v23, %v1073_v6  ;;  %vm8187_vm7 = vmmov %vm8186_vm8  ;;  %vm8188_vm0 = vcmask 130048   ;;  %v4927_v15 = vunpack.i.h.bf16 %v6602_v51  ;;  %v4937_v62 = vunpack.i.h.bf16 %v6661_v61 }
 0x473   :  { %4003 = vmatpush.bf16.msk.msra.mxu0 %vm5969_vm4, %v4002_v36 }
 0x475   :  { %v6680_v0 = vpop.permute.xlu0 %4974  ;;  %v6682_v17 = vpop.permute.xlu1 %4964 }
 0x476   :  { %v4966_v34 = vunpack.i.l.bf16 %v6682_v17  ;;  %v4976_v8 = vunpack.i.l.bf16 %v6680_v0  ;;  %v4995_v18 = vpop.permute.xlu2 %4994 }
 0x477   :  { %v4997_v59 = vunpack.i.h.bf16 %v4995_v18 }
 0x478   :  { %v1086_v38 = vsel %vm8182_vm2, %v4962_v1, %v4966_v34  ;;  %vm8189_vm2 = vmmov %vm8188_vm0  ;;  %v1062_v46 = vsel %vm8190_vm3, %v4972_v26, %v4976_v8  ;;  %v4996_v1 = vunpack.i.l.bf16 %v4995_v18 }
 0x479   :  { %v4018_v60 = vpack.c.bf16 %v1086_v38, %v1074_v3  ;;  %v4947_v3 = vunpack.i.h.bf16 %v6659_v50 }
 0x47a   :  { %v1433_v22 = vsel %vm8191_vm6, %v4996_v1, %v4997_v59 }
 0x47b   :  { %4019 = vmatpush.bf16.msk.msra.mxu1 %vm5958_vm13, %v4018_v60 }
 0x47d   :  { %v4985_v57 = vpop.permute.xlu0 %4984  ;;  %v4980_v9 = vpop.permute.xlu1 %4979 }
 0x47e   :  { %v4987_v7 = vunpack.i.h.bf16 %v4985_v57  ;;  %v4986_v43 = vunpack.i.l.bf16 %v4985_v57  ;;  %v4982_v42 = vunpack.i.h.bf16 %v4980_v9  ;;  %v4981_v13 = vunpack.i.l.bf16 %v4980_v9  ;;  %v5010_v26 = vpop.permute.xlu2 %5009 }
 0x47f   :  { %v5012_v8 = vunpack.i.h.bf16 %v5010_v26  ;;  %v5011_v57 = vunpack.i.l.bf16 %v5010_v26  ;;  %v4957_v9 = vunpack.i.h.bf16 %v6653_v5 }
 0x480   :  { %v1410_v44 = vsel %vm8186_vm8, %v4917_v30, %v4986_v43  ;;  %v1411_v63 = vsel %vm8187_vm7, %v4986_v43, %v4987_v7  ;;  %v1135_v24 = vsel %vm8188_vm0, %v4981_v13, %v4982_v42  ;;  %v1136_v32 = vsel %vm8189_vm2, %v4982_v42, %v1134_v54  ;;  %vm8193_vm8 = vmmov %vm8192_vm1 }
 0x481   :  { %v4058_v27 = vpack.c.bf16 1.0, %v1410_v44  ;;  %v4074_v20 = vpack.c.bf16 1.0, %v1411_v63  ;;  %v4005_v48 = vpack.c.bf16 %v1135_v24, %v1061_v16  ;;  %v4021_v2 = vpack.c.bf16 %v1136_v32, %v1062_v46  ;;  %vm8194_vm7 = vmmov %vm8191_vm6 }
 0x482   :  { %v1432_v51 = vsel %vm8194_vm7, %v4937_v62, %v4996_v1  ;;  %vm8195_vm0 = vcmask 1039360   ;;  %vm8196_vm2 = vcmask 924672   ;;  %v4967_v42 = vunpack.i.h.bf16 %v6682_v17 }
 0x483   :  { %4006 = vmatpush.bf16.msk.msra.mxu0 %vm5897_vm9, %v4005_v48  ;;  %4022 = vmatpush.bf16.msk.msra.mxu1 %vm5923_vm12, %v4021_v2  ;;  %vm8197_vm3 = vmmov %vm8196_vm2  ;;  %vm8201_vm7 = vcmask 121856  }
 0x484   :  { %vm8198_vm6 = vmmov %vm8195_vm0 }
 0x485   :  { %v5000_v23 = vpop.permute.xlu0 %4999  ;;  %v4990_v6 = vpop.permute.xlu1 %4989 }
 0x486   :  { %v5002_v36 = vunpack.i.h.bf16 %v5000_v23  ;;  %v5001_v54 = vunpack.i.l.bf16 %v5000_v23  ;;  %v4992_v49 = vunpack.i.h.bf16 %v4990_v6  ;;  %v4991_v34 = vunpack.i.l.bf16 %v4990_v6  ;;  %4007 = vmatmul.msk.bf16.vlgmr.msra.gmra.mxu0 %vm8192_vm1, %v6590_v19  ;;  %4023 = vmatmul.msk.bf16.vlgmr.msra.gmra.mxu1 %vm8193_vm8, %v6590_v19  ;;  %v1421_v59 = vpop.permute.xlu2 %1420 }
 0x487   :  { %4059 = vmatpush.bf16.msk.msrb.mxu0 %vm5878_vm5, %v4058_v27  ;;  %4075 = vmatpush.bf16.msk.msrb.mxu1 %vm5906_vm10, %v4074_v20  ;;  %vm8199_vm1 = vcmask 7168   ;;  %v4977_v27 = vunpack.i.h.bf16 %v6680_v0 }
 0x488   :  { %v1387_v61 = vsel %vm8195_vm0, %v5001_v54, %v5002_v36  ;;  %v1398_v38 = vsel %vm8196_vm2, %v4927_v15, %v4991_v34  ;;  %v1399_v60 = vsel %vm8197_vm3, %v4991_v34, %v4992_v49  ;;  %v1386_v50 = vsel %vm8198_vm6, %v4947_v3, %v5001_v54  ;;  %vm8200_vm8 = vmmov %vm8199_vm1  ;;  %v1619_v49 = vld [vmem:[%s7994_s2] sm:$0xf] }
 0x489   :  { %v4061_v11 = vpack.c.bf16 %v1432_v51, %v1398_v38  ;;  %v4077_v30 = vpack.c.bf16 %v1433_v22, %v1399_v60  ;;  %v4080_v19 = vpack.c.bf16 %v1387_v61, %v6479_v53  ;;  %v4064_v43 = vpack.c.bf16 %v1386_v50, %v6445_v29  ;;  %vm8202_vm0 = vmmov %vm8201_vm7 }
 0x48a   :  { %v1373_v13 = vsel %vm8199_vm1, %v5011_v57, %v5012_v8  ;;  %v1372_v53 = vsel %vm8200_vm8, %v4967_v42, %v5011_v57  ;;  %vm8203_vm2 = vcmask 138240   ;;  %vm8205_vm6 = vcmask 130048  }
 0x48b   :  { %4062 = vmatpush.bf16.msk.msrb.mxu0 %vm5897_vm9, %v4061_v11  ;;  %4078 = vmatpush.bf16.msk.msrb.mxu1 %vm5923_vm12, %v4077_v30  ;;  %vm8204_vm3 = vmmov %vm8203_vm2  ;;  %vm8207_vm8 = vcmask 654336   ;;  %v1627_v34 = vunpack.c.l.b16 %v1619_v49 }
 0x48c   :  { %vm8206_vm1 = vmmov %vm8205_vm6 }
 0x48d   :  { %v5005_v7 = vpop.permute.xlu1 %5004  ;;  %v5015_v63 = vpop.permute.xlu0 %5014 }
 0x48e   :  { %v5007_v16 = vunpack.i.h.bf16 %v5005_v7  ;;  %v5006_v18 = vunpack.i.l.bf16 %v5005_v7  ;;  %v5017_v17 = vunpack.i.h.bf16 %v5015_v63  ;;  %v5016_v32 = vunpack.i.l.bf16 %v5015_v63 }
 0x48f   :  { %4065 = vmatpush.bf16.msk.msrb.mxu0 %vm5932_vm14, %v4064_v43  ;;  %4081 = vmatpush.bf16.msk.msrb.mxu1 %vm5941_vm15, %v4080_v19 }
 0x490   :  { %v1360_v44 = vsel %vm8201_vm7, %v4957_v9, %v5006_v18  ;;  %v1361_v5 = vsel %vm8202_vm0, %v5006_v18, %v5007_v16  ;;  %v1349_v2 = vsel %vm8203_vm2, %v5016_v32, %v5017_v17  ;;  %v1348_v1 = vsel %vm8204_vm3, %v4977_v27, %v5016_v32  ;;  %vm8208_vm7 = vmmov %vm8207_vm8 }
 0x491   :  { %v4067_v29 = vpack.c.bf16 %v1372_v53, %v1360_v44  ;;  %v4083_v24 = vpack.c.bf16 %v1373_v13, %v1361_v5  ;;  %vm8212_vm0 = vcmask 64512   ;;  %v5733_v17 = vmov 1  }
 0x492   :  { %vm8213_vm2 = vmmov %vm8212_vm0  ;;  %5138 = vset.pattern.permute.xlu2 %v5733_v17 }
 0x493   :  { %4068 = vmatpush.bf16.msk.msrb.mxu0 %vm5969_vm4, %v4067_v29  ;;  %4084 = vmatpush.bf16.msk.msrb.mxu1 %vm5958_vm13, %v4083_v24  ;;  %vm8214_vm3 = vmmov %vm8212_vm0 }
 0x495   :  { %v5020_v46 = vpop.permute.xlu1 %5019 }
 0x496   :  { %v5022_v20 = vunpack.i.h.bf16 %v5020_v46  ;;  %v5021_v48 = vunpack.i.l.bf16 %v5020_v46  ;;  %v1620_v46 = vld [vmem:[%s7995_s3] sm:$0xff] }
 0x498   :  { %v1422_v15 = vsel %vm8205_vm6, %v5021_v48, %v5022_v20  ;;  %v1423_v62 = vsel %vm8206_vm1, %v5022_v20, %v1421_v59  ;;  %vm8215_vm6 = vmmov %vm8212_vm0  ;;  %vm8216_vm1 = vcmask 908288  }
 0x499   :  { %v4086_v22 = vpack.c.bf16 %v1423_v62, %v1349_v2  ;;  %v4070_v23 = vpack.c.bf16 %v1422_v15, %v1348_v1 }
 0x49b   :  { %4071 = vmatpush.bf16.msk.msrb.mxu0 %vm5897_vm9, %v4070_v23  ;;  %4087 = vmatpush.bf16.msk.msrb.mxu1 %vm5923_vm12, %v4086_v22 }
 0x49e   :  { %4072 = vmatmul.msk.bf16.vlgmr.msrb.gmra.mxu0 %vm8207_vm8, %v6691_v25  ;;  %4088 = vmatmul.msk.bf16.vlgmr.msrb.gmra.mxu1 %vm8208_vm7, %v6691_v25  ;;  %vm8217_vm8 = vmmov %vm8216_vm1  ;;  %vm8218_vm7 = vcmask 916480  }
 0x49f   :  { %1641 = vmatpush.bf16.msra.mxu0 %v6115_v37  ;;  %1654 = vmatpush.bf16.msra.mxu1 %v6122_v39  ;;  %v1628_v37 = vpack.c.b16 %v1627_v34, %v1627_v34 }
 0x4a1   :  { %1629 = vrot.lane.b32.xlu0 %v1628_v37, %s5732_s20 }
 0x4d1   :  { %v6763_v0 = vpop.f32.mrf.mxu2  ;;  %v6765_v6 = vpop.f32.mrf.mxu3 }
 0x4d2   :  { %8209 = vst [vmem:[#allocation7_spill] sm:$0xff] %v6763_v0 }
 0x4d3   :  { %8210 = vst [vmem:[#allocation8_spill] sm:$0xff] %v6765_v6 }
 0x4d9   :  { %v1313_v36 = vpop.f32.mrf.mxu2  ;;  %v1326_v54 = vpop.f32.mrf.mxu3 }
 0x4e9   :  { %v1598_v39 = vpop.f32.mrf.mxu2 }
 0x4ea   :  { %v6779_v19 = vmax.f32 %v1598_v39, 0.0 }
 0x4ec   :  { %v1611_v3 = vpop.f32.mrf.mxu3  ;;  %v5063_v42 = vpack.i.bf16 %v6779_v19, %v6331_v47 }
 0x4ed   :  { %v6781_v57 = vmax.f32 %v1611_v3, 0.0 }
 0x4ef   :  { %v5043_v43 = vpack.i.bf16 %v6781_v57, %v6779_v19  ;;  %v5068_v13 = vpack.i.bf16 %v6331_v47, %v6781_v57 }
 0x4f1   :  { %v1600_v61 = vpop.f32.mrf.mxu2 }
 0x4f4   :  { %v1613_v38 = vpop.f32.mrf.mxu3 }
 0x503   :  { %v6771_v51 = vpop.f32.mrf.mxu0  ;;  %v6773_v25 = vpop.f32.mrf.mxu1 }
 0x504   :  { %8211 = vst [vmem:[#allocation9_spill] sm:$0xff] %v6773_v25 }
 0x50b   :  { %v1287_v60 = vpop.f32.mrf.mxu0  ;;  %v1300_v26 = vpop.f32.mrf.mxu1 }
 0x51b   :  { %v1572_v11 = vpop.f32.mrf.mxu0  ;;  %v1585_v30 = vpop.f32.mrf.mxu1 }
 0x51c   :  { %v6775_v8 = vmax.f32 %v1572_v11, 0.0  ;;  %v6804_v16 = vmax.f32 %v1585_v30, 0.0 }
 0x51e   :  { %v5033_v50 = vpack.i.bf16 %v6775_v8, %v6331_v47  ;;  %v5098_v18 = vpack.i.bf16 %v6331_v47, %v6804_v16  ;;  %v5118_v53 = vpack.i.bf16 %v6804_v16, %v6775_v8  ;;  %v1630_v47 = vpop.permute.xlu0 %1629 }
 0x51f   :  { %4121 = vmatmul.msk.bf16.vlgmr.msra.gmra.mxu0 %vm8212_vm0, %v1630_v47  ;;  %4122 = vmatmul.msk.bf16.vlgmr.msra.gmra.mxu1 %vm8213_vm2, %v1630_v47  ;;  %vm8219_vm0 = vmmov %vm8218_vm7  ;;  %vm8220_vm2 = vcmask 924672  }
 0x520   :  { %5034 = vrot.lane.b32.xlu2 %v5033_v50, %s5724_s27  ;;  %5029 = vrot.lane.b32.xlu0 %v5033_v50, %s5722_s25 }
 0x521   :  { %5024 = vrot.lane.b32.xlu1 %v5033_v50, %s5723_s26  ;;  %4123 = vmatmul.msk.bf16.vlgmr.msra.gmra.mxu2 %vm8214_vm3, %v1630_v47  ;;  %vm8221_vm3 = vmmov %vm8220_vm2 }
 0x522   :  { %4124 = vmatmul.msk.bf16.vlgmr.msra.gmra.mxu3 %vm8215_vm6, %v1630_v47  ;;  %vm8222_vm6 = vmmov %vm8216_vm1 }
 0x523   :  { %v1574_v9 = vpop.f32.mrf.mxu0  ;;  %v1587_v7 = vpop.f32.mrf.mxu1 }
 0x528   :  { %5039 = vrot.lane.b32.xlu2 %v5033_v50, %s5725_s28  ;;  %5044 = vrot.lane.b32.xlu0 %v5043_v43, %s5723_s26 }
 0x529   :  { %5054 = vrot.lane.b32.xlu1 %v5043_v43, %s5724_s27 }
 0x530   :  { %5049 = vrot.lane.b32.xlu2 %v5043_v43, %s5722_s25  ;;  %5064 = vrot.lane.b32.xlu0 %v5063_v42, %s5726_s29 }
 0x531   :  { %5059 = vrot.lane.b32.xlu1 %v5043_v43, %s5725_s28 }
 0x538   :  { %5074 = vrot.lane.b32.xlu2 %v5063_v42, %s5727_s30  ;;  %5079 = vrot.lane.b32.xlu0 %v5068_v13, %s5727_s30 }
 0x539   :  { %5069 = vrot.lane.b32.xlu1 %v5068_v13, %s5726_s29 }
 0x540   :  { %5089 = vrot.lane.b32.xlu2 %v5068_v13, %s5728_s7  ;;  %5094 = vrot.lane.b32.xlu0 %v5063_v42, %s5729_s12 }
 0x541   :  { %5084 = vrot.lane.b32.xlu1 %v5063_v42, %s5728_s7 }
 0x548   :  { %5099 = vrot.lane.b32.xlu2 %v5098_v18, %s5723_s26  ;;  %5104 = vrot.lane.b32.xlu0 %v5098_v18, %s5722_s25 }
 0x549   :  { %1876 = vrot.lane.b32.xlu1 %v6781_v57, %s5729_s12 }
 0x550   :  { %5114 = vrot.lane.b32.xlu2 %v5098_v18, %s5725_s28  ;;  %5119 = vrot.lane.b32.xlu0 %v5118_v53, %s5726_s29 }
 0x551   :  { %5109 = vrot.lane.b32.xlu1 %v5098_v18, %s5724_s27 }
 0x558   :  { %5129 = vrot.lane.b32.xlu2 %v5118_v53, %s5728_s7  ;;  %5134 = vrot.lane.b32.xlu0 %v5033_v50, %s5729_s12 }
 0x559   :  { %5124 = vrot.lane.b32.xlu1 %v5118_v53, %s5727_s30 }
 0x560   :  { %1623 = vperm.xlu2 %5138, %v1620_v46  }
 0x561   :  { %1774 = vrot.lane.b32.xlu1 %v6804_v16, %s5729_s12 }
 0x57a   :  { %v6826_v44 = vpop.permute.xlu2 %5034 }
 0x57b   :  { %v5036_v15 = vunpack.i.l.bf16 %v6826_v44 }
 0x582   :  { %v6828_v5 = vpop.permute.xlu2 %5039 }
 0x583   :  { %v5041_v9 = vunpack.i.l.bf16 %v6828_v5 }
 0x58a   :  { %v5050_v63 = vpop.permute.xlu2 %5049 }
 0x58b   :  { %v5052_v62 = vunpack.i.h.bf16 %v5050_v63  ;;  %v5051_v36 = vunpack.i.l.bf16 %v5050_v63 }
 0x58d   :  { %v1854_v38 = vsel %vm8220_vm2, %v5051_v36, %v5052_v62  ;;  %vm8226_vm2 = vcmask 7168  }
 0x592   :  { %v6830_v29 = vpop.permute.xlu0 %5029  ;;  %v6832_v24 = vpop.permute.xlu2 %5074 }
 0x593   :  { %v5025_v32 = vpop.permute.xlu1 %5024  ;;  %v5031_v54 = vunpack.i.l.bf16 %v6830_v29  ;;  %v5077_v17 = vunpack.i.h.bf16 %v6832_v24  ;;  %v5076_v46 = vunpack.i.l.bf16 %v6832_v24 }
 0x594   :  { %v5026_v20 = vunpack.i.l.bf16 %v5025_v32  ;;  %v5027_v7 = vunpack.i.h.bf16 %v5025_v32 }
 0x595   :  { %v1855_v60 = vsel %vm8221_vm3, %v5052_v62, %v5031_v54  ;;  %v1824_v24 = vsel %vm8226_vm2, %v5076_v46, %v5077_v17  ;;  %vm8227_vm3 = vmmov %vm8226_vm2  ;;  %vm8233_vm2 = vcmask 654336  }
 0x59a   :  { %v6837_v59 = vpop.permute.xlu2 %5089  ;;  %v5045_v27 = vpop.permute.xlu0 %5044 }
 0x59b   :  { %v5055_v48 = vpop.permute.xlu1 %5054  ;;  %v5047_v2 = vunpack.i.h.bf16 %v5045_v27  ;;  %v5046_v1 = vunpack.i.l.bf16 %v5045_v27 }
 0x59c   :  { %v5057_v22 = vunpack.i.h.bf16 %v5055_v48  ;;  %v5056_v23 = vunpack.i.l.bf16 %v5055_v48 }
 0x59d   :  { %v1867_v49 = vsel %vm8216_vm1, %v5047_v2, %v5026_v20  ;;  %v1866_v34 = vsel %vm8217_vm8, %v5046_v1, %v5047_v2  ;;  %vm8223_vm8 = vcmask 1039360  }
 0x59e   :  { %v4175_v37 = vpack.c.bf16 1.0, %v1867_v49  ;;  %v4159_v39 = vpack.c.bf16 1.0, %v1866_v34  ;;  %v1889_v3 = vsel %vm8218_vm7, %v5057_v22, %v5036_v15  ;;  %v1888_v61 = vsel %vm8219_vm0, %v5056_v23, %v5057_v22  ;;  %vm8224_vm7 = vmmov %vm8223_vm8 }
 0x59f   :  { %v4162_v30 = vpack.c.bf16 %v1888_v61, %v1854_v38  ;;  %v4178_v50 = vpack.c.bf16 %v1889_v3, %v1855_v60  ;;  %vm8225_vm0 = vcmask 121856  }
 0x5a0   :  { %4160 = vmatpush.bf16.msk.msrb.mxu2 %vm5878_vm5, %v4159_v39  ;;  %4176 = vmatpush.bf16.msk.msrb.mxu3 %vm5906_vm10, %v4175_v37 }
 0x5a2   :  { %v5100_v26 = vpop.permute.xlu2 %5099  ;;  %v5065_v11 = vpop.permute.xlu0 %5064 }
 0x5a3   :  { %v5060_v43 = vpop.permute.xlu1 %5059  ;;  %v5102_v42 = vunpack.i.h.bf16 %v5100_v26  ;;  %v5101_v13 = vunpack.i.l.bf16 %v5100_v26  ;;  %v5067_v47 = vunpack.i.h.bf16 %v5065_v11  ;;  %v5066_v63 = vunpack.i.l.bf16 %v5065_v11 }
 0x5a4   :  { %v5062_v18 = vunpack.i.h.bf16 %v5060_v43  ;;  %v5061_v53 = vunpack.i.l.bf16 %v5060_v43  ;;  %4163 = vmatpush.bf16.msk.msrb.mxu2 %vm5897_vm9, %v4162_v30  ;;  %4179 = vmatpush.bf16.msk.msrb.mxu3 %vm5923_vm12, %v4178_v50 }
 0x5a5   :  { %v1764_v27 = vsel %vm8222_vm6, %v5027_v7, %v5101_v13  ;;  %v1765_v32 = vsel %vm8216_vm1, %v5101_v13, %v5102_v42  ;;  %v1812_v22 = vsel %vm8225_vm0, %v5066_v63, %v5067_v47  ;;  %vm8228_vm6 = vmmov %vm8225_vm0  ;;  %vm8229_vm1 = vcmask 130048  }
 0x5a6   :  { %v1843_v20 = vsel %vm8223_vm8, %v5062_v18, %v5041_v9  ;;  %v1842_v48 = vsel %vm8224_vm7, %v5061_v53, %v5062_v18  ;;  %v4127_v2 = vpack.c.bf16 1.0, %v1764_v27  ;;  %v4143_v1 = vpack.c.bf16 1.0, %v1765_v32  ;;  %v6893_v9 = vld [vmem:[%s7993_s1 + $0x14] sm:$0xf]  ;;  %vm8232_vm0 = vmmov %vm8229_vm1 }
 0x5a7   :  { %v4165_v15 = vpack.c.bf16 %v1842_v48, %v6779_v19  ;;  %v4181_v62 = vpack.c.bf16 %v1843_v20, %v6781_v57  ;;  %v4168_v36 = vpack.c.bf16 %v1824_v24, %v1812_v22  ;;  %vm8230_vm8 = vcmask 138240  }
 0x5a8   :  { %4128 = vmatpush.bf16.msk.msrb.mxu0 %vm5878_vm5, %v4127_v2  ;;  %4144 = vmatpush.bf16.msk.msrb.mxu1 %vm5906_vm10, %v4143_v1  ;;  %v5091_v7 = vunpack.i.l.bf16 %v6837_v59  ;;  %vm8231_vm7 = vmmov %vm8230_vm8  ;;  %v5037_v27 = vunpack.i.h.bf16 %v6826_v44  ;;  %v5032_v32 = vunpack.i.h.bf16 %v6830_v29 }
 0x5a9   :  { %4166 = vmatpush.bf16.msk.msrb.mxu2 %vm5932_vm14, %v4165_v15  ;;  %4182 = vmatpush.bf16.msk.msrb.mxu3 %vm5941_vm15, %v4181_v62  ;;  %v5042_v62 = vunpack.i.h.bf16 %v6828_v5 }
 0x5aa   :  { %v6874_v23 = vpop.permute.xlu0 %5079 }
 0x5ab   :  { %v6876_v19 = vpop.permute.xlu1 %5069  ;;  %v5081_v57 = vunpack.i.l.bf16 %v6874_v23 }
 0x5ac   :  { %v5071_v54 = vunpack.i.l.bf16 %v6876_v19 }
 0x5ad   :  { %v1825_v49 = vsel %vm8227_vm3, %v5077_v17, %v5081_v57  ;;  %4169 = vmatpush.bf16.msk.msrb.mxu2 %vm5969_vm4, %v4168_v36  ;;  %vm8234_vm3 = vmmov %vm8233_vm2 }
 0x5ae   :  { %v1813_v34 = vsel %vm8228_vm6, %v5067_v47, %v5071_v54  ;;  %v5115_v47 = vpop.permute.xlu2 %5114  ;;  %vm8235_vm6 = vcmask 924672  }
 0x5af   :  { %v4184_v37 = vpack.c.bf16 %v1825_v49, %v1813_v34  ;;  %v5117_v48 = vunpack.i.h.bf16 %v5115_v47  ;;  %v5116_v2 = vunpack.i.l.bf16 %v5115_v47 }
 0x5b1   :  { %4185 = vmatpush.bf16.msk.msrb.mxu3 %vm5958_vm13, %v4184_v37 }
 0x5b2   :  { %v5095_v39 = vpop.permute.xlu0 %5094 }
 0x5b3   :  { %v5085_v3 = vpop.permute.xlu1 %5084  ;;  %v5097_v61 = vunpack.i.h.bf16 %v5095_v39  ;;  %v5096_v38 = vunpack.i.l.bf16 %v5095_v39 }
 0x5b4   :  { %v5087_v60 = vunpack.i.h.bf16 %v5085_v3  ;;  %v5086_v26 = vunpack.i.l.bf16 %v5085_v3  ;;  %v5072_v3 = vunpack.i.h.bf16 %v6876_v19 }
 0x5b5   :  { %v1878_v11 = vsel %vm8229_vm1, %v5096_v38, %v5097_v61  ;;  %vm8236_vm1 = vmmov %vm8235_vm6 }
 0x5b6   :  { %v1800_v30 = vsel %vm8230_vm8, %v5086_v26, %v5087_v60  ;;  %v1801_v13 = vsel %vm8231_vm7, %v5087_v60, %v5091_v7  ;;  %vm8237_vm8 = vcmask 916480   ;;  %v5130_v5 = vpop.permute.xlu2 %5129 }
 0x5b7   :  { %v4171_v50 = vpack.c.bf16 %v1878_v11, %v1800_v30  ;;  %vm8238_vm7 = vmmov %vm8237_vm8 }
 0x5b9   :  { %4172 = vmatpush.bf16.msk.msrb.mxu2 %vm5897_vm9, %v4171_v50 }
 0x5ba   :  { %v5105_v43 = vpop.permute.xlu0 %5104 }
 0x5bb   :  { %v1877_v42 = vpop.permute.xlu1 %1876  ;;  %v5107_v63 = vunpack.i.h.bf16 %v5105_v43  ;;  %v5106_v17 = vunpack.i.l.bf16 %v5105_v43  ;;  %v5131_v43 = vunpack.i.l.bf16 %v5130_v5 }
 0x5bc   :  { %v1879_v18 = vsel %vm8232_vm0, %v5097_v61, %v1877_v42  ;;  %4173 = vmatmul.msk.bf16.vlgmr.msrb.gmra.mxu2 %vm8233_vm2, %v6893_v9  ;;  %vm8239_vm0 = vcmask 1039360   ;;  %v5082_v61 = vunpack.i.h.bf16 %v6874_v23 }
 0x5bd   :  { %v4187_v53 = vpack.c.bf16 %v1879_v18, %v1801_v13  ;;  %v1752_v22 = vsel %vm8235_vm6, %v5032_v32, %v5106_v17  ;;  %v1753_v24 = vsel %vm8236_vm1, %v5106_v17, %v5107_v63  ;;  %v1740_v44 = vsel %vm8239_vm0, %v5042_v62, %v5116_v2  ;;  %vm8240_vm2 = vmmov %vm8239_vm0 }
 0x5be   :  { %v1741_v29 = vsel %vm8240_vm2, %v5116_v2, %v5117_v48  ;;  %v4133_v60 = vpack.c.bf16 %v1740_v44, %v6775_v8  ;;  %vm8243_vm1 = vcmask 7168   ;;  %v5092_v18 = vunpack.i.h.bf16 %v6837_v59  ;;  %v1643_v59 = vpop.f32.mrf.mxu0  ;;  %v1656_v48 = vpop.f32.mrf.mxu1 }
 0x5bf   :  { %4188 = vmatpush.bf16.msk.msrb.mxu3 %vm5923_vm12, %v4187_v53  ;;  %v4149_v26 = vpack.c.bf16 %v1741_v29, %v6804_v16  ;;  %v5132_v53 = vunpack.i.h.bf16 %v5130_v5  ;;  %vm8246_vm0 = vcmask 138240   ;;  %v1669_v2 = vpop.f32.mrf.mxu2  ;;  %v1624_v44 = vpop.permute.xlu2 %1623 }
 0x5c0   :  { %v1702_v63 = vsel %vm8246_vm0, %v5092_v18, %v5131_v43  ;;  %vm8247_vm2 = vmmov %vm8246_vm0  ;;  %v1644_v29 = vadd.f32 %v1643_v59, %v1624_v44  ;;  %vm8253_vm0 = vcmask 924672  }
 0x5c2   :  { %4189 = vmatmul.msk.bf16.vlgmr.msrb.gmra.mxu3 %vm8234_vm3, %v6893_v9  ;;  %v5120_v46 = vpop.permute.xlu0 %5119  ;;  %vm8241_vm3 = vcmask 121856  }
 0x5c3   :  { %v5110_v20 = vpop.permute.xlu1 %5109  ;;  %v5122_v34 = vunpack.i.h.bf16 %v5120_v46  ;;  %v5121_v37 = vunpack.i.l.bf16 %v5120_v46  ;;  %vm8242_vm6 = vmmov %vm8241_vm3 }
 0x5c4   :  { %v5112_v1 = vunpack.i.h.bf16 %v5110_v20  ;;  %v5111_v15 = vunpack.i.l.bf16 %v5110_v20 }
 0x5c5   :  { %v1714_v19 = vsel %vm8241_vm3, %v5072_v3, %v5121_v37  ;;  %v1715_v23 = vsel %vm8242_vm6, %v5121_v37, %v5122_v34  ;;  %vm8249_vm6 = vcmask 654336  }
 0x5c6   :  { %v1786_v57 = vsel %vm8237_vm8, %v5037_v27, %v5111_v15  ;;  %v1787_v36 = vsel %vm8238_vm7, %v5111_v15, %v5112_v1  ;;  %vm8244_vm8 = vmmov %vm8243_vm1  ;;  %vm8245_vm7 = vcmask 130048   ;;  %v1703_v27 = vsel %vm8247_vm2, %v5131_v43, %v5132_v53  ;;  %v1682_v1 = vpop.f32.mrf.mxu3  ;;  %v1645_v15 = vpop.f32.mrf.mxu0 }
 0x5c7   :  { %v4130_v54 = vpack.c.bf16 %v1786_v57, %v1752_v22  ;;  %v4146_v49 = vpack.c.bf16 %v1787_v36, %v1753_v24  ;;  %vm8248_vm3 = vmmov %vm8245_vm7  ;;  %v1658_v62 = vpop.f32.mrf.mxu1  ;;  %v1671_v22 = vpop.f32.mrf.mxu2 }
 0x5c8   :  { %vm8254_vm2 = vmmov %vm8253_vm0 }
 0x5c9   :  { %4131 = vmatpush.bf16.msk.msrb.mxu0 %vm5897_vm9, %v4130_v54  ;;  %4147 = vmatpush.bf16.msk.msrb.mxu1 %vm5923_vm12, %v4146_v49 }
 0x5ca   :  { %v5135_v39 = vpop.permute.xlu0 %5134 }
 0x5cb   :  { %v5125_v38 = vpop.permute.xlu1 %5124  ;;  %v5137_v50 = vunpack.i.h.bf16 %v5135_v39  ;;  %v5136_v7 = vunpack.i.l.bf16 %v5135_v39  ;;  %v1683_v39 = vadd.f32 %v1682_v1, %v1624_v44 }
 0x5cc   :  { %v5127_v11 = vunpack.i.h.bf16 %v5125_v38  ;;  %v5126_v30 = vunpack.i.l.bf16 %v5125_v38  ;;  %v6948_v38 = vld [vmem:[#allocation3] sm:$0xff] }
 0x5cd   :  { %4134 = vmatpush.bf16.msk.msrb.mxu0 %vm5932_vm14, %v4133_v60  ;;  %4150 = vmatpush.bf16.msk.msrb.mxu1 %vm5941_vm15, %v4149_v26  ;;  %v1776_v47 = vsel %vm8245_vm7, %v5136_v7, %v5137_v50 }
 0x5ce   :  { %v1726_v42 = vsel %vm8243_vm1, %v5082_v61, %v5126_v30  ;;  %v1727_v8 = vsel %vm8244_vm8, %v5126_v30, %v5127_v11  ;;  %v4139_v17 = vpack.c.bf16 %v1776_v47, %v1702_v63  ;;  %vm8250_vm1 = vmmov %vm8249_vm6  ;;  %v1684_v24 = vpop.f32.mrf.mxu3  ;;  %vm8251_vm8 = vcmask 908288  }
 0x5cf   :  { %v4136_v16 = vpack.c.bf16 %v1726_v42, %v1714_v19  ;;  %v4152_v13 = vpack.c.bf16 %v1727_v8, %v1715_v23  ;;  %v1657_v42 = vadd.f32 %v1656_v48, %v1624_v44  ;;  %vm8252_vm7 = vmmov %vm8251_vm8 }
 0x5d1   :  { %4137 = vmatpush.bf16.msk.msrb.mxu0 %vm5969_vm4, %v4136_v16  ;;  %4153 = vmatpush.bf16.msk.msrb.mxu1 %vm5958_vm13, %v4152_v13 }
 0x5d3   :  { %v1775_v46 = vpop.permute.xlu1 %1774 }
 0x5d4   :  { %v1777_v32 = vsel %vm8248_vm3, %v5137_v50, %v1775_v46  ;;  %vm8255_vm3 = vcmask 916480  }
 0x5d5   :  { %v4155_v20 = vpack.c.bf16 %v1777_v32, %v1703_v27  ;;  %4140 = vmatpush.bf16.msk.msrb.mxu0 %vm5897_vm9, %v4139_v17 }
 0x5d7   :  { %4156 = vmatpush.bf16.msk.msrb.mxu1 %vm5923_vm12, %v4155_v20 }
 0x5d8   :  { %4141 = vmatmul.msk.bf16.vlgmr.msrb.gmra.mxu0 %vm8249_vm6, %v6893_v9  ;;  %vm8256_vm6 = vmmov %vm8255_vm3 }
 0x5da   :  { %4157 = vmatmul.msk.bf16.vlgmr.msrb.gmra.mxu1 %vm8250_vm1, %v6893_v9  ;;  %v1670_v9 = vadd.f32 %v1669_v2, %v1624_v44  ;;  %vm8257_vm1 = vcmask 1039360  }
 0x63f   :  { %v1952_v57 = vpop.f32.mrf.mxu2 }
 0x640   :  { %v1953_v26 = vadd.f32 %v1952_v57, %v1670_v9 }
 0x642   :  { %v6962_v7 = vmax.f32 %v1953_v26, 0.0 }
 0x644   :  { %v5179_v19 = vpack.i.bf16 %v6962_v7, %v6948_v38 }
 0x645   :  { %v1965_v36 = vpop.f32.mrf.mxu3 }
 0x646   :  { %v1966_v61 = vadd.f32 %v1965_v36, %v1683_v39 }
 0x647   :  { %v1954_v54 = vpop.f32.mrf.mxu2 }
 0x648   :  { %v6960_v30 = vmax.f32 %v1966_v61, 0.0 }
 0x64a   :  { %v5164_v43 = vpack.i.bf16 %v6960_v30, %v6962_v7  ;;  %v5194_v23 = vpack.i.bf16 %v6948_v38, %v6960_v30 }
 0x64d   :  { %v1967_v49 = vpop.f32.mrf.mxu3 }
 0x655   :  { %v1926_v5 = vpop.f32.mrf.mxu0 }
 0x656   :  { %v1927_v34 = vadd.f32 %v1926_v5, %v1644_v29 }
 0x657   :  { %v1939_v37 = vpop.f32.mrf.mxu1 }
 0x658   :  { %v6946_v3 = vmax.f32 %v1927_v34, 0.0  ;;  %v1940_v8 = vadd.f32 %v1939_v37, %v1657_v42 }
 0x65a   :  { %v6952_v60 = vpack.i.bf16 %v6946_v3, %v6948_v38  ;;  %v6983_v16 = vmax.f32 %v1940_v8, 0.0 }
 0x65c   :  { %5150 = vrot.lane.b32.xlu2 %v6952_v60, %s5724_s27  ;;  %5145 = vrot.lane.b32.xlu0 %v6952_v60, %s5722_s25  ;;  %v6987_v13 = vpack.i.bf16 %v6948_v38, %v6983_v16  ;;  %v6996_v18 = vpack.i.bf16 %v6983_v16, %v6946_v3 }
 0x65d   :  { %5140 = vrot.lane.b32.xlu1 %v6952_v60, %s5723_s26  ;;  %v1928_v11 = vpop.f32.mrf.mxu0 }
 0x65f   :  { %v1941_v50 = vpop.f32.mrf.mxu1 }
 0x664   :  { %5165 = vrot.lane.b32.xlu2 %v5164_v43, %s5722_s25  ;;  %5160 = vrot.lane.b32.xlu0 %v5164_v43, %s5723_s26 }
 0x665   :  { %5155 = vrot.lane.b32.xlu1 %v6952_v60, %s5725_s28 }
 0x66c   :  { %5180 = vrot.lane.b32.xlu2 %v5179_v19, %s5726_s29  ;;  %5175 = vrot.lane.b32.xlu0 %v5164_v43, %s5725_s28 }
 0x66d   :  { %5170 = vrot.lane.b32.xlu1 %v5164_v43, %s5724_s27 }
 0x674   :  { %5195 = vrot.lane.b32.xlu2 %v5194_v23, %s5727_s30  ;;  %5185 = vrot.lane.b32.xlu0 %v5194_v23, %s5726_s29 }
 0x675   :  { %5190 = vrot.lane.b32.xlu1 %v5179_v19, %s5727_s30 }
 0x67c   :  { %5210 = vrot.lane.b32.xlu2 %v5179_v19, %s5729_s12  ;;  %5200 = vrot.lane.b32.xlu0 %v5179_v19, %s5728_s7 }
 0x67d   :  { %5205 = vrot.lane.b32.xlu1 %v5194_v23, %s5728_s7 }
 0x684   :  { %5225 = vrot.lane.b32.xlu2 %v6987_v13, %s5722_s25  ;;  %5215 = vrot.lane.b32.xlu0 %v5194_v23, %s5729_s12 }
 0x685   :  { %5220 = vrot.lane.b32.xlu1 %v6987_v13, %s5723_s26 }
 0x68c   :  { %5240 = vrot.lane.b32.xlu2 %v6996_v18, %s5726_s29  ;;  %5230 = vrot.lane.b32.xlu0 %v6987_v13, %s5724_s27 }
 0x68d   :  { %5235 = vrot.lane.b32.xlu1 %v6987_v13, %s5725_s28 }
 0x694   :  { %5255 = vrot.lane.b32.xlu2 %v6996_v18, %s5729_s12  ;;  %5245 = vrot.lane.b32.xlu0 %v6996_v18, %s5727_s30 }
 0x695   :  { %5250 = vrot.lane.b32.xlu1 %v6996_v18, %s5728_s7 }
 0x69c   :  { %5270 = vrot.lane.b32.xlu2 %v5179_v19, %s5724_s27  ;;  %5265 = vrot.lane.b32.xlu0 %v5179_v19, %s5722_s25 }
 0x69d   :  { %2336 = vrot.lane.b32.xlu1 %v6948_v38, %s5723_s26 }
 0x6a4   :  { %5285 = vrot.lane.b32.xlu2 %v5164_v43, %s5729_s12  ;;  %5290 = vrot.lane.b32.xlu0 %v5164_v43, %s5726_s29 }
 0x6a5   :  { %5260 = vrot.lane.b32.xlu1 %v5179_v19, %s5723_s26 }
 0x6ac   :  { %5300 = vrot.lane.b32.xlu2 %v5194_v23, %s5725_s28  ;;  %5305 = vrot.lane.b32.xlu0 %v5194_v23, %s5722_s25 }
 0x6ad   :  { %5275 = vrot.lane.b32.xlu1 %v5179_v19, %s5725_s28 }
 0x6b4   :  { %5315 = vrot.lane.b32.xlu2 %v5194_v23, %s5723_s26 }
 0x6b5   :  { %5280 = vrot.lane.b32.xlu1 %v5164_v43, %s5728_s7 }
 0x6b6   :  { %v7022_v53 = vpop.permute.xlu2 %5150 }
 0x6b7   :  { %v5152_v49 = vunpack.i.l.bf16 %v7022_v53 }
 0x6bd   :  { %5295 = vrot.lane.b32.xlu1 %v5164_v43, %s5727_s30 }
 0x6be   :  { %v5166_v47 = vpop.permute.xlu2 %5165 }
 0x6bf   :  { %v5168_v24 = vunpack.i.h.bf16 %v5166_v47  ;;  %v5167_v57 = vunpack.i.l.bf16 %v5166_v47 }
 0x6c1   :  { %v2141_v39 = vsel %vm8253_vm0, %v5167_v57, %v5168_v24 }
 0x6c5   :  { %5310 = vrot.lane.b32.xlu1 %v5194_v23, %s5724_s27 }
 0x6c6   :  { %v5181_v63 = vpop.permute.xlu2 %5180 }
 0x6c7   :  { %v5183_v8 = vunpack.i.h.bf16 %v5181_v63  ;;  %v5182_v47 = vunpack.i.l.bf16 %v5181_v63 }
 0x6ce   :  { %v7026_v17 = vpop.permute.xlu0 %5145  ;;  %v7031_v20 = vpop.permute.xlu2 %5195 }
 0x6cf   :  { %v7028_v46 = vpop.permute.xlu1 %5140  ;;  %v5147_v36 = vunpack.i.l.bf16 %v7026_v17 }
 0x6d0   :  { %v5142_v32 = vunpack.i.l.bf16 %v7028_v46 }
 0x6d1   :  { %v2142_v61 = vsel %vm8254_vm2, %v5168_v24, %v5147_v36  ;;  %vm8261_vm2 = vcmask 7168  }
 0x6d6   :  { %v5161_v27 = vpop.permute.xlu0 %5160  ;;  %v5211_v9 = vpop.permute.xlu2 %5210 }
 0x6d7   :  { %v7033_v59 = vpop.permute.xlu1 %5155  ;;  %v5163_v48 = vunpack.i.h.bf16 %v5161_v27  ;;  %v5162_v2 = vunpack.i.l.bf16 %v5161_v27 }
 0x6d8   :  { %v5157_v26 = vunpack.i.l.bf16 %v7033_v59 }
 0x6d9   :  { %v2154_v1 = vsel %vm8251_vm8, %v5163_v48, %v5142_v32  ;;  %v2153_v15 = vsel %vm8252_vm7, %v5162_v2, %v5163_v48  ;;  %vm8258_vm8 = vmmov %vm8257_vm1  ;;  %vm8259_vm7 = vcmask 121856  }
 0x6da   :  { %v4240_v62 = vpack.c.bf16 1.0, %v2154_v1  ;;  %v4224_v22 = vpack.c.bf16 1.0, %v2153_v15  ;;  %v5197_v15 = vunpack.i.l.bf16 %v7031_v20  ;;  %vm8260_vm0 = vmmov %vm8259_vm7 }
 0x6db   :  { %v2099_v63 = vsel %vm8260_vm0, %v5182_v47, %v5183_v8  ;;  %v5143_v47 = vunpack.i.h.bf16 %v7028_v46 }
 0x6dc   :  { %4225 = vmatpush.bf16.msk.msra.mxu2 %vm5878_vm5, %v4224_v22  ;;  %4241 = vmatpush.bf16.msk.msra.mxu3 %vm5906_vm10, %v4240_v62 }
 0x6de   :  { %v5176_v54 = vpop.permute.xlu0 %5175 }
 0x6df   :  { %v5171_v44 = vpop.permute.xlu1 %5170  ;;  %v5178_v34 = vunpack.i.h.bf16 %v5176_v54  ;;  %v5177_v37 = vunpack.i.l.bf16 %v5176_v54  ;;  %v5226_v54 = vpop.permute.xlu2 %5225 }
 0x6e0   :  { %v5173_v29 = vunpack.i.h.bf16 %v5171_v44  ;;  %v5172_v5 = vunpack.i.l.bf16 %v5171_v44 }
 0x6e1   :  { %v2130_v23 = vsel %vm8257_vm1, %v5178_v34, %v5157_v26  ;;  %v2129_v42 = vsel %vm8258_vm8, %v5177_v37, %v5178_v34  ;;  %vm8264_vm1 = vcmask 138240   ;;  %vm8265_vm8 = vcmask 654336  }
 0x6e2   :  { %v2176_v11 = vsel %vm8255_vm3, %v5173_v29, %v5152_v49  ;;  %v2175_v50 = vsel %vm8256_vm6, %v5172_v5, %v5173_v29  ;;  %v4246_v32 = vpack.c.bf16 %v2130_v23, %v6960_v30  ;;  %v4230_v48 = vpack.c.bf16 %v2129_v42, %v6962_v7  ;;  %vm8262_vm3 = vmmov %vm8261_vm2 }
 0x6e3   :  { %v4227_v43 = vpack.c.bf16 %v2175_v50, %v2141_v39  ;;  %v4243_v19 = vpack.c.bf16 %v2176_v11, %v2142_v61  ;;  %v5213_v29 = vunpack.i.h.bf16 %v5211_v9  ;;  %v5212_v5 = vunpack.i.l.bf16 %v5211_v9  ;;  %v7081_v9 = vld [vmem:[%s7993_s1 + $0x18] sm:$0xf] }
 0x6e4   :  { %vm8263_vm6 = vcmask 130048  }
 0x6e5   :  { %4228 = vmatpush.bf16.msk.msra.mxu2 %vm5897_vm9, %v4227_v43  ;;  %4244 = vmatpush.bf16.msk.msra.mxu3 %vm5923_vm12, %v4243_v19  ;;  %v2165_v26 = vsel %vm8263_vm6, %v5212_v5, %v5213_v29  ;;  %vm8267_vm0 = vmmov %vm8263_vm6 }
 0x6e6   :  { %v7054_v27 = vpop.permute.xlu0 %5185  ;;  %vm8270_vm6 = vmmov %vm8265_vm8 }
 0x6e7   :  { %v5191_v2 = vpop.permute.xlu1 %5190  ;;  %v5187_v1 = vunpack.i.l.bf16 %v7054_v27  ;;  %v7083_v43 = vpop.permute.xlu2 %5240 }
 0x6e8   :  { %v5193_v62 = vunpack.i.h.bf16 %v5191_v2  ;;  %v5192_v22 = vunpack.i.l.bf16 %v5191_v2 }
 0x6e9   :  { %v2100_v24 = vsel %vm8259_vm7, %v5183_v8, %v5187_v1  ;;  %4231 = vmatpush.bf16.msk.msra.mxu2 %vm5932_vm14, %v4230_v48  ;;  %4247 = vmatpush.bf16.msk.msra.mxu3 %vm5941_vm15, %v4246_v32  ;;  %vm8266_vm7 = vmmov %vm8264_vm1 }
 0x6ea   :  { %v2111_v57 = vsel %vm8261_vm2, %v5192_v22, %v5193_v62  ;;  %v2112_v36 = vsel %vm8262_vm3, %v5193_v62, %v5197_v15  ;;  %vm8268_vm2 = vcmask 908288  }
 0x6eb   :  { %v4233_v49 = vpack.c.bf16 %v2111_v57, %v2099_v63  ;;  %v4249_v44 = vpack.c.bf16 %v2112_v36, %v2100_v24  ;;  %vm8269_vm3 = vmmov %vm8268_vm2  ;;  %v5228_v57 = vunpack.i.h.bf16 %v5226_v54  ;;  %v5227_v36 = vunpack.i.l.bf16 %v5226_v54 }
 0x6ec   :  { %v5158_v54 = vunpack.i.h.bf16 %v7033_v59  ;;  %v5188_v59 = vunpack.i.h.bf16 %v7054_v27 }
 0x6ed   :  { %4234 = vmatpush.bf16.msk.msra.mxu2 %vm5969_vm4, %v4233_v49  ;;  %4250 = vmatpush.bf16.msk.msra.mxu3 %vm5958_vm13, %v4249_v44  ;;  %v5153_v49 = vunpack.i.h.bf16 %v7022_v53  ;;  %v5148_v44 = vunpack.i.h.bf16 %v7026_v17 }
 0x6ee   :  { %v5201_v34 = vpop.permute.xlu0 %5200 }
 0x6ef   :  { %v7072_v37 = vpop.permute.xlu1 %5205  ;;  %v5203_v39 = vunpack.i.h.bf16 %v5201_v34  ;;  %v5202_v61 = vunpack.i.l.bf16 %v5201_v34 }
 0x6f0   :  { %v5207_v19 = vunpack.i.l.bf16 %v7072_v37 }
 0x6f1   :  { %v2087_v11 = vsel %vm8264_vm1, %v5202_v61, %v5203_v39  ;;  %vm8271_vm1 = vcmask 924672  }
 0x6f2   :  { %v4236_v50 = vpack.c.bf16 %v2165_v26, %v2087_v11  ;;  %v2088_v2 = vsel %vm8266_vm7, %v5203_v39, %v5207_v19  ;;  %v2039_v11 = vsel %vm8271_vm1, %v5148_v44, %v5227_v36  ;;  %vm8273_vm7 = vcmask 916480  }
 0x6f4   :  { %4237 = vmatpush.bf16.msk.msra.mxu2 %vm5897_vm9, %v4236_v50 }
 0x6f6   :  { %v7086_v23 = vpop.permute.xlu0 %5215 }
 0x6f7   :  { %v5221_v42 = vpop.permute.xlu1 %5220  ;;  %v5217_v8 = vunpack.i.l.bf16 %v7086_v23  ;;  %4238 = vmatmul.msk.bf16.vlgmr.msra.gmra.mxu2 %vm8265_vm8, %v7081_v9  ;;  %vm8272_vm8 = vmmov %vm8271_vm1  ;;  %vm8278_vm1 = vcmask 7168  }
 0x6f8   :  { %v5223_v32 = vunpack.i.h.bf16 %v5221_v42  ;;  %v5222_v48 = vunpack.i.l.bf16 %v5221_v42  ;;  %v2040_v50 = vsel %vm8272_vm8, %v5227_v36, %v5228_v57  ;;  %vm8279_vm8 = vmmov %vm8278_vm1 }
 0x6f9   :  { %v2166_v1 = vsel %vm8267_vm0, %v5213_v29, %v5217_v8  ;;  %v5256_v29 = vpop.permute.xlu2 %5255  ;;  %vm8274_vm0 = vmmov %vm8273_vm7 }
 0x6fa   :  { %v2051_v15 = vsel %vm8268_vm2, %v5143_v47, %v5222_v48  ;;  %v2052_v62 = vsel %vm8269_vm3, %v5222_v48, %v5223_v32  ;;  %v4252_v22 = vpack.c.bf16 %v2166_v1, %v2088_v2  ;;  %vm8275_vm2 = vcmask 1039360  }
 0x6fb   :  { %v4192_v24 = vpack.c.bf16 1.0, %v2051_v15  ;;  %v4208_v63 = vpack.c.bf16 1.0, %v2052_v62  ;;  %vm8276_vm3 = vmmov %vm8275_vm2  ;;  %v5242_v32 = vunpack.i.l.bf16 %v7083_v43  ;;  %v5243_v48 = vunpack.i.h.bf16 %v7083_v43 }
 0x6fc   :  { %4253 = vmatpush.bf16.msk.msra.mxu3 %vm5923_vm12, %v4252_v22  ;;  %v5198_v62 = vunpack.i.h.bf16 %v7031_v20  ;;  %v5208_v43 = vunpack.i.h.bf16 %v7072_v37 }
 0x6fd   :  { %4193 = vmatpush.bf16.msk.msra.mxu0 %vm5878_vm5, %v4192_v24  ;;  %4209 = vmatpush.bf16.msk.msra.mxu1 %vm5906_vm10, %v4208_v63 }
 0x6fe   :  { %v5231_v46 = vpop.permute.xlu0 %5230 }
 0x6ff   :  { %v5236_v5 = vpop.permute.xlu1 %5235  ;;  %v5233_v34 = vunpack.i.h.bf16 %v5231_v46  ;;  %v5232_v39 = vunpack.i.l.bf16 %v5231_v46  ;;  %4254 = vmatmul.msk.bf16.vlgmr.msra.gmra.mxu3 %vm8270_vm6, %v7081_v9  ;;  %vm8277_vm6 = vcmask 121856  }
 0x700   :  { %v5238_v61 = vunpack.i.h.bf16 %v5236_v5  ;;  %v5237_v26 = vunpack.i.l.bf16 %v5236_v5  ;;  %v2001_v27 = vsel %vm8277_vm6, %v5188_v59, %v5242_v32 }
 0x701   :  { %v2073_v19 = vsel %vm8273_vm7, %v5153_v49, %v5232_v39  ;;  %v2074_v53 = vsel %vm8274_vm0, %v5232_v39, %v5233_v34  ;;  %v7129_v46 = vpop.permute.xlu2 %5270  ;;  %v5218_v49 = vunpack.i.h.bf16 %v7086_v23  ;;  %vm8280_vm7 = vmmov %vm8277_vm6  ;;  %v5258_v34 = vunpack.i.h.bf16 %v5256_v29 }
 0x702   :  { %v4195_v17 = vpack.c.bf16 %v2073_v19, %v2039_v11  ;;  %v4211_v42 = vpack.c.bf16 %v2074_v53, %v2040_v50  ;;  %v2027_v8 = vsel %vm8275_vm2, %v5158_v54, %v5237_v26  ;;  %v2028_v47 = vsel %vm8276_vm3, %v5237_v26, %v5238_v61 }
 0x703   :  { %v4198_v2 = vpack.c.bf16 %v2027_v8, %v6946_v3  ;;  %v4214_v1 = vpack.c.bf16 %v2028_v47, %v6983_v16  ;;  %v2002_v5 = vsel %vm8280_vm7, %v5242_v32, %v5243_v48  ;;  %v5257_v39 = vunpack.i.l.bf16 %v5256_v29 }
 0x704   :  { %4196 = vmatpush.bf16.msk.msra.mxu0 %vm5897_vm9, %v4195_v17  ;;  %4212 = vmatpush.bf16.msk.msra.mxu1 %vm5923_vm12, %v4211_v42  ;;  %vm8281_vm0 = vcmask 138240   ;;  %vm8283_vm3 = vcmask 130048   ;;  %vm8287_vm7 = vcmask 1039360  }
 0x705   :  { %vm8282_vm2 = vmmov %vm8281_vm0  ;;  %v2063_v37 = vsel %vm8283_vm3, %v5218_v49, %v5257_v39 }
 0x706   :  { %v5246_v15 = vpop.permute.xlu0 %5245  ;;  %vm8284_vm6 = vmmov %vm8283_vm3 }
 0x707   :  { %v5251_v22 = vpop.permute.xlu1 %5250  ;;  %v5248_v24 = vunpack.i.h.bf16 %v5246_v15  ;;  %v5247_v63 = vunpack.i.l.bf16 %v5246_v15  ;;  %v2064_v23 = vsel %vm8284_vm6, %v5257_v39, %v5258_v34  ;;  %vm8289_vm6 = vnez %v8031_v33 }
 0x708   :  { %v5253_v57 = vunpack.i.h.bf16 %v5251_v22  ;;  %v5252_v36 = vunpack.i.l.bf16 %v5251_v22  ;;  %4199 = vmatpush.bf16.msk.msra.mxu0 %vm5932_vm14, %v4198_v2  ;;  %4215 = vmatpush.bf16.msk.msra.mxu1 %vm5941_vm15, %v4214_v1 }
 0x709   :  { %v2013_v20 = vsel %vm8278_vm1, %v5198_v62, %v5247_v63  ;;  %v2014_v44 = vsel %vm8279_vm8, %v5247_v63, %v5248_v24  ;;  %v7149_v29 = vpop.permute.xlu2 %5285  ;;  %vm8285_vm1 = vcmask 654336  }
 0x70a   :  { %v4201_v54 = vpack.c.bf16 %v2013_v20, %v2001_v27  ;;  %v1989_v61 = vsel %vm8281_vm0, %v5208_v43, %v5252_v36  ;;  %v4217_v26 = vpack.c.bf16 %v2014_v44, %v2002_v5  ;;  %v1990_v11 = vsel %vm8282_vm2, %v5252_v36, %v5253_v57  ;;  %vm8286_vm8 = vmmov %vm8285_vm1 }
 0x70b   :  { %v4204_v50 = vpack.c.bf16 %v2063_v37, %v1989_v61  ;;  %v4220_v19 = vpack.c.bf16 %v2064_v23, %v1990_v11  ;;  %v5288_v24 = vunpack.i.h.bf16 %v7149_v29  ;;  %v8020_v63 = vunpack.i.l.bf16 %v7149_v29 }
 0x70c   :  { %4202 = vmatpush.bf16.msk.msra.mxu0 %vm5969_vm4, %v4201_v54  ;;  %4218 = vmatpush.bf16.msk.msra.mxu1 %vm5958_vm13, %v4217_v26  ;;  %vm8288_vm2 = vcmask 121856  }
 0x70d   :  { %v2850_v49 = vsel %vm8283_vm3, %v8020_v63, %v5288_v24 }
 0x70e   :  { %v7157_v42 = vpop.permute.xlu0 %5265 }
 0x70f   :  { %v7143_v53 = vpop.permute.xlu1 %2336  ;;  %v5267_v0 = vunpack.i.l.bf16 %v7157_v42 }
 0x710   :  { %4205 = vmatpush.bf16.msk.msra.mxu0 %vm5897_vm9, %v4204_v50  ;;  %4221 = vmatpush.bf16.msk.msra.mxu1 %vm5923_vm12, %v4220_v19 }
 0x711   :  { %v5301_v8 = vpop.permute.xlu2 %5300 }
 0x712   :  { %v5302_v32 = vunpack.i.l.bf16 %v5301_v8  ;;  %v5303_v20 = vunpack.i.h.bf16 %v5301_v8 }
 0x713   :  { %4206 = vmatmul.msk.bf16.vlgmr.msra.gmra.mxu0 %vm8285_vm1, %v7081_v9  ;;  %4222 = vmatmul.msk.bf16.vlgmr.msra.gmra.mxu1 %vm8286_vm8, %v7081_v9  ;;  %vm8290_vm1 = vmmov %vm8287_vm7  ;;  %vm8291_vm8 = vcmask 7168  }
 0x714   :  { %v2896_v26 = vsel %vm8290_vm1, %v5302_v32, %v5303_v20  ;;  %vm8296_vm1 = vcmask 924672  }
 0x715   :  { %v2900_v50 = vsel %vm8289_vm6, %v2896_v26, 0.0 }
 0x716   :  { %v7165_v2 = vpop.permute.xlu0 %5290 }
 0x717   :  { %v7155_v17 = vpop.permute.xlu1 %5260  ;;  %v5293_v15 = vunpack.i.h.bf16 %v7165_v2  ;;  %v8021_v9 = vunpack.i.l.bf16 %v7165_v2 }
 0x719   :  { %v2862_v36 = vsel %vm8288_vm2, %v8021_v9, %v5293_v15 }
 0x71a   :  { %v2866_v5 = vsel %vm8289_vm6, %v2862_v36, 0.0 }
 0x71f   :  { %v7159_v47 = vpop.permute.xlu1 %5275 }
 0x720   :  { %v5278_v59 = vunpack.i.h.bf16 %v7159_v47 }
 0x722   :  { %v7163_v48 = vsel %vm8287_vm7, %v5278_v59, %v5302_v32  ;;  %vm8292_vm7 = vcmask 908288  }
 0x727   :  { %v7167_v1 = vpop.permute.xlu1 %5280 }
 0x728   :  { %v5283_v62 = vunpack.i.h.bf16 %v7167_v1  ;;  %v8022_v22 = vunpack.i.l.bf16 %v7167_v1 }
 0x72a   :  { %v2836_v27 = vsel %vm8281_vm0, %v8022_v22, %v5283_v62  ;;  %vm8293_vm0 = vmmov %vm8292_vm7 }
 0x72b   :  { %v2840_v57 = vsel %vm5910_vm11, %v2836_v27, 0.0  ;;  %vm8294_vm2 = vmmov %vm8293_vm0 }
 0x72c   :  { %v2842_v43 = vmax.f32 %v6960_v30, %v2840_v57  ;;  %vm8295_vm3 = vmmov %vm8293_vm0 }
 0x72e   :  { %v2854_v44 = vmax.f32 %v2842_v43, %v2850_v49 }
 0x72f   :  { %v7189_v34 = vpop.permute.xlu1 %5295 }
 0x730   :  { %v5298_v39 = vunpack.i.h.bf16 %v7189_v34  ;;  %v8019_v54 = vunpack.i.l.bf16 %v7189_v34  ;;  %v2868_v61 = vmax.f32 %v2854_v44, %v2866_v5 }
 0x732   :  { %v2876_v11 = vsel %vm8291_vm8, %v8019_v54, %v5298_v39  ;;  %vm8297_vm8 = vcmask 916480  }
 0x733   :  { %v2880_v37 = vsel %vm5910_vm11, %v2876_v11, 0.0 }
 0x734   :  { %v2882_v23 = vmax.f32 %v2868_v61, %v2880_v37 }
 0x736   :  { %v7201_v19 = vmax.f32 %v2882_v23, %v2900_v50  ;;  %v7281_v50 = vpop.permute.xlu0 %5305 }
 0x737   :  { %v7271_v37 = vpop.permute.xlu1 %5310 }
 0x77a   :  { %v2239_v8 = vpop.f32.mrf.mxu2 }
 0x77b   :  { %v7203_v59 = vmax.f32 %v2239_v8, 0.0 }
 0x77d   :  { %v5359_v57 = vpack.i.bf16 %v7203_v59, %v6948_v38 }
 0x782   :  { %v2252_v15 = vpop.f32.mrf.mxu3  ;;  %v2241_v62 = vpop.f32.mrf.mxu2 }
 0x783   :  { %v7205_v24 = vmax.f32 %v2252_v15, 0.0 }
 0x785   :  { %v5339_v32 = vpack.i.bf16 %v7205_v24, %v7203_v59  ;;  %v5374_v44 = vpack.i.bf16 %v6948_v38, %v7205_v24 }
 0x787   :  { %5340 = vrot.lane.b32.xlu1 %v5339_v32, %s5724_s27 }
 0x78a   :  { %v2254_v27 = vpop.f32.mrf.mxu3 }
 0x78f   :  { %5360 = vrot.lane.b32.xlu1 %v5359_v57, %s5727_s30 }
 0x790   :  { %v2213_v36 = vpop.f32.mrf.mxu0  ;;  %v2226_v49 = vpop.f32.mrf.mxu1 }
 0x791   :  { %v7213_v43 = vmax.f32 %v2213_v36, 0.0  ;;  %v7215_v20 = vmax.f32 %v2226_v49, 0.0 }
 0x793   :  { %v5324_v5 = vpack.i.bf16 %v7215_v20, %v7213_v43  ;;  %v5414_v26 = vpack.i.bf16 %v7213_v43, %v6948_v38  ;;  %v5429_v11 = vpack.i.bf16 %v6948_v38, %v7215_v20 }
 0x795   :  { %5325 = vrot.lane.b32.xlu2 %v5324_v5, %s5722_s25  ;;  %5320 = vrot.lane.b32.xlu0 %v5324_v5, %s5723_s26 }
 0x797   :  { %5375 = vrot.lane.b32.xlu1 %v5374_v44, %s5728_s7 }
 0x798   :  { %v2215_v39 = vpop.f32.mrf.mxu0  ;;  %v2228_v61 = vpop.f32.mrf.mxu1 }
 0x79d   :  { %5335 = vrot.lane.b32.xlu2 %v5339_v32, %s5722_s25  ;;  %5330 = vrot.lane.b32.xlu0 %v5339_v32, %s5723_s26 }
 0x79f   :  { %5390 = vrot.lane.b32.xlu1 %v5324_v5, %s5724_s27 }
 0x7a5   :  { %5350 = vrot.lane.b32.xlu2 %v5359_v57, %s5726_s29  ;;  %5345 = vrot.lane.b32.xlu0 %v5339_v32, %s5725_s28 }
 0x7a7   :  { %5400 = vrot.lane.b32.xlu1 %v6952_v60, %s5725_s28  ;;  %v7269_v60 = vpop.permute.xlu2 %5315 }
 0x7ad   :  { %5365 = vrot.lane.b32.xlu2 %v5374_v44, %s5727_s30  ;;  %5355 = vrot.lane.b32.xlu0 %v5374_v44, %s5726_s29 }
 0x7af   :  { %5415 = vrot.lane.b32.xlu1 %v5414_v26, %s5727_s30 }
 0x7b5   :  { %5380 = vrot.lane.b32.xlu2 %v5359_v57, %s5729_s12  ;;  %5370 = vrot.lane.b32.xlu0 %v5359_v57, %s5728_s7 }
 0x7b7   :  { %5430 = vrot.lane.b32.xlu1 %v5429_v11, %s5728_s7 }
 0x7bd   :  { %2358 = vrot.lane.b32.xlu2 %v6948_v38, %s5724_s27  ;;  %5385 = vrot.lane.b32.xlu0 %v5374_v44, %s5729_s12 }
 0x7bf   :  { %5445 = vrot.lane.b32.xlu1 %v6996_v18, %s5728_s7 }
 0x7c5   :  { %5405 = vrot.lane.b32.xlu2 %v5414_v26, %s5726_s29  ;;  %2324 = vrot.lane.b32.xlu0 %v6948_v38, %s5722_s25 }
 0x7c7   :  { %5460 = vrot.lane.b32.xlu1 %v6996_v18, %s5727_s30 }
 0x7cd   :  { %5420 = vrot.lane.b32.xlu2 %v5429_v11, %s5727_s30  ;;  %5395 = vrot.lane.b32.xlu0 %v5324_v5, %s5725_s28 }
 0x7cf   :  { %2663 = vrot.lane.b32.xlu1 %v6948_v38, %s5722_s25 }
 0x7d5   :  { %5435 = vrot.lane.b32.xlu2 %v5414_v26, %s5729_s12  ;;  %5410 = vrot.lane.b32.xlu0 %v5429_v11, %s5726_s29 }
 0x7d7   :  { %5480 = vrot.lane.b32.xlu1 %v6996_v18, %s5723_s26 }
 0x7dd   :  { %5450 = vrot.lane.b32.xlu2 %v6996_v18, %s5729_s12  ;;  %5425 = vrot.lane.b32.xlu0 %v5414_v26, %s5728_s7 }
 0x7e5   :  { %5465 = vrot.lane.b32.xlu2 %v6987_v13, %s5725_s28  ;;  %5440 = vrot.lane.b32.xlu0 %v5429_v11, %s5729_s12 }
 0x7ed   :  { %5475 = vrot.lane.b32.xlu2 %v6996_v18, %s5724_s27  ;;  %5455 = vrot.lane.b32.xlu0 %v6996_v18, %s5726_s29 }
 0x7ef   :  { %v7277_v23 = vpop.permute.xlu2 %5325 }
 0x7f0   :  { %v5328_v39 = vunpack.i.h.bf16 %v7277_v23  ;;  %v5327_v61 = vunpack.i.l.bf16 %v7277_v23  ;;  %v7451_v23 = vld [vmem:[%s7996_s5 + $0x18] sm:$0xff] }
 0x7f5   :  { %2689 = vrot.lane.b32.xlu2 %v6948_v38, %s5723_s26  ;;  %5470 = vrot.lane.b32.xlu0 %v6996_v18, %s5722_s25  ;;  %s5741_s26 = smov 56  }
 0x7f7   :  { %v5336_v15 = vpop.permute.xlu2 %5335 }
 0x7f8   :  { %v5337_v54 = vunpack.i.l.bf16 %v5336_v15 }
 0x7f9   :  { %v5341_v13 = vpop.permute.xlu1 %5340 }
 0x7fa   :  { %v5343_v11 = vunpack.i.h.bf16 %v5341_v13 }
 0x7fd   :  { %2677 = vrot.lane.b32.xlu0 %v6948_v38, %s5724_s27  ;;  %v5262_v38 = vunpack.i.l.bf16 %v7155_v17 }
 0x7ff   :  { %v5351_v5 = vpop.permute.xlu2 %5350 }
 0x801   :  { %v7283_v8 = vpop.permute.xlu1 %5360 }
 0x802   :  { %v5363_v28 = vunpack.i.h.bf16 %v7283_v8 }
 0x807   :  { %v5321_v62 = vpop.permute.xlu0 %5320 }
 0x808   :  { %v5323_v32 = vunpack.i.h.bf16 %v5321_v62  ;;  %v5322_v27 = vunpack.i.l.bf16 %v5321_v62 }
 0x809   :  { %v7285_v57 = vpop.permute.xlu1 %5375 }
 0x80a   :  { %v2339_v36 = vsel %vm8292_vm7, %v5323_v32, %v7143_v53  ;;  %v2338_v18 = vsel %vm8293_vm0, %v5322_v27, %v5323_v32  ;;  %v5342_v53 = vunpack.i.l.bf16 %v5341_v13  ;;  %v2326_v13 = vsel %vm8296_vm1, %v5327_v61, %v5328_v39  ;;  %vm8298_vm7 = vmmov %vm8297_vm8 }
 0x80b   :  { %v4273_v49 = vpack.c.bf16 1.0, %v2339_v36  ;;  %v4257_v44 = vpack.c.bf16 1.0, %v2338_v18  ;;  %v5272_v36 = vunpack.i.l.bf16 %v7129_v46  ;;  %vm8299_vm0 = vmmov %vm8298_vm7  ;;  %v5277_v61 = vunpack.i.l.bf16 %v7159_v47 }
 0x80d   :  { %4258 = vmatpush.bf16.msk.msrb.mxu0 %vm5878_vm5, %v4257_v44  ;;  %4274 = vmatpush.bf16.msk.msrb.mxu1 %vm5906_vm10, %v4273_v49  ;;  %v5338_v49 = vunpack.i.h.bf16 %v5336_v15  ;;  %v2463_v25 = vsel %vm8298_vm7, %v5343_v11, %v5272_v36  ;;  %v2462_v15 = vsel %vm8299_vm0, %v5342_v53, %v5343_v11  ;;  %v5362_v53 = vunpack.i.l.bf16 %v7283_v8 }
 0x80f   :  { %v5331_v26 = vpop.permute.xlu0 %5330 }
 0x810   :  { %v5333_v62 = vunpack.i.h.bf16 %v5331_v26  ;;  %v5332_v32 = vunpack.i.l.bf16 %v5331_v26 }
 0x811   :  { %v7297_v27 = vpop.permute.xlu1 %5390 }
 0x812   :  { %v5393_v18 = vunpack.i.h.bf16 %v7297_v27  ;;  %v5392_v44 = vunpack.i.l.bf16 %v7297_v27  ;;  %v2441_v63 = vsel %vm8294_vm2, %v5333_v62, %v5262_v38  ;;  %v2440_v9 = vsel %vm8295_vm3, %v5332_v32, %v5333_v62  ;;  %vm8300_vm2 = vmmov %vm8296_vm1  ;;  %v7319_v38 = vpop.permute.xlu2 %5365 }
 0x813   :  { %v4305_v22 = vpack.c.bf16 1.0, %v2441_v63  ;;  %v4289_v26 = vpack.c.bf16 1.0, %v2440_v9  ;;  %v2429_v63 = vsel %vm8300_vm2, %v5338_v49, %v5267_v0  ;;  %vm8301_vm3 = vmmov %vm8296_vm1  ;;  %v5353_v0 = vunpack.i.h.bf16 %v5351_v5 }
 0x814   :  { %v2360_v6 = vsel %vm8297_vm8, %v5392_v44, %v5393_v18  ;;  %v2428_v9 = vsel %vm8301_vm3, %v5337_v54, %v5338_v49  ;;  %v4308_v11 = vpack.c.bf16 %v2463_v25, %v2429_v63  ;;  %v5352_v54 = vunpack.i.l.bf16 %v5351_v5 }
 0x815   :  { %v4260_v58 = vpack.c.bf16 %v2360_v6, %v2326_v13  ;;  %4290 = vmatpush.bf16.msk.msrb.mxu2 %vm5878_vm5, %v4289_v26  ;;  %4306 = vmatpush.bf16.msk.msrb.mxu3 %vm5906_vm10, %v4305_v22  ;;  %v4292_v62 = vpack.c.bf16 %v2462_v15, %v2428_v9  ;;  %vm8302_vm5 = vcmask 1039360   ;;  %vm8304_vm1 = vcmask 7168  }
 0x816   :  { %vm8303_vm10 = vmmov %vm8302_vm5  ;;  %v2398_v8 = vsel %vm8304_vm1, %v5362_v53, %v5363_v28  ;;  %vm8305_vm8 = vcmask 121856   ;;  %v5367_v5 = vunpack.i.l.bf16 %v7319_v38  ;;  %vm8308_vm2 = vcmask 130048  }
 0x817   :  { %4261 = vmatpush.bf16.msk.msrb.mxu0 %vm5897_vm9, %v4260_v58  ;;  %v5346_v6 = vpop.permute.xlu0 %5345  ;;  %v2386_v36 = vsel %vm8305_vm8, %v5352_v54, %v5353_v0  ;;  %vm8306_vm7 = vmmov %vm8304_vm1  ;;  %vm8309_vm3 = vcmask 138240   ;;  %v8310_v54 = vunpack.i.l.bf16 %v7167_v1  ;;  %v7373_v1 = vld [vmem:[%s7996_s5 + $0x30] sm:$0xff]  ;;  %vm8313_vm1 = vcmask 654336  }
 0x818   :  { %v5348_v40 = vunpack.i.h.bf16 %v5346_v6  ;;  %v5347_v22 = vunpack.i.l.bf16 %v5346_v6  ;;  %v4298_v44 = vpack.c.bf16 %v2398_v8, %v2386_v36  ;;  %vm8307_vm0 = vmmov %vm8305_vm8  ;;  %v5368_v36 = vunpack.i.h.bf16 %v7319_v38 }
 0x819   :  { %4293 = vmatpush.bf16.msk.msrb.mxu2 %vm5897_vm9, %v4292_v62  ;;  %4309 = vmatpush.bf16.msk.msrb.mxu3 %vm5923_vm12, %v4308_v11  ;;  %v7348_v53 = vpop.permute.xlu1 %5400  ;;  %vm8315_vm8 = vmmov %vm8307_vm0 }
 0x81a   :  { %v2417_v58 = vsel %vm8302_vm5, %v5348_v40, %v5277_v61  ;;  %v2416_v47 = vsel %vm8303_vm10, %v5347_v22, %v5348_v40  ;;  %v5381_v13 = vpop.permute.xlu2 %5380  ;;  %v5378_v61 = vunpack.i.h.bf16 %v7285_v57  ;;  %vm8311_vm5 = vmmov %vm8309_vm3  ;;  %vm8312_vm10 = vnez %v8029_v31 }
 0x81b   :  { %v4311_v25 = vpack.c.bf16 %v2417_v58, %v7205_v24  ;;  %v4295_v32 = vpack.c.bf16 %v2416_v47, %v7203_v59  ;;  %v2399_v59 = vsel %vm8306_vm7, %v5363_v28, %v5367_v5  ;;  %v5383_v63 = vunpack.i.h.bf16 %v5381_v13  ;;  %vm8316_vm7 = vmmov %vm8309_vm3 }
 0x81c   :  { %v5382_v9 = vunpack.i.l.bf16 %v5381_v13  ;;  %v2835_v58 = vsel %vm8311_vm5, %v5378_v61, %v8310_v54  ;;  %vm8322_vm5 = vnez %v8025_v21 }
 0x81d   :  { %4296 = vmatpush.bf16.msk.msrb.mxu2 %vm5932_vm14, %v4295_v32  ;;  %4312 = vmatpush.bf16.msk.msrb.mxu3 %vm5941_vm15, %v4311_v25  ;;  %v7365_v32 = vld [vmem:[%s7993_s1 + $0x1c] sm:$0xf]  ;;  %v2839_v8 = vsel %vm8312_vm10, %v2835_v58, 0.0  ;;  %v5268_v58 = vunpack.i.h.bf16 %v7157_v42  ;;  %v7424_v42 = vld [vmem:[%s7996_s5 + $0x70] sm:$0xff] }
 0x81e   :  { %v2452_v40 = vsel %vm8308_vm2, %v5382_v9, %v5383_v63  ;;  %v8317_v9 = vunpack.i.l.bf16 %v7149_v29  ;;  %v8320_v29 = vunpack.i.l.bf16 %v7189_v34 }
 0x81f   :  { %v5356_v49 = vpop.permute.xlu0 %5355 }
 0x820   :  { %v5357_v26 = vunpack.i.l.bf16 %v5356_v49  ;;  %v5358_v25 = vunpack.i.h.bf16 %v5356_v49 }
 0x821   :  { %4299 = vmatpush.bf16.msk.msrb.mxu2 %vm5969_vm4, %v4298_v44  ;;  %v5377_v44 = vunpack.i.l.bf16 %v7285_v57  ;;  %v7392_v57 = vld [vmem:[%s7996_s5 + $0x28] sm:$0xff] }
 0x822   :  { %v2387_v24 = vsel %vm8307_vm0, %v5353_v0, %v5357_v26  ;;  %v2359_v22 = vpop.permute.xlu2 %2358  ;;  %v7355_v0 = vld [vmem:[%s7996_s5 + $0x38] sm:$0xff]  ;;  %v2841_v26 = vmax.f32 %v6962_v7, %v2839_v8  ;;  %vm8318_vm0 = vmmov %vm8308_vm2  ;;  %v5263_v8 = vunpack.i.h.bf16 %v7155_v17 }
 0x823   :  { %v4314_v15 = vpack.c.bf16 %v2399_v59, %v2387_v24  ;;  %v8314_v59 = vunpack.i.l.bf16 %v7165_v2  ;;  %vm8319_vm2 = vmmov %vm8318_vm0  ;;  %v7397_v2 = vld [vmem:[%s7996_s5 + $0x78] sm:$0xff] }
 0x825   :  { %4315 = vmatpush.bf16.msk.msrb.mxu3 %vm5958_vm13, %v4314_v15  ;;  %v2861_v24 = vsel %vm8315_vm8, %v5358_v25, %v8314_v59  ;;  %v7419_v25 = vld [vmem:[%s7996_s5 + $0x20] sm:$0xff]  ;;  %vm8324_vm8 = vcmask 916480   ;;  %v5317_v59 = vunpack.i.l.bf16 %v7269_v60 }
 0x826   :  { %v2865_v54 = vsel %vm8322_vm5, %v2861_v24, 0.0 }
 0x827   :  { %v5371_v62 = vpop.permute.xlu0 %5370 }
 0x828   :  { %v5373_v11 = vunpack.i.h.bf16 %v5371_v62  ;;  %v5372_v6 = vunpack.i.l.bf16 %v5371_v62  ;;  %v5307_v62 = vunpack.i.l.bf16 %v7281_v50 }
 0x82a   :  { %v2374_v28 = vsel %vm8309_vm3, %v5372_v6, %v5373_v11  ;;  %v2375_v15 = vsel %vm8316_vm7, %v5373_v11, %v5377_v44  ;;  %vm8321_vm3 = vcmask 7168   ;;  %v7403_v6 = vpop.permute.xlu1 %5415 }
 0x82b   :  { %v4301_v47 = vpack.c.bf16 %v2452_v40, %v2374_v28  ;;  %v2875_v11 = vsel %vm8321_vm3, %v5368_v36, %v8320_v29  ;;  %v7405_v28 = vpop.permute.xlu2 %5405  ;;  %vm8328_vm3 = vmmov %vm8324_vm8 }
 0x82c   :  { %v2879_v34 = vsel %vm8312_vm10, %v2875_v11, 0.0  ;;  %v7477_v11 = vld [vmem:[%s7996_s5 + $0x10] sm:$0xff] }
 0x82d   :  { %4302 = vmatpush.bf16.msk.msrb.mxu2 %vm5897_vm9, %v4301_v47 }
 0x82f   :  { %v5386_v5 = vpop.permute.xlu0 %5385 }
 0x830   :  { %v5388_v49 = vunpack.i.h.bf16 %v5386_v5  ;;  %v5387_v13 = vunpack.i.l.bf16 %v5386_v5  ;;  %4303 = vmatmul.msk.bf16.vlgmr.msrb.gmra.mxu2 %vm8313_vm1, %v7365_v32  ;;  %vm8323_vm1 = vcmask 924672  }
 0x831   :  { %2945 = vmatpush.bf16.msra.mxu2 %v7355_v0  ;;  %v2909_v36 = vsel %vm8323_vm1, %v5268_v58, %v5307_v62  ;;  %vm8325_vm7 = vmmov %vm8323_vm1  ;;  %v7484_v58 = vld [vmem:[%s7996_s5 + $0x60] sm:$0xff]  ;;  %vm8329_vm1 = vcmask 1039360  }
 0x832   :  { %v2849_v38 = vsel %vm8318_vm0, %v5388_v49, %v8317_v9  ;;  %v2453_v61 = vsel %vm8319_vm2, %v5383_v63, %v5387_v13  ;;  %v2899_v49 = vsel %vm8322_vm5, %v7163_v48, 0.0  ;;  %v5312_v13 = vunpack.i.l.bf16 %v7271_v37 }
 0x833   :  { %v2853_v63 = vmax.f32 %v2841_v26, %v2849_v38  ;;  %v4317_v40 = vpack.c.bf16 %v2453_v61, %v2375_v15  ;;  %v2361_v26 = vsel %vm8324_vm8, %v5393_v18, %v2359_v22  ;;  %vm8326_vm0 = vcmask 654336   ;;  %v7466_v22 = vpop.permute.xlu1 %5430  ;;  %v7470_v29 = vpop.permute.xlu2 %5420  ;;  %vm8330_vm8 = vmmov %vm8329_vm1 }
 0x834   :  { %v5273_v9 = vunpack.i.h.bf16 %v7129_v46  ;;  %v2913_v48 = vsel %vm8312_vm10, %v2909_v36, 0.0  ;;  %vm8327_vm2 = vcmask 908288  }
 0x835   :  { %2946 = vmatpush.bf16.msra.mxu2 %v7373_v1  ;;  %v2867_v47 = vmax.f32 %v2853_v63, %v2865_v54  ;;  %4318 = vmatpush.bf16.msk.msrb.mxu3 %vm5923_vm12, %v4317_v40  ;;  %v2935_v46 = vsel %vm8327_vm2, %v5263_v8, %v5317_v59  ;;  %v5308_v63 = vunpack.i.h.bf16 %v7281_v50  ;;  %v5402_v40 = vunpack.i.l.bf16 %v7348_v53  ;;  %v7521_v50 = vld [vmem:[%s7996_s5] sm:$0xff] }
 0x836   :  { %v2923_v18 = vsel %vm8328_vm3, %v5273_v9, %v5312_v13  ;;  %v2939_v61 = vsel %vm8322_vm5, %v2935_v46, 0.0  ;;  %v5417_v8 = vunpack.i.l.bf16 %v7403_v6  ;;  %v5313_v46 = vunpack.i.h.bf16 %v7271_v37 }
 0x837   :  { %v2881_v5 = vmax.f32 %v2867_v47, %v2879_v34  ;;  %v2325_v44 = vpop.permute.xlu0 %2324  ;;  %v5418_v34 = vunpack.i.h.bf16 %v7403_v6  ;;  %v2910_v9 = vsel %vm8325_vm7, %v5307_v62, %v5308_v63  ;;  %vm8332_vm2 = vcmask 121856  }
 0x838   :  { %v2327_v17 = vsel %vm8325_vm7, %v5328_v39, %v2325_v44  ;;  %4319 = vmatmul.msk.bf16.vlgmr.msrb.gmra.mxu3 %vm8326_vm0, %v7365_v32  ;;  %v7456_v39 = vld [vmem:[%s7996_s5 + $0x68] sm:$0xff]  ;;  %v5408_v44 = vunpack.i.h.bf16 %v7405_v28  ;;  %vm8331_vm0 = vcmask 7168   ;;  %v2914_v62 = vsel %vm5910_vm11, %v2910_v9, 0.0 }
 0x839   :  { %2947 = vmatpush.bf16.msra.mxu2 %v7392_v57  ;;  %2958 = vmatpush.bf16.msra.mxu3 %v7397_v2  ;;  %v2901_v24 = vmax.f32 %v2881_v5, %v2899_v49  ;;  %v4276_v15 = vpack.c.bf16 %v2361_v26, %v2327_v17  ;;  %v5407_v49 = vunpack.i.l.bf16 %v7405_v28  ;;  %v7504_v28 = vld [vmem:[%s7996_s5 + $0x58] sm:$0xff] }
 0x83b   :  { %4277 = vmatpush.bf16.msk.msrb.mxu1 %vm5923_vm12, %v4276_v15  ;;  %v2915_v27 = vmax.f32 %v2901_v24, %v2913_v48  ;;  %v7496_v24 = vld [vmem:[%s7996_s5 + $0x8] sm:$0xff]  ;;  %v2300_v48 = vsel %vm8331_vm0, %v5417_v8, %v5418_v34  ;;  %v5446_v52 = vpop.permute.xlu1 %5445  ;;  %v5436_v63 = vpop.permute.xlu2 %5435 }
 0x83d   :  { %2948 = vmatpush.bf16.msra.mxu2 %v7419_v25  ;;  %2959 = vmatpush.bf16.msra.mxu3 %v7424_v42  ;;  %v2927_v38 = vmax.f32 %v2915_v27, %v2923_v18  ;;  %v7531_v18 = vld [vmem:[%s7996_s5 + $0x50] sm:$0xff] }
 0x83f   :  { %v5396_v54 = vpop.permute.xlu0 %5395  ;;  %v2941_v47 = vmax.f32 %v2927_v38, %v2939_v61  ;;  %v5318_v38 = vunpack.i.h.bf16 %v7269_v60  ;;  %v2916_v61 = vmax.f32 %v7201_v19, %v2914_v62  ;;  %v5433_v62 = vunpack.i.h.bf16 %v7466_v22 }
 0x840   :  { %v5398_v36 = vunpack.i.h.bf16 %v5396_v54  ;;  %v5397_v5 = vunpack.i.l.bf16 %v5396_v54 }
 0x841   :  { %2949 = vmatpush.bf16.msra.mxu2 %v7451_v23  ;;  %2960 = vmatpush.bf16.msra.mxu3 %v7456_v39  ;;  %v2943_v19 = vpack.c.bf16 %v2941_v47, %v2941_v47 }
 0x842   :  { %v2315_v26 = vsel %vm8329_vm1, %v5398_v36, %v5402_v40  ;;  %v2314_v17 = vsel %vm8330_vm8, %v5397_v5, %v5398_v36  ;;  %vm8336_vm1 = vcmask 908288   ;;  %vm8339_vm8 = vcmask 654336  }
 0x843   :  { %v4279_v15 = vpack.c.bf16 %v2315_v26, %v7215_v20  ;;  %v4263_v6 = vpack.c.bf16 %v2314_v17, %v7213_v43  ;;  %v2288_v43 = vsel %vm8332_vm2, %v5407_v49, %v5408_v44  ;;  %v5422_v20 = vunpack.i.l.bf16 %v7470_v29  ;;  %v7548_v49 = vld [vmem:[%s7996_s5 + $0x48] sm:$0xff]  ;;  %v7561_v26 = vld [vmem:[%s7996_s5 + $0x40] sm:$0xff]  ;;  %s5734_s5 = smov 64  }
 0x844   :  { %v4266_v27 = vpack.c.bf16 %v2300_v48, %v2288_v43  ;;  %v2936_v10 = vsel %vm8336_vm1, %v5317_v59, %v5318_v38  ;;  %v5447_v43 = vunpack.i.l.bf16 %v5446_v52  ;;  %v5448_v38 = vunpack.i.h.bf16 %v5446_v52 }
 0x845   :  { %2950 = vmatpush.bf16.msra.mxu2 %v7477_v11  ;;  %2961 = vmatpush.bf16.msra.mxu3 %v7484_v58  ;;  %vm8348_vm1 = vcmask 121856  }
 0x846   :  { %4264 = vmatpush.bf16.msk.msrb.mxu0 %vm5932_vm14, %v4263_v6  ;;  %4280 = vmatpush.bf16.msk.msrb.mxu1 %vm5941_vm15, %v4279_v15  ;;  %vm8333_vm14 = vmmov %vm8328_vm3  ;;  %v7563_v15 = vpop.permute.xlu1 %5460  ;;  %v5451_v6 = vpop.permute.xlu2 %5450 }
 0x847   :  { %v7526_v55 = vpop.permute.xlu0 %5410  ;;  %v2924_v54 = vsel %vm8333_vm14, %v5312_v13, %v5313_v46  ;;  %vm8334_vm15 = vmmov %vm8331_vm0  ;;  %v5438_v13 = vunpack.i.h.bf16 %v5436_v63  ;;  %v5453_v52 = vunpack.i.h.bf16 %v5451_v6 }
 0x848   :  { %v5412_v40 = vunpack.i.l.bf16 %v7526_v55  ;;  %v2301_v8 = vsel %vm8334_vm15, %v5418_v34, %v5422_v20  ;;  %vm8335_vm3 = vmmov %vm8332_vm2  ;;  %v2928_v37 = vmax.f32 %v2916_v61, %v2924_v54  ;;  %v5437_v34 = vunpack.i.l.bf16 %v5436_v63 }
 0x849   :  { %2951 = vmatpush.bf16.msra.mxu2 %v7496_v24  ;;  %2962 = vmatpush.bf16.msra.mxu3 %v7504_v28 }
 0x84a   :  { %4267 = vmatpush.bf16.msk.msrb.mxu0 %vm5969_vm4, %v4266_v27  ;;  %v2289_v36 = vsel %vm8335_vm3, %v5408_v44, %v5412_v40  ;;  %v2940_v44 = vsel %vm8289_vm6, %v2936_v10, 0.0  ;;  %vm8337_vm4 = vcmask 130048   ;;  %v5432_v27 = vunpack.i.l.bf16 %v7466_v22 }
 0x84b   :  { %v4282_v5 = vpack.c.bf16 %v2301_v8, %v2289_v36  ;;  %v2942_v17 = vmax.f32 %v2928_v37, %v2940_v44  ;;  %v2350_v4 = vsel %vm8337_vm4, %v5437_v34, %v5438_v13  ;;  %vm8342_vm2 = vmmov %vm8337_vm4  ;;  %v5462_v10 = vunpack.i.l.bf16 %v7563_v15 }
 0x84c   :  { %vm8344_vm14 = vmmov %vm8342_vm2  ;;  %vm8347_vm3 = vcmask 7168  }
 0x84d   :  { %2952 = vmatpush.bf16.msra.mxu2 %v7521_v50  ;;  %2963 = vmatpush.bf16.msra.mxu3 %v7531_v18  ;;  %v2944_v46 = vpack.c.bf16 %v2942_v17, %v2942_v17  ;;  %vm8346_vm15 = vmmov %vm8342_vm2 }
 0x84e   :  { %4283 = vmatpush.bf16.msk.msrb.mxu1 %vm5958_vm13, %v4282_v5  ;;  %vm8338_vm13 = vcmask 138240   ;;  %v2664_v54 = vpop.permute.xlu1 %2663  ;;  %v5466_v5 = vpop.permute.xlu2 %5465  ;;  %vm8349_vm4 = vmmov %vm8348_vm1 }
 0x84f   :  { %v5426_v47 = vpop.permute.xlu0 %5425  ;;  %vm8340_vm7 = vmmov %vm8338_vm13 }
 0x850   :  { %2953 = vmatmul.bf16.vlgmr.msra.gmra.mxu2 %v2943_v19  ;;  %v5428_v60 = vunpack.i.h.bf16 %v5426_v47  ;;  %v5427_v59 = vunpack.i.l.bf16 %v5426_v47  ;;  %v2595_v63 = vsel %vm8340_vm7, %v5433_v62, %v5447_v43  ;;  %vm8341_vm0 = vmmov %vm8340_vm7  ;;  %v5452_v19 = vunpack.i.l.bf16 %v5451_v6 }
 0x851   :  { %2964 = vmatpush.bf16.msra.mxu3 %v7548_v49  ;;  %v2599_v22 = vsel %vm8312_vm10, %v2595_v63, 0.0  ;;  %v5413_v47 = vunpack.i.h.bf16 %v7526_v55  ;;  %v5463_v6 = vunpack.i.h.bf16 %v7563_v15  ;;  %vm8352_vm7 = vcmask 924672  }
 0x852   :  { %v2276_v9 = vsel %vm8338_vm13, %v5427_v59, %v5428_v60  ;;  %v2277_v40 = vsel %vm8341_vm0, %v5428_v60, %v5432_v27  ;;  %v2601_v44 = vmax.f32 %v6946_v3, %v2599_v22  ;;  %v2610_v45 = vsel %vm8346_vm15, %v5452_v19, %v5453_v52 }
 0x853   :  { %v4269_v48 = vpack.c.bf16 %v2350_v4, %v2276_v9  ;;  %v5403_v9 = vunpack.i.h.bf16 %v7348_v53  ;;  %vm8350_vm13 = vcmask 1039360   ;;  %v5468_v53 = vunpack.i.h.bf16 %v5466_v5 }
 0x855   :  { %2965 = vmatpush.bf16.msra.mxu3 %v7561_v26  ;;  %4270 = vmatpush.bf16.msk.msrb.mxu0 %vm5897_vm9, %v4269_v48  ;;  %vm8343_vm9 = vmmov %vm8341_vm0 }
 0x856   :  { %v2596_v36 = vsel %vm8343_vm9, %v5447_v43, %v5448_v38  ;;  %v5476_v62 = vpop.permute.xlu2 %5475  ;;  %vm8353_vm0 = vmmov %vm8350_vm13  ;;  %vm8355_vm9 = vcmask 908288  }
 0x857   :  { %v5441_v20 = vpop.permute.xlu0 %5440  ;;  %v2600_v37 = vsel %vm5910_vm11, %v2596_v36, 0.0  ;;  %v5478_v36 = vunpack.i.h.bf16 %v5476_v62  ;;  %v5477_v22 = vunpack.i.l.bf16 %v5476_v62 }
 0x858   :  { %2966 = vmatmul.bf16.vlgmr.msra.gmra.mxu3 %v2944_v46  ;;  %v5442_v61 = vunpack.i.l.bf16 %v5441_v20  ;;  %4271 = vmatmul.msk.bf16.vlgmr.msrb.gmra.mxu0 %vm8339_vm8, %v7365_v32  ;;  %v2602_v55 = vmax.f32 %v6983_v16, %v2600_v37 }
 0x859   :  { %2797 = vmatpush.bf16.msra.mxu0 %v7355_v0  ;;  %v5443_v0 = vunpack.i.h.bf16 %v5441_v20 }
 0x85a   :  { %v2351_v35 = vsel %vm8342_vm2, %v5438_v13, %v5442_v61  ;;  %v2614_v43 = vmax.f32 %v2602_v55, %v2610_v45  ;;  %vm8354_vm2 = vmmov %vm8352_vm7 }
 0x85b   :  { %v4285_v8 = vpack.c.bf16 %v2351_v35, %v2277_v40  ;;  %v2609_v13 = vsel %vm8344_vm14, %v5443_v0, %v5452_v19  ;;  %vm8356_vm14 = vcmask 916480  }
 0x85d   :  { %2798 = vmatpush.bf16.msra.mxu0 %v7373_v1  ;;  %4286 = vmatpush.bf16.msk.msrb.mxu1 %vm5923_vm12, %v4285_v8  ;;  %v5423_v1 = vunpack.i.h.bf16 %v7470_v29  ;;  %vm8345_vm12 = vmmov %vm8339_vm8  ;;  %v2613_v29 = vmax.f32 %v2601_v44, %v2609_v13 }
 0x85e   :  { %vm8351_vm8 = vmmov %vm8347_vm3 }
 0x85f   :  { %v5456_v34 = vpop.permute.xlu0 %5455  ;;  %v2636_v15 = vsel %vm8351_vm8, %v5462_v10, %v5463_v6 }
 0x860   :  { %v5458_v60 = vunpack.i.h.bf16 %v5456_v34  ;;  %v5457_v59 = vunpack.i.l.bf16 %v5456_v34  ;;  %4287 = vmatmul.msk.bf16.vlgmr.msrb.gmra.mxu1 %vm8345_vm12, %v7365_v32  ;;  %v2640_v52 = vsel %vm5910_vm11, %v2636_v15, 0.0  ;;  %v2679_v34 = vsel %vm8356_vm14, %v5477_v22, %v5478_v36  ;;  %vm8358_vm12 = vmmov %vm8355_vm9 }
 0x861   :  { %2799 = vmatpush.bf16.msra.mxu0 %v7392_v57  ;;  %2810 = vmatpush.bf16.msra.mxu1 %v7397_v2  ;;  %v2635_v57 = vsel %vm8347_vm3, %v5423_v1, %v5462_v10  ;;  %v5467_v2 = vunpack.i.l.bf16 %v5466_v5  ;;  %vm3003_vm3 = vcmask 56320  }
 0x862   :  { %v2621_v17 = vsel %vm8348_vm1, %v5413_v47, %v5457_v59  ;;  %v2622_v4 = vsel %vm8349_vm4, %v5457_v59, %v5458_v60  ;;  %v2639_v20 = vsel %vm8312_vm10, %v2635_v57, 0.0  ;;  %v2690_v60 = vpop.permute.xlu2 %2689  ;;  %vm8364_vm1 = vmmov %vm8351_vm8  ;;  %vm2993_vm4 = vcmask 72704  }
 0x863   :  { %v2625_v32 = vsel %vm8322_vm5, %v2621_v17, 0.0  ;;  %v2626_v48 = vsel %vm8289_vm6, %v2622_v4, 0.0  ;;  %v2652_v5 = vsel %vm8353_vm0, %v5467_v2, %v5468_v53  ;;  %vm8366_vm8 = vmmov %vm8364_vm1  ;;  %vm8368_vm0 = vcmask 654336  }
 0x864   :  { %v2627_v46 = vmax.f32 %v2613_v29, %v2625_v32  ;;  %v2628_v38 = vmax.f32 %v2614_v43, %v2626_v48  ;;  %v2656_v44 = vsel %vm8289_vm6, %v2652_v5, 0.0 }
 0x865   :  { %2800 = vmatpush.bf16.msra.mxu0 %v7419_v25  ;;  %2811 = vmatpush.bf16.msra.mxu1 %v7424_v42  ;;  %v5481_v25 = vpop.permute.xlu1 %5480  ;;  %v2651_v42 = vsel %vm8350_vm13, %v5403_v9, %v5467_v2  ;;  %vm8365_vm13 = vcmask 64512  }
 0x866   :  { %v2641_v27 = vmax.f32 %v2627_v46, %v2639_v20  ;;  %v5483_v63 = vunpack.i.h.bf16 %v5481_v25  ;;  %v5482_v40 = vunpack.i.l.bf16 %v5481_v25  ;;  %v2655_v8 = vsel %vm8322_vm5, %v2651_v42, 0.0 }
 0x867   :  { %v5471_v61 = vpop.permute.xlu0 %5470  ;;  %v2642_v1 = vmax.f32 %v2628_v38, %v2640_v52 }
 0x868   :  { %v5473_v35 = vunpack.i.h.bf16 %v5471_v61  ;;  %v5472_v0 = vunpack.i.l.bf16 %v5471_v61  ;;  %v2691_v37 = vsel %vm8355_vm9, %v5482_v40, %v5483_v63 }
 0x869   :  { %2801 = vmatpush.bf16.msra.mxu0 %v7451_v23  ;;  %2812 = vmatpush.bf16.msra.mxu1 %v7456_v39  ;;  %v2657_v23 = vmax.f32 %v2641_v27, %v2655_v8  ;;  %v2695_v31 = vsel %vm8322_vm5, %v2691_v37, 0.0  ;;  %v2658_v47 = vmax.f32 %v2642_v1, %v2656_v44  ;;  %v73_v8 = vand.u32 7, %v5860_v12 }
 0x86a   :  { %v2665_v39 = vsel %vm8352_vm7, %v5472_v0, %v5473_v35  ;;  %v2666_v19 = vsel %vm8354_vm2, %v5473_v35, %v2664_v54  ;;  %v7674_v35 = vld [vmem:[#allocation3] sm:$0xff]  ;;  %vm8361_vm5 = vcmp.eq.s32.totalorder %v5863_v14, 0  ;;  %vm8367_vm7 = vmmov %vm8365_vm13  ;;  %v5745_v14 = vmov 4  }
 0x86b   :  { %v2669_v10 = vsel %vm8312_vm10, %v2665_v39, 0.0  ;;  %vm8357_vm10 = vmmov %vm8356_vm14  ;;  %v68_v52 = vsel %vm8361_vm5, 1.0, %v7674_v35  ;;  %vm7694_vm15 = vcmp.gt.s32.totalorder %v73_v8, 0 }
 0x86c   :  { %v2671_v13 = vmax.f32 %v2657_v23, %v2669_v10  ;;  %vm8369_vm2 = vmmov %vm8364_vm1 }
 0x86d   :  { %2802 = vmatpush.bf16.msra.mxu0 %v7477_v11  ;;  %2813 = vmatpush.bf16.msra.mxu1 %v7484_v58  ;;  %v2670_v11 = vsel %vm5910_vm11, %v2666_v19, 0.0  ;;  %vm2975_vm11 = vcmask 523264   ;;  %vm8370_vm9 = vmmov %vm8367_vm7 }
 0x86e   :  { %v2683_v58 = vmax.f32 %v2671_v13, %v2679_v34  ;;  %v2672_v57 = vmax.f32 %v2658_v47, %v2670_v11  ;;  %vm8371_vm14 = vmmov %vm8364_vm1 }
 0x86f   :  { %v2678_v54 = vpop.permute.xlu0 %2677  ;;  %vm8374_vm5 = vmmov %vm8364_vm1 }
 0x870   :  { %v2680_v59 = vsel %vm8357_vm10, %v5478_v36, %v2678_v54  ;;  %v2697_v45 = vmax.f32 %v2683_v58, %v2695_v31  ;;  %vm8372_vm10 = vmmov %vm8367_vm7 }
 0x871   :  { %2803 = vmatpush.bf16.msra.mxu0 %v7496_v24  ;;  %2814 = vmatpush.bf16.msra.mxu1 %v7504_v28  ;;  %v2692_v28 = vsel %vm8358_vm12, %v5483_v63, %v2690_v60  ;;  %v2684_v41 = vmax.f32 %v2672_v57, %v2680_v59  ;;  %vm8373_vm12 = vmmov %vm8368_vm0 }
 0x872   :  { %v2699_v24 = vpack.c.bf16 %v2697_v45, %v2697_v45  ;;  %v2696_v21 = vsel %vm8289_vm6, %v2692_v28, 0.0  ;;  %vm7681_vm6 = vcmp.lt.s32.totalorder %v73_v8, 7 }
 0x873   :  { %v2698_v2 = vmax.f32 %v2684_v41, %v2696_v21 }
 0x875   :  { %2804 = vmatpush.bf16.msra.mxu0 %v7521_v50  ;;  %2815 = vmatpush.bf16.msra.mxu1 %v7531_v18  ;;  %v2700_v29 = vpack.c.bf16 %v2698_v2, %v2698_v2 }
 0x878   :  { %2805 = vmatmul.bf16.vlgmr.msra.gmra.mxu0 %v2699_v24 }
 0x879   :  { %2816 = vmatpush.bf16.msra.mxu1 %v7548_v49 }
 0x87d   :  { %2817 = vmatpush.bf16.msra.mxu1 %v7561_v26 }
 0x880   :  { %2818 = vmatmul.bf16.vlgmr.msra.gmra.mxu1 %v2700_v29 }
 0x8b3   :  { %v7643_v17 = vpop.f32.mrf.mxu2 }
 0x8bb   :  { %v7645_v50 = vpop.f32.mrf.mxu3  ;;  %v2528_v18 = vpop.f32.mrf.mxu2 }
 0x8c3   :  { %v2541_v4 = vpop.f32.mrf.mxu3 }
 0x8d3   :  { %v2954_v55 = vpop.f32.mrf.mxu2 }
 0x8d5   :  { %v7647_v6 = vpop.f32.mrf.mxu0 }
 0x8d6   :  { %v2501_v36 = vadd.f32 %v7647_v6, %v6946_v3 }
 0x8db   :  { %v2956_v32 = vpop.f32.mrf.mxu2  ;;  %v2967_v9 = vpop.f32.mrf.mxu3 }
 0x8dc   :  { %v2968_v33 = vadd.f32 %v2967_v9, %v2954_v55 }
 0x8dd   :  { %v7650_v49 = vpop.f32.mrf.mxu1  ;;  %v2502_v26 = vpop.f32.mrf.mxu0 }
 0x8de   :  { %2972 = vrot.lane.b32.xlu0 %v2968_v33, %s5734_s5 }
 0x8e3   :  { %v2969_v48 = vpop.f32.mrf.mxu3 }
 0x8e5   :  { %v2515_v46 = vpop.f32.mrf.mxu1 }
 0x8f5   :  { %v2806_v43 = vpop.f32.mrf.mxu0 }
 0x8fd   :  { %v2808_v20 = vpop.f32.mrf.mxu0  ;;  %v2819_v25 = vpop.f32.mrf.mxu1 }
 0x8fe   :  { %v2820_v42 = vadd.f32 %v2819_v25, %v2806_v43 }
 0x905   :  { %v2821_v62 = vpop.f32.mrf.mxu1 }
 0x950   :  { %v2973_v27 = vpop.permute.xlu0 %2972 }
 0x951   :  { %v7653_v15 = vsel %vm2975_vm11, %v2820_v42, %v2973_v27 }
 0x952   :  { %2977 = vst.msk [vmem:[#allocation3 + $0x8] sm:$0xff] %vm2975_vm11, %v7653_v15  ;;  %2979 = vrot.lane.b32.xlu1 %v7653_v15, %s5734_s5 }
 0x959   :  { %v7660_v38 = vld [vmem:[#allocation3 + $0x8] sm:$0xff] }
 0x95a   :  { %v5534_v0 = vpack.i.bf16 %v7660_v38, %v7674_v35 }
 0x9c4   :  { %v2980_v53 = vpop.permute.xlu1 %2979 }
 0x9c5   :  { %2982 = vst.msk [vmem:[#allocation3 + $0x10] sm:$0xff] %vm2975_vm11, %v2980_v53 }
 0x9cc   :  { %v3036_v61 = vld [vmem:[#allocation3 + $0x10] sm:$0xff] }
 0x9cd   :  { %v5494_v63 = vpack.i.bf16 %v7660_v38, %v3036_v61  ;;  %v5504_v40 = vpack.i.bf16 %v3036_v61, %v7660_v38 }
 0x9cf   :  { %5495 = vrot.lane.b32.xlu1 %v5494_v63, %s5732_s20  ;;  %5490 = vrot.lane.b32.xlu0 %v5494_v63, %s5735_s18 }
 0x9d0   :  { %5485 = vrot.lane.b32.xlu2 %v5494_v63, %s5736_s19 }
 0x9d7   :  { %5505 = vrot.lane.b32.xlu1 %v5504_v40, %s5727_s30  ;;  %5500 = vrot.lane.b32.xlu0 %v5504_v40, %s5737_s21 }
 0x9d8   :  { %3060 = vrot.lane.b32.xlu2 %v3036_v61, %s5725_s28 }
 0x9df   :  { %5515 = vrot.lane.b32.xlu0 %v5504_v40, %s5738_s22 }
 0x9e0   :  { %5510 = vrot.lane.b32.xlu2 %v5504_v40, %s5739_s23 }
 0x9e7   :  { %3014 = vrot.lane.b32.xlu0 %v7660_v38, %s5725_s28 }
 0x9ef   :  { %5535 = vrot.lane.b32.xlu0 %v5534_v0, %s5727_s30 }
 0x9f7   :  { %5545 = vrot.lane.b32.xlu0 %v5534_v0, %s5738_s22 }
 0xa2a   :  { %v5486_v22 = vpop.permute.xlu2 %5485 }
 0xa2b   :  { %v5487_v23 = vunpack.i.l.bf16 %v5486_v22  ;;  %v5488_v46 = vunpack.i.h.bf16 %v5486_v22 }
 0xa2d   :  { %v3071_v39 = vsel %vm7681_vm6, %v5487_v23, 0.0  ;;  %v3025_v63 = vsel %vm7681_vm6, %v5488_v46, 0.0 }
 0xa2e   :  { %v5519_v5 = vpack.i.bf16 %v68_v52, %v3071_v39 }
 0xa30   :  { %5520 = vrot.lane.b32.xlu1 %v5519_v5, %s5734_s5 }
 0xa32   :  { %v3061_v19 = vpop.permute.xlu2 %3060 }
 0xa33   :  { %v3063_v12 = vsel %vm7681_vm6, %v3061_v19, 0.0 }
 0xa34   :  { %v5549_v10 = vpack.i.bf16 %v3063_v12, %v3036_v61 }
 0xa38   :  { %5550 = vrot.lane.b32.xlu1 %v5549_v10, %s5734_s5 }
 0xa3a   :  { %v5511_v54 = vpop.permute.xlu2 %5510 }
 0xa3b   :  { %v5513_v28 = vunpack.i.h.bf16 %v5511_v54  ;;  %v5512_v41 = vunpack.i.l.bf16 %v5511_v54 }
 0xa3d   :  { %v3043_v18 = vsel %vm2993_vm4, %v5512_v41, %v5513_v28 }
 0xa3e   :  { %v3045_v9 = vsel %vm7694_vm15, %v3043_v18, 0.0 }
 0xa41   :  { %v5496_v1 = vpop.permute.xlu1 %5495  ;;  %v5491_v37 = vpop.permute.xlu0 %5490 }
 0xa42   :  { %v5497_v13 = vunpack.i.l.bf16 %v5496_v1  ;;  %v5492_v34 = vunpack.i.l.bf16 %v5491_v37  ;;  %v5493_v48 = vunpack.i.h.bf16 %v5491_v37  ;;  %v5498_v20 = vunpack.i.h.bf16 %v5496_v1 }
 0xa44   :  { %v3067_v44 = vsel %vm7694_vm15, %v5492_v34, 0.0  ;;  %v3021_v27 = vsel %vm7694_vm15, %v5493_v48, 0.0 }
 0xa45   :  { %v5524_v11 = vpack.i.bf16 %v5497_v13, %v3067_v44 }
 0xa47   :  { %5525 = vrot.lane.b32.xlu2 %v5524_v11, %s5734_s5 }
 0xa49   :  { %v5506_v58 = vpop.permute.xlu1 %5505  ;;  %v5501_v31 = vpop.permute.xlu0 %5500 }
 0xa4a   :  { %v5508_v47 = vunpack.i.h.bf16 %v5506_v58  ;;  %v5507_v60 = vunpack.i.l.bf16 %v5506_v58  ;;  %v5503_v59 = vunpack.i.h.bf16 %v5501_v31  ;;  %v5502_v45 = vunpack.i.l.bf16 %v5501_v31 }
 0xa4c   :  { %v3057_v57 = vsel %vm8364_vm1, %v5507_v60, %v5508_v47  ;;  %v3050_v24 = vsel %vm3003_vm3, %v5502_v45, %v5503_v59  ;;  %vm3470_vm1 = vcmask 588800  }
 0xa4d   :  { %v3059_v21 = vsel %vm7694_vm15, %v3057_v57, 0.0  ;;  %v3052_v2 = vsel %vm7681_vm6, %v3050_v24, 0.0 }
 0xa4e   :  { %v5554_v29 = vpack.i.bf16 %v3059_v21, %v3052_v2 }
 0xa4f   :  { %5530 = vrot.lane.b32.xlu2 %v5534_v0, %s5737_s21 }
 0xa50   :  { %5555 = vrot.lane.b32.xlu1 %v5554_v29, %s5734_s5 }
 0xa51   :  { %v5516_v4 = vpop.permute.xlu0 %5515 }
 0xa52   :  { %v5518_v55 = vunpack.i.h.bf16 %v5516_v4  ;;  %v5517_v32 = vunpack.i.l.bf16 %v5516_v4 }
 0xa54   :  { %v3076_v33 = vsel %vm8365_vm13, %v5517_v32, %v5518_v55  ;;  %vm8375_vm13 = vmmov %vm8367_vm7 }
 0xa55   :  { %v5559_v26 = vpack.i.bf16 %v3076_v33, %v3045_v9 }
 0xa57   :  { %5540 = vrot.lane.b32.xlu2 %v5534_v0, %s5739_s23 }
 0xa58   :  { %5560 = vrot.lane.b32.xlu1 %v5559_v26, %s5734_s5 }
 0xa59   :  { %v3015_v5 = vpop.permute.xlu0 %3014 }
 0xa5a   :  { %v3017_v1 = vsel %vm7681_vm6, %v3015_v5, 0.0 }
 0xa61   :  { %v5536_v44 = vpop.permute.xlu0 %5535 }
 0xa62   :  { %v5538_v11 = vunpack.i.h.bf16 %v5536_v44  ;;  %v5537_v58 = vunpack.i.l.bf16 %v5536_v44 }
 0xa64   :  { %v3011_v47 = vsel %vm8366_vm8, %v5537_v58, %v5538_v11 }
 0xa65   :  { %v3013_v28 = vsel %vm7694_vm15, %v3011_v47, 0.0 }
 0xa69   :  { %v5546_v41 = vpop.permute.xlu0 %5545 }
 0xa6a   :  { %v5548_v55 = vunpack.i.h.bf16 %v5546_v41  ;;  %v5547_v32 = vunpack.i.l.bf16 %v5546_v41 }
 0xa6c   :  { %v3030_v46 = vsel %vm8367_vm7, %v5547_v32, %v5548_v55 }
 0xaa1   :  { %v5526_v43 = vpop.permute.xlu2 %5525 }
 0xaa2   :  { %v5528_v25 = vunpack.i.h.bf16 %v5526_v43  ;;  %v5527_v42 = vunpack.i.l.bf16 %v5526_v43  ;;  %v5521_v62 = vpop.permute.xlu1 %5520 }
 0xaa3   :  { %v5523_v53 = vunpack.i.h.bf16 %v5521_v62  ;;  %v5522_v61 = vunpack.i.l.bf16 %v5521_v62  ;;  %v4384_v62 = vld [vmem:[%s7993_s1 + $0x20] sm:$0xf] }
 0xaa4   :  { %v3122_v40 = vsel %vm2975_vm11, %v3021_v27, %v5527_v42  ;;  %v3123_v0 = vsel %vm2975_vm11, %v5498_v20, %v5528_v25 }
 0xaa5   :  { %v7722_v8 = vsel %vm2975_vm11, %v68_v52, %v5523_v53  ;;  %v3124_v22 = vsel %vm2975_vm11, %v3025_v63, %v5522_v61  ;;  %v3131_v23 = vpack.c.bf16 %v3123_v0, %v3122_v40 }
 0xaa6   :  { %v3132_v39 = vpack.c.bf16 %v7722_v8, %v3124_v22 }
 0xaa8   :  { %3139 = vmatpush.bf16.msrb.mxu0 %v3132_v39 }
 0xaa9   :  { %v5531_v34 = vpop.permute.xlu2 %5530 }
 0xaaa   :  { %v5551_v19 = vpop.permute.xlu1 %5550  ;;  %v5533_v31 = vunpack.i.h.bf16 %v5531_v34  ;;  %v5532_v54 = vunpack.i.l.bf16 %v5531_v34 }
 0xaab   :  { %v5553_v12 = vunpack.i.h.bf16 %v5551_v19  ;;  %v5552_v10 = vunpack.i.l.bf16 %v5551_v19 }
 0xaac   :  { %3140 = vmatpush.bf16.msrb.mxu0 %v3131_v23  ;;  %v3004_v60 = vsel %vm3003_vm3, %v5532_v54, %v5533_v31 }
 0xaad   :  { %v3120_v37 = vsel %vm2975_vm11, %v7660_v38, %v5552_v10  ;;  %v3121_v52 = vsel %vm2975_vm11, %v3017_v1, %v5553_v12  ;;  %v3006_v38 = vsel %vm7681_vm6, %v3004_v60, 0.0 }
 0xaae   :  { %v3130_v13 = vpack.c.bf16 %v3121_v52, %v3120_v37 }
 0xab0   :  { %3141 = vmatpush.bf16.msrb.mxu0 %v3130_v13 }
 0xab1   :  { %v5541_v59 = vpop.permute.xlu2 %5540 }
 0xab2   :  { %v5543_v21 = vunpack.i.h.bf16 %v5541_v59  ;;  %v5542_v2 = vunpack.i.l.bf16 %v5541_v59 }
 0xab4   :  { %v2994_v9 = vsel %vm2993_vm4, %v5542_v2, %v5543_v21 }
 0xab5   :  { %v2996_v43 = vsel %vm7694_vm15, %v2994_v9, 0.0 }
 0xac2   :  { %v5556_v45 = vpop.permute.xlu1 %5555 }
 0xac3   :  { %v5558_v57 = vunpack.i.h.bf16 %v5556_v45  ;;  %v5557_v24 = vunpack.i.l.bf16 %v5556_v45 }
 0xac5   :  { %v3118_v29 = vsel %vm2975_vm11, %v3006_v38, %v5557_v24  ;;  %v3119_v18 = vsel %vm2975_vm11, %v3013_v28, %v5558_v57 }
 0xac6   :  { %v3129_v4 = vpack.c.bf16 %v3119_v18, %v3118_v29 }
 0xac8   :  { %3142 = vmatpush.bf16.msrb.mxu0 %v3129_v4 }
 0xaca   :  { %v5561_v33 = vpop.permute.xlu1 %5560 }
 0xacb   :  { %v5563_v26 = vunpack.i.h.bf16 %v5561_v33  ;;  %v5562_v48 = vunpack.i.l.bf16 %v5561_v33 }
 0xacd   :  { %v3116_v20 = vsel %vm2975_vm11, %v2996_v43, %v5562_v48  ;;  %v3117_v25 = vsel %vm2975_vm11, %v3030_v46, %v5563_v26 }
 0xace   :  { %v3128_v42 = vpack.c.bf16 %v3117_v25, %v3116_v20 }
 0xad0   :  { %3143 = vmatpush.bf16.msrb.mxu0 %v3128_v42 }
 0xad3   :  { %4385 = vmatmul.msk.bf16.vlgmr.msrb.gmra.mxu0 %vm8368_vm0, %v4384_v62 }
 0xb50   :  { %v3145_v27 = vpop.f32.mrf.mxu0 }
 0xb51   :  { %v3149_v53 = vmax.f32 %v3145_v27, 0.0 }
 0xb53   :  { %3150 = vst.msk [vmem:[#allocation3 + $0x8] sm:$0xff] %vm2975_vm11, %v3149_v53  ;;  %3152 = vrot.lane.b32.xlu2 %v3149_v53, %s5734_s5 }
 0xb58   :  { %v3147_v61 = vpop.f32.mrf.mxu0 }
 0xb5a   :  { %v7752_v40 = vld [vmem:[#allocation3 + $0x8] sm:$0xff] }
 0xb5b   :  { %v5609_v39 = vpack.i.bf16 %v7752_v40, %v7674_v35 }
 0xbad   :  { %v3153_v63 = vpop.permute.xlu2 %3152 }
 0xbae   :  { %3155 = vst.msk [vmem:[#allocation3 + $0x10] sm:$0xff] %vm2975_vm11, %v3153_v63 }
 0xbb5   :  { %v3203_v0 = vld [vmem:[#allocation3 + $0x10] sm:$0xff] }
 0xbb6   :  { %v5574_v22 = vpack.i.bf16 %v7752_v40, %v3203_v0  ;;  %v5584_v23 = vpack.i.bf16 %v3203_v0, %v7752_v40 }
 0xbb8   :  { %5575 = vrot.lane.b32.xlu2 %v5574_v22, %s5732_s20  ;;  %5570 = vrot.lane.b32.xlu1 %v5574_v22, %s5735_s18 }
 0xbb9   :  { %5565 = vrot.lane.b32.xlu0 %v5574_v22, %s5736_s19 }
 0xbc0   :  { %5585 = vrot.lane.b32.xlu2 %v5584_v23, %s5727_s30  ;;  %5580 = vrot.lane.b32.xlu1 %v5584_v23, %s5737_s21 }
 0xbc1   :  { %3227 = vrot.lane.b32.xlu0 %v3203_v0, %s5725_s28 }
 0xbc8   :  { %5595 = vrot.lane.b32.xlu1 %v5584_v23, %s5738_s22 }
 0xbc9   :  { %5590 = vrot.lane.b32.xlu0 %v5584_v23, %s5739_s23 }
 0xbd0   :  { %3181 = vrot.lane.b32.xlu1 %v7752_v40, %s5725_s28 }
 0xbd8   :  { %5610 = vrot.lane.b32.xlu1 %v5609_v39, %s5727_s30 }
 0xbe0   :  { %5620 = vrot.lane.b32.xlu1 %v5609_v39, %s5738_s22 }
 0xc12   :  { %v5576_v5 = vpop.permute.xlu2 %5575 }
 0xc13   :  { %v5577_v19 = vunpack.i.l.bf16 %v5576_v5  ;;  %v5578_v25 = vunpack.i.h.bf16 %v5576_v5 }
 0xc15   :  { %v5599_v12 = vpack.i.bf16 %v3203_v0, %v5577_v19 }
 0xc17   :  { %5600 = vrot.lane.b32.xlu0 %v5599_v12, %s5734_s5 }
 0xc1a   :  { %v5586_v47 = vpop.permute.xlu2 %5585 }
 0xc1b   :  { %v5588_v24 = vunpack.i.h.bf16 %v5586_v47  ;;  %v5587_v38 = vunpack.i.l.bf16 %v5586_v47 }
 0xc1d   :  { %v3224_v41 = vsel %vm8369_vm2, %v5587_v38, %v5588_v24 }
 0xc1e   :  { %v3226_v18 = vsel %vm7694_vm15, %v3224_v41, 0.0 }
 0xc1f   :  { %5605 = vrot.lane.b32.xlu0 %v5609_v39, %s5737_s21 }
 0xc27   :  { %5615 = vrot.lane.b32.xlu0 %v5609_v39, %s5739_s23 }
 0xc2a   :  { %v5571_v10 = vpop.permute.xlu1 %5570 }
 0xc2b   :  { %v5572_v1 = vunpack.i.l.bf16 %v5571_v10  ;;  %v5566_v37 = vpop.permute.xlu0 %5565  ;;  %v5573_v48 = vunpack.i.h.bf16 %v5571_v10 }
 0xc2c   :  { %v5567_v52 = vunpack.i.l.bf16 %v5566_v37  ;;  %v5568_v46 = vunpack.i.h.bf16 %v5566_v37 }
 0xc2d   :  { %v3234_v13 = vsel %vm7694_vm15, %v5572_v1, 0.0  ;;  %v3188_v63 = vsel %vm7694_vm15, %v5573_v48, 0.0 }
 0xc2e   :  { %v3238_v34 = vsel %vm7681_vm6, %v5567_v52, 0.0  ;;  %v3192_v0 = vsel %vm7681_vm6, %v5568_v46, 0.0 }
 0xc2f   :  { %v5624_v44 = vpack.i.bf16 %v3234_v13, %v3238_v34 }
 0xc31   :  { %5625 = vrot.lane.b32.xlu2 %v5624_v44, %s5734_s5 }
 0xc32   :  { %v5581_v11 = vpop.permute.xlu1 %5580 }
 0xc33   :  { %v5583_v58 = vunpack.i.h.bf16 %v5581_v11  ;;  %v5582_v31 = vunpack.i.l.bf16 %v5581_v11  ;;  %v3228_v54 = vpop.permute.xlu0 %3227 }
 0xc34   :  { %v3230_v45 = vsel %vm7681_vm6, %v3228_v54, 0.0 }
 0xc35   :  { %v3217_v60 = vsel %vm3003_vm3, %v5582_v31, %v5583_v58 }
 0xc36   :  { %v3219_v59 = vsel %vm7681_vm6, %v3217_v60, 0.0 }
 0xc37   :  { %v5629_v57 = vpack.i.bf16 %v3219_v59, %v3230_v45 }
 0xc39   :  { %5630 = vrot.lane.b32.xlu2 %v5629_v57, %s5734_s5 }
 0xc3a   :  { %v5596_v32 = vpop.permute.xlu1 %5595 }
 0xc3b   :  { %v5591_v28 = vpop.permute.xlu0 %5590  ;;  %v5598_v9 = vunpack.i.h.bf16 %v5596_v32  ;;  %v5597_v33 = vunpack.i.l.bf16 %v5596_v32 }
 0xc3c   :  { %v5593_v21 = vunpack.i.h.bf16 %v5591_v28  ;;  %v5592_v2 = vunpack.i.l.bf16 %v5591_v28 }
 0xc3d   :  { %v3243_v26 = vsel %vm8370_vm9, %v5597_v33, %v5598_v9 }
 0xc3e   :  { %v3210_v29 = vsel %vm2993_vm4, %v5592_v2, %v5593_v21 }
 0xc3f   :  { %v3212_v4 = vsel %vm7694_vm15, %v3210_v29, 0.0 }
 0xc40   :  { %v5634_v55 = vpack.i.bf16 %v3212_v4, %v3226_v18 }
 0xc42   :  { %5635 = vrot.lane.b32.xlu2 %v5634_v55, %s5734_s5  ;;  %v3182_v43 = vpop.permute.xlu1 %3181 }
 0xc43   :  { %v3184_v52 = vsel %vm7681_vm6, %v3182_v43, 0.0 }
 0xc4a   :  { %3254 = vrot.lane.b32.xlu2 %v3243_v26, %s5734_s5  ;;  %v5611_v10 = vpop.permute.xlu1 %5610 }
 0xc4b   :  { %v5613_v58 = vunpack.i.h.bf16 %v5611_v10 }
 0xc52   :  { %v5621_v28 = vpop.permute.xlu1 %5620 }
 0xc53   :  { %v5623_v18 = vunpack.i.h.bf16 %v5621_v28  ;;  %v5622_v4 = vunpack.i.l.bf16 %v5621_v28  ;;  %v4460_v28 = vld [vmem:[%s7997_s4 + $0x34] sm:$0xf] }
 0xc55   :  { %v3197_v33 = vsel %vm8372_vm10, %v5622_v4, %v5623_v18  ;;  %v4458_v18 = vld [vmem:[%s7997_s4 + $0x24] sm:$0xf] }
 0xc89   :  { %v5601_v20 = vpop.permute.xlu0 %5600 }
 0xc8a   :  { %v5602_v42 = vunpack.i.l.bf16 %v5601_v20  ;;  %v5603_v12 = vunpack.i.h.bf16 %v5601_v20  ;;  %v4386_v20 = vld [vmem:[%s7993_s1 + $0x24] sm:$0xf]  ;;  %s5740_s1 = smov 72  }
 0xc8b   :  { %v5626_v62 = vpop.permute.xlu2 %5625 }
 0xc8c   :  { %v5628_v27 = vunpack.i.h.bf16 %v5626_v62  ;;  %v5627_v53 = vunpack.i.l.bf16 %v5626_v62  ;;  %v3286_v61 = vsel %vm2975_vm11, %v5578_v25, %v5602_v42  ;;  %v3283_v44 = vsel %vm2975_vm11, %v7752_v40, %v5603_v12 }
 0xc8e   :  { %v3287_v22 = vsel %vm2975_vm11, %v3192_v0, %v5627_v53  ;;  %v3285_v23 = vsel %vm2975_vm11, %v3188_v63, %v5628_v27 }
 0xc8f   :  { %v3294_v39 = vpack.c.bf16 %v7722_v8, %v3287_v22  ;;  %v3293_v19 = vpack.c.bf16 %v3286_v61, %v3285_v23  ;;  %v5612_v8 = vunpack.i.l.bf16 %v5611_v10 }
 0xc91   :  { %3301 = vmatpush.bf16.msrb.mxu1 %v3294_v39  ;;  %v5606_v5 = vpop.permute.xlu0 %5605  ;;  %v3178_v60 = vsel %vm8371_vm14, %v5612_v8, %v5613_v58 }
 0xc92   :  { %v5608_v13 = vunpack.i.h.bf16 %v5606_v5  ;;  %v5607_v34 = vunpack.i.l.bf16 %v5606_v5  ;;  %v3180_v41 = vsel %vm7694_vm15, %v3178_v60, 0.0 }
 0xc93   :  { %v5631_v1 = vpop.permute.xlu2 %5630 }
 0xc94   :  { %v5632_v37 = vunpack.i.l.bf16 %v5631_v1  ;;  %v3171_v54 = vsel %vm3003_vm3, %v5607_v34, %v5608_v13  ;;  %v5633_v59 = vunpack.i.h.bf16 %v5631_v1 }
 0xc95   :  { %3302 = vmatpush.bf16.msrb.mxu1 %v3293_v19  ;;  %v3173_v38 = vsel %vm7681_vm6, %v3171_v54, 0.0 }
 0xc96   :  { %v3284_v11 = vsel %vm2975_vm11, %v3184_v52, %v5632_v37  ;;  %v3281_v2 = vsel %vm2975_vm11, %v3173_v38, %v5633_v59  ;;  %v4461_v38 = vld [vmem:[%s7997_s4 + $0x34] sm:$0xf0] }
 0xc97   :  { %v3292_v31 = vpack.c.bf16 %v3284_v11, %v3283_v44 }
 0xc99   :  { %v5616_v47 = vpop.permute.xlu0 %5615  ;;  %3303 = vmatpush.bf16.msrb.mxu1 %v3292_v31 }
 0xc9a   :  { %v5618_v45 = vunpack.i.h.bf16 %v5616_v47  ;;  %v5617_v57 = vunpack.i.l.bf16 %v5616_v47 }
 0xc9c   :  { %v5636_v24 = vpop.permute.xlu2 %5635  ;;  %v3164_v21 = vsel %vm2993_vm4, %v5617_v57, %v5618_v45 }
 0xc9d   :  { %v5637_v40 = vunpack.i.l.bf16 %v5636_v24  ;;  %v5638_v32 = vunpack.i.h.bf16 %v5636_v24  ;;  %v3166_v9 = vsel %vm7694_vm15, %v3164_v21, 0.0  ;;  %v4414_v24 = vld [vmem:[%s7997_s4 + $0x30] sm:$0xf] }
 0xc9f   :  { %v3282_v29 = vsel %vm2975_vm11, %v3180_v41, %v5637_v40  ;;  %v3279_v48 = vsel %vm2975_vm11, %v3166_v9, %v5638_v32  ;;  %v4415_v40 = vor.u32 %v4461_v38, %v4414_v24  ;;  %v4416_v41 = vld [vmem:[%s7997_s4 + $0x38] sm:$0xf0]  ;;  %v4408_v32 = vld [vmem:[%s7997_s4 + $0x28] sm:$0xf0] }
 0xca0   :  { %v3291_v55 = vpack.c.bf16 %v3282_v29, %v3281_v2  ;;  %v4419_v21 = vor.u32 %v4460_v28, %v4416_v41  ;;  %v4406_v2 = vld [vmem:[%s7997_s4 + $0x20] sm:$0xf]  ;;  %v4459_v29 = vld [vmem:[%s7997_s4 + $0x24] sm:$0xf0]  ;;  %v4411_v9 = vor.u32 %v4458_v18, %v4408_v32 }
 0xca1   :  { %3428 = vmatpush.bf16.msrb.mxu2 %v4415_v40 }
 0xca2   :  { %3304 = vmatpush.bf16.msrb.mxu1 %v3291_v55  ;;  %3441 = vmatpush.bf16.msrb.mxu3 %v4419_v21  ;;  %v4407_v55 = vor.u32 %v4459_v29, %v4406_v2 }
 0xca4   :  { %v3255_v26 = vpop.permute.xlu2 %3254 }
 0xca5   :  { %v3280_v46 = vsel %vm2975_vm11, %v3197_v33, %v3255_v26  ;;  %3429 = vmatpush.bf16.msrb.mxu2 %v4407_v55  ;;  %v4398_v33 = vld [vmem:[%s7997_s4 + $0x10] sm:$0xf]  ;;  %v4457_v26 = vld [vmem:[%s7997_s4 + $0x14] sm:$0xf0] }
 0xca6   :  { %v3290_v43 = vpack.c.bf16 %v3280_v46, %v3279_v48  ;;  %3442 = vmatpush.bf16.msrb.mxu3 %v4411_v9  ;;  %v4456_v48 = vld [vmem:[%s7997_s4 + $0x14] sm:$0xf]  ;;  %v4399_v46 = vor.u32 %v4457_v26, %v4398_v33 }
 0xca8   :  { %3305 = vmatpush.bf16.msrb.mxu1 %v3290_v43  ;;  %v4400_v43 = vld [vmem:[%s7997_s4 + $0x18] sm:$0xf0] }
 0xca9   :  { %3430 = vmatpush.bf16.msrb.mxu2 %v4399_v46 }
 0xcab   :  { %4387 = vmatmul.msk.bf16.vlgmr.msrb.gmra.mxu1 %vm8373_vm12, %v4386_v20  ;;  %v4403_v20 = vor.u32 %v4456_v48, %v4400_v43 }
 0xcad   :  { %3443 = vmatpush.bf16.msrb.mxu3 %v4403_v20 }
 0xd28   :  { %v3307_v25 = vpop.f32.mrf.mxu1 }
 0xd29   :  { %v3308_v42 = vadd.f32 %v3307_v25, %v7653_v15 }
 0xd2b   :  { %v7825_v62 = vmax.f32 %v3308_v42, 0.0 }
 0xd2d   :  { %3320 = vst.msk [vmem:[#allocation3 + $0x8] sm:$0xff] %vm2975_vm11, %v7825_v62  ;;  %3322 = vrot.lane.b32.xlu0 %v7825_v62, %s5734_s5 }
 0xd30   :  { %v3309_v27 = vpop.f32.mrf.mxu1 }
 0xd34   :  { %v3450_v61 = vld [vmem:[#allocation3 + $0x8] sm:$0xff] }
 0xd35   :  { %v5684_v15 = vpack.i.bf16 %v3450_v61, %v7674_v35 }
 0xd9f   :  { %v3323_v53 = vpop.permute.xlu0 %3322 }
 0xda0   :  { %3325 = vst.msk [vmem:[#allocation3 + $0x10] sm:$0xff] %vm2975_vm11, %v3323_v53  ;;  %v4390_v53 = vld [vmem:[%s7997_s4] sm:$0xf] }
 0xda7   :  { %v3451_v63 = vld [vmem:[#allocation3 + $0x10] sm:$0xff] }
 0xda8   :  { %v5649_v0 = vpack.i.bf16 %v3451_v63, %v3450_v61 }
 0xdaa   :  { %5650 = vrot.lane.b32.xlu0 %v5649_v0, %s5727_s30  ;;  %5645 = vrot.lane.b32.xlu2 %v5649_v0, %s5737_s21 }
 0xdab   :  { %5640 = vrot.lane.b32.xlu1 %v5649_v0, %s5739_s23 }
 0xdb2   :  { %3520 = vrot.lane.b32.xlu0 %v3451_v63, %s5736_s19  ;;  %3507 = vrot.lane.b32.xlu2 %v3451_v63, %s5735_s18 }
 0xdb3   :  { %3498 = vrot.lane.b32.xlu1 %v3451_v63, %s5725_s28 }
 0xdba   :  { %5660 = vrot.lane.b32.xlu2 %v5649_v0, %s5740_s1 }
 0xdc2   :  { %3516 = vrot.lane.b32.xlu2 %v3451_v63, %s5741_s26  ;;  %v4454_v63 = vld [vmem:[%s7997_s4 + $0x4] sm:$0xf] }
 0xdca   :  { %5685 = vrot.lane.b32.xlu2 %v5684_v15, %s5737_s21 }
 0xdd2   :  { %3366 = vrot.lane.b32.xlu2 %v3450_v61, %s5735_s18 }
 0xe04   :  { %v5646_v22 = vpop.permute.xlu2 %5645 }
 0xe05   :  { %v5648_v23 = vunpack.i.h.bf16 %v5646_v22  ;;  %v5647_v39 = vunpack.i.l.bf16 %v5646_v22  ;;  %v4392_v22 = vld [vmem:[%s7997_s4 + $0x8] sm:$0xf0] }
 0xe07   :  { %v3478_v12 = vsel %vm3003_vm3, %v5647_v39, %v5648_v23  ;;  %v4395_v23 = vor.u32 %v4454_v63, %v4392_v22 }
 0xe08   :  { %v3480_v35 = vsel %vm7681_vm6, %v3478_v12, 0.0 }
 0xe09   :  { %3444 = vmatpush.bf16.msrb.mxu3 %v4395_v23 }
 0xe0c   :  { %v3508_v31 = vpop.permute.xlu2 %3507 }
 0xe0d   :  { %v3510_v45 = vsel %vm7694_vm15, %v3508_v31, 0.0  ;;  %3553 = vmatpush.bf16.msra.mxu3 %v4419_v21 }
 0xe11   :  { %3554 = vmatpush.bf16.msra.mxu3 %v4411_v9 }
 0xe14   :  { %v5661_v4 = vpop.permute.xlu2 %5660 }
 0xe15   :  { %v5663_v25 = vunpack.i.h.bf16 %v5661_v4  ;;  %v5662_v42 = vunpack.i.l.bf16 %v5661_v4  ;;  %3555 = vmatpush.bf16.msra.mxu3 %v4403_v20  ;;  %v3588_v4 = vld [vmem:[%s7994_s2] sm:$0xf]  ;;  %s5744_s2 = smov 104  }
 0xe19   :  { %3556 = vmatpush.bf16.msra.mxu3 %v4395_v23 }
 0xe1c   :  { %v5651_v19 = vpop.permute.xlu0 %5650  ;;  %v3517_v39 = vpop.permute.xlu2 %3516 }
 0xe1d   :  { %v5641_v5 = vpop.permute.xlu1 %5640  ;;  %v5653_v37 = vunpack.i.h.bf16 %v5651_v19  ;;  %v5652_v52 = vunpack.i.l.bf16 %v5651_v19 }
 0xe1e   :  { %v5643_v10 = vunpack.i.h.bf16 %v5641_v5  ;;  %v5642_v1 = vunpack.i.l.bf16 %v5641_v5  ;;  %v3471_v5 = vsel %vm3470_vm1, %v5662_v42, %v5663_v25 }
 0xe1f   :  { %v3490_v11 = vsel %vm8374_vm5, %v5652_v52, %v5653_v37  ;;  %v7917_v52 = vld [vmem:[%s7995_s3] sm:$0xff] }
 0xe20   :  { %v3458_v13 = vsel %vm2993_vm4, %v5642_v1, %v5643_v10  ;;  %v3492_v54 = vsel %vm7694_vm15, %v3490_v11, 0.0 }
 0xe21   :  { %v3460_v34 = vsel %vm7694_vm15, %v3458_v13, 0.0 }
 0xe22   :  { %v5654_v44 = vpack.i.bf16 %v3480_v35, %v3460_v34  ;;  %v5742_v35 = vmov 2   ;;  %v5743_v34 = vmov 3  }
 0xe23   :  { %5694 = vset.pattern.permute.xlu0 %v5742_v35  ;;  %5695 = vset.pattern.permute.xlu1 %v5743_v34  ;;  %v2514_v35 = vadd.f32 %v7650_v49, %v6983_v16  ;;  %v2543_v34 = vmax.f32 %v2501_v36, 0.0 }
 0xe24   :  { %5655 = vrot.lane.b32.xlu1 %v5654_v44, %s5734_s5  ;;  %v3521_v58 = vpop.permute.xlu0 %3520 }
 0xe25   :  { %v3499_v8 = vpop.permute.xlu1 %3498  ;;  %v3523_v60 = vsel %vm7681_vm6, %v3521_v58, 0.0 }
 0xe26   :  { %v3501_v47 = vsel %vm7681_vm6, %v3499_v8, 0.0  ;;  %v5669_v57 = vpack.i.bf16 %v3523_v60, %v3510_v45 }
 0xe27   :  { %v5664_v59 = vpack.i.bf16 %v3501_v47, %v3492_v54  ;;  %v5686_v54 = vpop.permute.xlu2 %5685 }
 0xe28   :  { %v5688_v38 = vunpack.i.h.bf16 %v5686_v54  ;;  %v5687_v28 = vunpack.i.l.bf16 %v5686_v54 }
 0xe29   :  { %5665 = vrot.lane.b32.xlu0 %v5664_v59, %s5734_s5 }
 0xe2a   :  { %v3349_v33 = vsel %vm3003_vm3, %v5687_v28, %v5688_v38  ;;  %vm8380_vm3 = vmmov %vm8367_vm7 }
 0xe2b   :  { %v3351_v25 = vsel %vm7681_vm6, %v3349_v33, 0.0  ;;  %vm8383_vm0 = vmmov %vm8380_vm3 }
 0xe2c   :  { %5670 = vrot.lane.b32.xlu1 %v5669_v57, %s5734_s5  ;;  %vm8387_vm10 = vmmov %vm8383_vm0 }
 0xe2d   :  { %vm8388_vm12 = vmmov %vm8383_vm0 }
 0xe2f   :  { %v3367_v63 = vpop.permute.xlu2 %3366 }
 0xe30   :  { %v3369_v23 = vsel %vm7694_vm15, %v3367_v63, 0.0 }
 0xe31   :  { %5675 = vrot.lane.b32.xlu0 %v5684_v15, %s5739_s23 }
 0xe34   :  { %5680 = vrot.lane.b32.xlu1 %v5684_v15, %s5738_s22 }
 0xe39   :  { %5690 = vrot.lane.b32.xlu0 %v5684_v15, %s5727_s30 }
 0xe3c   :  { %3361 = vrot.lane.b32.xlu1 %v3450_v61, %s5725_s28 }
 0xe41   :  { %3371 = vrot.lane.b32.xlu0 %v3450_v61, %s5732_s20 }
 0xe44   :  { %3375 = vrot.lane.b32.xlu1 %v3450_v61, %s5736_s19  ;;  %v4455_v61 = vld [vmem:[%s7997_s4 + $0x4] sm:$0xf0] }
 0xe45   :  { %v4391_v15 = vor.u32 %v4455_v61, %v4390_v53 }
 0xe47   :  { %3431 = vmatpush.bf16.msrb.mxu2 %v4391_v15 }
 0xe49   :  { %3569 = vperm.xlu0 %5694, %v7917_v52  }
 0xe4b   :  { %3540 = vmatpush.bf16.msra.mxu2 %v4415_v40 }
 0xe4c   :  { %3577 = vperm.xlu1 %5695, %v7917_v52  }
 0xe4f   :  { %3541 = vmatpush.bf16.msra.mxu2 %v4407_v55 }
 0xe51   :  { %5697 = vset.pattern.permute.xlu0 %v5745_v14 }
 0xe53   :  { %3542 = vmatpush.bf16.msra.mxu2 %v4399_v46  ;;  %v3598_v46 = vunpack.c.l.b16 %v3588_v4 }
 0xe54   :  { %5696 = vset.pattern.permute.xlu1 %v5745_v14 }
 0xe55   :  { %v3599_v61 = vpack.c.b16 %v3598_v46, %v3598_v46  ;;  %3594 = vperm.xlu1 %5696, %v7917_v52  }
 0xe57   :  { %3543 = vmatpush.bf16.msra.mxu2 %v4391_v15 }
 0xe96   :  { %v5656_v27 = vpop.permute.xlu1 %5655 }
 0xe97   :  { %v5657_v0 = vunpack.i.l.bf16 %v5656_v27  ;;  %v5658_v12 = vunpack.i.h.bf16 %v5656_v27 }
 0xe99   :  { %v3465_v19 = vmax.f32 %v7825_v62, %v5657_v0 }
 0xe9b   :  { %v3473_v10 = vmax.f32 %v3465_v19, %v3471_v5  ;;  %v5666_v1 = vpop.permute.xlu0 %5665 }
 0xe9c   :  { %v5667_v37 = vunpack.i.l.bf16 %v5666_v1  ;;  %v5668_v11 = vunpack.i.h.bf16 %v5666_v1 }
 0xe9d   :  { %v3485_v13 = vmax.f32 %v3473_v10, %v5658_v12 }
 0xe9e   :  { %v5671_v44 = vpop.permute.xlu1 %5670 }
 0xe9f   :  { %v3497_v58 = vmax.f32 %v3485_v13, %v5667_v37  ;;  %v5672_v31 = vunpack.i.l.bf16 %v5671_v44  ;;  %v5673_v57 = vunpack.i.h.bf16 %v5671_v44  ;;  %v2544_v44 = vmax.f32 %v2514_v35, 0.0 }
 0xea1   :  { %v3506_v8 = vmax.f32 %v3497_v58, %v5668_v11 }
 0xea3   :  { %v3515_v47 = vmax.f32 %v3506_v8, %v5672_v31  ;;  %v5676_v60 = vpop.permute.xlu0 %5675 }
 0xea4   :  { %v5678_v59 = vunpack.i.h.bf16 %v5676_v60  ;;  %v5677_v45 = vunpack.i.l.bf16 %v5676_v60 }
 0xea5   :  { %v3519_v24 = vmax.f32 %v3515_v47, %v3517_v39 }
 0xea6   :  { %v3334_v40 = vsel %vm2993_vm4, %v5677_v45, %v5678_v59  ;;  %v5681_v41 = vpop.permute.xlu1 %5680  ;;  %vm8376_vm4 = vmmov %vm8369_vm2 }
 0xea7   :  { %v3528_v21 = vmax.f32 %v3519_v24, %v5673_v57  ;;  %v3336_v2 = vsel %vm7694_vm15, %v3334_v40, 0.0  ;;  %v5683_v29 = vunpack.i.h.bf16 %v5681_v41  ;;  %v5682_v18 = vunpack.i.l.bf16 %v5681_v41  ;;  %vm8384_vm2 = vmmov %vm8383_vm0 }
 0xea8   :  { %v3337_v55 = vmax.f32 %v7825_v62, %v3336_v2  ;;  %v2527_v41 = vadd.f32 %v7643_v17, %v6962_v7 }
 0xea9   :  { %v3529_v32 = vpack.c.bf16 %v3528_v21, %v3528_v21  ;;  %v3342_v9 = vsel %vm8375_vm13, %v5682_v18, %v5683_v29  ;;  %v2540_v21 = vadd.f32 %v7645_v50, %v6960_v30  ;;  %vm8391_vm13 = vmmov %vm8383_vm0 }
 0xeaa   :  { %v3344_v26 = vmax.f32 %v3337_v55, %v3342_v9  ;;  %v2545_v2 = vmax.f32 %v2527_v41, 0.0  ;;  %v8394_v41 = vld [vmem:[#allocation9_spill] sm:$0xff] }
 0xeab   :  { %3531 = vrot.lane.b32.xlu2 %v3529_v32, %s5734_s5  ;;  %v5691_v48 = vpop.permute.xlu0 %5690  ;;  %v2546_v29 = vmax.f32 %v2540_v21, 0.0 }
 0xeac   :  { %v5693_v43 = vunpack.i.h.bf16 %v5691_v48  ;;  %v5692_v20 = vunpack.i.l.bf16 %v5691_v48  ;;  %v3352_v27 = vmax.f32 %v3344_v26, %v3351_v25 }
 0xeae   :  { %v3362_v42 = vpop.permute.xlu1 %3361  ;;  %v3357_v53 = vsel %vm8376_vm4, %v5692_v20, %v5693_v43  ;;  %vm8392_vm4 = vmmov %vm8383_vm0 }
 0xeaf   :  { %v3359_v62 = vsel %vm7694_vm15, %v3357_v53, 0.0  ;;  %v3364_v15 = vsel %vm7681_vm6, %v3362_v42, 0.0  ;;  %vm8379_vm15 = vmmov %vm8367_vm7 }
 0xeb0   :  { %v3360_v0 = vmax.f32 %v3352_v27, %v3359_v62 }
 0xeb2   :  { %v3365_v22 = vmax.f32 %v3360_v0, %v3364_v15 }
 0xeb3   :  { %3600 = vrot.lane.b32.xlu2 %v3599_v61, %s5724_s27  ;;  %v3372_v19 = vpop.permute.xlu0 %3371 }
 0xeb4   :  { %v3370_v39 = vmax.f32 %v3365_v22, %v3369_v23 }
 0xeb6   :  { %v3374_v5 = vmax.f32 %v3370_v39, %v3372_v19  ;;  %v3376_v12 = vpop.permute.xlu1 %3375 }
 0xeb7   :  { %v3378_v10 = vsel %vm7681_vm6, %v3376_v12, 0.0 }
 0xeb8   :  { %v3379_v1 = vmax.f32 %v3374_v5, %v3378_v10 }
 0xeba   :  { %v3380_v37 = vpack.c.bf16 %v3379_v1, %v3379_v1 }
 0xebb   :  { %3677 = vrot.lane.b32.xlu2 %v3599_v61, %s5744_s2  ;;  %v3570_v11 = vpop.permute.xlu0 %3569 }
 0xebc   :  { %4420 = vmatmul.msk.bf16.vlgmr.msrb.gmra.mxu2 %vm2975_vm11, %v3380_v37  ;;  %4421 = vmatmul.msk.bf16.vlgmr.msrb.gmra.mxu3 %vm2975_vm11, %v3380_v37 }
 0xebe   :  { %v3578_v47 = vpop.permute.xlu1 %3577 }
 0xec7   :  { %v3595_v17 = vpop.permute.xlu1 %3594 }
 0xf05   :  { %v3532_v13 = vpop.permute.xlu2 %3531 }
 0xf06   :  { %4422 = vmatmul.msk.bf16.vlgmr.msra.gmra.mxu2 %vm2975_vm11, %v3532_v13  ;;  %4423 = vmatmul.msk.bf16.vlgmr.msra.gmra.mxu3 %vm2975_vm11, %v3532_v13  ;;  %vm8377_vm11 = vcmask 1043456  }
 0xf07   :  { %vm8378_vm6 = vmmov %vm8377_vm11 }
 0xf08   :  { %vm8381_vm8 = vmmov %vm8378_vm6 }
 0xf09   :  { %vm8382_vm7 = vmmov %vm8378_vm6 }
 0xf0a   :  { %vm8385_vm9 = vmmov %vm8378_vm6 }
 0xf0b   :  { %vm8386_vm14 = vmmov %vm8378_vm6 }
 0xf0c   :  { %vm8389_vm5 = vmmov %vm8378_vm6 }
 0xf0d   :  { %v3601_v40 = vpop.permute.xlu2 %3600  ;;  %vm8390_vm1 = vmmov %vm8389_vm5 }
 0xf15   :  { %v3678_v19 = vpop.permute.xlu2 %3677 }
 0xf3f   :  { %v3433_v58 = vpop.f32.mrf.mxu2  ;;  %v3446_v8 = vpop.f32.mrf.mxu3 }
 0xf40   :  { %v3562_v31 = vadd.f32 %v3433_v58, %v2543_v34  ;;  %v3563_v54 = vadd.f32 %v3446_v8, %v2544_v44 }
 0xf42   :  { %v3572_v60 = vmul.f32 %v3570_v11, %v3562_v31  ;;  %v3573_v59 = vmul.f32 %v3570_v11, %v3563_v54 }
 0xf44   :  { %v3580_v45 = vadd.f32 %v3578_v47, %v3572_v60  ;;  %v3581_v57 = vadd.f32 %v3578_v47, %v3573_v59 }
 0xf46   :  { %v3584_v24 = vmax.f32 %v3580_v45, 0.0  ;;  %v3585_v52 = vmax.f32 %v3581_v57, 0.0 }
 0xf47   :  { %v3435_v38 = vpop.f32.mrf.mxu2  ;;  %v3448_v28 = vpop.f32.mrf.mxu3 }
 0xf48   :  { %v3589_v3 = vpack.c.bf16 %v3584_v24, %v3584_v24  ;;  %v3590_v6 = vpack.c.bf16 %v3585_v52, %v3585_v52 }
 0xf4a   :  { %v3606_v16 = vsel %vm8377_vm11, %v3589_v3, 0  ;;  %v3609_v49 = vsel %vm8378_vm6, %v3590_v6, 0 }
 0xf4b   :  { %3624 = vmatpush.bf16.msra.mxu0 %v3606_v16  ;;  %3637 = vmatpush.bf16.msra.mxu1 %v3609_v49  ;;  %v1286_v49 = vadd.f32 %v6771_v51, %v6223_v56 }
 0xf4e   :  { %4424 = vmatmul.msk.bf16.vlgmr.msra.gmra.mxu0 %vm8379_vm15, %v3601_v40  ;;  %4425 = vmatmul.msk.bf16.vlgmr.msra.gmra.mxu1 %vm8380_vm3, %v3601_v40 }
 0xf89   :  { %v3545_v18 = vpop.f32.mrf.mxu2  ;;  %v3558_v4 = vpop.f32.mrf.mxu3 }
 0xf8a   :  { %v3564_v55 = vadd.f32 %v3545_v18, %v2545_v2  ;;  %v3565_v32 = vadd.f32 %v3558_v4, %v2546_v29  ;;  %v1328_v18 = vmax.f32 %v1286_v49, 0.0 }
 0xf8c   :  { %v3574_v9 = vmul.f32 %v3570_v11, %v3564_v55  ;;  %v3575_v33 = vmul.f32 %v3570_v11, %v3565_v32 }
 0xf8e   :  { %v3582_v26 = vadd.f32 %v3578_v47, %v3574_v9  ;;  %v3583_v48 = vadd.f32 %v3578_v47, %v3575_v33 }
 0xf90   :  { %v3586_v46 = vmax.f32 %v3582_v26, 0.0  ;;  %v3587_v43 = vmax.f32 %v3583_v48, 0.0 }
 0xf91   :  { %v3547_v20 = vpop.f32.mrf.mxu2  ;;  %v3560_v25 = vpop.f32.mrf.mxu3 }
 0xf92   :  { %v3591_v42 = vpack.c.bf16 %v3586_v46, %v3586_v46  ;;  %v3592_v27 = vpack.c.bf16 %v3587_v43, %v3587_v43 }
 0xf94   :  { %v3612_v7 = vsel %vm8381_vm8, %v3591_v42, 0  ;;  %v3615_v30 = vsel %vm8382_vm7, %v3592_v27, 0 }
 0xf95   :  { %3650 = vmatpush.bf16.msrb.mxu2 %v3612_v7  ;;  %3663 = vmatpush.bf16.msrb.mxu3 %v3615_v30 }
 0xf98   :  { %4426 = vmatmul.msk.bf16.vlgmr.msrb.gmra.mxu2 %vm8383_vm0, %v3601_v40  ;;  %4427 = vmatmul.msk.bf16.vlgmr.msrb.gmra.mxu3 %vm8384_vm2, %v3601_v40  ;;  %v8393_v40 = vld [vmem:[#allocation6_spill] sm:$0xff] }
 0xf99   :  { %v1299_v21 = vadd.f32 %v8394_v41, %v8393_v40 }
 0xf9b   :  { %v1329_v55 = vmax.f32 %v1299_v21, 0.0 }
 0xfcb   :  { %v3626_v50 = vpop.f32.mrf.mxu0  ;;  %v3639_v53 = vpop.f32.mrf.mxu1 }
 0xfcc   :  { %v3627_v62 = vadd.f32 %v3626_v50, %v3595_v17  ;;  %v3640_v61 = vadd.f32 %v3639_v53, %v3595_v17  ;;  %v8395_v53 = vld [vmem:[#allocation4_spill] sm:$0xff] }
 0xfce   :  { %v3669_v63 = vmax.f32 %v3627_v62, 0.0  ;;  %v3670_v0 = vmax.f32 %v3640_v61, 0.0  ;;  %v8396_v62 = vld [vmem:[#allocation7_spill] sm:$0xff] }
 0xfcf   :  { %v1312_v61 = vadd.f32 %v8396_v62, %v8395_v53 }
 0xfd0   :  { %v3673_v15 = vpack.c.bf16 %v3669_v63, %v3669_v63  ;;  %v3674_v22 = vpack.c.bf16 %v3670_v0, %v3670_v0  ;;  %v8397_v63 = vld [vmem:[#allocation5_spill] sm:$0xff]  ;;  %v8398_v0 = vld [vmem:[#allocation8_spill] sm:$0xff] }
 0xfd2   :  { %v3683_v23 = vsel %vm8385_vm9, %v3673_v15, 0  ;;  %v3686_v39 = vsel %vm8386_vm14, %v3674_v22, 0  ;;  %v1325_v15 = vadd.f32 %v8398_v0, %v8397_v63 }
 0xfd3   :  { %3701 = vmatpush.bf16.msrb.mxu0 %v3683_v23  ;;  %3714 = vmatpush.bf16.msrb.mxu1 %v3686_v39  ;;  %v3628_v5 = vpop.f32.mrf.mxu0  ;;  %v3641_v12 = vpop.f32.mrf.mxu1  ;;  %v1330_v39 = vmax.f32 %v1312_v61, 0.0 }
 0xfd4   :  { %v1331_v5 = vmax.f32 %v1325_v15, 0.0 }
 0xfd6   :  { %4428 = vmatmul.msk.bf16.vlgmr.msrb.gmra.mxu0 %vm8387_vm10, %v3678_v19  ;;  %4429 = vmatmul.msk.bf16.vlgmr.msrb.gmra.mxu1 %vm8388_vm12, %v3678_v19 }
0x101b   :  { %v3652_v10 = vpop.f32.mrf.mxu2  ;;  %v3665_v1 = vpop.f32.mrf.mxu3 }
0x101c   :  { %v3653_v37 = vadd.f32 %v3652_v10, %v3595_v17  ;;  %v3666_v13 = vadd.f32 %v3665_v1, %v3595_v17 }
0x101e   :  { %v3671_v14 = vmax.f32 %v3653_v37, 0.0  ;;  %v3672_v36 = vmax.f32 %v3666_v13, 0.0 }
0x1020   :  { %v3675_v35 = vpack.c.bf16 %v3671_v14, %v3671_v14  ;;  %v3676_v34 = vpack.c.bf16 %v3672_v36, %v3672_v36 }
0x1022   :  { %v3689_v44 = vsel %vm8389_vm5, %v3675_v35, 0  ;;  %v3692_v11 = vsel %vm8390_vm1, %v3676_v34, 0 }
0x1023   :  { %v3654_v58 = vpop.f32.mrf.mxu2  ;;  %v3667_v8 = vpop.f32.mrf.mxu3  ;;  %3727 = vmatpush.bf16.msra.mxu2 %v3689_v44  ;;  %3740 = vmatpush.bf16.msra.mxu3 %v3692_v11 }
0x1026   :  { %4430 = vmatmul.msk.bf16.vlgmr.msra.gmra.mxu2 %vm8391_vm13, %v3678_v19  ;;  %4431 = vmatmul.msk.bf16.vlgmr.msra.gmra.mxu3 %vm8392_vm4, %v3678_v19 }
0x1053   :  { %v3703_v31 = vpop.f32.mrf.mxu0  ;;  %v3716_v54 = vpop.f32.mrf.mxu1 }
0x1054   :  { %v4432_v47 = vclamps-f32 %v3703_v31, 30.0  ;;  %v4433_v60 = vclamps-f32 %v3716_v54, 30.0 }
0x1056   :  { %v3754_v59 = vsub.f32 0.0, %v4432_v47  ;;  %v3755_v45 = vsub.f32 0.0, %v4433_v60 }
0x1058   :  { %v3758_v57 = vmul.f32 1.442695, %v3754_v59  ;;  %v3760_v24 = vmul.f32 1.442695, %v3755_v45 }
0x105a   :  { %5698 = vpow2.f32 %v3758_v57 }
0x105b   :  { %5700 = vpow2.f32 %v3760_v24  ;;  %v3705_v52 = vpop.f32.mrf.mxu0  ;;  %v3718_v38 = vpop.f32.mrf.mxu1 }
0x1060   :  { %v5699_v28 = vpop.eup %5698 }
0x1061   :  { %v5701_v3 = vpop.eup %5700  ;;  %v3766_v6 = vadd.f32 1.0, %v5699_v28 }
0x1062   :  { %v3767_v16 = vadd.f32 1.0, %v5701_v3 }
0x1063   :  { %5702 = vrcp.f32 %v3766_v6 }
0x1064   :  { %5704 = vrcp.f32 %v3767_v16 }
0x1069   :  { %v5703_v2 = vpop.eup %5702 }
0x106a   :  { %v5705_v29 = vpop.eup %5704  ;;  %v3774_v4 = vadd.f32 1.0, %v5703_v2 }
0x106b   :  { %v3775_v32 = vadd.f32 1.0, %v5705_v29 }
0x106c   :  { %v3778_v9 = vmul.f32 %v3774_v4, %v1328_v18 }
0x106d   :  { %v3779_v33 = vmul.f32 %v3775_v32, %v1329_v55 }
0x106e   :  { %3782 = vst [vmem:[%s7998_s6] sm:$0xff] %v3778_v9 }
0x106f   :  { %3783 = vst [vmem:[%s7998_s6 + $0x8] sm:$0xff] %v3779_v33 }
0x10a9   :  { %v3729_v56 = vpop.f32.mrf.mxu2  ;;  %v3742_v51 = vpop.f32.mrf.mxu3 }
0x10aa   :  { %v4434_v26 = vclamps-f32 %v3729_v56, 30.0  ;;  %v4435_v48 = vclamps-f32 %v3742_v51, 30.0 }
0x10ac   :  { %v3756_v46 = vsub.f32 0.0, %v4434_v26  ;;  %v3757_v43 = vsub.f32 0.0, %v4435_v48 }
0x10ae   :  { %v3762_v20 = vmul.f32 1.442695, %v3756_v46  ;;  %v3764_v25 = vmul.f32 1.442695, %v3757_v43 }
0x10b0   :  { %5706 = vpow2.f32 %v3762_v20 }
0x10b1   :  { %5708 = vpow2.f32 %v3764_v25  ;;  %v3731_v42 = vpop.f32.mrf.mxu2  ;;  %v3744_v27 = vpop.f32.mrf.mxu3 }
0x10b6   :  { %v5707_v7 = vpop.eup %5706 }
0x10b7   :  { %v5709_v30 = vpop.eup %5708  ;;  %v3768_v17 = vadd.f32 1.0, %v5707_v7 }
0x10b8   :  { %v3769_v50 = vadd.f32 1.0, %v5709_v30 }
0x10b9   :  { %5710 = vrcp.f32 %v3768_v17 }
0x10ba   :  { %5712 = vrcp.f32 %v3769_v50 }
0x10bf   :  { %v5711_v22 = vpop.eup %5710 }
0x10c0   :  { %v5713_v23 = vpop.eup %5712  ;;  %v3776_v19 = vadd.f32 1.0, %v5711_v22 }
0x10c1   :  { %v3777_v12 = vadd.f32 1.0, %v5713_v23 }
0x10c2   :  { %v3780_v10 = vmul.f32 %v3776_v19, %v1330_v39 }
0x10c3   :  { %v3781_v1 = vmul.f32 %v3777_v12, %v1331_v5 }
0x10c4   :  { %4436 = vst [vmem:[%s7998_s6 + $0x10] sm:$0xff] %v3780_v10 }
0x10c5   :  { %4437 = vst [vmem:[%s7998_s6 + $0x18] sm:$0xff] %v3781_v1 }

</bundles_post_ra>
